<compile_context>
chip_gen: v6e
topology: v6e:2x2x1
jax: 0.10.0
libtpu: 0.0.40
codegen_flags: <defaults>
</compile_context>

<pallas_src>
import jax
import jax.numpy as jnp
from jax.experimental import pallas as pl
from jax.experimental.pallas import tpu as pltpu

KH, KW = 3, 3
C_IN, C_OUT = 3, 16
ROW_TILE = 16                      # output rows per grid step (multiple of 8)
VMEM_LIMIT_BYTES = 48 * 1024 * 1024  # safe on v5e/v6e (128 MiB) and v7x (64 MiB)


def conv2d_rowtile_kernel(x_ref, w_ref, b_ref, o_ref):
    """One (batch image, output-row tile) per grid step, computed in NCHW.

    x_ref : (1, Cin, H_pad, W)   VMEM  full (padded) image, resident across row tiles
    w_ref : (Cout*Cin*KH*KW,)    SMEM  flat f32 scalars, OIHW order
    b_ref : (Cout,)              SMEM  f32 scalars
    o_ref : (1, Cout, TH, Wo)    VMEM  current output row tile (Wo on lanes)
    """
    th = o_ref.shape[2]
    wo = o_ref.shape[3]
    j = pl.program_id(1)

    row0 = j * th
    if th % 8 == 0:
        row0 = pl.multiple_of(row0, 8)

    # Materialize the 27 shifted tap tiles ONCE per row tile; reuse for all 16
    # output channels.  Only 9 loads touch x_ref (one lane shift per (cin, kw));
    # the kh shift is a cheap sublane slice of the already-loaded value.
    taps = []
    for cin in range(C_IN):
        for kw in range(KW):
            xs = x_ref[0, cin, pl.ds(row0, th + KH - 1), kw:kw + wo]   # (TH+2, Wo)
            for kh in range(KH):
                taps.append(xs[kh:kh + th, :])                         # (TH, Wo)

    # co-outer: one accumulator live at a time; store each channel slab as soon as
    # its 27 taps are done so the store overlaps the next channel's compute.
    for co in range(C_OUT):
        acc = jnp.full((th, wo), b_ref[co], jnp.float32)
        for cin in range(C_IN):
            for kh in range(KH):
                for kw in range(KW):
                    widx = ((co * C_IN + cin) * KH + kh) * KW + kw
                    tap = taps[(cin * KW + kw) * KH + kh]
                    acc = acc + w_ref[widx] * tap                      # VPU FMA
        o_ref[0, co, :, :] = acc.astype(o_ref.dtype)


def dl_model_forward(x_nchw, weight_oihw, bias):
    """Forward pass of DLModel: y = Conv2d(3, 16, 3)(x), valid padding, stride 1.

    x_nchw      : (N, 3, H, W)      float32
    weight_oihw : (16, 3, 3, 3)     float32  (PyTorch layout: Cout, Cin, KH, KW)
    bias        : (16,)             float32
    returns     : (N, 16, H-2, W-2) float32
    """
    n, cin, h, w = x_nchw.shape
    assert cin == C_IN, f"expected {C_IN} input channels, got {cin}"
    assert h >= KH and w >= KW, "input spatial dims must be >= kernel size"
    ho, wo = h - KH + 1, w - KW + 1

    # Pick the row tile: whole output height for small images (block dim == full dim
    # is always legal); otherwise a fixed multiple-of-8 tile with the height padded
    # up so every tile is full (padded rows are sliced off below).
    if ho <= ROW_TILE:
        th = ho
        ho_pad = ho
    else:
        th = ROW_TILE
        ho_pad = ((ho + th - 1) // th) * th
    n_row_tiles = ho_pad // th

    h_pad = ho_pad + KH - 1
    x_in = x_nchw
    if h_pad != h:
        # Zero-pad a few rows at the bottom so the last row tile never reads OOB.
        x_in = jnp.pad(x_nchw, ((0, 0), (0, 0), (0, h_pad - h), (0, 0)))

    # Hoisted parameter prep: flatten once, SMEM-resident for the whole grid.
    w_flat = weight_oihw.astype(jnp.float32).reshape(-1)   # (432,)
    b_flat = bias.astype(jnp.float32).reshape(-1)          # (16,)

    out = pl.pallas_call(
        conv2d_rowtile_kernel,
        out_shape=jax.ShapeDtypeStruct((n, C_OUT, ho_pad, wo), jnp.float32),
        grid_spec=pltpu.PrefetchScalarGridSpec(
            num_scalar_prefetch=0,
            grid=(n, n_row_tiles),
            in_specs=[
                # Full image per batch element; block index ignores the row-tile
                # coordinate, so it is NOT re-DMA'd across row tiles.
                pl.BlockSpec((1, C_IN, h_pad, w), lambda i, j: (i, 0, 0, 0)),
                pl.BlockSpec(memory_space=pltpu.MemorySpace.SMEM),   # weights (flat)
                pl.BlockSpec(memory_space=pltpu.MemorySpace.SMEM),   # bias
            ],
            out_specs=pl.BlockSpec((1, C_OUT, th, wo), lambda i, j: (i, 0, j, 0)),
        ),
        compiler_params=pltpu.CompilerParams(
            dimension_semantics=("parallel", "parallel"),
            vmem_limit_bytes=VMEM_LIMIT_BYTES,
        ),
    )(x_in, w_flat, b_flat)

    if ho_pad != ho:
        out = out[:, :, :ho, :]
    return out   # NCHW, no output transpose needed


if __name__ == "__main__":
    key = jax.random.PRNGKey(0)
    k_x, k_w, k_b = jax.random.split(key, 3)

    # Small deterministic example consistent with Conv2d(3, 16, 3): NCHW input.
    N, H, W = 2, 16, 16
    x = jax.random.normal(k_x, (N, C_IN, H, W), dtype=jnp.float32)

    # Deterministic synthetic parameters (PyTorch weight layout OIHW).
    fan_in = C_IN * KH * KW
    weight = jax.random.normal(k_w, (C_OUT, C_IN, KH, KW), dtype=jnp.float32) / jnp.sqrt(fan_in)
    bias = jax.random.normal(k_b, (C_OUT,), dtype=jnp.float32) * 0.01

    y = dl_model_forward(x, weight, bias)
    y = jax.block_until_ready(y)

    # Cross-check against XLA's conv (same semantics as PyTorch Conv2d, valid padding).
    y_ref = jax.lax.conv_general_dilated(
        x, weight, window_strides=(1, 1), padding="VALID",
        dimension_numbers=("NCHW", "OIHW", "NCHW"),
    ) + bias.reshape(1, C_OUT, 1, 1)
    y_ref = jax.block_until_ready(y_ref)

    assert y.shape == (N, C_OUT, H - 2, W - 2), y.shape
    assert jnp.allclose(y, y_ref, atol=1e-4, rtol=1e-4), float(jnp.max(jnp.abs(y - y_ref)))

    print("KERNEL_OK")
</pallas_src>

<mosaic_0001>
module attributes {stable_mosaic.version = 11 : i64} {
  func.func @conv2d_rowtile_kernel(%arg0: i32, %arg1: i32, %arg2: memref<1x3x16x16xf32, #tpu.memory_space<vmem>>, %arg3: memref<432xf32, #tpu.memory_space<smem>>, %arg4: memref<16xf32, #tpu.memory_space<smem>>, %arg5: memref<1x16x14x14xf32, #tpu.memory_space<vmem>>) attributes {dimension_semantics = [#tpu.dimension_semantics<parallel>, #tpu.dimension_semantics<parallel>], iteration_bounds = array<i64: 2, 1>, scalar_prefetch = 0 : i64, scratch_operands = 0 : i64, tpu.core_type = #tpu.core_type<tc>, window_params = [{transform_indices = @transform_0, window_bounds = array<i64: 1, 3, 16, 16>}, {transform_indices = @transform_1, window_bounds = array<i64: 432>}, {transform_indices = @transform_2, window_bounds = array<i64: 16>}, {transform_indices = @transform_3, window_bounds = array<i64: 1, 16, 14, 14>}]} {
    %c14_i32 = arith.constant 14 : i32
    %0 = arith.muli %arg1, %c14_i32 : i32
    %c0 = arith.constant 0 : index
    %c0_0 = arith.constant 0 : index
    %1 = arith.index_cast %0 : i32 to index
    %c0_1 = arith.constant 0 : index
    %2 = vector.load %arg2[%c0, %c0_0, %1, %c0_1] : memref<1x3x16x16xf32, #tpu.memory_space<vmem>>, vector<1x1x16x14xf32>
    %3 = vector.shape_cast %2 : vector<1x1x16x14xf32> to vector<16x14xf32>
    %4 = vector.extract_strided_slice %3 {offsets = [0, 0], sizes = [14, 14], strides = [1, 1]} : vector<16x14xf32> to vector<14x14xf32>
    %5 = vector.extract_strided_slice %3 {offsets = [1, 0], sizes = [14, 14], strides = [1, 1]} : vector<16x14xf32> to vector<14x14xf32>
    %6 = vector.extract_strided_slice %3 {offsets = [2, 0], sizes = [14, 14], strides = [1, 1]} : vector<16x14xf32> to vector<14x14xf32>
    %c0_2 = arith.constant 0 : index
    %c0_3 = arith.constant 0 : index
    %7 = arith.index_cast %0 : i32 to index
    %c1 = arith.constant 1 : index
    %8 = vector.load %arg2[%c0_2, %c0_3, %7, %c1] : memref<1x3x16x16xf32, #tpu.memory_space<vmem>>, vector<1x1x16x14xf32>
    %9 = vector.shape_cast %8 : vector<1x1x16x14xf32> to vector<16x14xf32>
    %10 = vector.extract_strided_slice %9 {offsets = [0, 0], sizes = [14, 14], strides = [1, 1]} : vector<16x14xf32> to vector<14x14xf32>
    %11 = vector.extract_strided_slice %9 {offsets = [1, 0], sizes = [14, 14], strides = [1, 1]} : vector<16x14xf32> to vector<14x14xf32>
    %12 = vector.extract_strided_slice %9 {offsets = [2, 0], sizes = [14, 14], strides = [1, 1]} : vector<16x14xf32> to vector<14x14xf32>
    %c0_4 = arith.constant 0 : index
    %c0_5 = arith.constant 0 : index
    %13 = arith.index_cast %0 : i32 to index
    %c2 = arith.constant 2 : index
    %14 = vector.load %arg2[%c0_4, %c0_5, %13, %c2] : memref<1x3x16x16xf32, #tpu.memory_space<vmem>>, vector<1x1x16x14xf32>
    %15 = vector.shape_cast %14 : vector<1x1x16x14xf32> to vector<16x14xf32>
    %16 = vector.extract_strided_slice %15 {offsets = [0, 0], sizes = [14, 14], strides = [1, 1]} : vector<16x14xf32> to vector<14x14xf32>
    %17 = vector.extract_strided_slice %15 {offsets = [1, 0], sizes = [14, 14], strides = [1, 1]} : vector<16x14xf32> to vector<14x14xf32>
    %18 = vector.extract_strided_slice %15 {offsets = [2, 0], sizes = [14, 14], strides = [1, 1]} : vector<16x14xf32> to vector<14x14xf32>
    %c0_6 = arith.constant 0 : index
    %c1_7 = arith.constant 1 : index
    %19 = arith.index_cast %0 : i32 to index
    %c0_8 = arith.constant 0 : index
    %20 = vector.load %arg2[%c0_6, %c1_7, %19, %c0_8] : memref<1x3x16x16xf32, #tpu.memory_space<vmem>>, vector<1x1x16x14xf32>
    %21 = vector.shape_cast %20 : vector<1x1x16x14xf32> to vector<16x14xf32>
    %22 = vector.extract_strided_slice %21 {offsets = [0, 0], sizes = [14, 14], strides = [1, 1]} : vector<16x14xf32> to vector<14x14xf32>
    %23 = vector.extract_strided_slice %21 {offsets = [1, 0], sizes = [14, 14], strides = [1, 1]} : vector<16x14xf32> to vector<14x14xf32>
    %24 = vector.extract_strided_slice %21 {offsets = [2, 0], sizes = [14, 14], strides = [1, 1]} : vector<16x14xf32> to vector<14x14xf32>
    %c0_9 = arith.constant 0 : index
    %c1_10 = arith.constant 1 : index
    %25 = arith.index_cast %0 : i32 to index
    %c1_11 = arith.constant 1 : index
    %26 = vector.load %arg2[%c0_9, %c1_10, %25, %c1_11] : memref<1x3x16x16xf32, #tpu.memory_space<vmem>>, vector<1x1x16x14xf32>
    %27 = vector.shape_cast %26 : vector<1x1x16x14xf32> to vector<16x14xf32>
    %28 = vector.extract_strided_slice %27 {offsets = [0, 0], sizes = [14, 14], strides = [1, 1]} : vector<16x14xf32> to vector<14x14xf32>
    %29 = vector.extract_strided_slice %27 {offsets = [1, 0], sizes = [14, 14], strides = [1, 1]} : vector<16x14xf32> to vector<14x14xf32>
    %30 = vector.extract_strided_slice %27 {offsets = [2, 0], sizes = [14, 14], strides = [1, 1]} : vector<16x14xf32> to vector<14x14xf32>
    %c0_12 = arith.constant 0 : index
    %c1_13 = arith.constant 1 : index
    %31 = arith.index_cast %0 : i32 to index
    %c2_14 = arith.constant 2 : index
    %32 = vector.load %arg2[%c0_12, %c1_13, %31, %c2_14] : memref<1x3x16x16xf32, #tpu.memory_space<vmem>>, vector<1x1x16x14xf32>
    %33 = vector.shape_cast %32 : vector<1x1x16x14xf32> to vector<16x14xf32>
    %34 = vector.extract_strided_slice %33 {offsets = [0, 0], sizes = [14, 14], strides = [1, 1]} : vector<16x14xf32> to vector<14x14xf32>
    %35 = vector.extract_strided_slice %33 {offsets = [1, 0], sizes = [14, 14], strides = [1, 1]} : vector<16x14xf32> to vector<14x14xf32>
    %36 = vector.extract_strided_slice %33 {offsets = [2, 0], sizes = [14, 14], strides = [1, 1]} : vector<16x14xf32> to vector<14x14xf32>
    %c0_15 = arith.constant 0 : index
    %c2_16 = arith.constant 2 : index
    %37 = arith.index_cast %0 : i32 to index
    %c0_17 = arith.constant 0 : index
    %38 = vector.load %arg2[%c0_15, %c2_16, %37, %c0_17] : memref<1x3x16x16xf32, #tpu.memory_space<vmem>>, vector<1x1x16x14xf32>
    %39 = vector.shape_cast %38 : vector<1x1x16x14xf32> to vector<16x14xf32>
    %40 = vector.extract_strided_slice %39 {offsets = [0, 0], sizes = [14, 14], strides = [1, 1]} : vector<16x14xf32> to vector<14x14xf32>
    %41 = vector.extract_strided_slice %39 {offsets = [1, 0], sizes = [14, 14], strides = [1, 1]} : vector<16x14xf32> to vector<14x14xf32>
    %42 = vector.extract_strided_slice %39 {offsets = [2, 0], sizes = [14, 14], strides = [1, 1]} : vector<16x14xf32> to vector<14x14xf32>
    %c0_18 = arith.constant 0 : index
    %c2_19 = arith.constant 2 : index
    %43 = arith.index_cast %0 : i32 to index
    %c1_20 = arith.constant 1 : index
    %44 = vector.load %arg2[%c0_18, %c2_19, %43, %c1_20] : memref<1x3x16x16xf32, #tpu.memory_space<vmem>>, vector<1x1x16x14xf32>
    %45 = vector.shape_cast %44 : vector<1x1x16x14xf32> to vector<16x14xf32>
    %46 = vector.extract_strided_slice %45 {offsets = [0, 0], sizes = [14, 14], strides = [1, 1]} : vector<16x14xf32> to vector<14x14xf32>
    %47 = vector.extract_strided_slice %45 {offsets = [1, 0], sizes = [14, 14], strides = [1, 1]} : vector<16x14xf32> to vector<14x14xf32>
    %48 = vector.extract_strided_slice %45 {offsets = [2, 0], sizes = [14, 14], strides = [1, 1]} : vector<16x14xf32> to vector<14x14xf32>
    %c0_21 = arith.constant 0 : index
    %c2_22 = arith.constant 2 : index
    %49 = arith.index_cast %0 : i32 to index
    %c2_23 = arith.constant 2 : index
    %50 = vector.load %arg2[%c0_21, %c2_22, %49, %c2_23] : memref<1x3x16x16xf32, #tpu.memory_space<vmem>>, vector<1x1x16x14xf32>
    %51 = vector.shape_cast %50 : vector<1x1x16x14xf32> to vector<16x14xf32>
    %52 = vector.extract_strided_slice %51 {offsets = [0, 0], sizes = [14, 14], strides = [1, 1]} : vector<16x14xf32> to vector<14x14xf32>
    %53 = vector.extract_strided_slice %51 {offsets = [1, 0], sizes = [14, 14], strides = [1, 1]} : vector<16x14xf32> to vector<14x14xf32>
    %54 = vector.extract_strided_slice %51 {offsets = [2, 0], sizes = [14, 14], strides = [1, 1]} : vector<16x14xf32> to vector<14x14xf32>
    %c0_24 = arith.constant 0 : index
    %55 = memref.load %arg4[%c0_24] : memref<16xf32, #tpu.memory_space<smem>>
    %56 = vector.broadcast %55 : f32 to vector<14x14xf32>
    %c0_25 = arith.constant 0 : index
    %57 = memref.load %arg3[%c0_25] : memref<432xf32, #tpu.memory_space<smem>>
    %58 = vector.broadcast %57 : f32 to vector<14x14xf32>
    %59 = arith.mulf %58, %4 : vector<14x14xf32>
    %60 = arith.addf %56, %59 : vector<14x14xf32>
    %c1_26 = arith.constant 1 : index
    %61 = memref.load %arg3[%c1_26] : memref<432xf32, #tpu.memory_space<smem>>
    %62 = vector.broadcast %61 : f32 to vector<14x14xf32>
    %63 = arith.mulf %62, %10 : vector<14x14xf32>
    %64 = arith.addf %60, %63 : vector<14x14xf32>
    %c2_27 = arith.constant 2 : index
    %65 = memref.load %arg3[%c2_27] : memref<432xf32, #tpu.memory_space<smem>>
    %66 = vector.broadcast %65 : f32 to vector<14x14xf32>
    %67 = arith.mulf %66, %16 : vector<14x14xf32>
    %68 = arith.addf %64, %67 : vector<14x14xf32>
    %c3 = arith.constant 3 : index
    %69 = memref.load %arg3[%c3] : memref<432xf32, #tpu.memory_space<smem>>
    %70 = vector.broadcast %69 : f32 to vector<14x14xf32>
    %71 = arith.mulf %70, %5 : vector<14x14xf32>
    %72 = arith.addf %68, %71 : vector<14x14xf32>
    %c4 = arith.constant 4 : index
    %73 = memref.load %arg3[%c4] : memref<432xf32, #tpu.memory_space<smem>>
    %74 = vector.broadcast %73 : f32 to vector<14x14xf32>
    %75 = arith.mulf %74, %11 : vector<14x14xf32>
    %76 = arith.addf %72, %75 : vector<14x14xf32>
    %c5 = arith.constant 5 : index
    %77 = memref.load %arg3[%c5] : memref<432xf32, #tpu.memory_space<smem>>
    %78 = vector.broadcast %77 : f32 to vector<14x14xf32>
    %79 = arith.mulf %78, %17 : vector<14x14xf32>
    %80 = arith.addf %76, %79 : vector<14x14xf32>
    %c6 = arith.constant 6 : index
    %81 = memref.load %arg3[%c6] : memref<432xf32, #tpu.memory_space<smem>>
    %82 = vector.broadcast %81 : f32 to vector<14x14xf32>
    %83 = arith.mulf %82, %6 : vector<14x14xf32>
    %84 = arith.addf %80, %83 : vector<14x14xf32>
    %c7 = arith.constant 7 : index
    %85 = memref.load %arg3[%c7] : memref<432xf32, #tpu.memory_space<smem>>
    %86 = vector.broadcast %85 : f32 to vector<14x14xf32>
    %87 = arith.mulf %86, %12 : vector<14x14xf32>
    %88 = arith.addf %84, %87 : vector<14x14xf32>
    %c8 = arith.constant 8 : index
    %89 = memref.load %arg3[%c8] : memref<432xf32, #tpu.memory_space<smem>>
    %90 = vector.broadcast %89 : f32 to vector<14x14xf32>
    %91 = arith.mulf %90, %18 : vector<14x14xf32>
    %92 = arith.addf %88, %91 : vector<14x14xf32>
    %c9 = arith.constant 9 : index
    %93 = memref.load %arg3[%c9] : memref<432xf32, #tpu.memory_space<smem>>
    %94 = vector.broadcast %93 : f32 to vector<14x14xf32>
    %95 = arith.mulf %94, %22 : vector<14x14xf32>
    %96 = arith.addf %92, %95 : vector<14x14xf32>
    %c10 = arith.constant 10 : index
    %97 = memref.load %arg3[%c10] : memref<432xf32, #tpu.memory_space<smem>>
    %98 = vector.broadcast %97 : f32 to vector<14x14xf32>
    %99 = arith.mulf %98, %28 : vector<14x14xf32>
    %100 = arith.addf %96, %99 : vector<14x14xf32>
    %c11 = arith.constant 11 : index
    %101 = memref.load %arg3[%c11] : memref<432xf32, #tpu.memory_space<smem>>
    %102 = vector.broadcast %101 : f32 to vector<14x14xf32>
    %103 = arith.mulf %102, %34 : vector<14x14xf32>
    %104 = arith.addf %100, %103 : vector<14x14xf32>
    %c12 = arith.constant 12 : index
    %105 = memref.load %arg3[%c12] : memref<432xf32, #tpu.memory_space<smem>>
    %106 = vector.broadcast %105 : f32 to vector<14x14xf32>
    %107 = arith.mulf %106, %23 : vector<14x14xf32>
    %108 = arith.addf %104, %107 : vector<14x14xf32>
    %c13 = arith.constant 13 : index
    %109 = memref.load %arg3[%c13] : memref<432xf32, #tpu.memory_space<smem>>
    %110 = vector.broadcast %109 : f32 to vector<14x14xf32>
    %111 = arith.mulf %110, %29 : vector<14x14xf32>
    %112 = arith.addf %108, %111 : vector<14x14xf32>
    %c14 = arith.constant 14 : index
    %113 = memref.load %arg3[%c14] : memref<432xf32, #tpu.memory_space<smem>>
    %114 = vector.broadcast %113 : f32 to vector<14x14xf32>
    %115 = arith.mulf %114, %35 : vector<14x14xf32>
    %116 = arith.addf %112, %115 : vector<14x14xf32>
    %c15 = arith.constant 15 : index
    %117 = memref.load %arg3[%c15] : memref<432xf32, #tpu.memory_space<smem>>
    %118 = vector.broadcast %117 : f32 to vector<14x14xf32>
    %119 = arith.mulf %118, %24 : vector<14x14xf32>
    %120 = arith.addf %116, %119 : vector<14x14xf32>
    %c16 = arith.constant 16 : index
    %121 = memref.load %arg3[%c16] : memref<432xf32, #tpu.memory_space<smem>>
    %122 = vector.broadcast %121 : f32 to vector<14x14xf32>
    %123 = arith.mulf %122, %30 : vector<14x14xf32>
    %124 = arith.addf %120, %123 : vector<14x14xf32>
    %c17 = arith.constant 17 : index
    %125 = memref.load %arg3[%c17] : memref<432xf32, #tpu.memory_space<smem>>
    %126 = vector.broadcast %125 : f32 to vector<14x14xf32>
    %127 = arith.mulf %126, %36 : vector<14x14xf32>
    %128 = arith.addf %124, %127 : vector<14x14xf32>
    %c18 = arith.constant 18 : index
    %129 = memref.load %arg3[%c18] : memref<432xf32, #tpu.memory_space<smem>>
    %130 = vector.broadcast %129 : f32 to vector<14x14xf32>
    %131 = arith.mulf %130, %40 : vector<14x14xf32>
    %132 = arith.addf %128, %131 : vector<14x14xf32>
    %c19 = arith.constant 19 : index
    %133 = memref.load %arg3[%c19] : memref<432xf32, #tpu.memory_space<smem>>
    %134 = vector.broadcast %133 : f32 to vector<14x14xf32>
    %135 = arith.mulf %134, %46 : vector<14x14xf32>
    %136 = arith.addf %132, %135 : vector<14x14xf32>
    %c20 = arith.constant 20 : index
    %137 = memref.load %arg3[%c20] : memref<432xf32, #tpu.memory_space<smem>>
    %138 = vector.broadcast %137 : f32 to vector<14x14xf32>
    %139 = arith.mulf %138, %52 : vector<14x14xf32>
    %140 = arith.addf %136, %139 : vector<14x14xf32>
    %c21 = arith.constant 21 : index
    %141 = memref.load %arg3[%c21] : memref<432xf32, #tpu.memory_space<smem>>
    %142 = vector.broadcast %141 : f32 to vector<14x14xf32>
    %143 = arith.mulf %142, %41 : vector<14x14xf32>
    %144 = arith.addf %140, %143 : vector<14x14xf32>
    %c22 = arith.constant 22 : index
    %145 = memref.load %arg3[%c22] : memref<432xf32, #tpu.memory_space<smem>>
    %146 = vector.broadcast %145 : f32 to vector<14x14xf32>
    %147 = arith.mulf %146, %47 : vector<14x14xf32>
    %148 = arith.addf %144, %147 : vector<14x14xf32>
    %c23 = arith.constant 23 : index
    %149 = memref.load %arg3[%c23] : memref<432xf32, #tpu.memory_space<smem>>
    %150 = vector.broadcast %149 : f32 to vector<14x14xf32>
    %151 = arith.mulf %150, %53 : vector<14x14xf32>
    %152 = arith.addf %148, %151 : vector<14x14xf32>
    %c24 = arith.constant 24 : index
    %153 = memref.load %arg3[%c24] : memref<432xf32, #tpu.memory_space<smem>>
    %154 = vector.broadcast %153 : f32 to vector<14x14xf32>
    %155 = arith.mulf %154, %42 : vector<14x14xf32>
    %156 = arith.addf %152, %155 : vector<14x14xf32>
    %c25 = arith.constant 25 : index
    %157 = memref.load %arg3[%c25] : memref<432xf32, #tpu.memory_space<smem>>
    %158 = vector.broadcast %157 : f32 to vector<14x14xf32>
    %159 = arith.mulf %158, %48 : vector<14x14xf32>
    %160 = arith.addf %156, %159 : vector<14x14xf32>
    %c26 = arith.constant 26 : index
    %161 = memref.load %arg3[%c26] : memref<432xf32, #tpu.memory_space<smem>>
    %162 = vector.broadcast %161 : f32 to vector<14x14xf32>
    %163 = arith.mulf %162, %54 : vector<14x14xf32>
    %164 = arith.addf %160, %163 : vector<14x14xf32>
    %c0_28 = arith.constant 0 : index
    %c0_29 = arith.constant 0 : index
    %c0_30 = arith.constant 0 : index
    %c0_31 = arith.constant 0 : index
    %165 = vector.load %arg5[%c0_28, %c0_29, %c0_30, %c0_31] : memref<1x16x14x14xf32, #tpu.memory_space<vmem>>, vector<1x1x14x14xf32>
    %166 = vector.shape_cast %165 : vector<1x1x14x14xf32> to vector<14x14xf32>
    %167 = vector.shape_cast %164 : vector<14x14xf32> to vector<1x1x14x14xf32>
    tpu.vector_store %arg5[%c0_28, %c0_29, %c0_30, %c0_31], %167 {strides = array<i32>} : memref<1x16x14x14xf32, #tpu.memory_space<vmem>>, vector<1x1x14x14xf32>,
    %c1_32 = arith.constant 1 : index
    %168 = memref.load %arg4[%c1_32] : memref<16xf32, #tpu.memory_space<smem>>
    %169 = vector.broadcast %168 : f32 to vector<14x14xf32>
    %c27 = arith.constant 27 : index
    %170 = memref.load %arg3[%c27] : memref<432xf32, #tpu.memory_space<smem>>
    %171 = vector.broadcast %170 : f32 to vector<14x14xf32>
    %172 = arith.mulf %171, %4 : vector<14x14xf32>
    %173 = arith.addf %169, %172 : vector<14x14xf32>
    %c28 = arith.constant 28 : index
    %174 = memref.load %arg3[%c28] : memref<432xf32, #tpu.memory_space<smem>>
    %175 = vector.broadcast %174 : f32 to vector<14x14xf32>
    %176 = arith.mulf %175, %10 : vector<14x14xf32>
    %177 = arith.addf %173, %176 : vector<14x14xf32>
    %c29 = arith.constant 29 : index
    %178 = memref.load %arg3[%c29] : memref<432xf32, #tpu.memory_space<smem>>
    %179 = vector.broadcast %178 : f32 to vector<14x14xf32>
    %180 = arith.mulf %179, %16 : vector<14x14xf32>
    %181 = arith.addf %177, %180 : vector<14x14xf32>
    %c30 = arith.constant 30 : index
    %182 = memref.load %arg3[%c30] : memref<432xf32, #tpu.memory_space<smem>>
    %183 = vector.broadcast %182 : f32 to vector<14x14xf32>
    %184 = arith.mulf %183, %5 : vector<14x14xf32>
    %185 = arith.addf %181, %184 : vector<14x14xf32>
    %c31 = arith.constant 31 : index
    %186 = memref.load %arg3[%c31] : memref<432xf32, #tpu.memory_space<smem>>
    %187 = vector.broadcast %186 : f32 to vector<14x14xf32>
    %188 = arith.mulf %187, %11 : vector<14x14xf32>
    %189 = arith.addf %185, %188 : vector<14x14xf32>
    %c32 = arith.constant 32 : index
    %190 = memref.load %arg3[%c32] : memref<432xf32, #tpu.memory_space<smem>>
    %191 = vector.broadcast %190 : f32 to vector<14x14xf32>
    %192 = arith.mulf %191, %17 : vector<14x14xf32>
    %193 = arith.addf %189, %192 : vector<14x14xf32>
    %c33 = arith.constant 33 : index
    %194 = memref.load %arg3[%c33] : memref<432xf32, #tpu.memory_space<smem>>
    %195 = vector.broadcast %194 : f32 to vector<14x14xf32>
    %196 = arith.mulf %195, %6 : vector<14x14xf32>
    %197 = arith.addf %193, %196 : vector<14x14xf32>
    %c34 = arith.constant 34 : index
    %198 = memref.load %arg3[%c34] : memref<432xf32, #tpu.memory_space<smem>>
    %199 = vector.broadcast %198 : f32 to vector<14x14xf32>
    %200 = arith.mulf %199, %12 : vector<14x14xf32>
    %201 = arith.addf %197, %200 : vector<14x14xf32>
    %c35 = arith.constant 35 : index
    %202 = memref.load %arg3[%c35] : memref<432xf32, #tpu.memory_space<smem>>
    %203 = vector.broadcast %202 : f32 to vector<14x14xf32>
    %204 = arith.mulf %203, %18 : vector<14x14xf32>
    %205 = arith.addf %201, %204 : vector<14x14xf32>
    %c36 = arith.constant 36 : index
    %206 = memref.load %arg3[%c36] : memref<432xf32, #tpu.memory_space<smem>>
    %207 = vector.broadcast %206 : f32 to vector<14x14xf32>
    %208 = arith.mulf %207, %22 : vector<14x14xf32>
    %209 = arith.addf %205, %208 : vector<14x14xf32>
    %c37 = arith.constant 37 : index
    %210 = memref.load %arg3[%c37] : memref<432xf32, #tpu.memory_space<smem>>
    %211 = vector.broadcast %210 : f32 to vector<14x14xf32>
    %212 = arith.mulf %211, %28 : vector<14x14xf32>
    %213 = arith.addf %209, %212 : vector<14x14xf32>
    %c38 = arith.constant 38 : index
    %214 = memref.load %arg3[%c38] : memref<432xf32, #tpu.memory_space<smem>>
    %215 = vector.broadcast %214 : f32 to vector<14x14xf32>
    %216 = arith.mulf %215, %34 : vector<14x14xf32>
    %217 = arith.addf %213, %216 : vector<14x14xf32>
    %c39 = arith.constant 39 : index
    %218 = memref.load %arg3[%c39] : memref<432xf32, #tpu.memory_space<smem>>
    %219 = vector.broadcast %218 : f32 to vector<14x14xf32>
    %220 = arith.mulf %219, %23 : vector<14x14xf32>
    %221 = arith.addf %217, %220 : vector<14x14xf32>
    %c40 = arith.constant 40 : index
    %222 = memref.load %arg3[%c40] : memref<432xf32, #tpu.memory_space<smem>>
    %223 = vector.broadcast %222 : f32 to vector<14x14xf32>
    %224 = arith.mulf %223, %29 : vector<14x14xf32>
    %225 = arith.addf %221, %224 : vector<14x14xf32>
    %c41 = arith.constant 41 : index
    %226 = memref.load %arg3[%c41] : memref<432xf32, #tpu.memory_space<smem>>
    %227 = vector.broadcast %226 : f32 to vector<14x14xf32>
    %228 = arith.mulf %227, %35 : vector<14x14xf32>
    %229 = arith.addf %225, %228 : vector<14x14xf32>
    %c42 = arith.constant 42 : index
    %230 = memref.load %arg3[%c42] : memref<432xf32, #tpu.memory_space<smem>>
    %231 = vector.broadcast %230 : f32 to vector<14x14xf32>
    %232 = arith.mulf %231, %24 : vector<14x14xf32>
    %233 = arith.addf %229, %232 : vector<14x14xf32>
    %c43 = arith.constant 43 : index
    %234 = memref.load %arg3[%c43] : memref<432xf32, #tpu.memory_space<smem>>
    %235 = vector.broadcast %234 : f32 to vector<14x14xf32>
    %236 = arith.mulf %235, %30 : vector<14x14xf32>
    %237 = arith.addf %233, %236 : vector<14x14xf32>
    %c44 = arith.constant 44 : index
    %238 = memref.load %arg3[%c44] : memref<432xf32, #tpu.memory_space<smem>>
    %239 = vector.broadcast %238 : f32 to vector<14x14xf32>
    %240 = arith.mulf %239, %36 : vector<14x14xf32>
    %241 = arith.addf %237, %240 : vector<14x14xf32>
    %c45 = arith.constant 45 : index
    %242 = memref.load %arg3[%c45] : memref<432xf32, #tpu.memory_space<smem>>
    %243 = vector.broadcast %242 : f32 to vector<14x14xf32>
    %244 = arith.mulf %243, %40 : vector<14x14xf32>
    %245 = arith.addf %241, %244 : vector<14x14xf32>
    %c46 = arith.constant 46 : index
    %246 = memref.load %arg3[%c46] : memref<432xf32, #tpu.memory_space<smem>>
    %247 = vector.broadcast %246 : f32 to vector<14x14xf32>
    %248 = arith.mulf %247, %46 : vector<14x14xf32>
    %249 = arith.addf %245, %248 : vector<14x14xf32>
    %c47 = arith.constant 47 : index
    %250 = memref.load %arg3[%c47] : memref<432xf32, #tpu.memory_space<smem>>
    %251 = vector.broadcast %250 : f32 to vector<14x14xf32>
    %252 = arith.mulf %251, %52 : vector<14x14xf32>
    %253 = arith.addf %249, %252 : vector<14x14xf32>
    %c48 = arith.constant 48 : index
    %254 = memref.load %arg3[%c48] : memref<432xf32, #tpu.memory_space<smem>>
    %255 = vector.broadcast %254 : f32 to vector<14x14xf32>
    %256 = arith.mulf %255, %41 : vector<14x14xf32>
    %257 = arith.addf %253, %256 : vector<14x14xf32>
    %c49 = arith.constant 49 : index
    %258 = memref.load %arg3[%c49] : memref<432xf32, #tpu.memory_space<smem>>
    %259 = vector.broadcast %258 : f32 to vector<14x14xf32>
    %260 = arith.mulf %259, %47 : vector<14x14xf32>
    %261 = arith.addf %257, %260 : vector<14x14xf32>
    %c50 = arith.constant 50 : index
    %262 = memref.load %arg3[%c50] : memref<432xf32, #tpu.memory_space<smem>>
    %263 = vector.broadcast %262 : f32 to vector<14x14xf32>
    %264 = arith.mulf %263, %53 : vector<14x14xf32>
    %265 = arith.addf %261, %264 : vector<14x14xf32>
    %c51 = arith.constant 51 : index
    %266 = memref.load %arg3[%c51] : memref<432xf32, #tpu.memory_space<smem>>
    %267 = vector.broadcast %266 : f32 to vector<14x14xf32>
    %268 = arith.mulf %267, %42 : vector<14x14xf32>
    %269 = arith.addf %265, %268 : vector<14x14xf32>
    %c52 = arith.constant 52 : index
    %270 = memref.load %arg3[%c52] : memref<432xf32, #tpu.memory_space<smem>>
    %271 = vector.broadcast %270 : f32 to vector<14x14xf32>
    %272 = arith.mulf %271, %48 : vector<14x14xf32>
    %273 = arith.addf %269, %272 : vector<14x14xf32>
    %c53 = arith.constant 53 : index
    %274 = memref.load %arg3[%c53] : memref<432xf32, #tpu.memory_space<smem>>
    %275 = vector.broadcast %274 : f32 to vector<14x14xf32>
    %276 = arith.mulf %275, %54 : vector<14x14xf32>
    %277 = arith.addf %273, %276 : vector<14x14xf32>
    %c0_33 = arith.constant 0 : index
    %c1_34 = arith.constant 1 : index
    %c0_35 = arith.constant 0 : index
    %c0_36 = arith.constant 0 : index
    %278 = vector.load %arg5[%c0_33, %c1_34, %c0_35, %c0_36] : memref<1x16x14x14xf32, #tpu.memory_space<vmem>>, vector<1x1x14x14xf32>
    %279 = vector.shape_cast %278 : vector<1x1x14x14xf32> to vector<14x14xf32>
    %280 = vector.shape_cast %277 : vector<14x14xf32> to vector<1x1x14x14xf32>
    tpu.vector_store %arg5[%c0_33, %c1_34, %c0_35, %c0_36], %280 {strides = array<i32>} : memref<1x16x14x14xf32, #tpu.memory_space<vmem>>, vector<1x1x14x14xf32>,
    %c2_37 = arith.constant 2 : index
    %281 = memref.load %arg4[%c2_37] : memref<16xf32, #tpu.memory_space<smem>>
    %282 = vector.broadcast %281 : f32 to vector<14x14xf32>
    %c54 = arith.constant 54 : index
    %283 = memref.load %arg3[%c54] : memref<432xf32, #tpu.memory_space<smem>>
    %284 = vector.broadcast %283 : f32 to vector<14x14xf32>
    %285 = arith.mulf %284, %4 : vector<14x14xf32>
    %286 = arith.addf %282, %285 : vector<14x14xf32>
    %c55 = arith.constant 55 : index
    %287 = memref.load %arg3[%c55] : memref<432xf32, #tpu.memory_space<smem>>
    %288 = vector.broadcast %287 : f32 to vector<14x14xf32>
    %289 = arith.mulf %288, %10 : vector<14x14xf32>
    %290 = arith.addf %286, %289 : vector<14x14xf32>
    %c56 = arith.constant 56 : index
    %291 = memref.load %arg3[%c56] : memref<432xf32, #tpu.memory_space<smem>>
    %292 = vector.broadcast %291 : f32 to vector<14x14xf32>
    %293 = arith.mulf %292, %16 : vector<14x14xf32>
    %294 = arith.addf %290, %293 : vector<14x14xf32>
    %c57 = arith.constant 57 : index
    %295 = memref.load %arg3[%c57] : memref<432xf32, #tpu.memory_space<smem>>
    %296 = vector.broadcast %295 : f32 to vector<14x14xf32>
    %297 = arith.mulf %296, %5 : vector<14x14xf32>
    %298 = arith.addf %294, %297 : vector<14x14xf32>
    %c58 = arith.constant 58 : index
    %299 = memref.load %arg3[%c58] : memref<432xf32, #tpu.memory_space<smem>>
    %300 = vector.broadcast %299 : f32 to vector<14x14xf32>
    %301 = arith.mulf %300, %11 : vector<14x14xf32>
    %302 = arith.addf %298, %301 : vector<14x14xf32>
    %c59 = arith.constant 59 : index
    %303 = memref.load %arg3[%c59] : memref<432xf32, #tpu.memory_space<smem>>
    %304 = vector.broadcast %303 : f32 to vector<14x14xf32>
    %305 = arith.mulf %304, %17 : vector<14x14xf32>
    %306 = arith.addf %302, %305 : vector<14x14xf32>
    %c60 = arith.constant 60 : index
    %307 = memref.load %arg3[%c60] : memref<432xf32, #tpu.memory_space<smem>>
    %308 = vector.broadcast %307 : f32 to vector<14x14xf32>
    %309 = arith.mulf %308, %6 : vector<14x14xf32>
    %310 = arith.addf %306, %309 : vector<14x14xf32>
    %c61 = arith.constant 61 : index
    %311 = memref.load %arg3[%c61] : memref<432xf32, #tpu.memory_space<smem>>
    %312 = vector.broadcast %311 : f32 to vector<14x14xf32>
    %313 = arith.mulf %312, %12 : vector<14x14xf32>
    %314 = arith.addf %310, %313 : vector<14x14xf32>
    %c62 = arith.constant 62 : index
    %315 = memref.load %arg3[%c62] : memref<432xf32, #tpu.memory_space<smem>>
    %316 = vector.broadcast %315 : f32 to vector<14x14xf32>
    %317 = arith.mulf %316, %18 : vector<14x14xf32>
    %318 = arith.addf %314, %317 : vector<14x14xf32>
    %c63 = arith.constant 63 : index
    %319 = memref.load %arg3[%c63] : memref<432xf32, #tpu.memory_space<smem>>
    %320 = vector.broadcast %319 : f32 to vector<14x14xf32>
    %321 = arith.mulf %320, %22 : vector<14x14xf32>
    %322 = arith.addf %318, %321 : vector<14x14xf32>
    %c64 = arith.constant 64 : index
    %323 = memref.load %arg3[%c64] : memref<432xf32, #tpu.memory_space<smem>>
    %324 = vector.broadcast %323 : f32 to vector<14x14xf32>
    %325 = arith.mulf %324, %28 : vector<14x14xf32>
    %326 = arith.addf %322, %325 : vector<14x14xf32>
    %c65 = arith.constant 65 : index
    %327 = memref.load %arg3[%c65] : memref<432xf32, #tpu.memory_space<smem>>
    %328 = vector.broadcast %327 : f32 to vector<14x14xf32>
    %329 = arith.mulf %328, %34 : vector<14x14xf32>
    %330 = arith.addf %326, %329 : vector<14x14xf32>
    %c66 = arith.constant 66 : index
    %331 = memref.load %arg3[%c66] : memref<432xf32, #tpu.memory_space<smem>>
    %332 = vector.broadcast %331 : f32 to vector<14x14xf32>
    %333 = arith.mulf %332, %23 : vector<14x14xf32>
    %334 = arith.addf %330, %333 : vector<14x14xf32>
    %c67 = arith.constant 67 : index
    %335 = memref.load %arg3[%c67] : memref<432xf32, #tpu.memory_space<smem>>
    %336 = vector.broadcast %335 : f32 to vector<14x14xf32>
    %337 = arith.mulf %336, %29 : vector<14x14xf32>
    %338 = arith.addf %334, %337 : vector<14x14xf32>
    %c68 = arith.constant 68 : index
    %339 = memref.load %arg3[%c68] : memref<432xf32, #tpu.memory_space<smem>>
    %340 = vector.broadcast %339 : f32 to vector<14x14xf32>
    %341 = arith.mulf %340, %35 : vector<14x14xf32>
    %342 = arith.addf %338, %341 : vector<14x14xf32>
    %c69 = arith.constant 69 : index
    %343 = memref.load %arg3[%c69] : memref<432xf32, #tpu.memory_space<smem>>
    %344 = vector.broadcast %343 : f32 to vector<14x14xf32>
    %345 = arith.mulf %344, %24 : vector<14x14xf32>
    %346 = arith.addf %342, %345 : vector<14x14xf32>
    %c70 = arith.constant 70 : index
    %347 = memref.load %arg3[%c70] : memref<432xf32, #tpu.memory_space<smem>>
    %348 = vector.broadcast %347 : f32 to vector<14x14xf32>
    %349 = arith.mulf %348, %30 : vector<14x14xf32>
    %350 = arith.addf %346, %349 : vector<14x14xf32>
    %c71 = arith.constant 71 : index
    %351 = memref.load %arg3[%c71] : memref<432xf32, #tpu.memory_space<smem>>
    %352 = vector.broadcast %351 : f32 to vector<14x14xf32>
    %353 = arith.mulf %352, %36 : vector<14x14xf32>
    %354 = arith.addf %350, %353 : vector<14x14xf32>
    %c72 = arith.constant 72 : index
    %355 = memref.load %arg3[%c72] : memref<432xf32, #tpu.memory_space<smem>>
    %356 = vector.broadcast %355 : f32 to vector<14x14xf32>
    %357 = arith.mulf %356, %40 : vector<14x14xf32>
    %358 = arith.addf %354, %357 : vector<14x14xf32>
    %c73 = arith.constant 73 : index
    %359 = memref.load %arg3[%c73] : memref<432xf32, #tpu.memory_space<smem>>
    %360 = vector.broadcast %359 : f32 to vector<14x14xf32>
    %361 = arith.mulf %360, %46 : vector<14x14xf32>
    %362 = arith.addf %358, %361 : vector<14x14xf32>
    %c74 = arith.constant 74 : index
    %363 = memref.load %arg3[%c74] : memref<432xf32, #tpu.memory_space<smem>>
    %364 = vector.broadcast %363 : f32 to vector<14x14xf32>
    %365 = arith.mulf %364, %52 : vector<14x14xf32>
    %366 = arith.addf %362, %365 : vector<14x14xf32>
    %c75 = arith.constant 75 : index
    %367 = memref.load %arg3[%c75] : memref<432xf32, #tpu.memory_space<smem>>
    %368 = vector.broadcast %367 : f32 to vector<14x14xf32>
    %369 = arith.mulf %368, %41 : vector<14x14xf32>
    %370 = arith.addf %366, %369 : vector<14x14xf32>
    %c76 = arith.constant 76 : index
    %371 = memref.load %arg3[%c76] : memref<432xf32, #tpu.memory_space<smem>>
    %372 = vector.broadcast %371 : f32 to vector<14x14xf32>
    %373 = arith.mulf %372, %47 : vector<14x14xf32>
    %374 = arith.addf %370, %373 : vector<14x14xf32>
    %c77 = arith.constant 77 : index
    %375 = memref.load %arg3[%c77] : memref<432xf32, #tpu.memory_space<smem>>
    %376 = vector.broadcast %375 : f32 to vector<14x14xf32>
    %377 = arith.mulf %376, %53 : vector<14x14xf32>
    %378 = arith.addf %374, %377 : vector<14x14xf32>
    %c78 = arith.constant 78 : index
    %379 = memref.load %arg3[%c78] : memref<432xf32, #tpu.memory_space<smem>>
    %380 = vector.broadcast %379 : f32 to vector<14x14xf32>
    %381 = arith.mulf %380, %42 : vector<14x14xf32>
    %382 = arith.addf %378, %381 : vector<14x14xf32>
    %c79 = arith.constant 79 : index
    %383 = memref.load %arg3[%c79] : memref<432xf32, #tpu.memory_space<smem>>
    %384 = vector.broadcast %383 : f32 to vector<14x14xf32>
    %385 = arith.mulf %384, %48 : vector<14x14xf32>
    %386 = arith.addf %382, %385 : vector<14x14xf32>
    %c80 = arith.constant 80 : index
    %387 = memref.load %arg3[%c80] : memref<432xf32, #tpu.memory_space<smem>>
    %388 = vector.broadcast %387 : f32 to vector<14x14xf32>
    %389 = arith.mulf %388, %54 : vector<14x14xf32>
    %390 = arith.addf %386, %389 : vector<14x14xf32>
    %c0_38 = arith.constant 0 : index
    %c2_39 = arith.constant 2 : index
    %c0_40 = arith.constant 0 : index
    %c0_41 = arith.constant 0 : index
    %391 = vector.load %arg5[%c0_38, %c2_39, %c0_40, %c0_41] : memref<1x16x14x14xf32, #tpu.memory_space<vmem>>, vector<1x1x14x14xf32>
    %392 = vector.shape_cast %391 : vector<1x1x14x14xf32> to vector<14x14xf32>
    %393 = vector.shape_cast %390 : vector<14x14xf32> to vector<1x1x14x14xf32>
    tpu.vector_store %arg5[%c0_38, %c2_39, %c0_40, %c0_41], %393 {strides = array<i32>} : memref<1x16x14x14xf32, #tpu.memory_space<vmem>>, vector<1x1x14x14xf32>,
    %c3_42 = arith.constant 3 : index
    %394 = memref.load %arg4[%c3_42] : memref<16xf32, #tpu.memory_space<smem>>
    %395 = vector.broadcast %394 : f32 to vector<14x14xf32>
    %c81 = arith.constant 81 : index
    %396 = memref.load %arg3[%c81] : memref<432xf32, #tpu.memory_space<smem>>
    %397 = vector.broadcast %396 : f32 to vector<14x14xf32>
    %398 = arith.mulf %397, %4 : vector<14x14xf32>
    %399 = arith.addf %395, %398 : vector<14x14xf32>
    %c82 = arith.constant 82 : index
    %400 = memref.load %arg3[%c82] : memref<432xf32, #tpu.memory_space<smem>>
    %401 = vector.broadcast %400 : f32 to vector<14x14xf32>
    %402 = arith.mulf %401, %10 : vector<14x14xf32>
    %403 = arith.addf %399, %402 : vector<14x14xf32>
    %c83 = arith.constant 83 : index
    %404 = memref.load %arg3[%c83] : memref<432xf32, #tpu.memory_space<smem>>
    %405 = vector.broadcast %404 : f32 to vector<14x14xf32>
    %406 = arith.mulf %405, %16 : vector<14x14xf32>
    %407 = arith.addf %403, %406 : vector<14x14xf32>
    %c84 = arith.constant 84 : index
    %408 = memref.load %arg3[%c84] : memref<432xf32, #tpu.memory_space<smem>>
    %409 = vector.broadcast %408 : f32 to vector<14x14xf32>
    %410 = arith.mulf %409, %5 : vector<14x14xf32>
    %411 = arith.addf %407, %410 : vector<14x14xf32>
    %c85 = arith.constant 85 : index
    %412 = memref.load %arg3[%c85] : memref<432xf32, #tpu.memory_space<smem>>
    %413 = vector.broadcast %412 : f32 to vector<14x14xf32>
    %414 = arith.mulf %413, %11 : vector<14x14xf32>
    %415 = arith.addf %411, %414 : vector<14x14xf32>
    %c86 = arith.constant 86 : index
    %416 = memref.load %arg3[%c86] : memref<432xf32, #tpu.memory_space<smem>>
    %417 = vector.broadcast %416 : f32 to vector<14x14xf32>
    %418 = arith.mulf %417, %17 : vector<14x14xf32>
    %419 = arith.addf %415, %418 : vector<14x14xf32>
    %c87 = arith.constant 87 : index
    %420 = memref.load %arg3[%c87] : memref<432xf32, #tpu.memory_space<smem>>
    %421 = vector.broadcast %420 : f32 to vector<14x14xf32>
    %422 = arith.mulf %421, %6 : vector<14x14xf32>
    %423 = arith.addf %419, %422 : vector<14x14xf32>
    %c88 = arith.constant 88 : index
    %424 = memref.load %arg3[%c88] : memref<432xf32, #tpu.memory_space<smem>>
    %425 = vector.broadcast %424 : f32 to vector<14x14xf32>
    %426 = arith.mulf %425, %12 : vector<14x14xf32>
    %427 = arith.addf %423, %426 : vector<14x14xf32>
    %c89 = arith.constant 89 : index
    %428 = memref.load %arg3[%c89] : memref<432xf32, #tpu.memory_space<smem>>
    %429 = vector.broadcast %428 : f32 to vector<14x14xf32>
    %430 = arith.mulf %429, %18 : vector<14x14xf32>
    %431 = arith.addf %427, %430 : vector<14x14xf32>
    %c90 = arith.constant 90 : index
    %432 = memref.load %arg3[%c90] : memref<432xf32, #tpu.memory_space<smem>>
    %433 = vector.broadcast %432 : f32 to vector<14x14xf32>
    %434 = arith.mulf %433, %22 : vector<14x14xf32>
    %435 = arith.addf %431, %434 : vector<14x14xf32>
    %c91 = arith.constant 91 : index
    %436 = memref.load %arg3[%c91] : memref<432xf32, #tpu.memory_space<smem>>
    %437 = vector.broadcast %436 : f32 to vector<14x14xf32>
    %438 = arith.mulf %437, %28 : vector<14x14xf32>
    %439 = arith.addf %435, %438 : vector<14x14xf32>
    %c92 = arith.constant 92 : index
    %440 = memref.load %arg3[%c92] : memref<432xf32, #tpu.memory_space<smem>>
    %441 = vector.broadcast %440 : f32 to vector<14x14xf32>
    %442 = arith.mulf %441, %34 : vector<14x14xf32>
    %443 = arith.addf %439, %442 : vector<14x14xf32>
    %c93 = arith.constant 93 : index
    %444 = memref.load %arg3[%c93] : memref<432xf32, #tpu.memory_space<smem>>
    %445 = vector.broadcast %444 : f32 to vector<14x14xf32>
    %446 = arith.mulf %445, %23 : vector<14x14xf32>
    %447 = arith.addf %443, %446 : vector<14x14xf32>
    %c94 = arith.constant 94 : index
    %448 = memref.load %arg3[%c94] : memref<432xf32, #tpu.memory_space<smem>>
    %449 = vector.broadcast %448 : f32 to vector<14x14xf32>
    %450 = arith.mulf %449, %29 : vector<14x14xf32>
    %451 = arith.addf %447, %450 : vector<14x14xf32>
    %c95 = arith.constant 95 : index
    %452 = memref.load %arg3[%c95] : memref<432xf32, #tpu.memory_space<smem>>
    %453 = vector.broadcast %452 : f32 to vector<14x14xf32>
    %454 = arith.mulf %453, %35 : vector<14x14xf32>
    %455 = arith.addf %451, %454 : vector<14x14xf32>
    %c96 = arith.constant 96 : index
    %456 = memref.load %arg3[%c96] : memref<432xf32, #tpu.memory_space<smem>>
    %457 = vector.broadcast %456 : f32 to vector<14x14xf32>
    %458 = arith.mulf %457, %24 : vector<14x14xf32>
    %459 = arith.addf %455, %458 : vector<14x14xf32>
    %c97 = arith.constant 97 : index
    %460 = memref.load %arg3[%c97] : memref<432xf32, #tpu.memory_space<smem>>
    %461 = vector.broadcast %460 : f32 to vector<14x14xf32>
    %462 = arith.mulf %461, %30 : vector<14x14xf32>
    %463 = arith.addf %459, %462 : vector<14x14xf32>
    %c98 = arith.constant 98 : index
    %464 = memref.load %arg3[%c98] : memref<432xf32, #tpu.memory_space<smem>>
    %465 = vector.broadcast %464 : f32 to vector<14x14xf32>
    %466 = arith.mulf %465, %36 : vector<14x14xf32>
    %467 = arith.addf %463, %466 : vector<14x14xf32>
    %c99 = arith.constant 99 : index
    %468 = memref.load %arg3[%c99] : memref<432xf32, #tpu.memory_space<smem>>
    %469 = vector.broadcast %468 : f32 to vector<14x14xf32>
    %470 = arith.mulf %469, %40 : vector<14x14xf32>
    %471 = arith.addf %467, %470 : vector<14x14xf32>
    %c100 = arith.constant 100 : index
    %472 = memref.load %arg3[%c100] : memref<432xf32, #tpu.memory_space<smem>>
    %473 = vector.broadcast %472 : f32 to vector<14x14xf32>
    %474 = arith.mulf %473, %46 : vector<14x14xf32>
    %475 = arith.addf %471, %474 : vector<14x14xf32>
    %c101 = arith.constant 101 : index
    %476 = memref.load %arg3[%c101] : memref<432xf32, #tpu.memory_space<smem>>
    %477 = vector.broadcast %476 : f32 to vector<14x14xf32>
    %478 = arith.mulf %477, %52 : vector<14x14xf32>
    %479 = arith.addf %475, %478 : vector<14x14xf32>
    %c102 = arith.constant 102 : index
    %480 = memref.load %arg3[%c102] : memref<432xf32, #tpu.memory_space<smem>>
    %481 = vector.broadcast %480 : f32 to vector<14x14xf32>
    %482 = arith.mulf %481, %41 : vector<14x14xf32>
    %483 = arith.addf %479, %482 : vector<14x14xf32>
    %c103 = arith.constant 103 : index
    %484 = memref.load %arg3[%c103] : memref<432xf32, #tpu.memory_space<smem>>
    %485 = vector.broadcast %484 : f32 to vector<14x14xf32>
    %486 = arith.mulf %485, %47 : vector<14x14xf32>
    %487 = arith.addf %483, %486 : vector<14x14xf32>
    %c104 = arith.constant 104 : index
    %488 = memref.load %arg3[%c104] : memref<432xf32, #tpu.memory_space<smem>>
    %489 = vector.broadcast %488 : f32 to vector<14x14xf32>
    %490 = arith.mulf %489, %53 : vector<14x14xf32>
    %491 = arith.addf %487, %490 : vector<14x14xf32>
    %c105 = arith.constant 105 : index
    %492 = memref.load %arg3[%c105] : memref<432xf32, #tpu.memory_space<smem>>
    %493 = vector.broadcast %492 : f32 to vector<14x14xf32>
    %494 = arith.mulf %493, %42 : vector<14x14xf32>
    %495 = arith.addf %491, %494 : vector<14x14xf32>
    %c106 = arith.constant 106 : index
    %496 = memref.load %arg3[%c106] : memref<432xf32, #tpu.memory_space<smem>>
    %497 = vector.broadcast %496 : f32 to vector<14x14xf32>
    %498 = arith.mulf %497, %48 : vector<14x14xf32>
    %499 = arith.addf %495, %498 : vector<14x14xf32>
    %c107 = arith.constant 107 : index
    %500 = memref.load %arg3[%c107] : memref<432xf32, #tpu.memory_space<smem>>
    %501 = vector.broadcast %500 : f32 to vector<14x14xf32>
    %502 = arith.mulf %501, %54 : vector<14x14xf32>
    %503 = arith.addf %499, %502 : vector<14x14xf32>
    %c0_43 = arith.constant 0 : index
    %c3_44 = arith.constant 3 : index
    %c0_45 = arith.constant 0 : index
    %c0_46 = arith.constant 0 : index
    %504 = vector.load %arg5[%c0_43, %c3_44, %c0_45, %c0_46] : memref<1x16x14x14xf32, #tpu.memory_space<vmem>>, vector<1x1x14x14xf32>
    %505 = vector.shape_cast %504 : vector<1x1x14x14xf32> to vector<14x14xf32>
    %506 = vector.shape_cast %503 : vector<14x14xf32> to vector<1x1x14x14xf32>
    tpu.vector_store %arg5[%c0_43, %c3_44, %c0_45, %c0_46], %506 {strides = array<i32>} : memref<1x16x14x14xf32, #tpu.memory_space<vmem>>, vector<1x1x14x14xf32>,
    %c4_47 = arith.constant 4 : index
    %507 = memref.load %arg4[%c4_47] : memref<16xf32, #tpu.memory_space<smem>>
    %508 = vector.broadcast %507 : f32 to vector<14x14xf32>
    %c108 = arith.constant 108 : index
    %509 = memref.load %arg3[%c108] : memref<432xf32, #tpu.memory_space<smem>>
    %510 = vector.broadcast %509 : f32 to vector<14x14xf32>
    %511 = arith.mulf %510, %4 : vector<14x14xf32>
    %512 = arith.addf %508, %511 : vector<14x14xf32>
    %c109 = arith.constant 109 : index
    %513 = memref.load %arg3[%c109] : memref<432xf32, #tpu.memory_space<smem>>
    %514 = vector.broadcast %513 : f32 to vector<14x14xf32>
    %515 = arith.mulf %514, %10 : vector<14x14xf32>
    %516 = arith.addf %512, %515 : vector<14x14xf32>
    %c110 = arith.constant 110 : index
    %517 = memref.load %arg3[%c110] : memref<432xf32, #tpu.memory_space<smem>>
    %518 = vector.broadcast %517 : f32 to vector<14x14xf32>
    %519 = arith.mulf %518, %16 : vector<14x14xf32>
    %520 = arith.addf %516, %519 : vector<14x14xf32>
    %c111 = arith.constant 111 : index
    %521 = memref.load %arg3[%c111] : memref<432xf32, #tpu.memory_space<smem>>
    %522 = vector.broadcast %521 : f32 to vector<14x14xf32>
    %523 = arith.mulf %522, %5 : vector<14x14xf32>
    %524 = arith.addf %520, %523 : vector<14x14xf32>
    %c112 = arith.constant 112 : index
    %525 = memref.load %arg3[%c112] : memref<432xf32, #tpu.memory_space<smem>>
    %526 = vector.broadcast %525 : f32 to vector<14x14xf32>
    %527 = arith.mulf %526, %11 : vector<14x14xf32>
    %528 = arith.addf %524, %527 : vector<14x14xf32>
    %c113 = arith.constant 113 : index
    %529 = memref.load %arg3[%c113] : memref<432xf32, #tpu.memory_space<smem>>
    %530 = vector.broadcast %529 : f32 to vector<14x14xf32>
    %531 = arith.mulf %530, %17 : vector<14x14xf32>
    %532 = arith.addf %528, %531 : vector<14x14xf32>
    %c114 = arith.constant 114 : index
    %533 = memref.load %arg3[%c114] : memref<432xf32, #tpu.memory_space<smem>>
    %534 = vector.broadcast %533 : f32 to vector<14x14xf32>
    %535 = arith.mulf %534, %6 : vector<14x14xf32>
    %536 = arith.addf %532, %535 : vector<14x14xf32>
    %c115 = arith.constant 115 : index
    %537 = memref.load %arg3[%c115] : memref<432xf32, #tpu.memory_space<smem>>
    %538 = vector.broadcast %537 : f32 to vector<14x14xf32>
    %539 = arith.mulf %538, %12 : vector<14x14xf32>
    %540 = arith.addf %536, %539 : vector<14x14xf32>
    %c116 = arith.constant 116 : index
    %541 = memref.load %arg3[%c116] : memref<432xf32, #tpu.memory_space<smem>>
    %542 = vector.broadcast %541 : f32 to vector<14x14xf32>
    %543 = arith.mulf %542, %18 : vector<14x14xf32>
    %544 = arith.addf %540, %543 : vector<14x14xf32>
    %c117 = arith.constant 117 : index
    %545 = memref.load %arg3[%c117] : memref<432xf32, #tpu.memory_space<smem>>
    %546 = vector.broadcast %545 : f32 to vector<14x14xf32>
    %547 = arith.mulf %546, %22 : vector<14x14xf32>
    %548 = arith.addf %544, %547 : vector<14x14xf32>
    %c118 = arith.constant 118 : index
    %549 = memref.load %arg3[%c118] : memref<432xf32, #tpu.memory_space<smem>>
    %550 = vector.broadcast %549 : f32 to vector<14x14xf32>
    %551 = arith.mulf %550, %28 : vector<14x14xf32>
    %552 = arith.addf %548, %551 : vector<14x14xf32>
    %c119 = arith.constant 119 : index
    %553 = memref.load %arg3[%c119] : memref<432xf32, #tpu.memory_space<smem>>
    %554 = vector.broadcast %553 : f32 to vector<14x14xf32>
    %555 = arith.mulf %554, %34 : vector<14x14xf32>
    %556 = arith.addf %552, %555 : vector<14x14xf32>
    %c120 = arith.constant 120 : index
    %557 = memref.load %arg3[%c120] : memref<432xf32, #tpu.memory_space<smem>>
    %558 = vector.broadcast %557 : f32 to vector<14x14xf32>
    %559 = arith.mulf %558, %23 : vector<14x14xf32>
    %560 = arith.addf %556, %559 : vector<14x14xf32>
    %c121 = arith.constant 121 : index
    %561 = memref.load %arg3[%c121] : memref<432xf32, #tpu.memory_space<smem>>
    %562 = vector.broadcast %561 : f32 to vector<14x14xf32>
    %563 = arith.mulf %562, %29 : vector<14x14xf32>
    %564 = arith.addf %560, %563 : vector<14x14xf32>
    %c122 = arith.constant 122 : index
    %565 = memref.load %arg3[%c122] : memref<432xf32, #tpu.memory_space<smem>>
    %566 = vector.broadcast %565 : f32 to vector<14x14xf32>
    %567 = arith.mulf %566, %35 : vector<14x14xf32>
    %568 = arith.addf %564, %567 : vector<14x14xf32>
    %c123 = arith.constant 123 : index
    %569 = memref.load %arg3[%c123] : memref<432xf32, #tpu.memory_space<smem>>
    %570 = vector.broadcast %569 : f32 to vector<14x14xf32>
    %571 = arith.mulf %570, %24 : vector<14x14xf32>
    %572 = arith.addf %568, %571 : vector<14x14xf32>
    %c124 = arith.constant 124 : index
    %573 = memref.load %arg3[%c124] : memref<432xf32, #tpu.memory_space<smem>>
    %574 = vector.broadcast %573 : f32 to vector<14x14xf32>
    %575 = arith.mulf %574, %30 : vector<14x14xf32>
    %576 = arith.addf %572, %575 : vector<14x14xf32>
    %c125 = arith.constant 125 : index
    %577 = memref.load %arg3[%c125] : memref<432xf32, #tpu.memory_space<smem>>
    %578 = vector.broadcast %577 : f32 to vector<14x14xf32>
    %579 = arith.mulf %578, %36 : vector<14x14xf32>
    %580 = arith.addf %576, %579 : vector<14x14xf32>
    %c126 = arith.constant 126 : index
    %581 = memref.load %arg3[%c126] : memref<432xf32, #tpu.memory_space<smem>>
    %582 = vector.broadcast %581 : f32 to vector<14x14xf32>
    %583 = arith.mulf %582, %40 : vector<14x14xf32>
    %584 = arith.addf %580, %583 : vector<14x14xf32>
    %c127 = arith.constant 127 : index
    %585 = memref.load %arg3[%c127] : memref<432xf32, #tpu.memory_space<smem>>
    %586 = vector.broadcast %585 : f32 to vector<14x14xf32>
    %587 = arith.mulf %586, %46 : vector<14x14xf32>
    %588 = arith.addf %584, %587 : vector<14x14xf32>
    %c128 = arith.constant 128 : index
    %589 = memref.load %arg3[%c128] : memref<432xf32, #tpu.memory_space<smem>>
    %590 = vector.broadcast %589 : f32 to vector<14x14xf32>
    %591 = arith.mulf %590, %52 : vector<14x14xf32>
    %592 = arith.addf %588, %591 : vector<14x14xf32>
    %c129 = arith.constant 129 : index
    %593 = memref.load %arg3[%c129] : memref<432xf32, #tpu.memory_space<smem>>
    %594 = vector.broadcast %593 : f32 to vector<14x14xf32>
    %595 = arith.mulf %594, %41 : vector<14x14xf32>
    %596 = arith.addf %592, %595 : vector<14x14xf32>
    %c130 = arith.constant 130 : index
    %597 = memref.load %arg3[%c130] : memref<432xf32, #tpu.memory_space<smem>>
    %598 = vector.broadcast %597 : f32 to vector<14x14xf32>
    %599 = arith.mulf %598, %47 : vector<14x14xf32>
    %600 = arith.addf %596, %599 : vector<14x14xf32>
    %c131 = arith.constant 131 : index
    %601 = memref.load %arg3[%c131] : memref<432xf32, #tpu.memory_space<smem>>
    %602 = vector.broadcast %601 : f32 to vector<14x14xf32>
    %603 = arith.mulf %602, %53 : vector<14x14xf32>
    %604 = arith.addf %600, %603 : vector<14x14xf32>
    %c132 = arith.constant 132 : index
    %605 = memref.load %arg3[%c132] : memref<432xf32, #tpu.memory_space<smem>>
    %606 = vector.broadcast %605 : f32 to vector<14x14xf32>
    %607 = arith.mulf %606, %42 : vector<14x14xf32>
    %608 = arith.addf %604, %607 : vector<14x14xf32>
    %c133 = arith.constant 133 : index
    %609 = memref.load %arg3[%c133] : memref<432xf32, #tpu.memory_space<smem>>
    %610 = vector.broadcast %609 : f32 to vector<14x14xf32>
    %611 = arith.mulf %610, %48 : vector<14x14xf32>
    %612 = arith.addf %608, %611 : vector<14x14xf32>
    %c134 = arith.constant 134 : index
    %613 = memref.load %arg3[%c134] : memref<432xf32, #tpu.memory_space<smem>>
    %614 = vector.broadcast %613 : f32 to vector<14x14xf32>
    %615 = arith.mulf %614, %54 : vector<14x14xf32>
    %616 = arith.addf %612, %615 : vector<14x14xf32>
    %c0_48 = arith.constant 0 : index
    %c4_49 = arith.constant 4 : index
    %c0_50 = arith.constant 0 : index
    %c0_51 = arith.constant 0 : index
    %617 = vector.load %arg5[%c0_48, %c4_49, %c0_50, %c0_51] : memref<1x16x14x14xf32, #tpu.memory_space<vmem>>, vector<1x1x14x14xf32>
    %618 = vector.shape_cast %617 : vector<1x1x14x14xf32> to vector<14x14xf32>
    %619 = vector.shape_cast %616 : vector<14x14xf32> to vector<1x1x14x14xf32>
    tpu.vector_store %arg5[%c0_48, %c4_49, %c0_50, %c0_51], %619 {strides = array<i32>} : memref<1x16x14x14xf32, #tpu.memory_space<vmem>>, vector<1x1x14x14xf32>,
    %c5_52 = arith.constant 5 : index
    %620 = memref.load %arg4[%c5_52] : memref<16xf32, #tpu.memory_space<smem>>
    %621 = vector.broadcast %620 : f32 to vector<14x14xf32>
    %c135 = arith.constant 135 : index
    %622 = memref.load %arg3[%c135] : memref<432xf32, #tpu.memory_space<smem>>
    %623 = vector.broadcast %622 : f32 to vector<14x14xf32>
    %624 = arith.mulf %623, %4 : vector<14x14xf32>
    %625 = arith.addf %621, %624 : vector<14x14xf32>
    %c136 = arith.constant 136 : index
    %626 = memref.load %arg3[%c136] : memref<432xf32, #tpu.memory_space<smem>>
    %627 = vector.broadcast %626 : f32 to vector<14x14xf32>
    %628 = arith.mulf %627, %10 : vector<14x14xf32>
    %629 = arith.addf %625, %628 : vector<14x14xf32>
    %c137 = arith.constant 137 : index
    %630 = memref.load %arg3[%c137] : memref<432xf32, #tpu.memory_space<smem>>
    %631 = vector.broadcast %630 : f32 to vector<14x14xf32>
    %632 = arith.mulf %631, %16 : vector<14x14xf32>
    %633 = arith.addf %629, %632 : vector<14x14xf32>
    %c138 = arith.constant 138 : index
    %634 = memref.load %arg3[%c138] : memref<432xf32, #tpu.memory_space<smem>>
    %635 = vector.broadcast %634 : f32 to vector<14x14xf32>
    %636 = arith.mulf %635, %5 : vector<14x14xf32>
    %637 = arith.addf %633, %636 : vector<14x14xf32>
    %c139 = arith.constant 139 : index
    %638 = memref.load %arg3[%c139] : memref<432xf32, #tpu.memory_space<smem>>
    %639 = vector.broadcast %638 : f32 to vector<14x14xf32>
    %640 = arith.mulf %639, %11 : vector<14x14xf32>
    %641 = arith.addf %637, %640 : vector<14x14xf32>
    %c140 = arith.constant 140 : index
    %642 = memref.load %arg3[%c140] : memref<432xf32, #tpu.memory_space<smem>>
    %643 = vector.broadcast %642 : f32 to vector<14x14xf32>
    %644 = arith.mulf %643, %17 : vector<14x14xf32>
    %645 = arith.addf %641, %644 : vector<14x14xf32>
    %c141 = arith.constant 141 : index
    %646 = memref.load %arg3[%c141] : memref<432xf32, #tpu.memory_space<smem>>
    %647 = vector.broadcast %646 : f32 to vector<14x14xf32>
    %648 = arith.mulf %647, %6 : vector<14x14xf32>
    %649 = arith.addf %645, %648 : vector<14x14xf32>
    %c142 = arith.constant 142 : index
    %650 = memref.load %arg3[%c142] : memref<432xf32, #tpu.memory_space<smem>>
    %651 = vector.broadcast %650 : f32 to vector<14x14xf32>
    %652 = arith.mulf %651, %12 : vector<14x14xf32>
    %653 = arith.addf %649, %652 : vector<14x14xf32>
    %c143 = arith.constant 143 : index
    %654 = memref.load %arg3[%c143] : memref<432xf32, #tpu.memory_space<smem>>
    %655 = vector.broadcast %654 : f32 to vector<14x14xf32>
    %656 = arith.mulf %655, %18 : vector<14x14xf32>
    %657 = arith.addf %653, %656 : vector<14x14xf32>
    %c144 = arith.constant 144 : index
    %658 = memref.load %arg3[%c144] : memref<432xf32, #tpu.memory_space<smem>>
    %659 = vector.broadcast %658 : f32 to vector<14x14xf32>
    %660 = arith.mulf %659, %22 : vector<14x14xf32>
    %661 = arith.addf %657, %660 : vector<14x14xf32>
    %c145 = arith.constant 145 : index
    %662 = memref.load %arg3[%c145] : memref<432xf32, #tpu.memory_space<smem>>
    %663 = vector.broadcast %662 : f32 to vector<14x14xf32>
    %664 = arith.mulf %663, %28 : vector<14x14xf32>
    %665 = arith.addf %661, %664 : vector<14x14xf32>
    %c146 = arith.constant 146 : index
    %666 = memref.load %arg3[%c146] : memref<432xf32, #tpu.memory_space<smem>>
    %667 = vector.broadcast %666 : f32 to vector<14x14xf32>
    %668 = arith.mulf %667, %34 : vector<14x14xf32>
    %669 = arith.addf %665, %668 : vector<14x14xf32>
    %c147 = arith.constant 147 : index
    %670 = memref.load %arg3[%c147] : memref<432xf32, #tpu.memory_space<smem>>
    %671 = vector.broadcast %670 : f32 to vector<14x14xf32>
    %672 = arith.mulf %671, %23 : vector<14x14xf32>
    %673 = arith.addf %669, %672 : vector<14x14xf32>
    %c148 = arith.constant 148 : index
    %674 = memref.load %arg3[%c148] : memref<432xf32, #tpu.memory_space<smem>>
    %675 = vector.broadcast %674 : f32 to vector<14x14xf32>
    %676 = arith.mulf %675, %29 : vector<14x14xf32>
    %677 = arith.addf %673, %676 : vector<14x14xf32>
    %c149 = arith.constant 149 : index
    %678 = memref.load %arg3[%c149] : memref<432xf32, #tpu.memory_space<smem>>
    %679 = vector.broadcast %678 : f32 to vector<14x14xf32>
    %680 = arith.mulf %679, %35 : vector<14x14xf32>
    %681 = arith.addf %677, %680 : vector<14x14xf32>
    %c150 = arith.constant 150 : index
    %682 = memref.load %arg3[%c150] : memref<432xf32, #tpu.memory_space<smem>>
    %683 = vector.broadcast %682 : f32 to vector<14x14xf32>
    %684 = arith.mulf %683, %24 : vector<14x14xf32>
    %685 = arith.addf %681, %684 : vector<14x14xf32>
    %c151 = arith.constant 151 : index
    %686 = memref.load %arg3[%c151] : memref<432xf32, #tpu.memory_space<smem>>
    %687 = vector.broadcast %686 : f32 to vector<14x14xf32>
    %688 = arith.mulf %687, %30 : vector<14x14xf32>
    %689 = arith.addf %685, %688 : vector<14x14xf32>
    %c152 = arith.constant 152 : index
    %690 = memref.load %arg3[%c152] : memref<432xf32, #tpu.memory_space<smem>>
    %691 = vector.broadcast %690 : f32 to vector<14x14xf32>
    %692 = arith.mulf %691, %36 : vector<14x14xf32>
    %693 = arith.addf %689, %692 : vector<14x14xf32>
    %c153 = arith.constant 153 : index
    %694 = memref.load %arg3[%c153] : memref<432xf32, #tpu.memory_space<smem>>
    %695 = vector.broadcast %694 : f32 to vector<14x14xf32>
    %696 = arith.mulf %695, %40 : vector<14x14xf32>
    %697 = arith.addf %693, %696 : vector<14x14xf32>
    %c154 = arith.constant 154 : index
    %698 = memref.load %arg3[%c154] : memref<432xf32, #tpu.memory_space<smem>>
    %699 = vector.broadcast %698 : f32 to vector<14x14xf32>
    %700 = arith.mulf %699, %46 : vector<14x14xf32>
    %701 = arith.addf %697, %700 : vector<14x14xf32>
    %c155 = arith.constant 155 : index
    %702 = memref.load %arg3[%c155] : memref<432xf32, #tpu.memory_space<smem>>
    %703 = vector.broadcast %702 : f32 to vector<14x14xf32>
    %704 = arith.mulf %703, %52 : vector<14x14xf32>
    %705 = arith.addf %701, %704 : vector<14x14xf32>
    %c156 = arith.constant 156 : index
    %706 = memref.load %arg3[%c156] : memref<432xf32, #tpu.memory_space<smem>>
    %707 = vector.broadcast %706 : f32 to vector<14x14xf32>
    %708 = arith.mulf %707, %41 : vector<14x14xf32>
    %709 = arith.addf %705, %708 : vector<14x14xf32>
    %c157 = arith.constant 157 : index
    %710 = memref.load %arg3[%c157] : memref<432xf32, #tpu.memory_space<smem>>
    %711 = vector.broadcast %710 : f32 to vector<14x14xf32>
    %712 = arith.mulf %711, %47 : vector<14x14xf32>
    %713 = arith.addf %709, %712 : vector<14x14xf32>
    %c158 = arith.constant 158 : index
    %714 = memref.load %arg3[%c158] : memref<432xf32, #tpu.memory_space<smem>>
    %715 = vector.broadcast %714 : f32 to vector<14x14xf32>
    %716 = arith.mulf %715, %53 : vector<14x14xf32>
    %717 = arith.addf %713, %716 : vector<14x14xf32>
    %c159 = arith.constant 159 : index
    %718 = memref.load %arg3[%c159] : memref<432xf32, #tpu.memory_space<smem>>
    %719 = vector.broadcast %718 : f32 to vector<14x14xf32>
    %720 = arith.mulf %719, %42 : vector<14x14xf32>
    %721 = arith.addf %717, %720 : vector<14x14xf32>
    %c160 = arith.constant 160 : index
    %722 = memref.load %arg3[%c160] : memref<432xf32, #tpu.memory_space<smem>>
    %723 = vector.broadcast %722 : f32 to vector<14x14xf32>
    %724 = arith.mulf %723, %48 : vector<14x14xf32>
    %725 = arith.addf %721, %724 : vector<14x14xf32>
    %c161 = arith.constant 161 : index
    %726 = memref.load %arg3[%c161] : memref<432xf32, #tpu.memory_space<smem>>
    %727 = vector.broadcast %726 : f32 to vector<14x14xf32>
    %728 = arith.mulf %727, %54 : vector<14x14xf32>
    %729 = arith.addf %725, %728 : vector<14x14xf32>
    %c0_53 = arith.constant 0 : index
    %c5_54 = arith.constant 5 : index
    %c0_55 = arith.constant 0 : index
    %c0_56 = arith.constant 0 : index
    %730 = vector.load %arg5[%c0_53, %c5_54, %c0_55, %c0_56] : memref<1x16x14x14xf32, #tpu.memory_space<vmem>>, vector<1x1x14x14xf32>
    %731 = vector.shape_cast %730 : vector<1x1x14x14xf32> to vector<14x14xf32>
    %732 = vector.shape_cast %729 : vector<14x14xf32> to vector<1x1x14x14xf32>
    tpu.vector_store %arg5[%c0_53, %c5_54, %c0_55, %c0_56], %732 {strides = array<i32>} : memref<1x16x14x14xf32, #tpu.memory_space<vmem>>, vector<1x1x14x14xf32>,
    %c6_57 = arith.constant 6 : index
    %733 = memref.load %arg4[%c6_57] : memref<16xf32, #tpu.memory_space<smem>>
    %734 = vector.broadcast %733 : f32 to vector<14x14xf32>
    %c162 = arith.constant 162 : index
    %735 = memref.load %arg3[%c162] : memref<432xf32, #tpu.memory_space<smem>>
    %736 = vector.broadcast %735 : f32 to vector<14x14xf32>
    %737 = arith.mulf %736, %4 : vector<14x14xf32>
    %738 = arith.addf %734, %737 : vector<14x14xf32>
    %c163 = arith.constant 163 : index
    %739 = memref.load %arg3[%c163] : memref<432xf32, #tpu.memory_space<smem>>
    %740 = vector.broadcast %739 : f32 to vector<14x14xf32>
    %741 = arith.mulf %740, %10 : vector<14x14xf32>
    %742 = arith.addf %738, %741 : vector<14x14xf32>
    %c164 = arith.constant 164 : index
    %743 = memref.load %arg3[%c164] : memref<432xf32, #tpu.memory_space<smem>>
    %744 = vector.broadcast %743 : f32 to vector<14x14xf32>
    %745 = arith.mulf %744, %16 : vector<14x14xf32>
    %746 = arith.addf %742, %745 : vector<14x14xf32>
    %c165 = arith.constant 165 : index
    %747 = memref.load %arg3[%c165] : memref<432xf32, #tpu.memory_space<smem>>
    %748 = vector.broadcast %747 : f32 to vector<14x14xf32>
    %749 = arith.mulf %748, %5 : vector<14x14xf32>
    %750 = arith.addf %746, %749 : vector<14x14xf32>
    %c166 = arith.constant 166 : index
    %751 = memref.load %arg3[%c166] : memref<432xf32, #tpu.memory_space<smem>>
    %752 = vector.broadcast %751 : f32 to vector<14x14xf32>
    %753 = arith.mulf %752, %11 : vector<14x14xf32>
    %754 = arith.addf %750, %753 : vector<14x14xf32>
    %c167 = arith.constant 167 : index
    %755 = memref.load %arg3[%c167] : memref<432xf32, #tpu.memory_space<smem>>
    %756 = vector.broadcast %755 : f32 to vector<14x14xf32>
    %757 = arith.mulf %756, %17 : vector<14x14xf32>
    %758 = arith.addf %754, %757 : vector<14x14xf32>
    %c168 = arith.constant 168 : index
    %759 = memref.load %arg3[%c168] : memref<432xf32, #tpu.memory_space<smem>>
    %760 = vector.broadcast %759 : f32 to vector<14x14xf32>
    %761 = arith.mulf %760, %6 : vector<14x14xf32>
    %762 = arith.addf %758, %761 : vector<14x14xf32>
    %c169 = arith.constant 169 : index
    %763 = memref.load %arg3[%c169] : memref<432xf32, #tpu.memory_space<smem>>
    %764 = vector.broadcast %763 : f32 to vector<14x14xf32>
    %765 = arith.mulf %764, %12 : vector<14x14xf32>
    %766 = arith.addf %762, %765 : vector<14x14xf32>
    %c170 = arith.constant 170 : index
    %767 = memref.load %arg3[%c170] : memref<432xf32, #tpu.memory_space<smem>>
    %768 = vector.broadcast %767 : f32 to vector<14x14xf32>
    %769 = arith.mulf %768, %18 : vector<14x14xf32>
    %770 = arith.addf %766, %769 : vector<14x14xf32>
    %c171 = arith.constant 171 : index
    %771 = memref.load %arg3[%c171] : memref<432xf32, #tpu.memory_space<smem>>
    %772 = vector.broadcast %771 : f32 to vector<14x14xf32>
    %773 = arith.mulf %772, %22 : vector<14x14xf32>
    %774 = arith.addf %770, %773 : vector<14x14xf32>
    %c172 = arith.constant 172 : index
    %775 = memref.load %arg3[%c172] : memref<432xf32, #tpu.memory_space<smem>>
    %776 = vector.broadcast %775 : f32 to vector<14x14xf32>
    %777 = arith.mulf %776, %28 : vector<14x14xf32>
    %778 = arith.addf %774, %777 : vector<14x14xf32>
    %c173 = arith.constant 173 : index
    %779 = memref.load %arg3[%c173] : memref<432xf32, #tpu.memory_space<smem>>
    %780 = vector.broadcast %779 : f32 to vector<14x14xf32>
    %781 = arith.mulf %780, %34 : vector<14x14xf32>
    %782 = arith.addf %778, %781 : vector<14x14xf32>
    %c174 = arith.constant 174 : index
    %783 = memref.load %arg3[%c174] : memref<432xf32, #tpu.memory_space<smem>>
    %784 = vector.broadcast %783 : f32 to vector<14x14xf32>
    %785 = arith.mulf %784, %23 : vector<14x14xf32>
    %786 = arith.addf %782, %785 : vector<14x14xf32>
    %c175 = arith.constant 175 : index
    %787 = memref.load %arg3[%c175] : memref<432xf32, #tpu.memory_space<smem>>
    %788 = vector.broadcast %787 : f32 to vector<14x14xf32>
    %789 = arith.mulf %788, %29 : vector<14x14xf32>
    %790 = arith.addf %786, %789 : vector<14x14xf32>
    %c176 = arith.constant 176 : index
    %791 = memref.load %arg3[%c176] : memref<432xf32, #tpu.memory_space<smem>>
    %792 = vector.broadcast %791 : f32 to vector<14x14xf32>
    %793 = arith.mulf %792, %35 : vector<14x14xf32>
    %794 = arith.addf %790, %793 : vector<14x14xf32>
    %c177 = arith.constant 177 : index
    %795 = memref.load %arg3[%c177] : memref<432xf32, #tpu.memory_space<smem>>
    %796 = vector.broadcast %795 : f32 to vector<14x14xf32>
    %797 = arith.mulf %796, %24 : vector<14x14xf32>
    %798 = arith.addf %794, %797 : vector<14x14xf32>
    %c178 = arith.constant 178 : index
    %799 = memref.load %arg3[%c178] : memref<432xf32, #tpu.memory_space<smem>>
    %800 = vector.broadcast %799 : f32 to vector<14x14xf32>
    %801 = arith.mulf %800, %30 : vector<14x14xf32>
    %802 = arith.addf %798, %801 : vector<14x14xf32>
    %c179 = arith.constant 179 : index
    %803 = memref.load %arg3[%c179] : memref<432xf32, #tpu.memory_space<smem>>
    %804 = vector.broadcast %803 : f32 to vector<14x14xf32>
    %805 = arith.mulf %804, %36 : vector<14x14xf32>
    %806 = arith.addf %802, %805 : vector<14x14xf32>
    %c180 = arith.constant 180 : index
    %807 = memref.load %arg3[%c180] : memref<432xf32, #tpu.memory_space<smem>>
    %808 = vector.broadcast %807 : f32 to vector<14x14xf32>
    %809 = arith.mulf %808, %40 : vector<14x14xf32>
    %810 = arith.addf %806, %809 : vector<14x14xf32>
    %c181 = arith.constant 181 : index
    %811 = memref.load %arg3[%c181] : memref<432xf32, #tpu.memory_space<smem>>
    %812 = vector.broadcast %811 : f32 to vector<14x14xf32>
    %813 = arith.mulf %812, %46 : vector<14x14xf32>
    %814 = arith.addf %810, %813 : vector<14x14xf32>
    %c182 = arith.constant 182 : index
    %815 = memref.load %arg3[%c182] : memref<432xf32, #tpu.memory_space<smem>>
    %816 = vector.broadcast %815 : f32 to vector<14x14xf32>
    %817 = arith.mulf %816, %52 : vector<14x14xf32>
    %818 = arith.addf %814, %817 : vector<14x14xf32>
    %c183 = arith.constant 183 : index
    %819 = memref.load %arg3[%c183] : memref<432xf32, #tpu.memory_space<smem>>
    %820 = vector.broadcast %819 : f32 to vector<14x14xf32>
    %821 = arith.mulf %820, %41 : vector<14x14xf32>
    %822 = arith.addf %818, %821 : vector<14x14xf32>
    %c184 = arith.constant 184 : index
    %823 = memref.load %arg3[%c184] : memref<432xf32, #tpu.memory_space<smem>>
    %824 = vector.broadcast %823 : f32 to vector<14x14xf32>
    %825 = arith.mulf %824, %47 : vector<14x14xf32>
    %826 = arith.addf %822, %825 : vector<14x14xf32>
    %c185 = arith.constant 185 : index
    %827 = memref.load %arg3[%c185] : memref<432xf32, #tpu.memory_space<smem>>
    %828 = vector.broadcast %827 : f32 to vector<14x14xf32>
    %829 = arith.mulf %828, %53 : vector<14x14xf32>
    %830 = arith.addf %826, %829 : vector<14x14xf32>
    %c186 = arith.constant 186 : index
    %831 = memref.load %arg3[%c186] : memref<432xf32, #tpu.memory_space<smem>>
    %832 = vector.broadcast %831 : f32 to vector<14x14xf32>
    %833 = arith.mulf %832, %42 : vector<14x14xf32>
    %834 = arith.addf %830, %833 : vector<14x14xf32>
    %c187 = arith.constant 187 : index
    %835 = memref.load %arg3[%c187] : memref<432xf32, #tpu.memory_space<smem>>
    %836 = vector.broadcast %835 : f32 to vector<14x14xf32>
    %837 = arith.mulf %836, %48 : vector<14x14xf32>
    %838 = arith.addf %834, %837 : vector<14x14xf32>
    %c188 = arith.constant 188 : index
    %839 = memref.load %arg3[%c188] : memref<432xf32, #tpu.memory_space<smem>>
    %840 = vector.broadcast %839 : f32 to vector<14x14xf32>
    %841 = arith.mulf %840, %54 : vector<14x14xf32>
    %842 = arith.addf %838, %841 : vector<14x14xf32>
    %c0_58 = arith.constant 0 : index
    %c6_59 = arith.constant 6 : index
    %c0_60 = arith.constant 0 : index
    %c0_61 = arith.constant 0 : index
    %843 = vector.load %arg5[%c0_58, %c6_59, %c0_60, %c0_61] : memref<1x16x14x14xf32, #tpu.memory_space<vmem>>, vector<1x1x14x14xf32>
    %844 = vector.shape_cast %843 : vector<1x1x14x14xf32> to vector<14x14xf32>
    %845 = vector.shape_cast %842 : vector<14x14xf32> to vector<1x1x14x14xf32>
    tpu.vector_store %arg5[%c0_58, %c6_59, %c0_60, %c0_61], %845 {strides = array<i32>} : memref<1x16x14x14xf32, #tpu.memory_space<vmem>>, vector<1x1x14x14xf32>,
    %c7_62 = arith.constant 7 : index
    %846 = memref.load %arg4[%c7_62] : memref<16xf32, #tpu.memory_space<smem>>
    %847 = vector.broadcast %846 : f32 to vector<14x14xf32>
    %c189 = arith.constant 189 : index
    %848 = memref.load %arg3[%c189] : memref<432xf32, #tpu.memory_space<smem>>
    %849 = vector.broadcast %848 : f32 to vector<14x14xf32>
    %850 = arith.mulf %849, %4 : vector<14x14xf32>
    %851 = arith.addf %847, %850 : vector<14x14xf32>
    %c190 = arith.constant 190 : index
    %852 = memref.load %arg3[%c190] : memref<432xf32, #tpu.memory_space<smem>>
    %853 = vector.broadcast %852 : f32 to vector<14x14xf32>
    %854 = arith.mulf %853, %10 : vector<14x14xf32>
    %855 = arith.addf %851, %854 : vector<14x14xf32>
    %c191 = arith.constant 191 : index
    %856 = memref.load %arg3[%c191] : memref<432xf32, #tpu.memory_space<smem>>
    %857 = vector.broadcast %856 : f32 to vector<14x14xf32>
    %858 = arith.mulf %857, %16 : vector<14x14xf32>
    %859 = arith.addf %855, %858 : vector<14x14xf32>
    %c192 = arith.constant 192 : index
    %860 = memref.load %arg3[%c192] : memref<432xf32, #tpu.memory_space<smem>>
    %861 = vector.broadcast %860 : f32 to vector<14x14xf32>
    %862 = arith.mulf %861, %5 : vector<14x14xf32>
    %863 = arith.addf %859, %862 : vector<14x14xf32>
    %c193 = arith.constant 193 : index
    %864 = memref.load %arg3[%c193] : memref<432xf32, #tpu.memory_space<smem>>
    %865 = vector.broadcast %864 : f32 to vector<14x14xf32>
    %866 = arith.mulf %865, %11 : vector<14x14xf32>
    %867 = arith.addf %863, %866 : vector<14x14xf32>
    %c194 = arith.constant 194 : index
    %868 = memref.load %arg3[%c194] : memref<432xf32, #tpu.memory_space<smem>>
    %869 = vector.broadcast %868 : f32 to vector<14x14xf32>
    %870 = arith.mulf %869, %17 : vector<14x14xf32>
    %871 = arith.addf %867, %870 : vector<14x14xf32>
    %c195 = arith.constant 195 : index
    %872 = memref.load %arg3[%c195] : memref<432xf32, #tpu.memory_space<smem>>
    %873 = vector.broadcast %872 : f32 to vector<14x14xf32>
    %874 = arith.mulf %873, %6 : vector<14x14xf32>
    %875 = arith.addf %871, %874 : vector<14x14xf32>
    %c196 = arith.constant 196 : index
    %876 = memref.load %arg3[%c196] : memref<432xf32, #tpu.memory_space<smem>>
    %877 = vector.broadcast %876 : f32 to vector<14x14xf32>
    %878 = arith.mulf %877, %12 : vector<14x14xf32>
    %879 = arith.addf %875, %878 : vector<14x14xf32>
    %c197 = arith.constant 197 : index
    %880 = memref.load %arg3[%c197] : memref<432xf32, #tpu.memory_space<smem>>
    %881 = vector.broadcast %880 : f32 to vector<14x14xf32>
    %882 = arith.mulf %881, %18 : vector<14x14xf32>
    %883 = arith.addf %879, %882 : vector<14x14xf32>
    %c198 = arith.constant 198 : index
    %884 = memref.load %arg3[%c198] : memref<432xf32, #tpu.memory_space<smem>>
    %885 = vector.broadcast %884 : f32 to vector<14x14xf32>
    %886 = arith.mulf %885, %22 : vector<14x14xf32>
    %887 = arith.addf %883, %886 : vector<14x14xf32>
    %c199 = arith.constant 199 : index
    %888 = memref.load %arg3[%c199] : memref<432xf32, #tpu.memory_space<smem>>
    %889 = vector.broadcast %888 : f32 to vector<14x14xf32>
    %890 = arith.mulf %889, %28 : vector<14x14xf32>
    %891 = arith.addf %887, %890 : vector<14x14xf32>
    %c200 = arith.constant 200 : index
    %892 = memref.load %arg3[%c200] : memref<432xf32, #tpu.memory_space<smem>>
    %893 = vector.broadcast %892 : f32 to vector<14x14xf32>
    %894 = arith.mulf %893, %34 : vector<14x14xf32>
    %895 = arith.addf %891, %894 : vector<14x14xf32>
    %c201 = arith.constant 201 : index
    %896 = memref.load %arg3[%c201] : memref<432xf32, #tpu.memory_space<smem>>
    %897 = vector.broadcast %896 : f32 to vector<14x14xf32>
    %898 = arith.mulf %897, %23 : vector<14x14xf32>
    %899 = arith.addf %895, %898 : vector<14x14xf32>
    %c202 = arith.constant 202 : index
    %900 = memref.load %arg3[%c202] : memref<432xf32, #tpu.memory_space<smem>>
    %901 = vector.broadcast %900 : f32 to vector<14x14xf32>
    %902 = arith.mulf %901, %29 : vector<14x14xf32>
    %903 = arith.addf %899, %902 : vector<14x14xf32>
    %c203 = arith.constant 203 : index
    %904 = memref.load %arg3[%c203] : memref<432xf32, #tpu.memory_space<smem>>
    %905 = vector.broadcast %904 : f32 to vector<14x14xf32>
    %906 = arith.mulf %905, %35 : vector<14x14xf32>
    %907 = arith.addf %903, %906 : vector<14x14xf32>
    %c204 = arith.constant 204 : index
    %908 = memref.load %arg3[%c204] : memref<432xf32, #tpu.memory_space<smem>>
    %909 = vector.broadcast %908 : f32 to vector<14x14xf32>
    %910 = arith.mulf %909, %24 : vector<14x14xf32>
    %911 = arith.addf %907, %910 : vector<14x14xf32>
    %c205 = arith.constant 205 : index
    %912 = memref.load %arg3[%c205] : memref<432xf32, #tpu.memory_space<smem>>
    %913 = vector.broadcast %912 : f32 to vector<14x14xf32>
    %914 = arith.mulf %913, %30 : vector<14x14xf32>
    %915 = arith.addf %911, %914 : vector<14x14xf32>
    %c206 = arith.constant 206 : index
    %916 = memref.load %arg3[%c206] : memref<432xf32, #tpu.memory_space<smem>>
    %917 = vector.broadcast %916 : f32 to vector<14x14xf32>
    %918 = arith.mulf %917, %36 : vector<14x14xf32>
    %919 = arith.addf %915, %918 : vector<14x14xf32>
    %c207 = arith.constant 207 : index
    %920 = memref.load %arg3[%c207] : memref<432xf32, #tpu.memory_space<smem>>
    %921 = vector.broadcast %920 : f32 to vector<14x14xf32>
    %922 = arith.mulf %921, %40 : vector<14x14xf32>
    %923 = arith.addf %919, %922 : vector<14x14xf32>
    %c208 = arith.constant 208 : index
    %924 = memref.load %arg3[%c208] : memref<432xf32, #tpu.memory_space<smem>>
    %925 = vector.broadcast %924 : f32 to vector<14x14xf32>
    %926 = arith.mulf %925, %46 : vector<14x14xf32>
    %927 = arith.addf %923, %926 : vector<14x14xf32>
    %c209 = arith.constant 209 : index
    %928 = memref.load %arg3[%c209] : memref<432xf32, #tpu.memory_space<smem>>
    %929 = vector.broadcast %928 : f32 to vector<14x14xf32>
    %930 = arith.mulf %929, %52 : vector<14x14xf32>
    %931 = arith.addf %927, %930 : vector<14x14xf32>
    %c210 = arith.constant 210 : index
    %932 = memref.load %arg3[%c210] : memref<432xf32, #tpu.memory_space<smem>>
    %933 = vector.broadcast %932 : f32 to vector<14x14xf32>
    %934 = arith.mulf %933, %41 : vector<14x14xf32>
    %935 = arith.addf %931, %934 : vector<14x14xf32>
    %c211 = arith.constant 211 : index
    %936 = memref.load %arg3[%c211] : memref<432xf32, #tpu.memory_space<smem>>
    %937 = vector.broadcast %936 : f32 to vector<14x14xf32>
    %938 = arith.mulf %937, %47 : vector<14x14xf32>
    %939 = arith.addf %935, %938 : vector<14x14xf32>
    %c212 = arith.constant 212 : index
    %940 = memref.load %arg3[%c212] : memref<432xf32, #tpu.memory_space<smem>>
    %941 = vector.broadcast %940 : f32 to vector<14x14xf32>
    %942 = arith.mulf %941, %53 : vector<14x14xf32>
    %943 = arith.addf %939, %942 : vector<14x14xf32>
    %c213 = arith.constant 213 : index
    %944 = memref.load %arg3[%c213] : memref<432xf32, #tpu.memory_space<smem>>
    %945 = vector.broadcast %944 : f32 to vector<14x14xf32>
    %946 = arith.mulf %945, %42 : vector<14x14xf32>
    %947 = arith.addf %943, %946 : vector<14x14xf32>
    %c214 = arith.constant 214 : index
    %948 = memref.load %arg3[%c214] : memref<432xf32, #tpu.memory_space<smem>>
    %949 = vector.broadcast %948 : f32 to vector<14x14xf32>
    %950 = arith.mulf %949, %48 : vector<14x14xf32>
    %951 = arith.addf %947, %950 : vector<14x14xf32>
    %c215 = arith.constant 215 : index
    %952 = memref.load %arg3[%c215] : memref<432xf32, #tpu.memory_space<smem>>
    %953 = vector.broadcast %952 : f32 to vector<14x14xf32>
    %954 = arith.mulf %953, %54 : vector<14x14xf32>
    %955 = arith.addf %951, %954 : vector<14x14xf32>
    %c0_63 = arith.constant 0 : index
    %c7_64 = arith.constant 7 : index
    %c0_65 = arith.constant 0 : index
    %c0_66 = arith.constant 0 : index
    %956 = vector.load %arg5[%c0_63, %c7_64, %c0_65, %c0_66] : memref<1x16x14x14xf32, #tpu.memory_space<vmem>>, vector<1x1x14x14xf32>
    %957 = vector.shape_cast %956 : vector<1x1x14x14xf32> to vector<14x14xf32>
    %958 = vector.shape_cast %955 : vector<14x14xf32> to vector<1x1x14x14xf32>
    tpu.vector_store %arg5[%c0_63, %c7_64, %c0_65, %c0_66], %958 {strides = array<i32>} : memref<1x16x14x14xf32, #tpu.memory_space<vmem>>, vector<1x1x14x14xf32>,
    %c8_67 = arith.constant 8 : index
    %959 = memref.load %arg4[%c8_67] : memref<16xf32, #tpu.memory_space<smem>>
    %960 = vector.broadcast %959 : f32 to vector<14x14xf32>
    %c216 = arith.constant 216 : index
    %961 = memref.load %arg3[%c216] : memref<432xf32, #tpu.memory_space<smem>>
    %962 = vector.broadcast %961 : f32 to vector<14x14xf32>
    %963 = arith.mulf %962, %4 : vector<14x14xf32>
    %964 = arith.addf %960, %963 : vector<14x14xf32>
    %c217 = arith.constant 217 : index
    %965 = memref.load %arg3[%c217] : memref<432xf32, #tpu.memory_space<smem>>
    %966 = vector.broadcast %965 : f32 to vector<14x14xf32>
    %967 = arith.mulf %966, %10 : vector<14x14xf32>
    %968 = arith.addf %964, %967 : vector<14x14xf32>
    %c218 = arith.constant 218 : index
    %969 = memref.load %arg3[%c218] : memref<432xf32, #tpu.memory_space<smem>>
    %970 = vector.broadcast %969 : f32 to vector<14x14xf32>
    %971 = arith.mulf %970, %16 : vector<14x14xf32>
    %972 = arith.addf %968, %971 : vector<14x14xf32>
    %c219 = arith.constant 219 : index
    %973 = memref.load %arg3[%c219] : memref<432xf32, #tpu.memory_space<smem>>
    %974 = vector.broadcast %973 : f32 to vector<14x14xf32>
    %975 = arith.mulf %974, %5 : vector<14x14xf32>
    %976 = arith.addf %972, %975 : vector<14x14xf32>
    %c220 = arith.constant 220 : index
    %977 = memref.load %arg3[%c220] : memref<432xf32, #tpu.memory_space<smem>>
    %978 = vector.broadcast %977 : f32 to vector<14x14xf32>
    %979 = arith.mulf %978, %11 : vector<14x14xf32>
    %980 = arith.addf %976, %979 : vector<14x14xf32>
    %c221 = arith.constant 221 : index
    %981 = memref.load %arg3[%c221] : memref<432xf32, #tpu.memory_space<smem>>
    %982 = vector.broadcast %981 : f32 to vector<14x14xf32>
    %983 = arith.mulf %982, %17 : vector<14x14xf32>
    %984 = arith.addf %980, %983 : vector<14x14xf32>
    %c222 = arith.constant 222 : index
    %985 = memref.load %arg3[%c222] : memref<432xf32, #tpu.memory_space<smem>>
    %986 = vector.broadcast %985 : f32 to vector<14x14xf32>
    %987 = arith.mulf %986, %6 : vector<14x14xf32>
    %988 = arith.addf %984, %987 : vector<14x14xf32>
    %c223 = arith.constant 223 : index
    %989 = memref.load %arg3[%c223] : memref<432xf32, #tpu.memory_space<smem>>
    %990 = vector.broadcast %989 : f32 to vector<14x14xf32>
    %991 = arith.mulf %990, %12 : vector<14x14xf32>
    %992 = arith.addf %988, %991 : vector<14x14xf32>
    %c224 = arith.constant 224 : index
    %993 = memref.load %arg3[%c224] : memref<432xf32, #tpu.memory_space<smem>>
    %994 = vector.broadcast %993 : f32 to vector<14x14xf32>
    %995 = arith.mulf %994, %18 : vector<14x14xf32>
    %996 = arith.addf %992, %995 : vector<14x14xf32>
    %c225 = arith.constant 225 : index
    %997 = memref.load %arg3[%c225] : memref<432xf32, #tpu.memory_space<smem>>
    %998 = vector.broadcast %997 : f32 to vector<14x14xf32>
    %999 = arith.mulf %998, %22 : vector<14x14xf32>
    %1000 = arith.addf %996, %999 : vector<14x14xf32>
    %c226 = arith.constant 226 : index
    %1001 = memref.load %arg3[%c226] : memref<432xf32, #tpu.memory_space<smem>>
    %1002 = vector.broadcast %1001 : f32 to vector<14x14xf32>
    %1003 = arith.mulf %1002, %28 : vector<14x14xf32>
    %1004 = arith.addf %1000, %1003 : vector<14x14xf32>
    %c227 = arith.constant 227 : index
    %1005 = memref.load %arg3[%c227] : memref<432xf32, #tpu.memory_space<smem>>
    %1006 = vector.broadcast %1005 : f32 to vector<14x14xf32>
    %1007 = arith.mulf %1006, %34 : vector<14x14xf32>
    %1008 = arith.addf %1004, %1007 : vector<14x14xf32>
    %c228 = arith.constant 228 : index
    %1009 = memref.load %arg3[%c228] : memref<432xf32, #tpu.memory_space<smem>>
    %1010 = vector.broadcast %1009 : f32 to vector<14x14xf32>
    %1011 = arith.mulf %1010, %23 : vector<14x14xf32>
    %1012 = arith.addf %1008, %1011 : vector<14x14xf32>
    %c229 = arith.constant 229 : index
    %1013 = memref.load %arg3[%c229] : memref<432xf32, #tpu.memory_space<smem>>
    %1014 = vector.broadcast %1013 : f32 to vector<14x14xf32>
    %1015 = arith.mulf %1014, %29 : vector<14x14xf32>
    %1016 = arith.addf %1012, %1015 : vector<14x14xf32>
    %c230 = arith.constant 230 : index
    %1017 = memref.load %arg3[%c230] : memref<432xf32, #tpu.memory_space<smem>>
    %1018 = vector.broadcast %1017 : f32 to vector<14x14xf32>
    %1019 = arith.mulf %1018, %35 : vector<14x14xf32>
    %1020 = arith.addf %1016, %1019 : vector<14x14xf32>
    %c231 = arith.constant 231 : index
    %1021 = memref.load %arg3[%c231] : memref<432xf32, #tpu.memory_space<smem>>
    %1022 = vector.broadcast %1021 : f32 to vector<14x14xf32>
    %1023 = arith.mulf %1022, %24 : vector<14x14xf32>
    %1024 = arith.addf %1020, %1023 : vector<14x14xf32>
    %c232 = arith.constant 232 : index
    %1025 = memref.load %arg3[%c232] : memref<432xf32, #tpu.memory_space<smem>>
    %1026 = vector.broadcast %1025 : f32 to vector<14x14xf32>
    %1027 = arith.mulf %1026, %30 : vector<14x14xf32>
    %1028 = arith.addf %1024, %1027 : vector<14x14xf32>
    %c233 = arith.constant 233 : index
    %1029 = memref.load %arg3[%c233] : memref<432xf32, #tpu.memory_space<smem>>
    %1030 = vector.broadcast %1029 : f32 to vector<14x14xf32>
    %1031 = arith.mulf %1030, %36 : vector<14x14xf32>
    %1032 = arith.addf %1028, %1031 : vector<14x14xf32>
    %c234 = arith.constant 234 : index
    %1033 = memref.load %arg3[%c234] : memref<432xf32, #tpu.memory_space<smem>>
    %1034 = vector.broadcast %1033 : f32 to vector<14x14xf32>
    %1035 = arith.mulf %1034, %40 : vector<14x14xf32>
    %1036 = arith.addf %1032, %1035 : vector<14x14xf32>
    %c235 = arith.constant 235 : index
    %1037 = memref.load %arg3[%c235] : memref<432xf32, #tpu.memory_space<smem>>
    %1038 = vector.broadcast %1037 : f32 to vector<14x14xf32>
    %1039 = arith.mulf %1038, %46 : vector<14x14xf32>
    %1040 = arith.addf %1036, %1039 : vector<14x14xf32>
    %c236 = arith.constant 236 : index
    %1041 = memref.load %arg3[%c236] : memref<432xf32, #tpu.memory_space<smem>>
    %1042 = vector.broadcast %1041 : f32 to vector<14x14xf32>
    %1043 = arith.mulf %1042, %52 : vector<14x14xf32>
    %1044 = arith.addf %1040, %1043 : vector<14x14xf32>
    %c237 = arith.constant 237 : index
    %1045 = memref.load %arg3[%c237] : memref<432xf32, #tpu.memory_space<smem>>
    %1046 = vector.broadcast %1045 : f32 to vector<14x14xf32>
    %1047 = arith.mulf %1046, %41 : vector<14x14xf32>
    %1048 = arith.addf %1044, %1047 : vector<14x14xf32>
    %c238 = arith.constant 238 : index
    %1049 = memref.load %arg3[%c238] : memref<432xf32, #tpu.memory_space<smem>>
    %1050 = vector.broadcast %1049 : f32 to vector<14x14xf32>
    %1051 = arith.mulf %1050, %47 : vector<14x14xf32>
    %1052 = arith.addf %1048, %1051 : vector<14x14xf32>
    %c239 = arith.constant 239 : index
    %1053 = memref.load %arg3[%c239] : memref<432xf32, #tpu.memory_space<smem>>
    %1054 = vector.broadcast %1053 : f32 to vector<14x14xf32>
    %1055 = arith.mulf %1054, %53 : vector<14x14xf32>
    %1056 = arith.addf %1052, %1055 : vector<14x14xf32>
    %c240 = arith.constant 240 : index
    %1057 = memref.load %arg3[%c240] : memref<432xf32, #tpu.memory_space<smem>>
    %1058 = vector.broadcast %1057 : f32 to vector<14x14xf32>
    %1059 = arith.mulf %1058, %42 : vector<14x14xf32>
    %1060 = arith.addf %1056, %1059 : vector<14x14xf32>
    %c241 = arith.constant 241 : index
    %1061 = memref.load %arg3[%c241] : memref<432xf32, #tpu.memory_space<smem>>
    %1062 = vector.broadcast %1061 : f32 to vector<14x14xf32>
    %1063 = arith.mulf %1062, %48 : vector<14x14xf32>
    %1064 = arith.addf %1060, %1063 : vector<14x14xf32>
    %c242 = arith.constant 242 : index
    %1065 = memref.load %arg3[%c242] : memref<432xf32, #tpu.memory_space<smem>>
    %1066 = vector.broadcast %1065 : f32 to vector<14x14xf32>
    %1067 = arith.mulf %1066, %54 : vector<14x14xf32>
    %1068 = arith.addf %1064, %1067 : vector<14x14xf32>
    %c0_68 = arith.constant 0 : index
    %c8_69 = arith.constant 8 : index
    %c0_70 = arith.constant 0 : index
    %c0_71 = arith.constant 0 : index
    %1069 = vector.load %arg5[%c0_68, %c8_69, %c0_70, %c0_71] : memref<1x16x14x14xf32, #tpu.memory_space<vmem>>, vector<1x1x14x14xf32>
    %1070 = vector.shape_cast %1069 : vector<1x1x14x14xf32> to vector<14x14xf32>
    %1071 = vector.shape_cast %1068 : vector<14x14xf32> to vector<1x1x14x14xf32>
    tpu.vector_store %arg5[%c0_68, %c8_69, %c0_70, %c0_71], %1071 {strides = array<i32>} : memref<1x16x14x14xf32, #tpu.memory_space<vmem>>, vector<1x1x14x14xf32>,
    %c9_72 = arith.constant 9 : index
    %1072 = memref.load %arg4[%c9_72] : memref<16xf32, #tpu.memory_space<smem>>
    %1073 = vector.broadcast %1072 : f32 to vector<14x14xf32>
    %c243 = arith.constant 243 : index
    %1074 = memref.load %arg3[%c243] : memref<432xf32, #tpu.memory_space<smem>>
    %1075 = vector.broadcast %1074 : f32 to vector<14x14xf32>
    %1076 = arith.mulf %1075, %4 : vector<14x14xf32>
    %1077 = arith.addf %1073, %1076 : vector<14x14xf32>
    %c244 = arith.constant 244 : index
    %1078 = memref.load %arg3[%c244] : memref<432xf32, #tpu.memory_space<smem>>
    %1079 = vector.broadcast %1078 : f32 to vector<14x14xf32>
    %1080 = arith.mulf %1079, %10 : vector<14x14xf32>
    %1081 = arith.addf %1077, %1080 : vector<14x14xf32>
    %c245 = arith.constant 245 : index
    %1082 = memref.load %arg3[%c245] : memref<432xf32, #tpu.memory_space<smem>>
    %1083 = vector.broadcast %1082 : f32 to vector<14x14xf32>
    %1084 = arith.mulf %1083, %16 : vector<14x14xf32>
    %1085 = arith.addf %1081, %1084 : vector<14x14xf32>
    %c246 = arith.constant 246 : index
    %1086 = memref.load %arg3[%c246] : memref<432xf32, #tpu.memory_space<smem>>
    %1087 = vector.broadcast %1086 : f32 to vector<14x14xf32>
    %1088 = arith.mulf %1087, %5 : vector<14x14xf32>
    %1089 = arith.addf %1085, %1088 : vector<14x14xf32>
    %c247 = arith.constant 247 : index
    %1090 = memref.load %arg3[%c247] : memref<432xf32, #tpu.memory_space<smem>>
    %1091 = vector.broadcast %1090 : f32 to vector<14x14xf32>
    %1092 = arith.mulf %1091, %11 : vector<14x14xf32>
    %1093 = arith.addf %1089, %1092 : vector<14x14xf32>
    %c248 = arith.constant 248 : index
    %1094 = memref.load %arg3[%c248] : memref<432xf32, #tpu.memory_space<smem>>
    %1095 = vector.broadcast %1094 : f32 to vector<14x14xf32>
    %1096 = arith.mulf %1095, %17 : vector<14x14xf32>
    %1097 = arith.addf %1093, %1096 : vector<14x14xf32>
    %c249 = arith.constant 249 : index
    %1098 = memref.load %arg3[%c249] : memref<432xf32, #tpu.memory_space<smem>>
    %1099 = vector.broadcast %1098 : f32 to vector<14x14xf32>
    %1100 = arith.mulf %1099, %6 : vector<14x14xf32>
    %1101 = arith.addf %1097, %1100 : vector<14x14xf32>
    %c250 = arith.constant 250 : index
    %1102 = memref.load %arg3[%c250] : memref<432xf32, #tpu.memory_space<smem>>
    %1103 = vector.broadcast %1102 : f32 to vector<14x14xf32>
    %1104 = arith.mulf %1103, %12 : vector<14x14xf32>
    %1105 = arith.addf %1101, %1104 : vector<14x14xf32>
    %c251 = arith.constant 251 : index
    %1106 = memref.load %arg3[%c251] : memref<432xf32, #tpu.memory_space<smem>>
    %1107 = vector.broadcast %1106 : f32 to vector<14x14xf32>
    %1108 = arith.mulf %1107, %18 : vector<14x14xf32>
    %1109 = arith.addf %1105, %1108 : vector<14x14xf32>
    %c252 = arith.constant 252 : index
    %1110 = memref.load %arg3[%c252] : memref<432xf32, #tpu.memory_space<smem>>
    %1111 = vector.broadcast %1110 : f32 to vector<14x14xf32>
    %1112 = arith.mulf %1111, %22 : vector<14x14xf32>
    %1113 = arith.addf %1109, %1112 : vector<14x14xf32>
    %c253 = arith.constant 253 : index
    %1114 = memref.load %arg3[%c253] : memref<432xf32, #tpu.memory_space<smem>>
    %1115 = vector.broadcast %1114 : f32 to vector<14x14xf32>
    %1116 = arith.mulf %1115, %28 : vector<14x14xf32>
    %1117 = arith.addf %1113, %1116 : vector<14x14xf32>
    %c254 = arith.constant 254 : index
    %1118 = memref.load %arg3[%c254] : memref<432xf32, #tpu.memory_space<smem>>
    %1119 = vector.broadcast %1118 : f32 to vector<14x14xf32>
    %1120 = arith.mulf %1119, %34 : vector<14x14xf32>
    %1121 = arith.addf %1117, %1120 : vector<14x14xf32>
    %c255 = arith.constant 255 : index
    %1122 = memref.load %arg3[%c255] : memref<432xf32, #tpu.memory_space<smem>>
    %1123 = vector.broadcast %1122 : f32 to vector<14x14xf32>
    %1124 = arith.mulf %1123, %23 : vector<14x14xf32>
    %1125 = arith.addf %1121, %1124 : vector<14x14xf32>
    %c256 = arith.constant 256 : index
    %1126 = memref.load %arg3[%c256] : memref<432xf32, #tpu.memory_space<smem>>
    %1127 = vector.broadcast %1126 : f32 to vector<14x14xf32>
    %1128 = arith.mulf %1127, %29 : vector<14x14xf32>
    %1129 = arith.addf %1125, %1128 : vector<14x14xf32>
    %c257 = arith.constant 257 : index
    %1130 = memref.load %arg3[%c257] : memref<432xf32, #tpu.memory_space<smem>>
    %1131 = vector.broadcast %1130 : f32 to vector<14x14xf32>
    %1132 = arith.mulf %1131, %35 : vector<14x14xf32>
    %1133 = arith.addf %1129, %1132 : vector<14x14xf32>
    %c258 = arith.constant 258 : index
    %1134 = memref.load %arg3[%c258] : memref<432xf32, #tpu.memory_space<smem>>
    %1135 = vector.broadcast %1134 : f32 to vector<14x14xf32>
    %1136 = arith.mulf %1135, %24 : vector<14x14xf32>
    %1137 = arith.addf %1133, %1136 : vector<14x14xf32>
    %c259 = arith.constant 259 : index
    %1138 = memref.load %arg3[%c259] : memref<432xf32, #tpu.memory_space<smem>>
    %1139 = vector.broadcast %1138 : f32 to vector<14x14xf32>
    %1140 = arith.mulf %1139, %30 : vector<14x14xf32>
    %1141 = arith.addf %1137, %1140 : vector<14x14xf32>
    %c260 = arith.constant 260 : index
    %1142 = memref.load %arg3[%c260] : memref<432xf32, #tpu.memory_space<smem>>
    %1143 = vector.broadcast %1142 : f32 to vector<14x14xf32>
    %1144 = arith.mulf %1143, %36 : vector<14x14xf32>
    %1145 = arith.addf %1141, %1144 : vector<14x14xf32>
    %c261 = arith.constant 261 : index
    %1146 = memref.load %arg3[%c261] : memref<432xf32, #tpu.memory_space<smem>>
    %1147 = vector.broadcast %1146 : f32 to vector<14x14xf32>
    %1148 = arith.mulf %1147, %40 : vector<14x14xf32>
    %1149 = arith.addf %1145, %1148 : vector<14x14xf32>
    %c262 = arith.constant 262 : index
    %1150 = memref.load %arg3[%c262] : memref<432xf32, #tpu.memory_space<smem>>
    %1151 = vector.broadcast %1150 : f32 to vector<14x14xf32>
    %1152 = arith.mulf %1151, %46 : vector<14x14xf32>
    %1153 = arith.addf %1149, %1152 : vector<14x14xf32>
    %c263 = arith.constant 263 : index
    %1154 = memref.load %arg3[%c263] : memref<432xf32, #tpu.memory_space<smem>>
    %1155 = vector.broadcast %1154 : f32 to vector<14x14xf32>
    %1156 = arith.mulf %1155, %52 : vector<14x14xf32>
    %1157 = arith.addf %1153, %1156 : vector<14x14xf32>
    %c264 = arith.constant 264 : index
    %1158 = memref.load %arg3[%c264] : memref<432xf32, #tpu.memory_space<smem>>
    %1159 = vector.broadcast %1158 : f32 to vector<14x14xf32>
    %1160 = arith.mulf %1159, %41 : vector<14x14xf32>
    %1161 = arith.addf %1157, %1160 : vector<14x14xf32>
    %c265 = arith.constant 265 : index
    %1162 = memref.load %arg3[%c265] : memref<432xf32, #tpu.memory_space<smem>>
    %1163 = vector.broadcast %1162 : f32 to vector<14x14xf32>
    %1164 = arith.mulf %1163, %47 : vector<14x14xf32>
    %1165 = arith.addf %1161, %1164 : vector<14x14xf32>
    %c266 = arith.constant 266 : index
    %1166 = memref.load %arg3[%c266] : memref<432xf32, #tpu.memory_space<smem>>
    %1167 = vector.broadcast %1166 : f32 to vector<14x14xf32>
    %1168 = arith.mulf %1167, %53 : vector<14x14xf32>
    %1169 = arith.addf %1165, %1168 : vector<14x14xf32>
    %c267 = arith.constant 267 : index
    %1170 = memref.load %arg3[%c267] : memref<432xf32, #tpu.memory_space<smem>>
    %1171 = vector.broadcast %1170 : f32 to vector<14x14xf32>
    %1172 = arith.mulf %1171, %42 : vector<14x14xf32>
    %1173 = arith.addf %1169, %1172 : vector<14x14xf32>
    %c268 = arith.constant 268 : index
    %1174 = memref.load %arg3[%c268] : memref<432xf32, #tpu.memory_space<smem>>
    %1175 = vector.broadcast %1174 : f32 to vector<14x14xf32>
    %1176 = arith.mulf %1175, %48 : vector<14x14xf32>
    %1177 = arith.addf %1173, %1176 : vector<14x14xf32>
    %c269 = arith.constant 269 : index
    %1178 = memref.load %arg3[%c269] : memref<432xf32, #tpu.memory_space<smem>>
    %1179 = vector.broadcast %1178 : f32 to vector<14x14xf32>
    %1180 = arith.mulf %1179, %54 : vector<14x14xf32>
    %1181 = arith.addf %1177, %1180 : vector<14x14xf32>
    %c0_73 = arith.constant 0 : index
    %c9_74 = arith.constant 9 : index
    %c0_75 = arith.constant 0 : index
    %c0_76 = arith.constant 0 : index
    %1182 = vector.load %arg5[%c0_73, %c9_74, %c0_75, %c0_76] : memref<1x16x14x14xf32, #tpu.memory_space<vmem>>, vector<1x1x14x14xf32>
    %1183 = vector.shape_cast %1182 : vector<1x1x14x14xf32> to vector<14x14xf32>
    %1184 = vector.shape_cast %1181 : vector<14x14xf32> to vector<1x1x14x14xf32>
    tpu.vector_store %arg5[%c0_73, %c9_74, %c0_75, %c0_76], %1184 {strides = array<i32>} : memref<1x16x14x14xf32, #tpu.memory_space<vmem>>, vector<1x1x14x14xf32>,
    %c10_77 = arith.constant 10 : index
    %1185 = memref.load %arg4[%c10_77] : memref<16xf32, #tpu.memory_space<smem>>
    %1186 = vector.broadcast %1185 : f32 to vector<14x14xf32>
    %c270 = arith.constant 270 : index
    %1187 = memref.load %arg3[%c270] : memref<432xf32, #tpu.memory_space<smem>>
    %1188 = vector.broadcast %1187 : f32 to vector<14x14xf32>
    %1189 = arith.mulf %1188, %4 : vector<14x14xf32>
    %1190 = arith.addf %1186, %1189 : vector<14x14xf32>
    %c271 = arith.constant 271 : index
    %1191 = memref.load %arg3[%c271] : memref<432xf32, #tpu.memory_space<smem>>
    %1192 = vector.broadcast %1191 : f32 to vector<14x14xf32>
    %1193 = arith.mulf %1192, %10 : vector<14x14xf32>
    %1194 = arith.addf %1190, %1193 : vector<14x14xf32>
    %c272 = arith.constant 272 : index
    %1195 = memref.load %arg3[%c272] : memref<432xf32, #tpu.memory_space<smem>>
    %1196 = vector.broadcast %1195 : f32 to vector<14x14xf32>
    %1197 = arith.mulf %1196, %16 : vector<14x14xf32>
    %1198 = arith.addf %1194, %1197 : vector<14x14xf32>
    %c273 = arith.constant 273 : index
    %1199 = memref.load %arg3[%c273] : memref<432xf32, #tpu.memory_space<smem>>
    %1200 = vector.broadcast %1199 : f32 to vector<14x14xf32>
    %1201 = arith.mulf %1200, %5 : vector<14x14xf32>
    %1202 = arith.addf %1198, %1201 : vector<14x14xf32>
    %c274 = arith.constant 274 : index
    %1203 = memref.load %arg3[%c274] : memref<432xf32, #tpu.memory_space<smem>>
    %1204 = vector.broadcast %1203 : f32 to vector<14x14xf32>
    %1205 = arith.mulf %1204, %11 : vector<14x14xf32>
    %1206 = arith.addf %1202, %1205 : vector<14x14xf32>
    %c275 = arith.constant 275 : index
    %1207 = memref.load %arg3[%c275] : memref<432xf32, #tpu.memory_space<smem>>
    %1208 = vector.broadcast %1207 : f32 to vector<14x14xf32>
    %1209 = arith.mulf %1208, %17 : vector<14x14xf32>
    %1210 = arith.addf %1206, %1209 : vector<14x14xf32>
    %c276 = arith.constant 276 : index
    %1211 = memref.load %arg3[%c276] : memref<432xf32, #tpu.memory_space<smem>>
    %1212 = vector.broadcast %1211 : f32 to vector<14x14xf32>
    %1213 = arith.mulf %1212, %6 : vector<14x14xf32>
    %1214 = arith.addf %1210, %1213 : vector<14x14xf32>
    %c277 = arith.constant 277 : index
    %1215 = memref.load %arg3[%c277] : memref<432xf32, #tpu.memory_space<smem>>
    %1216 = vector.broadcast %1215 : f32 to vector<14x14xf32>
    %1217 = arith.mulf %1216, %12 : vector<14x14xf32>
    %1218 = arith.addf %1214, %1217 : vector<14x14xf32>
    %c278 = arith.constant 278 : index
    %1219 = memref.load %arg3[%c278] : memref<432xf32, #tpu.memory_space<smem>>
    %1220 = vector.broadcast %1219 : f32 to vector<14x14xf32>
    %1221 = arith.mulf %1220, %18 : vector<14x14xf32>
    %1222 = arith.addf %1218, %1221 : vector<14x14xf32>
    %c279 = arith.constant 279 : index
    %1223 = memref.load %arg3[%c279] : memref<432xf32, #tpu.memory_space<smem>>
    %1224 = vector.broadcast %1223 : f32 to vector<14x14xf32>
    %1225 = arith.mulf %1224, %22 : vector<14x14xf32>
    %1226 = arith.addf %1222, %1225 : vector<14x14xf32>
    %c280 = arith.constant 280 : index
    %1227 = memref.load %arg3[%c280] : memref<432xf32, #tpu.memory_space<smem>>
    %1228 = vector.broadcast %1227 : f32 to vector<14x14xf32>
    %1229 = arith.mulf %1228, %28 : vector<14x14xf32>
    %1230 = arith.addf %1226, %1229 : vector<14x14xf32>
    %c281 = arith.constant 281 : index
    %1231 = memref.load %arg3[%c281] : memref<432xf32, #tpu.memory_space<smem>>
    %1232 = vector.broadcast %1231 : f32 to vector<14x14xf32>
    %1233 = arith.mulf %1232, %34 : vector<14x14xf32>
    %1234 = arith.addf %1230, %1233 : vector<14x14xf32>
    %c282 = arith.constant 282 : index
    %1235 = memref.load %arg3[%c282] : memref<432xf32, #tpu.memory_space<smem>>
    %1236 = vector.broadcast %1235 : f32 to vector<14x14xf32>
    %1237 = arith.mulf %1236, %23 : vector<14x14xf32>
    %1238 = arith.addf %1234, %1237 : vector<14x14xf32>
    %c283 = arith.constant 283 : index
    %1239 = memref.load %arg3[%c283] : memref<432xf32, #tpu.memory_space<smem>>
    %1240 = vector.broadcast %1239 : f32 to vector<14x14xf32>
    %1241 = arith.mulf %1240, %29 : vector<14x14xf32>
    %1242 = arith.addf %1238, %1241 : vector<14x14xf32>
    %c284 = arith.constant 284 : index
    %1243 = memref.load %arg3[%c284] : memref<432xf32, #tpu.memory_space<smem>>
    %1244 = vector.broadcast %1243 : f32 to vector<14x14xf32>
    %1245 = arith.mulf %1244, %35 : vector<14x14xf32>
    %1246 = arith.addf %1242, %1245 : vector<14x14xf32>
    %c285 = arith.constant 285 : index
    %1247 = memref.load %arg3[%c285] : memref<432xf32, #tpu.memory_space<smem>>
    %1248 = vector.broadcast %1247 : f32 to vector<14x14xf32>
    %1249 = arith.mulf %1248, %24 : vector<14x14xf32>
    %1250 = arith.addf %1246, %1249 : vector<14x14xf32>
    %c286 = arith.constant 286 : index
    %1251 = memref.load %arg3[%c286] : memref<432xf32, #tpu.memory_space<smem>>
    %1252 = vector.broadcast %1251 : f32 to vector<14x14xf32>
    %1253 = arith.mulf %1252, %30 : vector<14x14xf32>
    %1254 = arith.addf %1250, %1253 : vector<14x14xf32>
    %c287 = arith.constant 287 : index
    %1255 = memref.load %arg3[%c287] : memref<432xf32, #tpu.memory_space<smem>>
    %1256 = vector.broadcast %1255 : f32 to vector<14x14xf32>
    %1257 = arith.mulf %1256, %36 : vector<14x14xf32>
    %1258 = arith.addf %1254, %1257 : vector<14x14xf32>
    %c288 = arith.constant 288 : index
    %1259 = memref.load %arg3[%c288] : memref<432xf32, #tpu.memory_space<smem>>
    %1260 = vector.broadcast %1259 : f32 to vector<14x14xf32>
    %1261 = arith.mulf %1260, %40 : vector<14x14xf32>
    %1262 = arith.addf %1258, %1261 : vector<14x14xf32>
    %c289 = arith.constant 289 : index
    %1263 = memref.load %arg3[%c289] : memref<432xf32, #tpu.memory_space<smem>>
    %1264 = vector.broadcast %1263 : f32 to vector<14x14xf32>
    %1265 = arith.mulf %1264, %46 : vector<14x14xf32>
    %1266 = arith.addf %1262, %1265 : vector<14x14xf32>
    %c290 = arith.constant 290 : index
    %1267 = memref.load %arg3[%c290] : memref<432xf32, #tpu.memory_space<smem>>
    %1268 = vector.broadcast %1267 : f32 to vector<14x14xf32>
    %1269 = arith.mulf %1268, %52 : vector<14x14xf32>
    %1270 = arith.addf %1266, %1269 : vector<14x14xf32>
    %c291 = arith.constant 291 : index
    %1271 = memref.load %arg3[%c291] : memref<432xf32, #tpu.memory_space<smem>>
    %1272 = vector.broadcast %1271 : f32 to vector<14x14xf32>
    %1273 = arith.mulf %1272, %41 : vector<14x14xf32>
    %1274 = arith.addf %1270, %1273 : vector<14x14xf32>
    %c292 = arith.constant 292 : index
    %1275 = memref.load %arg3[%c292] : memref<432xf32, #tpu.memory_space<smem>>
    %1276 = vector.broadcast %1275 : f32 to vector<14x14xf32>
    %1277 = arith.mulf %1276, %47 : vector<14x14xf32>
    %1278 = arith.addf %1274, %1277 : vector<14x14xf32>
    %c293 = arith.constant 293 : index
    %1279 = memref.load %arg3[%c293] : memref<432xf32, #tpu.memory_space<smem>>
    %1280 = vector.broadcast %1279 : f32 to vector<14x14xf32>
    %1281 = arith.mulf %1280, %53 : vector<14x14xf32>
    %1282 = arith.addf %1278, %1281 : vector<14x14xf32>
    %c294 = arith.constant 294 : index
    %1283 = memref.load %arg3[%c294] : memref<432xf32, #tpu.memory_space<smem>>
    %1284 = vector.broadcast %1283 : f32 to vector<14x14xf32>
    %1285 = arith.mulf %1284, %42 : vector<14x14xf32>
    %1286 = arith.addf %1282, %1285 : vector<14x14xf32>
    %c295 = arith.constant 295 : index
    %1287 = memref.load %arg3[%c295] : memref<432xf32, #tpu.memory_space<smem>>
    %1288 = vector.broadcast %1287 : f32 to vector<14x14xf32>
    %1289 = arith.mulf %1288, %48 : vector<14x14xf32>
    %1290 = arith.addf %1286, %1289 : vector<14x14xf32>
    %c296 = arith.constant 296 : index
    %1291 = memref.load %arg3[%c296] : memref<432xf32, #tpu.memory_space<smem>>
    %1292 = vector.broadcast %1291 : f32 to vector<14x14xf32>
    %1293 = arith.mulf %1292, %54 : vector<14x14xf32>
    %1294 = arith.addf %1290, %1293 : vector<14x14xf32>
    %c0_78 = arith.constant 0 : index
    %c10_79 = arith.constant 10 : index
    %c0_80 = arith.constant 0 : index
    %c0_81 = arith.constant 0 : index
    %1295 = vector.load %arg5[%c0_78, %c10_79, %c0_80, %c0_81] : memref<1x16x14x14xf32, #tpu.memory_space<vmem>>, vector<1x1x14x14xf32>
    %1296 = vector.shape_cast %1295 : vector<1x1x14x14xf32> to vector<14x14xf32>
    %1297 = vector.shape_cast %1294 : vector<14x14xf32> to vector<1x1x14x14xf32>
    tpu.vector_store %arg5[%c0_78, %c10_79, %c0_80, %c0_81], %1297 {strides = array<i32>} : memref<1x16x14x14xf32, #tpu.memory_space<vmem>>, vector<1x1x14x14xf32>,
    %c11_82 = arith.constant 11 : index
    %1298 = memref.load %arg4[%c11_82] : memref<16xf32, #tpu.memory_space<smem>>
    %1299 = vector.broadcast %1298 : f32 to vector<14x14xf32>
    %c297 = arith.constant 297 : index
    %1300 = memref.load %arg3[%c297] : memref<432xf32, #tpu.memory_space<smem>>
    %1301 = vector.broadcast %1300 : f32 to vector<14x14xf32>
    %1302 = arith.mulf %1301, %4 : vector<14x14xf32>
    %1303 = arith.addf %1299, %1302 : vector<14x14xf32>
    %c298 = arith.constant 298 : index
    %1304 = memref.load %arg3[%c298] : memref<432xf32, #tpu.memory_space<smem>>
    %1305 = vector.broadcast %1304 : f32 to vector<14x14xf32>
    %1306 = arith.mulf %1305, %10 : vector<14x14xf32>
    %1307 = arith.addf %1303, %1306 : vector<14x14xf32>
    %c299 = arith.constant 299 : index
    %1308 = memref.load %arg3[%c299] : memref<432xf32, #tpu.memory_space<smem>>
    %1309 = vector.broadcast %1308 : f32 to vector<14x14xf32>
    %1310 = arith.mulf %1309, %16 : vector<14x14xf32>
    %1311 = arith.addf %1307, %1310 : vector<14x14xf32>
    %c300 = arith.constant 300 : index
    %1312 = memref.load %arg3[%c300] : memref<432xf32, #tpu.memory_space<smem>>
    %1313 = vector.broadcast %1312 : f32 to vector<14x14xf32>
    %1314 = arith.mulf %1313, %5 : vector<14x14xf32>
    %1315 = arith.addf %1311, %1314 : vector<14x14xf32>
    %c301 = arith.constant 301 : index
    %1316 = memref.load %arg3[%c301] : memref<432xf32, #tpu.memory_space<smem>>
    %1317 = vector.broadcast %1316 : f32 to vector<14x14xf32>
    %1318 = arith.mulf %1317, %11 : vector<14x14xf32>
    %1319 = arith.addf %1315, %1318 : vector<14x14xf32>
    %c302 = arith.constant 302 : index
    %1320 = memref.load %arg3[%c302] : memref<432xf32, #tpu.memory_space<smem>>
    %1321 = vector.broadcast %1320 : f32 to vector<14x14xf32>
    %1322 = arith.mulf %1321, %17 : vector<14x14xf32>
    %1323 = arith.addf %1319, %1322 : vector<14x14xf32>
    %c303 = arith.constant 303 : index
    %1324 = memref.load %arg3[%c303] : memref<432xf32, #tpu.memory_space<smem>>
    %1325 = vector.broadcast %1324 : f32 to vector<14x14xf32>
    %1326 = arith.mulf %1325, %6 : vector<14x14xf32>
    %1327 = arith.addf %1323, %1326 : vector<14x14xf32>
    %c304 = arith.constant 304 : index
    %1328 = memref.load %arg3[%c304] : memref<432xf32, #tpu.memory_space<smem>>
    %1329 = vector.broadcast %1328 : f32 to vector<14x14xf32>
    %1330 = arith.mulf %1329, %12 : vector<14x14xf32>
    %1331 = arith.addf %1327, %1330 : vector<14x14xf32>
    %c305 = arith.constant 305 : index
    %1332 = memref.load %arg3[%c305] : memref<432xf32, #tpu.memory_space<smem>>
    %1333 = vector.broadcast %1332 : f32 to vector<14x14xf32>
    %1334 = arith.mulf %1333, %18 : vector<14x14xf32>
    %1335 = arith.addf %1331, %1334 : vector<14x14xf32>
    %c306 = arith.constant 306 : index
    %1336 = memref.load %arg3[%c306] : memref<432xf32, #tpu.memory_space<smem>>
    %1337 = vector.broadcast %1336 : f32 to vector<14x14xf32>
    %1338 = arith.mulf %1337, %22 : vector<14x14xf32>
    %1339 = arith.addf %1335, %1338 : vector<14x14xf32>
    %c307 = arith.constant 307 : index
    %1340 = memref.load %arg3[%c307] : memref<432xf32, #tpu.memory_space<smem>>
    %1341 = vector.broadcast %1340 : f32 to vector<14x14xf32>
    %1342 = arith.mulf %1341, %28 : vector<14x14xf32>
    %1343 = arith.addf %1339, %1342 : vector<14x14xf32>
    %c308 = arith.constant 308 : index
    %1344 = memref.load %arg3[%c308] : memref<432xf32, #tpu.memory_space<smem>>
    %1345 = vector.broadcast %1344 : f32 to vector<14x14xf32>
    %1346 = arith.mulf %1345, %34 : vector<14x14xf32>
    %1347 = arith.addf %1343, %1346 : vector<14x14xf32>
    %c309 = arith.constant 309 : index
    %1348 = memref.load %arg3[%c309] : memref<432xf32, #tpu.memory_space<smem>>
    %1349 = vector.broadcast %1348 : f32 to vector<14x14xf32>
    %1350 = arith.mulf %1349, %23 : vector<14x14xf32>
    %1351 = arith.addf %1347, %1350 : vector<14x14xf32>
    %c310 = arith.constant 310 : index
    %1352 = memref.load %arg3[%c310] : memref<432xf32, #tpu.memory_space<smem>>
    %1353 = vector.broadcast %1352 : f32 to vector<14x14xf32>
    %1354 = arith.mulf %1353, %29 : vector<14x14xf32>
    %1355 = arith.addf %1351, %1354 : vector<14x14xf32>
    %c311 = arith.constant 311 : index
    %1356 = memref.load %arg3[%c311] : memref<432xf32, #tpu.memory_space<smem>>
    %1357 = vector.broadcast %1356 : f32 to vector<14x14xf32>
    %1358 = arith.mulf %1357, %35 : vector<14x14xf32>
    %1359 = arith.addf %1355, %1358 : vector<14x14xf32>
    %c312 = arith.constant 312 : index
    %1360 = memref.load %arg3[%c312] : memref<432xf32, #tpu.memory_space<smem>>
    %1361 = vector.broadcast %1360 : f32 to vector<14x14xf32>
    %1362 = arith.mulf %1361, %24 : vector<14x14xf32>
    %1363 = arith.addf %1359, %1362 : vector<14x14xf32>
    %c313 = arith.constant 313 : index
    %1364 = memref.load %arg3[%c313] : memref<432xf32, #tpu.memory_space<smem>>
    %1365 = vector.broadcast %1364 : f32 to vector<14x14xf32>
    %1366 = arith.mulf %1365, %30 : vector<14x14xf32>
    %1367 = arith.addf %1363, %1366 : vector<14x14xf32>
    %c314 = arith.constant 314 : index
    %1368 = memref.load %arg3[%c314] : memref<432xf32, #tpu.memory_space<smem>>
    %1369 = vector.broadcast %1368 : f32 to vector<14x14xf32>
    %1370 = arith.mulf %1369, %36 : vector<14x14xf32>
    %1371 = arith.addf %1367, %1370 : vector<14x14xf32>
    %c315 = arith.constant 315 : index
    %1372 = memref.load %arg3[%c315] : memref<432xf32, #tpu.memory_space<smem>>
    %1373 = vector.broadcast %1372 : f32 to vector<14x14xf32>
    %1374 = arith.mulf %1373, %40 : vector<14x14xf32>
    %1375 = arith.addf %1371, %1374 : vector<14x14xf32>
    %c316 = arith.constant 316 : index
    %1376 = memref.load %arg3[%c316] : memref<432xf32, #tpu.memory_space<smem>>
    %1377 = vector.broadcast %1376 : f32 to vector<14x14xf32>
    %1378 = arith.mulf %1377, %46 : vector<14x14xf32>
    %1379 = arith.addf %1375, %1378 : vector<14x14xf32>
    %c317 = arith.constant 317 : index
    %1380 = memref.load %arg3[%c317] : memref<432xf32, #tpu.memory_space<smem>>
    %1381 = vector.broadcast %1380 : f32 to vector<14x14xf32>
    %1382 = arith.mulf %1381, %52 : vector<14x14xf32>
    %1383 = arith.addf %1379, %1382 : vector<14x14xf32>
    %c318 = arith.constant 318 : index
    %1384 = memref.load %arg3[%c318] : memref<432xf32, #tpu.memory_space<smem>>
    %1385 = vector.broadcast %1384 : f32 to vector<14x14xf32>
    %1386 = arith.mulf %1385, %41 : vector<14x14xf32>
    %1387 = arith.addf %1383, %1386 : vector<14x14xf32>
    %c319 = arith.constant 319 : index
    %1388 = memref.load %arg3[%c319] : memref<432xf32, #tpu.memory_space<smem>>
    %1389 = vector.broadcast %1388 : f32 to vector<14x14xf32>
    %1390 = arith.mulf %1389, %47 : vector<14x14xf32>
    %1391 = arith.addf %1387, %1390 : vector<14x14xf32>
    %c320 = arith.constant 320 : index
    %1392 = memref.load %arg3[%c320] : memref<432xf32, #tpu.memory_space<smem>>
    %1393 = vector.broadcast %1392 : f32 to vector<14x14xf32>
    %1394 = arith.mulf %1393, %53 : vector<14x14xf32>
    %1395 = arith.addf %1391, %1394 : vector<14x14xf32>
    %c321 = arith.constant 321 : index
    %1396 = memref.load %arg3[%c321] : memref<432xf32, #tpu.memory_space<smem>>
    %1397 = vector.broadcast %1396 : f32 to vector<14x14xf32>
    %1398 = arith.mulf %1397, %42 : vector<14x14xf32>
    %1399 = arith.addf %1395, %1398 : vector<14x14xf32>
    %c322 = arith.constant 322 : index
    %1400 = memref.load %arg3[%c322] : memref<432xf32, #tpu.memory_space<smem>>
    %1401 = vector.broadcast %1400 : f32 to vector<14x14xf32>
    %1402 = arith.mulf %1401, %48 : vector<14x14xf32>
    %1403 = arith.addf %1399, %1402 : vector<14x14xf32>
    %c323 = arith.constant 323 : index
    %1404 = memref.load %arg3[%c323] : memref<432xf32, #tpu.memory_space<smem>>
    %1405 = vector.broadcast %1404 : f32 to vector<14x14xf32>
    %1406 = arith.mulf %1405, %54 : vector<14x14xf32>
    %1407 = arith.addf %1403, %1406 : vector<14x14xf32>
    %c0_83 = arith.constant 0 : index
    %c11_84 = arith.constant 11 : index
    %c0_85 = arith.constant 0 : index
    %c0_86 = arith.constant 0 : index
    %1408 = vector.load %arg5[%c0_83, %c11_84, %c0_85, %c0_86] : memref<1x16x14x14xf32, #tpu.memory_space<vmem>>, vector<1x1x14x14xf32>
    %1409 = vector.shape_cast %1408 : vector<1x1x14x14xf32> to vector<14x14xf32>
    %1410 = vector.shape_cast %1407 : vector<14x14xf32> to vector<1x1x14x14xf32>
    tpu.vector_store %arg5[%c0_83, %c11_84, %c0_85, %c0_86], %1410 {strides = array<i32>} : memref<1x16x14x14xf32, #tpu.memory_space<vmem>>, vector<1x1x14x14xf32>,
    %c12_87 = arith.constant 12 : index
    %1411 = memref.load %arg4[%c12_87] : memref<16xf32, #tpu.memory_space<smem>>
    %1412 = vector.broadcast %1411 : f32 to vector<14x14xf32>
    %c324 = arith.constant 324 : index
    %1413 = memref.load %arg3[%c324] : memref<432xf32, #tpu.memory_space<smem>>
    %1414 = vector.broadcast %1413 : f32 to vector<14x14xf32>
    %1415 = arith.mulf %1414, %4 : vector<14x14xf32>
    %1416 = arith.addf %1412, %1415 : vector<14x14xf32>
    %c325 = arith.constant 325 : index
    %1417 = memref.load %arg3[%c325] : memref<432xf32, #tpu.memory_space<smem>>
    %1418 = vector.broadcast %1417 : f32 to vector<14x14xf32>
    %1419 = arith.mulf %1418, %10 : vector<14x14xf32>
    %1420 = arith.addf %1416, %1419 : vector<14x14xf32>
    %c326 = arith.constant 326 : index
    %1421 = memref.load %arg3[%c326] : memref<432xf32, #tpu.memory_space<smem>>
    %1422 = vector.broadcast %1421 : f32 to vector<14x14xf32>
    %1423 = arith.mulf %1422, %16 : vector<14x14xf32>
    %1424 = arith.addf %1420, %1423 : vector<14x14xf32>
    %c327 = arith.constant 327 : index
    %1425 = memref.load %arg3[%c327] : memref<432xf32, #tpu.memory_space<smem>>
    %1426 = vector.broadcast %1425 : f32 to vector<14x14xf32>
    %1427 = arith.mulf %1426, %5 : vector<14x14xf32>
    %1428 = arith.addf %1424, %1427 : vector<14x14xf32>
    %c328 = arith.constant 328 : index
    %1429 = memref.load %arg3[%c328] : memref<432xf32, #tpu.memory_space<smem>>
    %1430 = vector.broadcast %1429 : f32 to vector<14x14xf32>
    %1431 = arith.mulf %1430, %11 : vector<14x14xf32>
    %1432 = arith.addf %1428, %1431 : vector<14x14xf32>
    %c329 = arith.constant 329 : index
    %1433 = memref.load %arg3[%c329] : memref<432xf32, #tpu.memory_space<smem>>
    %1434 = vector.broadcast %1433 : f32 to vector<14x14xf32>
    %1435 = arith.mulf %1434, %17 : vector<14x14xf32>
    %1436 = arith.addf %1432, %1435 : vector<14x14xf32>
    %c330 = arith.constant 330 : index
    %1437 = memref.load %arg3[%c330] : memref<432xf32, #tpu.memory_space<smem>>
    %1438 = vector.broadcast %1437 : f32 to vector<14x14xf32>
    %1439 = arith.mulf %1438, %6 : vector<14x14xf32>
    %1440 = arith.addf %1436, %1439 : vector<14x14xf32>
    %c331 = arith.constant 331 : index
    %1441 = memref.load %arg3[%c331] : memref<432xf32, #tpu.memory_space<smem>>
    %1442 = vector.broadcast %1441 : f32 to vector<14x14xf32>
    %1443 = arith.mulf %1442, %12 : vector<14x14xf32>
    %1444 = arith.addf %1440, %1443 : vector<14x14xf32>
    %c332 = arith.constant 332 : index
    %1445 = memref.load %arg3[%c332] : memref<432xf32, #tpu.memory_space<smem>>
    %1446 = vector.broadcast %1445 : f32 to vector<14x14xf32>
    %1447 = arith.mulf %1446, %18 : vector<14x14xf32>
    %1448 = arith.addf %1444, %1447 : vector<14x14xf32>
    %c333 = arith.constant 333 : index
    %1449 = memref.load %arg3[%c333] : memref<432xf32, #tpu.memory_space<smem>>
    %1450 = vector.broadcast %1449 : f32 to vector<14x14xf32>
    %1451 = arith.mulf %1450, %22 : vector<14x14xf32>
    %1452 = arith.addf %1448, %1451 : vector<14x14xf32>
    %c334 = arith.constant 334 : index
    %1453 = memref.load %arg3[%c334] : memref<432xf32, #tpu.memory_space<smem>>
    %1454 = vector.broadcast %1453 : f32 to vector<14x14xf32>
    %1455 = arith.mulf %1454, %28 : vector<14x14xf32>
    %1456 = arith.addf %1452, %1455 : vector<14x14xf32>
    %c335 = arith.constant 335 : index
    %1457 = memref.load %arg3[%c335] : memref<432xf32, #tpu.memory_space<smem>>
    %1458 = vector.broadcast %1457 : f32 to vector<14x14xf32>
    %1459 = arith.mulf %1458, %34 : vector<14x14xf32>
    %1460 = arith.addf %1456, %1459 : vector<14x14xf32>
    %c336 = arith.constant 336 : index
    %1461 = memref.load %arg3[%c336] : memref<432xf32, #tpu.memory_space<smem>>
    %1462 = vector.broadcast %1461 : f32 to vector<14x14xf32>
    %1463 = arith.mulf %1462, %23 : vector<14x14xf32>
    %1464 = arith.addf %1460, %1463 : vector<14x14xf32>
    %c337 = arith.constant 337 : index
    %1465 = memref.load %arg3[%c337] : memref<432xf32, #tpu.memory_space<smem>>
    %1466 = vector.broadcast %1465 : f32 to vector<14x14xf32>
    %1467 = arith.mulf %1466, %29 : vector<14x14xf32>
    %1468 = arith.addf %1464, %1467 : vector<14x14xf32>
    %c338 = arith.constant 338 : index
    %1469 = memref.load %arg3[%c338] : memref<432xf32, #tpu.memory_space<smem>>
    %1470 = vector.broadcast %1469 : f32 to vector<14x14xf32>
    %1471 = arith.mulf %1470, %35 : vector<14x14xf32>
    %1472 = arith.addf %1468, %1471 : vector<14x14xf32>
    %c339 = arith.constant 339 : index
    %1473 = memref.load %arg3[%c339] : memref<432xf32, #tpu.memory_space<smem>>
    %1474 = vector.broadcast %1473 : f32 to vector<14x14xf32>
    %1475 = arith.mulf %1474, %24 : vector<14x14xf32>
    %1476 = arith.addf %1472, %1475 : vector<14x14xf32>
    %c340 = arith.constant 340 : index
    %1477 = memref.load %arg3[%c340] : memref<432xf32, #tpu.memory_space<smem>>
    %1478 = vector.broadcast %1477 : f32 to vector<14x14xf32>
    %1479 = arith.mulf %1478, %30 : vector<14x14xf32>
    %1480 = arith.addf %1476, %1479 : vector<14x14xf32>
    %c341 = arith.constant 341 : index
    %1481 = memref.load %arg3[%c341] : memref<432xf32, #tpu.memory_space<smem>>
    %1482 = vector.broadcast %1481 : f32 to vector<14x14xf32>
    %1483 = arith.mulf %1482, %36 : vector<14x14xf32>
    %1484 = arith.addf %1480, %1483 : vector<14x14xf32>
    %c342 = arith.constant 342 : index
    %1485 = memref.load %arg3[%c342] : memref<432xf32, #tpu.memory_space<smem>>
    %1486 = vector.broadcast %1485 : f32 to vector<14x14xf32>
    %1487 = arith.mulf %1486, %40 : vector<14x14xf32>
    %1488 = arith.addf %1484, %1487 : vector<14x14xf32>
    %c343 = arith.constant 343 : index
    %1489 = memref.load %arg3[%c343] : memref<432xf32, #tpu.memory_space<smem>>
    %1490 = vector.broadcast %1489 : f32 to vector<14x14xf32>
    %1491 = arith.mulf %1490, %46 : vector<14x14xf32>
    %1492 = arith.addf %1488, %1491 : vector<14x14xf32>
    %c344 = arith.constant 344 : index
    %1493 = memref.load %arg3[%c344] : memref<432xf32, #tpu.memory_space<smem>>
    %1494 = vector.broadcast %1493 : f32 to vector<14x14xf32>
    %1495 = arith.mulf %1494, %52 : vector<14x14xf32>
    %1496 = arith.addf %1492, %1495 : vector<14x14xf32>
    %c345 = arith.constant 345 : index
    %1497 = memref.load %arg3[%c345] : memref<432xf32, #tpu.memory_space<smem>>
    %1498 = vector.broadcast %1497 : f32 to vector<14x14xf32>
    %1499 = arith.mulf %1498, %41 : vector<14x14xf32>
    %1500 = arith.addf %1496, %1499 : vector<14x14xf32>
    %c346 = arith.constant 346 : index
    %1501 = memref.load %arg3[%c346] : memref<432xf32, #tpu.memory_space<smem>>
    %1502 = vector.broadcast %1501 : f32 to vector<14x14xf32>
    %1503 = arith.mulf %1502, %47 : vector<14x14xf32>
    %1504 = arith.addf %1500, %1503 : vector<14x14xf32>
    %c347 = arith.constant 347 : index
    %1505 = memref.load %arg3[%c347] : memref<432xf32, #tpu.memory_space<smem>>
    %1506 = vector.broadcast %1505 : f32 to vector<14x14xf32>
    %1507 = arith.mulf %1506, %53 : vector<14x14xf32>
    %1508 = arith.addf %1504, %1507 : vector<14x14xf32>
    %c348 = arith.constant 348 : index
    %1509 = memref.load %arg3[%c348] : memref<432xf32, #tpu.memory_space<smem>>
    %1510 = vector.broadcast %1509 : f32 to vector<14x14xf32>
    %1511 = arith.mulf %1510, %42 : vector<14x14xf32>
    %1512 = arith.addf %1508, %1511 : vector<14x14xf32>
    %c349 = arith.constant 349 : index
    %1513 = memref.load %arg3[%c349] : memref<432xf32, #tpu.memory_space<smem>>
    %1514 = vector.broadcast %1513 : f32 to vector<14x14xf32>
    %1515 = arith.mulf %1514, %48 : vector<14x14xf32>
    %1516 = arith.addf %1512, %1515 : vector<14x14xf32>
    %c350 = arith.constant 350 : index
    %1517 = memref.load %arg3[%c350] : memref<432xf32, #tpu.memory_space<smem>>
    %1518 = vector.broadcast %1517 : f32 to vector<14x14xf32>
    %1519 = arith.mulf %1518, %54 : vector<14x14xf32>
    %1520 = arith.addf %1516, %1519 : vector<14x14xf32>
    %c0_88 = arith.constant 0 : index
    %c12_89 = arith.constant 12 : index
    %c0_90 = arith.constant 0 : index
    %c0_91 = arith.constant 0 : index
    %1521 = vector.load %arg5[%c0_88, %c12_89, %c0_90, %c0_91] : memref<1x16x14x14xf32, #tpu.memory_space<vmem>>, vector<1x1x14x14xf32>
    %1522 = vector.shape_cast %1521 : vector<1x1x14x14xf32> to vector<14x14xf32>
    %1523 = vector.shape_cast %1520 : vector<14x14xf32> to vector<1x1x14x14xf32>
    tpu.vector_store %arg5[%c0_88, %c12_89, %c0_90, %c0_91], %1523 {strides = array<i32>} : memref<1x16x14x14xf32, #tpu.memory_space<vmem>>, vector<1x1x14x14xf32>,
    %c13_92 = arith.constant 13 : index
    %1524 = memref.load %arg4[%c13_92] : memref<16xf32, #tpu.memory_space<smem>>
    %1525 = vector.broadcast %1524 : f32 to vector<14x14xf32>
    %c351 = arith.constant 351 : index
    %1526 = memref.load %arg3[%c351] : memref<432xf32, #tpu.memory_space<smem>>
    %1527 = vector.broadcast %1526 : f32 to vector<14x14xf32>
    %1528 = arith.mulf %1527, %4 : vector<14x14xf32>
    %1529 = arith.addf %1525, %1528 : vector<14x14xf32>
    %c352 = arith.constant 352 : index
    %1530 = memref.load %arg3[%c352] : memref<432xf32, #tpu.memory_space<smem>>
    %1531 = vector.broadcast %1530 : f32 to vector<14x14xf32>
    %1532 = arith.mulf %1531, %10 : vector<14x14xf32>
    %1533 = arith.addf %1529, %1532 : vector<14x14xf32>
    %c353 = arith.constant 353 : index
    %1534 = memref.load %arg3[%c353] : memref<432xf32, #tpu.memory_space<smem>>
    %1535 = vector.broadcast %1534 : f32 to vector<14x14xf32>
    %1536 = arith.mulf %1535, %16 : vector<14x14xf32>
    %1537 = arith.addf %1533, %1536 : vector<14x14xf32>
    %c354 = arith.constant 354 : index
    %1538 = memref.load %arg3[%c354] : memref<432xf32, #tpu.memory_space<smem>>
    %1539 = vector.broadcast %1538 : f32 to vector<14x14xf32>
    %1540 = arith.mulf %1539, %5 : vector<14x14xf32>
    %1541 = arith.addf %1537, %1540 : vector<14x14xf32>
    %c355 = arith.constant 355 : index
    %1542 = memref.load %arg3[%c355] : memref<432xf32, #tpu.memory_space<smem>>
    %1543 = vector.broadcast %1542 : f32 to vector<14x14xf32>
    %1544 = arith.mulf %1543, %11 : vector<14x14xf32>
    %1545 = arith.addf %1541, %1544 : vector<14x14xf32>
    %c356 = arith.constant 356 : index
    %1546 = memref.load %arg3[%c356] : memref<432xf32, #tpu.memory_space<smem>>
    %1547 = vector.broadcast %1546 : f32 to vector<14x14xf32>
    %1548 = arith.mulf %1547, %17 : vector<14x14xf32>
    %1549 = arith.addf %1545, %1548 : vector<14x14xf32>
    %c357 = arith.constant 357 : index
    %1550 = memref.load %arg3[%c357] : memref<432xf32, #tpu.memory_space<smem>>
    %1551 = vector.broadcast %1550 : f32 to vector<14x14xf32>
    %1552 = arith.mulf %1551, %6 : vector<14x14xf32>
    %1553 = arith.addf %1549, %1552 : vector<14x14xf32>
    %c358 = arith.constant 358 : index
    %1554 = memref.load %arg3[%c358] : memref<432xf32, #tpu.memory_space<smem>>
    %1555 = vector.broadcast %1554 : f32 to vector<14x14xf32>
    %1556 = arith.mulf %1555, %12 : vector<14x14xf32>
    %1557 = arith.addf %1553, %1556 : vector<14x14xf32>
    %c359 = arith.constant 359 : index
    %1558 = memref.load %arg3[%c359] : memref<432xf32, #tpu.memory_space<smem>>
    %1559 = vector.broadcast %1558 : f32 to vector<14x14xf32>
    %1560 = arith.mulf %1559, %18 : vector<14x14xf32>
    %1561 = arith.addf %1557, %1560 : vector<14x14xf32>
    %c360 = arith.constant 360 : index
    %1562 = memref.load %arg3[%c360] : memref<432xf32, #tpu.memory_space<smem>>
    %1563 = vector.broadcast %1562 : f32 to vector<14x14xf32>
    %1564 = arith.mulf %1563, %22 : vector<14x14xf32>
    %1565 = arith.addf %1561, %1564 : vector<14x14xf32>
    %c361 = arith.constant 361 : index
    %1566 = memref.load %arg3[%c361] : memref<432xf32, #tpu.memory_space<smem>>
    %1567 = vector.broadcast %1566 : f32 to vector<14x14xf32>
    %1568 = arith.mulf %1567, %28 : vector<14x14xf32>
    %1569 = arith.addf %1565, %1568 : vector<14x14xf32>
    %c362 = arith.constant 362 : index
    %1570 = memref.load %arg3[%c362] : memref<432xf32, #tpu.memory_space<smem>>
    %1571 = vector.broadcast %1570 : f32 to vector<14x14xf32>
    %1572 = arith.mulf %1571, %34 : vector<14x14xf32>
    %1573 = arith.addf %1569, %1572 : vector<14x14xf32>
    %c363 = arith.constant 363 : index
    %1574 = memref.load %arg3[%c363] : memref<432xf32, #tpu.memory_space<smem>>
    %1575 = vector.broadcast %1574 : f32 to vector<14x14xf32>
    %1576 = arith.mulf %1575, %23 : vector<14x14xf32>
    %1577 = arith.addf %1573, %1576 : vector<14x14xf32>
    %c364 = arith.constant 364 : index
    %1578 = memref.load %arg3[%c364] : memref<432xf32, #tpu.memory_space<smem>>
    %1579 = vector.broadcast %1578 : f32 to vector<14x14xf32>
    %1580 = arith.mulf %1579, %29 : vector<14x14xf32>
    %1581 = arith.addf %1577, %1580 : vector<14x14xf32>
    %c365 = arith.constant 365 : index
    %1582 = memref.load %arg3[%c365] : memref<432xf32, #tpu.memory_space<smem>>
    %1583 = vector.broadcast %1582 : f32 to vector<14x14xf32>
    %1584 = arith.mulf %1583, %35 : vector<14x14xf32>
    %1585 = arith.addf %1581, %1584 : vector<14x14xf32>
    %c366 = arith.constant 366 : index
    %1586 = memref.load %arg3[%c366] : memref<432xf32, #tpu.memory_space<smem>>
    %1587 = vector.broadcast %1586 : f32 to vector<14x14xf32>
    %1588 = arith.mulf %1587, %24 : vector<14x14xf32>
    %1589 = arith.addf %1585, %1588 : vector<14x14xf32>
    %c367 = arith.constant 367 : index
    %1590 = memref.load %arg3[%c367] : memref<432xf32, #tpu.memory_space<smem>>
    %1591 = vector.broadcast %1590 : f32 to vector<14x14xf32>
    %1592 = arith.mulf %1591, %30 : vector<14x14xf32>
    %1593 = arith.addf %1589, %1592 : vector<14x14xf32>
    %c368 = arith.constant 368 : index
    %1594 = memref.load %arg3[%c368] : memref<432xf32, #tpu.memory_space<smem>>
    %1595 = vector.broadcast %1594 : f32 to vector<14x14xf32>
    %1596 = arith.mulf %1595, %36 : vector<14x14xf32>
    %1597 = arith.addf %1593, %1596 : vector<14x14xf32>
    %c369 = arith.constant 369 : index
    %1598 = memref.load %arg3[%c369] : memref<432xf32, #tpu.memory_space<smem>>
    %1599 = vector.broadcast %1598 : f32 to vector<14x14xf32>
    %1600 = arith.mulf %1599, %40 : vector<14x14xf32>
    %1601 = arith.addf %1597, %1600 : vector<14x14xf32>
    %c370 = arith.constant 370 : index
    %1602 = memref.load %arg3[%c370] : memref<432xf32, #tpu.memory_space<smem>>
    %1603 = vector.broadcast %1602 : f32 to vector<14x14xf32>
    %1604 = arith.mulf %1603, %46 : vector<14x14xf32>
    %1605 = arith.addf %1601, %1604 : vector<14x14xf32>
    %c371 = arith.constant 371 : index
    %1606 = memref.load %arg3[%c371] : memref<432xf32, #tpu.memory_space<smem>>
    %1607 = vector.broadcast %1606 : f32 to vector<14x14xf32>
    %1608 = arith.mulf %1607, %52 : vector<14x14xf32>
    %1609 = arith.addf %1605, %1608 : vector<14x14xf32>
    %c372 = arith.constant 372 : index
    %1610 = memref.load %arg3[%c372] : memref<432xf32, #tpu.memory_space<smem>>
    %1611 = vector.broadcast %1610 : f32 to vector<14x14xf32>
    %1612 = arith.mulf %1611, %41 : vector<14x14xf32>
    %1613 = arith.addf %1609, %1612 : vector<14x14xf32>
    %c373 = arith.constant 373 : index
    %1614 = memref.load %arg3[%c373] : memref<432xf32, #tpu.memory_space<smem>>
    %1615 = vector.broadcast %1614 : f32 to vector<14x14xf32>
    %1616 = arith.mulf %1615, %47 : vector<14x14xf32>
    %1617 = arith.addf %1613, %1616 : vector<14x14xf32>
    %c374 = arith.constant 374 : index
    %1618 = memref.load %arg3[%c374] : memref<432xf32, #tpu.memory_space<smem>>
    %1619 = vector.broadcast %1618 : f32 to vector<14x14xf32>
    %1620 = arith.mulf %1619, %53 : vector<14x14xf32>
    %1621 = arith.addf %1617, %1620 : vector<14x14xf32>
    %c375 = arith.constant 375 : index
    %1622 = memref.load %arg3[%c375] : memref<432xf32, #tpu.memory_space<smem>>
    %1623 = vector.broadcast %1622 : f32 to vector<14x14xf32>
    %1624 = arith.mulf %1623, %42 : vector<14x14xf32>
    %1625 = arith.addf %1621, %1624 : vector<14x14xf32>
    %c376 = arith.constant 376 : index
    %1626 = memref.load %arg3[%c376] : memref<432xf32, #tpu.memory_space<smem>>
    %1627 = vector.broadcast %1626 : f32 to vector<14x14xf32>
    %1628 = arith.mulf %1627, %48 : vector<14x14xf32>
    %1629 = arith.addf %1625, %1628 : vector<14x14xf32>
    %c377 = arith.constant 377 : index
    %1630 = memref.load %arg3[%c377] : memref<432xf32, #tpu.memory_space<smem>>
    %1631 = vector.broadcast %1630 : f32 to vector<14x14xf32>
    %1632 = arith.mulf %1631, %54 : vector<14x14xf32>
    %1633 = arith.addf %1629, %1632 : vector<14x14xf32>
    %c0_93 = arith.constant 0 : index
    %c13_94 = arith.constant 13 : index
    %c0_95 = arith.constant 0 : index
    %c0_96 = arith.constant 0 : index
    %1634 = vector.load %arg5[%c0_93, %c13_94, %c0_95, %c0_96] : memref<1x16x14x14xf32, #tpu.memory_space<vmem>>, vector<1x1x14x14xf32>
    %1635 = vector.shape_cast %1634 : vector<1x1x14x14xf32> to vector<14x14xf32>
    %1636 = vector.shape_cast %1633 : vector<14x14xf32> to vector<1x1x14x14xf32>
    tpu.vector_store %arg5[%c0_93, %c13_94, %c0_95, %c0_96], %1636 {strides = array<i32>} : memref<1x16x14x14xf32, #tpu.memory_space<vmem>>, vector<1x1x14x14xf32>,
    %c14_97 = arith.constant 14 : index
    %1637 = memref.load %arg4[%c14_97] : memref<16xf32, #tpu.memory_space<smem>>
    %1638 = vector.broadcast %1637 : f32 to vector<14x14xf32>
    %c378 = arith.constant 378 : index
    %1639 = memref.load %arg3[%c378] : memref<432xf32, #tpu.memory_space<smem>>
    %1640 = vector.broadcast %1639 : f32 to vector<14x14xf32>
    %1641 = arith.mulf %1640, %4 : vector<14x14xf32>
    %1642 = arith.addf %1638, %1641 : vector<14x14xf32>
    %c379 = arith.constant 379 : index
    %1643 = memref.load %arg3[%c379] : memref<432xf32, #tpu.memory_space<smem>>
    %1644 = vector.broadcast %1643 : f32 to vector<14x14xf32>
    %1645 = arith.mulf %1644, %10 : vector<14x14xf32>
    %1646 = arith.addf %1642, %1645 : vector<14x14xf32>
    %c380 = arith.constant 380 : index
    %1647 = memref.load %arg3[%c380] : memref<432xf32, #tpu.memory_space<smem>>
    %1648 = vector.broadcast %1647 : f32 to vector<14x14xf32>
    %1649 = arith.mulf %1648, %16 : vector<14x14xf32>
    %1650 = arith.addf %1646, %1649 : vector<14x14xf32>
    %c381 = arith.constant 381 : index
    %1651 = memref.load %arg3[%c381] : memref<432xf32, #tpu.memory_space<smem>>
    %1652 = vector.broadcast %1651 : f32 to vector<14x14xf32>
    %1653 = arith.mulf %1652, %5 : vector<14x14xf32>
    %1654 = arith.addf %1650, %1653 : vector<14x14xf32>
    %c382 = arith.constant 382 : index
    %1655 = memref.load %arg3[%c382] : memref<432xf32, #tpu.memory_space<smem>>
    %1656 = vector.broadcast %1655 : f32 to vector<14x14xf32>
    %1657 = arith.mulf %1656, %11 : vector<14x14xf32>
    %1658 = arith.addf %1654, %1657 : vector<14x14xf32>
    %c383 = arith.constant 383 : index
    %1659 = memref.load %arg3[%c383] : memref<432xf32, #tpu.memory_space<smem>>
    %1660 = vector.broadcast %1659 : f32 to vector<14x14xf32>
    %1661 = arith.mulf %1660, %17 : vector<14x14xf32>
    %1662 = arith.addf %1658, %1661 : vector<14x14xf32>
    %c384 = arith.constant 384 : index
    %1663 = memref.load %arg3[%c384] : memref<432xf32, #tpu.memory_space<smem>>
    %1664 = vector.broadcast %1663 : f32 to vector<14x14xf32>
    %1665 = arith.mulf %1664, %6 : vector<14x14xf32>
    %1666 = arith.addf %1662, %1665 : vector<14x14xf32>
    %c385 = arith.constant 385 : index
    %1667 = memref.load %arg3[%c385] : memref<432xf32, #tpu.memory_space<smem>>
    %1668 = vector.broadcast %1667 : f32 to vector<14x14xf32>
    %1669 = arith.mulf %1668, %12 : vector<14x14xf32>
    %1670 = arith.addf %1666, %1669 : vector<14x14xf32>
    %c386 = arith.constant 386 : index
    %1671 = memref.load %arg3[%c386] : memref<432xf32, #tpu.memory_space<smem>>
    %1672 = vector.broadcast %1671 : f32 to vector<14x14xf32>
    %1673 = arith.mulf %1672, %18 : vector<14x14xf32>
    %1674 = arith.addf %1670, %1673 : vector<14x14xf32>
    %c387 = arith.constant 387 : index
    %1675 = memref.load %arg3[%c387] : memref<432xf32, #tpu.memory_space<smem>>
    %1676 = vector.broadcast %1675 : f32 to vector<14x14xf32>
    %1677 = arith.mulf %1676, %22 : vector<14x14xf32>
    %1678 = arith.addf %1674, %1677 : vector<14x14xf32>
    %c388 = arith.constant 388 : index
    %1679 = memref.load %arg3[%c388] : memref<432xf32, #tpu.memory_space<smem>>
    %1680 = vector.broadcast %1679 : f32 to vector<14x14xf32>
    %1681 = arith.mulf %1680, %28 : vector<14x14xf32>
    %1682 = arith.addf %1678, %1681 : vector<14x14xf32>
    %c389 = arith.constant 389 : index
    %1683 = memref.load %arg3[%c389] : memref<432xf32, #tpu.memory_space<smem>>
    %1684 = vector.broadcast %1683 : f32 to vector<14x14xf32>
    %1685 = arith.mulf %1684, %34 : vector<14x14xf32>
    %1686 = arith.addf %1682, %1685 : vector<14x14xf32>
    %c390 = arith.constant 390 : index
    %1687 = memref.load %arg3[%c390] : memref<432xf32, #tpu.memory_space<smem>>
    %1688 = vector.broadcast %1687 : f32 to vector<14x14xf32>
    %1689 = arith.mulf %1688, %23 : vector<14x14xf32>
    %1690 = arith.addf %1686, %1689 : vector<14x14xf32>
    %c391 = arith.constant 391 : index
    %1691 = memref.load %arg3[%c391] : memref<432xf32, #tpu.memory_space<smem>>
    %1692 = vector.broadcast %1691 : f32 to vector<14x14xf32>
    %1693 = arith.mulf %1692, %29 : vector<14x14xf32>
    %1694 = arith.addf %1690, %1693 : vector<14x14xf32>
    %c392 = arith.constant 392 : index
    %1695 = memref.load %arg3[%c392] : memref<432xf32, #tpu.memory_space<smem>>
    %1696 = vector.broadcast %1695 : f32 to vector<14x14xf32>
    %1697 = arith.mulf %1696, %35 : vector<14x14xf32>
    %1698 = arith.addf %1694, %1697 : vector<14x14xf32>
    %c393 = arith.constant 393 : index
    %1699 = memref.load %arg3[%c393] : memref<432xf32, #tpu.memory_space<smem>>
    %1700 = vector.broadcast %1699 : f32 to vector<14x14xf32>
    %1701 = arith.mulf %1700, %24 : vector<14x14xf32>
    %1702 = arith.addf %1698, %1701 : vector<14x14xf32>
    %c394 = arith.constant 394 : index
    %1703 = memref.load %arg3[%c394] : memref<432xf32, #tpu.memory_space<smem>>
    %1704 = vector.broadcast %1703 : f32 to vector<14x14xf32>
    %1705 = arith.mulf %1704, %30 : vector<14x14xf32>
    %1706 = arith.addf %1702, %1705 : vector<14x14xf32>
    %c395 = arith.constant 395 : index
    %1707 = memref.load %arg3[%c395] : memref<432xf32, #tpu.memory_space<smem>>
    %1708 = vector.broadcast %1707 : f32 to vector<14x14xf32>
    %1709 = arith.mulf %1708, %36 : vector<14x14xf32>
    %1710 = arith.addf %1706, %1709 : vector<14x14xf32>
    %c396 = arith.constant 396 : index
    %1711 = memref.load %arg3[%c396] : memref<432xf32, #tpu.memory_space<smem>>
    %1712 = vector.broadcast %1711 : f32 to vector<14x14xf32>
    %1713 = arith.mulf %1712, %40 : vector<14x14xf32>
    %1714 = arith.addf %1710, %1713 : vector<14x14xf32>
    %c397 = arith.constant 397 : index
    %1715 = memref.load %arg3[%c397] : memref<432xf32, #tpu.memory_space<smem>>
    %1716 = vector.broadcast %1715 : f32 to vector<14x14xf32>
    %1717 = arith.mulf %1716, %46 : vector<14x14xf32>
    %1718 = arith.addf %1714, %1717 : vector<14x14xf32>
    %c398 = arith.constant 398 : index
    %1719 = memref.load %arg3[%c398] : memref<432xf32, #tpu.memory_space<smem>>
    %1720 = vector.broadcast %1719 : f32 to vector<14x14xf32>
    %1721 = arith.mulf %1720, %52 : vector<14x14xf32>
    %1722 = arith.addf %1718, %1721 : vector<14x14xf32>
    %c399 = arith.constant 399 : index
    %1723 = memref.load %arg3[%c399] : memref<432xf32, #tpu.memory_space<smem>>
    %1724 = vector.broadcast %1723 : f32 to vector<14x14xf32>
    %1725 = arith.mulf %1724, %41 : vector<14x14xf32>
    %1726 = arith.addf %1722, %1725 : vector<14x14xf32>
    %c400 = arith.constant 400 : index
    %1727 = memref.load %arg3[%c400] : memref<432xf32, #tpu.memory_space<smem>>
    %1728 = vector.broadcast %1727 : f32 to vector<14x14xf32>
    %1729 = arith.mulf %1728, %47 : vector<14x14xf32>
    %1730 = arith.addf %1726, %1729 : vector<14x14xf32>
    %c401 = arith.constant 401 : index
    %1731 = memref.load %arg3[%c401] : memref<432xf32, #tpu.memory_space<smem>>
    %1732 = vector.broadcast %1731 : f32 to vector<14x14xf32>
    %1733 = arith.mulf %1732, %53 : vector<14x14xf32>
    %1734 = arith.addf %1730, %1733 : vector<14x14xf32>
    %c402 = arith.constant 402 : index
    %1735 = memref.load %arg3[%c402] : memref<432xf32, #tpu.memory_space<smem>>
    %1736 = vector.broadcast %1735 : f32 to vector<14x14xf32>
    %1737 = arith.mulf %1736, %42 : vector<14x14xf32>
    %1738 = arith.addf %1734, %1737 : vector<14x14xf32>
    %c403 = arith.constant 403 : index
    %1739 = memref.load %arg3[%c403] : memref<432xf32, #tpu.memory_space<smem>>
    %1740 = vector.broadcast %1739 : f32 to vector<14x14xf32>
    %1741 = arith.mulf %1740, %48 : vector<14x14xf32>
    %1742 = arith.addf %1738, %1741 : vector<14x14xf32>
    %c404 = arith.constant 404 : index
    %1743 = memref.load %arg3[%c404] : memref<432xf32, #tpu.memory_space<smem>>
    %1744 = vector.broadcast %1743 : f32 to vector<14x14xf32>
    %1745 = arith.mulf %1744, %54 : vector<14x14xf32>
    %1746 = arith.addf %1742, %1745 : vector<14x14xf32>
    %c0_98 = arith.constant 0 : index
    %c14_99 = arith.constant 14 : index
    %c0_100 = arith.constant 0 : index
    %c0_101 = arith.constant 0 : index
    %1747 = vector.load %arg5[%c0_98, %c14_99, %c0_100, %c0_101] : memref<1x16x14x14xf32, #tpu.memory_space<vmem>>, vector<1x1x14x14xf32>
    %1748 = vector.shape_cast %1747 : vector<1x1x14x14xf32> to vector<14x14xf32>
    %1749 = vector.shape_cast %1746 : vector<14x14xf32> to vector<1x1x14x14xf32>
    tpu.vector_store %arg5[%c0_98, %c14_99, %c0_100, %c0_101], %1749 {strides = array<i32>} : memref<1x16x14x14xf32, #tpu.memory_space<vmem>>, vector<1x1x14x14xf32>,
    %c15_102 = arith.constant 15 : index
    %1750 = memref.load %arg4[%c15_102] : memref<16xf32, #tpu.memory_space<smem>>
    %1751 = vector.broadcast %1750 : f32 to vector<14x14xf32>
    %c405 = arith.constant 405 : index
    %1752 = memref.load %arg3[%c405] : memref<432xf32, #tpu.memory_space<smem>>
    %1753 = vector.broadcast %1752 : f32 to vector<14x14xf32>
    %1754 = arith.mulf %1753, %4 : vector<14x14xf32>
    %1755 = arith.addf %1751, %1754 : vector<14x14xf32>
    %c406 = arith.constant 406 : index
    %1756 = memref.load %arg3[%c406] : memref<432xf32, #tpu.memory_space<smem>>
    %1757 = vector.broadcast %1756 : f32 to vector<14x14xf32>
    %1758 = arith.mulf %1757, %10 : vector<14x14xf32>
    %1759 = arith.addf %1755, %1758 : vector<14x14xf32>
    %c407 = arith.constant 407 : index
    %1760 = memref.load %arg3[%c407] : memref<432xf32, #tpu.memory_space<smem>>
    %1761 = vector.broadcast %1760 : f32 to vector<14x14xf32>
    %1762 = arith.mulf %1761, %16 : vector<14x14xf32>
    %1763 = arith.addf %1759, %1762 : vector<14x14xf32>
    %c408 = arith.constant 408 : index
    %1764 = memref.load %arg3[%c408] : memref<432xf32, #tpu.memory_space<smem>>
    %1765 = vector.broadcast %1764 : f32 to vector<14x14xf32>
    %1766 = arith.mulf %1765, %5 : vector<14x14xf32>
    %1767 = arith.addf %1763, %1766 : vector<14x14xf32>
    %c409 = arith.constant 409 : index
    %1768 = memref.load %arg3[%c409] : memref<432xf32, #tpu.memory_space<smem>>
    %1769 = vector.broadcast %1768 : f32 to vector<14x14xf32>
    %1770 = arith.mulf %1769, %11 : vector<14x14xf32>
    %1771 = arith.addf %1767, %1770 : vector<14x14xf32>
    %c410 = arith.constant 410 : index
    %1772 = memref.load %arg3[%c410] : memref<432xf32, #tpu.memory_space<smem>>
    %1773 = vector.broadcast %1772 : f32 to vector<14x14xf32>
    %1774 = arith.mulf %1773, %17 : vector<14x14xf32>
    %1775 = arith.addf %1771, %1774 : vector<14x14xf32>
    %c411 = arith.constant 411 : index
    %1776 = memref.load %arg3[%c411] : memref<432xf32, #tpu.memory_space<smem>>
    %1777 = vector.broadcast %1776 : f32 to vector<14x14xf32>
    %1778 = arith.mulf %1777, %6 : vector<14x14xf32>
    %1779 = arith.addf %1775, %1778 : vector<14x14xf32>
    %c412 = arith.constant 412 : index
    %1780 = memref.load %arg3[%c412] : memref<432xf32, #tpu.memory_space<smem>>
    %1781 = vector.broadcast %1780 : f32 to vector<14x14xf32>
    %1782 = arith.mulf %1781, %12 : vector<14x14xf32>
    %1783 = arith.addf %1779, %1782 : vector<14x14xf32>
    %c413 = arith.constant 413 : index
    %1784 = memref.load %arg3[%c413] : memref<432xf32, #tpu.memory_space<smem>>
    %1785 = vector.broadcast %1784 : f32 to vector<14x14xf32>
    %1786 = arith.mulf %1785, %18 : vector<14x14xf32>
    %1787 = arith.addf %1783, %1786 : vector<14x14xf32>
    %c414 = arith.constant 414 : index
    %1788 = memref.load %arg3[%c414] : memref<432xf32, #tpu.memory_space<smem>>
    %1789 = vector.broadcast %1788 : f32 to vector<14x14xf32>
    %1790 = arith.mulf %1789, %22 : vector<14x14xf32>
    %1791 = arith.addf %1787, %1790 : vector<14x14xf32>
    %c415 = arith.constant 415 : index
    %1792 = memref.load %arg3[%c415] : memref<432xf32, #tpu.memory_space<smem>>
    %1793 = vector.broadcast %1792 : f32 to vector<14x14xf32>
    %1794 = arith.mulf %1793, %28 : vector<14x14xf32>
    %1795 = arith.addf %1791, %1794 : vector<14x14xf32>
    %c416 = arith.constant 416 : index
    %1796 = memref.load %arg3[%c416] : memref<432xf32, #tpu.memory_space<smem>>
    %1797 = vector.broadcast %1796 : f32 to vector<14x14xf32>
    %1798 = arith.mulf %1797, %34 : vector<14x14xf32>
    %1799 = arith.addf %1795, %1798 : vector<14x14xf32>
    %c417 = arith.constant 417 : index
    %1800 = memref.load %arg3[%c417] : memref<432xf32, #tpu.memory_space<smem>>
    %1801 = vector.broadcast %1800 : f32 to vector<14x14xf32>
    %1802 = arith.mulf %1801, %23 : vector<14x14xf32>
    %1803 = arith.addf %1799, %1802 : vector<14x14xf32>
    %c418 = arith.constant 418 : index
    %1804 = memref.load %arg3[%c418] : memref<432xf32, #tpu.memory_space<smem>>
    %1805 = vector.broadcast %1804 : f32 to vector<14x14xf32>
    %1806 = arith.mulf %1805, %29 : vector<14x14xf32>
    %1807 = arith.addf %1803, %1806 : vector<14x14xf32>
    %c419 = arith.constant 419 : index
    %1808 = memref.load %arg3[%c419] : memref<432xf32, #tpu.memory_space<smem>>
    %1809 = vector.broadcast %1808 : f32 to vector<14x14xf32>
    %1810 = arith.mulf %1809, %35 : vector<14x14xf32>
    %1811 = arith.addf %1807, %1810 : vector<14x14xf32>
    %c420 = arith.constant 420 : index
    %1812 = memref.load %arg3[%c420] : memref<432xf32, #tpu.memory_space<smem>>
    %1813 = vector.broadcast %1812 : f32 to vector<14x14xf32>
    %1814 = arith.mulf %1813, %24 : vector<14x14xf32>
    %1815 = arith.addf %1811, %1814 : vector<14x14xf32>
    %c421 = arith.constant 421 : index
    %1816 = memref.load %arg3[%c421] : memref<432xf32, #tpu.memory_space<smem>>
    %1817 = vector.broadcast %1816 : f32 to vector<14x14xf32>
    %1818 = arith.mulf %1817, %30 : vector<14x14xf32>
    %1819 = arith.addf %1815, %1818 : vector<14x14xf32>
    %c422 = arith.constant 422 : index
    %1820 = memref.load %arg3[%c422] : memref<432xf32, #tpu.memory_space<smem>>
    %1821 = vector.broadcast %1820 : f32 to vector<14x14xf32>
    %1822 = arith.mulf %1821, %36 : vector<14x14xf32>
    %1823 = arith.addf %1819, %1822 : vector<14x14xf32>
    %c423 = arith.constant 423 : index
    %1824 = memref.load %arg3[%c423] : memref<432xf32, #tpu.memory_space<smem>>
    %1825 = vector.broadcast %1824 : f32 to vector<14x14xf32>
    %1826 = arith.mulf %1825, %40 : vector<14x14xf32>
    %1827 = arith.addf %1823, %1826 : vector<14x14xf32>
    %c424 = arith.constant 424 : index
    %1828 = memref.load %arg3[%c424] : memref<432xf32, #tpu.memory_space<smem>>
    %1829 = vector.broadcast %1828 : f32 to vector<14x14xf32>
    %1830 = arith.mulf %1829, %46 : vector<14x14xf32>
    %1831 = arith.addf %1827, %1830 : vector<14x14xf32>
    %c425 = arith.constant 425 : index
    %1832 = memref.load %arg3[%c425] : memref<432xf32, #tpu.memory_space<smem>>
    %1833 = vector.broadcast %1832 : f32 to vector<14x14xf32>
    %1834 = arith.mulf %1833, %52 : vector<14x14xf32>
    %1835 = arith.addf %1831, %1834 : vector<14x14xf32>
    %c426 = arith.constant 426 : index
    %1836 = memref.load %arg3[%c426] : memref<432xf32, #tpu.memory_space<smem>>
    %1837 = vector.broadcast %1836 : f32 to vector<14x14xf32>
    %1838 = arith.mulf %1837, %41 : vector<14x14xf32>
    %1839 = arith.addf %1835, %1838 : vector<14x14xf32>
    %c427 = arith.constant 427 : index
    %1840 = memref.load %arg3[%c427] : memref<432xf32, #tpu.memory_space<smem>>
    %1841 = vector.broadcast %1840 : f32 to vector<14x14xf32>
    %1842 = arith.mulf %1841, %47 : vector<14x14xf32>
    %1843 = arith.addf %1839, %1842 : vector<14x14xf32>
    %c428 = arith.constant 428 : index
    %1844 = memref.load %arg3[%c428] : memref<432xf32, #tpu.memory_space<smem>>
    %1845 = vector.broadcast %1844 : f32 to vector<14x14xf32>
    %1846 = arith.mulf %1845, %53 : vector<14x14xf32>
    %1847 = arith.addf %1843, %1846 : vector<14x14xf32>
    %c429 = arith.constant 429 : index
    %1848 = memref.load %arg3[%c429] : memref<432xf32, #tpu.memory_space<smem>>
    %1849 = vector.broadcast %1848 : f32 to vector<14x14xf32>
    %1850 = arith.mulf %1849, %42 : vector<14x14xf32>
    %1851 = arith.addf %1847, %1850 : vector<14x14xf32>
    %c430 = arith.constant 430 : index
    %1852 = memref.load %arg3[%c430] : memref<432xf32, #tpu.memory_space<smem>>
    %1853 = vector.broadcast %1852 : f32 to vector<14x14xf32>
    %1854 = arith.mulf %1853, %48 : vector<14x14xf32>
    %1855 = arith.addf %1851, %1854 : vector<14x14xf32>
    %c431 = arith.constant 431 : index
    %1856 = memref.load %arg3[%c431] : memref<432xf32, #tpu.memory_space<smem>>
    %1857 = vector.broadcast %1856 : f32 to vector<14x14xf32>
    %1858 = arith.mulf %1857, %54 : vector<14x14xf32>
    %1859 = arith.addf %1855, %1858 : vector<14x14xf32>
    %c0_103 = arith.constant 0 : index
    %c15_104 = arith.constant 15 : index
    %c0_105 = arith.constant 0 : index
    %c0_106 = arith.constant 0 : index
    %1860 = vector.load %arg5[%c0_103, %c15_104, %c0_105, %c0_106] : memref<1x16x14x14xf32, #tpu.memory_space<vmem>>, vector<1x1x14x14xf32>
    %1861 = vector.shape_cast %1860 : vector<1x1x14x14xf32> to vector<14x14xf32>
    %1862 = vector.shape_cast %1859 : vector<14x14xf32> to vector<1x1x14x14xf32>
    tpu.vector_store %arg5[%c0_103, %c15_104, %c0_105, %c0_106], %1862 {strides = array<i32>} : memref<1x16x14x14xf32, #tpu.memory_space<vmem>>, vector<1x1x14x14xf32>,
    return
  }
  func.func @transform_0(%arg0: i32, %arg1: i32) -> (i32, i32, i32, i32) {
    %c0_i32 = arith.constant 0 : i32
    %c0_i32_0 = arith.constant 0 : i32
    %c0_i32_1 = arith.constant 0 : i32
    %c0_i32_2 = arith.constant 0 : i32
    return %arg0, %c0_i32, %c0_i32_0, %c0_i32_1 : i32, i32, i32, i32
  }
  func.func @transform_1(%arg0: i32, %arg1: i32) -> i32 {
    %c0_i32 = arith.constant 0 : i32
    %c0_i32_0 = arith.constant 0 : i32
    return %c0_i32 : i32
  }
  func.func @transform_2(%arg0: i32, %arg1: i32) -> i32 {
    %c0_i32 = arith.constant 0 : i32
    %c0_i32_0 = arith.constant 0 : i32
    return %c0_i32 : i32
  }
  func.func @transform_3(%arg0: i32, %arg1: i32) -> (i32, i32, i32, i32) {
    %c0_i32 = arith.constant 0 : i32
    %c0_i32_0 = arith.constant 0 : i32
    %c0_i32_1 = arith.constant 0 : i32
    return %arg0, %c0_i32, %arg1, %c0_i32_0 : i32, i32, i32, i32
  }
}

</mosaic_0001>

<bundles_post_ra>
// kernel: tpu_custom_call.1
= control target key start
LH: loop header
LB: loop body
LE: loop exit
PB: predicated region body
PF: predicated region fallthrough
CT: control target
= control target key end

     0   :  { %8 = vsyncpa [#allocation3], 0  ;;  %s10762_s0 = inlined_call_operand.hbm [shape: f32[2,3,16,16], index: 0, kind: input, shape index: {}]   ;;  %s10763_s1 = inlined_call_operand.hbm [shape: f32[432], index: 1, kind: input, shape index: {}]   ;;  %s10764_s2 = inlined_call_operand.vmem [shape: f32[16], index: 2, kind: input, shape index: {}]   ;;  %s10765_s3 = inlined_call_operand.vmem [shape: f32[2,16,14,14], index: 3, kind: output, shape index: {}]  }
   0x1   :  { %10 = vsyncpa [#allocation3 + $0x1], 0 }
   0x2   :  { %11 = vsyncpa [#allocation4], 0 }
   0x3   :  { %12 = vsyncpa [#allocation5], 0  ;;  %s7363_s12 = smov 0   ;;  %s7365_s13 = smov 0  }
   0x4   :  { %s7367_s14 = smov 0   ;;  %s7369_s15 = smov 0  }
   0x5   :  { %s7371_s16 = smov 0   ;;  %s7373_s17 = smov 0  }
   0x6 LB: > { %s6602_s18 = sadd.s32 4294967295, %s7334_s17   ;;  %s37_s19 = sadd.s32 1, %s7322_s14  ;;  %s7334_s17 = sphi %s7373_s17, %s18_s17   ;;  %s7330_s16 = sphi %s7371_s16, %s10775_s16   ;;  %s7326_s15 = sphi %s7369_s15, %s10774_s15   ;;  %s7322_s14 = sphi %s7367_s14, %s10773_s14   ;;  %s7318_s13 = sphi %s7365_s13, %s10772_s13   ;;  %s7314_s12 = sphi %s7363_s12, %s10771_s12  }
   0x7   : > { %p44_p0 = scmp.ne.s32.totalorder %s7322_s14, %s7318_s13  ;;  %p45_p1 = scmp.eq.s32.totalorder %s7334_s17, 0 }
   0x8   : > { %p50_p2 = scmp.ne.s32.totalorder %s7318_s13, %s7314_s12  ;;  %p7397_p3 = scmp.eq.s32.totalorder %s6602_s18, 0 }
   0x9   : > { %p46_p4 = por %p45_p1, %p44_p0  ;;  %p6604_p5 = scmp.ge.s32.totalorder %s7334_s17, 1 }
   0xa   : > { %p7404_p6 = por %p7397_p3, %p50_p2  ;;  %p131_p7 = scmp.lt.s32.totalorder %s7334_s17, 3 }
   0xb   : > { %p7123_p9 = scmp.lt.s32.totalorder %s7334_s17, 2  ;;  %s153_s25 = sshll.u32 %s10764_s2, 4  ;;  %s154_s25 = int_to_ptr.vmem [resolvable:$true] %s153_s25 }
   0xc   : > { %p7409_p8 = pnand %p6604_p5, %p131_p7  ;;  %s30_s28 = sadd.s32 1, %s7330_s16 }
   0xd   : > { %p7419_p11 = pnand %p7123_p9, %p46_p4  ;;  %s7336_s29 = smov [#allocation6]  }
   0xe   : > { %p7110_p10 = pneg %p7409_p8  ;;  %s7233_s5 = scalar_lea.vmem %s154_s25, 16 }
   0xf   : > { %p7234_p13 = scmp.ne.s32.totalorder %s154_s25, %s7233_s5  ;;  %p7241_p4 = scmp.lt.s32.totalorder %s154_s25, %s154_s25 }
  0x10   : > { %p7425_p12 = pnand %p7110_p10, %p7397_p3  ;;  %p7242_p5 = scmp.lt.s32.totalorder %s7233_s5, %s7233_s5 }
  0x12   : > { %7113 = dma.hbm_to_smem (!%p7425_p12), %s10763_s1, 64, %s7336_s29, [#allocation4]  }
  0x13   : > { %p7235_p0 = pneg %p7425_p12  ;;  %p7243_p7 = por %p7242_p5, %p7241_p4 }
  0x15   : > { %p7236_p1 = pnand %p7235_p0, %p7234_p13 }
  0x17   : > { %p7237_p2 = pneg %p7236_p1 }
  0x19   : > { %p7244_p9 = pnand %p7243_p7, %p7237_p2 }
  0x1b   : > { %7247 = shalt.err (!%p7244_p9)
}
  0x1c   : > { %s7337_s6 = smov [#allocation7]   ;;  %p32_p10 = scmp.ge.s32.totalorder %s30_s28, 2 }
  0x1d   : > { %7116 = dma.vmem_to_smem (!%p7425_p12), %s154_s25, 16, %s7337_s6, [#allocation5]  }
  0x1e   : > { %s164_s7 = sand.u32 1, %s7322_s14   ;;  %s10777_s28 = smov (%p32_p10, %s30_s28), 0 }
  0x1f   : > { %s7097_s8 = smul.u32 48, %s164_s7  ;;  %s34_s10 = ssub.s32 %s7330_s16, %s10777_s28 }
  0x20   : > { %s7098_s9 = smul.u32 768, %s7330_s16  ;;  %p35_p13 = scmp.eq.s32.totalorder %s34_s10, 0 }
  0x21   : > { %s168_s11 = scalar_lea.vmem [#allocation2], %s7097_s8  ;;  %s165_s25 = scalar_lea.sflag [#allocation3], %s164_s7 }
  0x22   : > { %s175_s12 = sshll.u32 %s168_s11, 4  ;;  %s174_s24 = scalar_lea.hbm %s10762_s0, %s7098_s9  ;;  %s176_s12 = int_to_ptr.vmem [resolvable:$true] %s175_s12 }
  0x23   : > { %s7451_s27 = scalar_select %p35_p13, %s7322_s14, %s37_s19  }
  0x24   : > { %p7250_p12 = pneg %p7419_p11  ;;  %s7261_s29 = scalar_lea.vmem %s176_s12, 768 }
  0x25   : > { %p7262_p0 = scmp.ne.s32.totalorder %s176_s12, %s7261_s29  ;;  %s7338_s30 = smov [#allocation2]  }
  0x26   : > { %s7266_s4 = sshll.u32 %s7338_s30, 4  ;;  %s7267_s4 = int_to_ptr.vmem [resolvable:$false] %s7266_s4 }
  0x27   : > { %p7264_p1 = pnand %p7262_p0, %p7250_p12  ;;  %s7268_s5 = scalar_lea.vmem %s7267_s4, 1536 }
  0x28   : > { %p7269_p4 = scmp.lt.s32.totalorder %s176_s12, %s7267_s4  ;;  %p7270_p5 = scmp.lt.s32.totalorder %s7268_s5, %s7261_s29 }
  0x29   : > { %p7265_p2 = pneg %p7264_p1 }
  0x2a   : > { %p7271_p7 = por %p7270_p5, %p7269_p4 }
  0x2c   : > { %p7272_p9 = pnand %p7271_p7, %p7265_p2 }
  0x2e   : > { %7275 = shalt.err (!%p7272_p9)
}
  0x2f   : > { %s7339_s6 = smov 128   ;;  %s7340_s19 = smov 8  }
  0x30   : > { %7120 = dma.hbm_to_vmem [thread:$0]  (!%p7419_p11), %s174_s24, 768, %s176_s12, %s165_s25, %s7339_s6, %s7339_s6, %s7340_s19  }
  0x31   : > { %187 = sbr.rel (%p7409_p8) target bundleno = 1337 (0x539), region = 32  ;;  %s189_s7 = sand.u32 (!%p7409_p8), 1, %s7318_s13  }
  0x32   : > { %s7099_s8 = smul.u32 (!%p7409_p8), 48, %s189_s7  ;;  %s190_s9 = scalar_lea.sflag (!%p7409_p8), [#allocation3], %s189_s7 }
  0x34   : > { %s7460_s10 = scalar_lea.vmem (!%p7409_p8), [#allocation2], %s7099_s8 }
  0x36   : > { %7301 = dma.done.wait (%p7404_p6), %s190_s9, 768  }
  0x37   : > { %7303 = vsyncadd (%p7404_p6), %s190_s9, 4294966528 }
  0x38   : > { %7305 = dma.done.wait (%p7397_p3), [#allocation4], 64  }
  0x39   : > { %7307 = vsyncadd (%p7397_p3), [#allocation4], 4294967232 }
  0x3a   : > { %7309 = dma.done.wait (%p7397_p3), [#allocation5], 16  }
  0x3b   : > { %7311 = vsyncadd (%p7397_p3), [#allocation5], 4294967280 }
  0x3c   : > { %206 = sfence }
  0x3d   : > { %s6619_s22 = sld [smem:[#allocation6 + $0x2]]  ;;  %v7475_v0 = vld [vmem:[%s7460_s10] sm:$0xff]  ;;  %v7478_v1 = vld [vmem:[%s7460_s10 + $0x8] sm:$0xff]  ;;  %s7341_s18 = smov 126   ;;  %vm293_vm0 = vcmask 1046528   ;;  %vm341_vm1 = vcmask 1045504  }
  0x3e   : > { %s6618_s26 = sld [smem:[#allocation6 + $0x1]]  ;;  %s7342_s23 = smov 127   ;;  %v7509_v31 = vld [vmem:[%s7460_s10 + $0x18] sm:$0xff]  ;;  %v7513_v34 = vld [vmem:[%s7460_s10 + $0x10] sm:$0xff]  ;;  %v7543_v63 = vld [vmem:[%s7460_s10 + $0x28] sm:$0xff]  ;;  %vm641_vm2 = vcmask 111616  }
  0x3f   : > { %s6621_s11 = sld [smem:[#allocation6 + $0x4]]  ;;  %p230_p3 = scmp.lt.s32.totalorder %s7326_s15, 1  ;;  %vm639_vm3 = vcmask 113664  }
  0x40   : > { %s6622_s21 = sld [smem:[#allocation6 + $0x5]] }
  0x41   : > { %s6624_s12 = sld [smem:[#allocation6 + $0x7]]  ;;  %s10779_s15 = smov (!%p230_p3, %s7326_s15), 1 }
  0x42   : > { %s7482_s20 = sld [smem:[#allocation6 + $0x8]] }
  0x43   : > { %v274_v2 = vstv %s6619_s22  ;;  %s6627_s24 = sld [smem:[#allocation6 + $0xa]] }
  0x44   : > { %v275_v3 = vmul.f32 %v274_v2, %v7475_v0  ;;  %v260_v4 = vstv %s6618_s26  ;;  %v276_v7 = vmul.f32 %v274_v2, %v7478_v1  ;;  %s6630_s25 = sld [smem:[#allocation6 + $0xd]] }
  0x45   : > { %v261_v5 = vmul.f32 %v260_v4, %v7475_v0  ;;  %v302_v6 = vstv %s6621_s11  ;;  %v262_v11 = vmul.f32 %v260_v4, %v7478_v1  ;;  %s6628_s29 = sld [smem:[#allocation6 + $0xb]]  ;;  %v7547_v4 = vld [vmem:[%s7460_s10 + $0x20] sm:$0xff] }
  0x46   : > { %279 = vrot.lane.b32.xlu1 %v275_v3, %s7341_s18  ;;  %v303_v8 = vmul.f32 %v302_v6, %v7475_v0  ;;  %v304_v9 = vmul.f32 %v302_v6, %v7478_v1  ;;  %v319_v10 = vstv %s6622_s21  ;;  %s6631_s30 = sld [smem:[#allocation6 + $0xe]] }
  0x47   : > { %265 = vrot.lane.b32.xlu0 %v261_v5, %s7342_s23  ;;  %v320_v12 = vmul.f32 %v319_v10, %v7475_v0  ;;  %v321_v15 = vmul.f32 %v319_v10, %v7478_v1  ;;  %v350_v16 = vstv %s6624_s12  ;;  %s6633_s4 = sld [smem:[#allocation6 + $0x10]] }
  0x48   : > { %v308_v13 = vrot.slane %v304_v9, 1  ;;  %v307_v14 = vrot.slane %v303_v8, 1  ;;  %v352_v17 = vmul.f32 %v350_v16, %v7478_v1  ;;  %v351_v21 = vmul.f32 %v350_v16, %v7475_v0  ;;  %s6634_s5 = sld [smem:[#allocation6 + $0x11]] }
  0x49   : > { %v325_v19 = vrot.slane %v321_v15, 1  ;;  %v324_v20 = vrot.slane %v320_v12, 1  ;;  %v367_v22 = vstv %s7482_s20  ;;  %v390_v32 = vstv %s6627_s24  ;;  %s6636_s6 = sld [smem:[#allocation6 + $0x13]] }
  0x4a   : > { %281 = vrot.lane.b32.xlu1 %v276_v7, %s7341_s18  ;;  %v309_v18 = vsel %vm293_vm0, %v307_v14, %v308_v13  ;;  %v356_v23 = vrot.slane %v352_v17, 2  ;;  %v355_v25 = vrot.slane %v351_v21, 2  ;;  %v368_v26 = vmul.f32 %v367_v22, %v7475_v0  ;;  %s6639_s19 = sld [smem:[#allocation6 + $0x16]] }
  0x4b   : > { %267 = vrot.lane.b32.xlu0 %v262_v11, %s7342_s23  ;;  %v326_v24 = vsel %vm293_vm0, %v324_v20, %v325_v19  ;;  %v369_v27 = vmul.f32 %v367_v22, %v7478_v1  ;;  %v431_v35 = vstv %s6630_s25  ;;  %v392_v36 = vmul.f32 %v7509_v31, %v390_v32  ;;  %s6637_s7 = sld [smem:[#allocation6 + $0x14]] }
  0x4c   : > { %v357_v28 = vsel %vm341_vm1, %v355_v25, %v356_v23  ;;  %v372_v30 = vrot.slane %v368_v26, 2  ;;  %v391_v37 = vmul.f32 %v7513_v34, %v390_v32  ;;  %v404_v38 = vstv %s6628_s29  ;;  %s6640_s8 = sld [smem:[#allocation6 + $0x17]] }
  0x4d   : > { %v373_v29 = vrot.slane %v369_v27, 2  ;;  %v432_v39 = vmul.f32 %v7513_v34, %v431_v35  ;;  %v433_v40 = vmul.f32 %v7509_v31, %v431_v35  ;;  %v448_v41 = vstv %s6631_s30  ;;  %s6642_s9 = sld [smem:[#allocation6 + $0x19]] }
  0x4e   : > { %312 = vrot.lane.b32.xlu1 %v308_v13, %s7342_s23  ;;  %v406_v42 = vmul.f32 %v7509_v31, %v404_v38  ;;  %v405_v43 = vmul.f32 %v7513_v34, %v404_v38  ;;  %v478_v44 = vstv %s6633_s4  ;;  %v449_v47 = vmul.f32 %v7513_v34, %v448_v41  ;;  %s6643_s22 = sld [smem:[#allocation6 + $0x1a]] }
  0x4f   : > { %310 = vrot.lane.b32.xlu0 %v309_v18, %s7342_s23  ;;  %v374_v33 = vsel %vm341_vm1, %v372_v30, %v373_v29  ;;  %v437_v45 = vrot.slane %v433_v40, 1  ;;  %v436_v46 = vrot.slane %v432_v39, 1  ;;  %v450_v48 = vmul.f32 %v7509_v31, %v448_v41  ;;  %s6646_s26 = sld [smem:[#allocation6 + $0x1c]] }
  0x50   : > { %v479_v49 = vmul.f32 %v7513_v34, %v478_v44  ;;  %v495_v50 = vstv %s6634_s5  ;;  %v453_v53 = vrot.slane %v449_v47, 1  ;;  %v480_v54 = vmul.f32 %v7509_v31, %v478_v44  ;;  %s6649_s11 = sld [smem:[#allocation6 + $0x1f]] }
  0x51   : > { %v438_v51 = vsel %vm293_vm0, %v436_v46, %v437_v45  ;;  %v454_v52 = vrot.slane %v450_v48, 1  ;;  %v496_v55 = vmul.f32 %v7513_v34, %v495_v50  ;;  %v497_v59 = vmul.f32 %v7509_v31, %v495_v50  ;;  %s6647_s21 = sld [smem:[#allocation6 + $0x1d]] }
  0x52   : > { %329 = vrot.lane.b32.xlu1 %v325_v19, %s7341_s18  ;;  %v484_v57 = vrot.slane %v480_v54, 2  ;;  %v483_v58 = vrot.slane %v479_v49, 2  ;;  %v518_v2 = vstv %s6636_s6  ;;  %v559_v5 = vstv %s6639_s19  ;;  %s6650_s12 = sld [smem:[#allocation6 + $0x20]] }
  0x53   : > { %327 = vrot.lane.b32.xlu0 %v326_v24, %s7341_s18  ;;  %v455_v56 = vsel %vm293_vm0, %v453_v53, %v454_v52  ;;  %v501_v61 = vrot.slane %v497_v59, 2  ;;  %v500_v62 = vrot.slane %v496_v55, 2  ;;  %v520_v6 = vmul.f32 %v7543_v63, %v518_v2  ;;  %s6652_s20 = sld [smem:[#allocation6 + $0x22]] }
  0x54   : > { %v485_v60 = vsel %vm341_vm1, %v483_v58, %v484_v57  ;;  %v519_v7 = vmul.f32 %v7547_v4, %v518_v2  ;;  %v532_v8 = vstv %s6637_s7  ;;  %v560_v9 = vmul.f32 %v7547_v4, %v559_v5  ;;  %s6653_s24 = sld [smem:[#allocation6 + $0x23]] }
  0x55   : > { %v502_v3 = vsel %vm341_vm1, %v500_v62, %v501_v61  ;;  %v561_v10 = vmul.f32 %v7543_v63, %v559_v5  ;;  %v576_v11 = vstv %s6640_s8  ;;  %v534_v12 = vmul.f32 %v7543_v63, %v532_v8  ;;  %s6655_s25 = sld [smem:[#allocation6 + $0x25]] }
  0x56   : > { %360 = vrot.lane.b32.xlu1 %v356_v23, %s7342_s23  ;;  %v533_v13 = vmul.f32 %v7547_v4, %v532_v8  ;;  %v577_v14 = vmul.f32 %v7547_v4, %v576_v11  ;;  %v564_v16 = vrot.slane %v560_v9, 1  ;;  %v578_v17 = vmul.f32 %v7543_v63, %v576_v11  ;;  %s6658_s29 = sld [smem:[#allocation6 + $0x28]] }
  0x57   : > { %358 = vrot.lane.b32.xlu0 %v357_v28, %s7342_s23  ;;  %v565_v15 = vrot.slane %v561_v10, 1  ;;  %v606_v18 = vstv %s6642_s9  ;;  %v623_v24 = vstv %s6643_s22  ;;  %v652_v35 = vstv %s6646_s26  ;;  %s6656_s30 = sld [smem:[#allocation6 + $0x26]] }
  0x58   : > { %v607_v19 = vmul.f32 %v7547_v4, %v606_v18  ;;  %v608_v20 = vmul.f32 %v7543_v63, %v606_v18  ;;  %v582_v22 = vrot.slane %v578_v17, 1  ;;  %v581_v23 = vrot.slane %v577_v14, 1  ;;  %s6659_s4 = sld [smem:[#allocation6 + $0x29]] }
  0x59   : > { %v566_v21 = vsel %vm293_vm0, %v564_v16, %v565_v15  ;;  %v624_v25 = vmul.f32 %v7547_v4, %v623_v24  ;;  %v654_v38 = vmul.f32 %v652_v35, %v7478_v1  ;;  %v653_v39 = vmul.f32 %v652_v35, %v7475_v0  ;;  %s6661_s5 = sld [smem:[#allocation6 + $0x2b]] }
  0x5a   : > { %377 = vrot.lane.b32.xlu1 %v373_v29, %s7341_s18  ;;  %v583_v26 = vsel %vm293_vm0, %v581_v23, %v582_v22  ;;  %v612_v27 = vrot.slane %v608_v20, 2  ;;  %v611_v28 = vrot.slane %v607_v19, 2  ;;  %v625_v29 = vmul.f32 %v7543_v63, %v623_v24  ;;  %s6662_s6 = sld [smem:[#allocation6 + $0x2c]] }
  0x5b   : > { %375 = vrot.lane.b32.xlu0 %v374_v33, %s7341_s18  ;;  %v628_v33 = vrot.slane %v624_v25, 2  ;;  %v666_v40 = vstv %s6647_s21  ;;  %v740_v50 = vstv %s6652_s20  ;;  %v780_v5 = vstv %s6655_s25  ;;  %s7617_s19 = sld [smem:[#allocation6]] }
  0x5c   : > { %v613_v30 = vsel %vm341_vm1, %v611_v28, %v612_v27  ;;  %v629_v32 = vrot.slane %v625_v29, 2  ;;  %v668_v44 = vmul.f32 %v666_v40, %v7478_v1  ;;  %v741_v55 = vmul.f32 %v740_v50, %v7475_v0  ;;  %s7621_s7 = sld [smem:[#allocation7]] }
  0x5d   : > { %v782_v8 = vmul.f32 %v7509_v31, %v780_v5  ;;  %v781_v9 = vmul.f32 %v7513_v34, %v780_v5  ;;  %v794_v10 = vstv %s6656_s30  ;;  %s6620_s8 = sld [smem:[#allocation6 + $0x3]] }
  0x5e   : > { %397 = vrot.lane.b32.xlu1 %v392_v36, %s7342_s23  ;;  %v630_v36 = vsel %vm341_vm1, %v628_v33, %v629_v32  ;;  %v796_v14 = vmul.f32 %v7509_v31, %v794_v10  ;;  %s7630_s9 = sld [smem:[#allocation6 + $0x2e]] }
  0x5f   : > { %395 = vrot.lane.b32.xlu0 %v391_v37, %s7342_s23  ;;  %v693_v37 = vstv %s6649_s11  ;;  %v868_v20 = vstv %s6661_s5  ;;  %s7634_s22 = sld [smem:[#allocation6 + $0x31]] }
  0x60   : > { %v694_v41 = vmul.f32 %v693_v37, %v7475_v0  ;;  %v869_v24 = vmul.f32 %v7513_v34, %v868_v20  ;;  %v870_v25 = vmul.f32 %v7509_v31, %v868_v20  ;;  %s7638_s26 = sld [smem:[#allocation6 + $0x6]] }
  0x61   : > { %v254_v28 = vstv %s7617_s19  ;;  %s7642_s11 = sld [smem:[#allocation6 + $0x2f]] }
  0x62   : > { %411 = vrot.lane.b32.xlu1 %v406_v42, %s7341_s18  ;;  %v695_v42 = vmul.f32 %v693_v37, %v7478_v1  ;;  %v698_v48 = vrot.slane %v694_v41, 1  ;;  %v874_v29 = vrot.slane %v870_v25, 2  ;;  %v255_v35 = vmul.f32 %v254_v28, %v7475_v0  ;;  %s7645_s21 = sld [smem:[#allocation6 + $0x32]] }
  0x63   : > { %409 = vrot.lane.b32.xlu0 %v405_v43, %s7341_s18  ;;  %v710_v43 = vstv %s6650_s12  ;;  %s7654_s12 = sld [smem:[#allocation6 + $0x34]] }
  0x64   : > { %v711_v46 = vmul.f32 %v710_v43, %v7475_v0  ;;  %v699_v47 = vrot.slane %v695_v42, 1  ;;  %v712_v49 = vmul.f32 %v710_v43, %v7478_v1  ;;  %v256_v42 = vmul.f32 %v254_v28, %v7478_v1  ;;  %s7668_s20 = sld [smem:[#allocation6 + $0x35]] }
  0x65   : > { %v908_v43 = vstv %s7630_s9  ;;  %s7681_s25 = sld [smem:[#allocation6 + $0xc]] }
  0x66   : > { %441 = vrot.lane.b32.xlu1 %v437_v45, %s7342_s23  ;;  %v667_v45 = vmul.f32 %v666_v40, %v7475_v0  ;;  %v700_v53 = vsel %vm293_vm0, %v698_v48, %v699_v47  ;;  %v716_v54 = vrot.slane %v712_v49, 1  ;;  %v288_v40 = vstv %s6620_s8  ;;  %s7697_s30 = sld [smem:[#allocation6 + $0x3a]] }
  0x67   : > { %439 = vrot.lane.b32.xlu0 %v438_v51, %s7342_s23  ;;  %v715_v51 = vrot.slane %v711_v46, 1  ;;  %v949_v49 = vstv %s7634_s22  ;;  %s7706_s5 = sld [smem:[#allocation6 + $0x38]] }
  0x68   : > { %s7717_s19 = sld [smem:[#allocation6 + $0x3d]] }
  0x69   : > { %v717_v58 = vsel %vm293_vm0, %v715_v51, %v716_v54  ;;  %s7740_s8 = sld [smem:[#allocation6 + $0x12]] }
  0x6a   : > { %458 = vrot.lane.b32.xlu1 %v454_v52, %s7341_s18  ;;  %v757_v52 = vstv %s6653_s24  ;;  %s7677_s24 = sld [smem:[#allocation6 + $0x9]] }
  0x6b   : > { %456 = vrot.lane.b32.xlu0 %v455_v56, %s7341_s18  ;;  %v742_v56 = vmul.f32 %v740_v50, %v7478_v1  ;;  %s7744_s9 = sld [smem:[#allocation6 + $0x15]] }
  0x6c   : > { %s7756_s22 = sld [smem:[#allocation6 + $0x40]] }
  0x6d   : > { %v746_v59 = vrot.slane %v742_v56, 2 }
  0x6e   : > { %488 = vrot.lane.b32.xlu1 %v484_v57, %s7342_s23  ;;  %v758_v57 = vmul.f32 %v757_v52, %v7475_v0 }
  0x6f   : > { %486 = vrot.lane.b32.xlu0 %v485_v60, %s7342_s23  ;;  %v745_v60 = vrot.slane %v741_v55, 2 }
  0x71   : > { %v747_v62 = vsel %vm341_vm1, %v745_v60, %v746_v59  ;;  %v951_v60 = vmul.f32 %v7543_v63, %v949_v49 }
  0x72   : > { %505 = vrot.lane.b32.xlu1 %v501_v61, %s7341_s18  ;;  %v759_v61 = vmul.f32 %v757_v52, %v7478_v1  ;;  %v910_v52 = vmul.f32 %v7543_v63, %v908_v43 }
  0x73   : > { %503 = vrot.lane.b32.xlu0 %v502_v3, %s7341_s18  ;;  %v762_v3 = vrot.slane %v758_v57, 2  ;;  %v922_v57 = vstv %s7642_s11  ;;  %s7764_s11 = sld [smem:[#allocation6 + $0x18]] }
  0x74   : > { %v763_v2 = vrot.slane %v759_v61, 2  ;;  %v966_v61 = vstv %s7645_s21  ;;  %s7769_s21 = sld [smem:[#allocation6 + $0x41]] }
  0x76   : > { %525 = vrot.lane.b32.xlu1 %v520_v6, %s7342_s23  ;;  %v764_v6 = vsel %vm341_vm1, %v762_v3, %v763_v2 }
  0x77   : > { %523 = vrot.lane.b32.xlu0 %v519_v7, %s7342_s23  ;;  %v821_v7 = vstv %s6658_s29  ;;  %s7693_s29 = sld [smem:[#allocation6 + $0x37]] }
  0x78   : > { %v822_v11 = vmul.f32 %v7513_v34, %v821_v7 }
  0x7a   : > { %539 = vrot.lane.b32.xlu1 %v534_v12, %s7341_s18  ;;  %v823_v12 = vmul.f32 %v7509_v31, %v821_v7  ;;  %v826_v19 = vrot.slane %v822_v11, 1  ;;  %v924_v7 = vmul.f32 %v7543_v63, %v922_v57  ;;  %v968_v11 = vmul.f32 %v7543_v63, %v966_v61 }
  0x7b   : > { %537 = vrot.lane.b32.xlu0 %v533_v13, %s7341_s18  ;;  %v838_v13 = vstv %s6659_s4  ;;  %s7701_s4 = sld [smem:[#allocation6 + $0xf]] }
  0x7c   : > { %v839_v16 = vmul.f32 %v7513_v34, %v838_v13  ;;  %v840_v17 = vmul.f32 %v7509_v31, %v838_v13  ;;  %v827_v18 = vrot.slane %v823_v12, 1 }
  0x7e   : > { %569 = vrot.lane.b32.xlu1 %v565_v15, %s7342_s23  ;;  %v795_v15 = vmul.f32 %v7513_v34, %v794_v10  ;;  %v828_v23 = vsel %vm293_vm0, %v826_v19, %v827_v18  ;;  %v967_v10 = vmul.f32 %v7547_v4, %v966_v61 }
  0x7f   : > { %567 = vrot.lane.b32.xlu0 %v566_v21, %s7342_s23  ;;  %v844_v21 = vrot.slane %v840_v17, 1 }
  0x82   : > { %586 = vrot.lane.b32.xlu1 %v582_v22, %s7341_s18  ;;  %v843_v22 = vrot.slane %v839_v16, 1  ;;  %v996_v16 = vstv %s7654_s12  ;;  %s7772_s12 = sld [smem:[#allocation6 + $0x44]] }
  0x83   : > { %584 = vrot.lane.b32.xlu0 %v583_v26, %s7341_s18  ;;  %v885_v26 = vstv %s6662_s6  ;;  %v998_v25 = vmul.f32 %v7543_v63, %v996_v16  ;;  %s7709_s6 = sld [smem:[#allocation6 + $0x3b]] }
  0x84   : > { %v887_v33 = vmul.f32 %v7509_v31, %v885_v26 }
  0x86   : > { %616 = vrot.lane.b32.xlu1 %v612_v27, %s7342_s23  ;;  %v845_v27 = vsel %vm293_vm0, %v843_v22, %v844_v21  ;;  %v972_v22 = vrot.slane %v968_v11, 1  ;;  %v465_v11 = vstv %s7701_s4  ;;  %s7827_s4 = sld [smem:[#allocation6 + $0x49]] }
  0x87   : > { %614 = vrot.lane.b32.xlu0 %v613_v30, %s7342_s23  ;;  %v873_v30 = vrot.slane %v869_v24, 2  ;;  %v997_v24 = vmul.f32 %v7547_v4, %v996_v16 }
  0x89   : > { %v875_v37 = vsel %vm341_vm1, %v873_v30, %v874_v29 }
  0x8a   : > { %633 = vrot.lane.b32.xlu1 %v629_v32, %s7341_s18  ;;  %v886_v32 = vmul.f32 %v7513_v34, %v885_v26 }
  0x8b   : > { %631 = vrot.lane.b32.xlu0 %v630_v36, %s7341_s18  ;;  %v252_v36 = vstv %s7621_s7  ;;  %s7732_s7 = sld [smem:[#allocation6 + $0x3e]] }
  0x8c   : > { %v257_v41 = vadd.f32 %v255_v35, %v252_v36  ;;  %v258_v51 = vadd.f32 %v256_v42, %v252_v36 }
  0x8e   : > { %659 = vrot.lane.b32.xlu1 %v654_v38, %s7342_s23  ;;  %v891_v38 = vrot.slane %v887_v33, 2  ;;  %v1013_v33 = vstv %s7668_s20  ;;  %s7780_s20 = sld [smem:[#allocation6 + $0x46]] }
  0x8f   : > { %657 = vrot.lane.b32.xlu0 %v653_v39, %s7342_s23  ;;  %v890_v39 = vrot.slane %v886_v32, 2 }
  0x92   : > { %673 = vrot.lane.b32.xlu1 %v668_v44, %s7341_s18  ;;  %v290_v44 = vmul.f32 %v288_v40, %v7478_v1 }
  0x93   : > { %671 = vrot.lane.b32.xlu0 %v667_v45, %s7341_s18  ;;  %v289_v45 = vmul.f32 %v288_v40, %v7475_v0  ;;  %v384_v40 = vstv %s7677_s24  ;;  %s7795_s24 = sld [smem:[#allocation6 + $0x47]] }
  0x94   : > { %v295_v55 = vrot.slane %v290_v44, 1  ;;  %v1014_v44 = vmul.f32 %v7547_v4, %v1013_v33 }
  0x95   : > { %v294_v56 = vrot.slane %v289_v45, 1  ;;  %v1015_v45 = vmul.f32 %v7543_v63, %v1013_v33 }
  0x96   : > { %703 = vrot.lane.b32.xlu1 %v699_v47, %s7342_s23  ;;  %v892_v47 = vsel %vm341_vm1, %v890_v39, %v891_v38  ;;  %v1001_v39 = vrot.slane %v997_v24, 2  ;;  %v467_v24 = vmul.f32 %v7509_v31, %v465_v11 }
  0x97   : > { %701 = vrot.lane.b32.xlu0 %v700_v53, %s7342_s23  ;;  %v336_v53 = vstv %s7638_s26  ;;  %s7760_s26 = sld [smem:[#allocation6 + $0x43]] }
  0x98   : > { %v338_v3 = vmul.f32 %v336_v53, %v7478_v1 }
  0x9a   : > { %720 = vrot.lane.b32.xlu1 %v716_v54, %s7341_s18  ;;  %v909_v54 = vmul.f32 %v7547_v4, %v908_v43  ;;  %v343_v19 = vrot.slane %v338_v3, 2 }
  0x9b   : > { %718 = vrot.lane.b32.xlu0 %v717_v58, %s7341_s18 }
  0x9e   : > { %750 = vrot.lane.b32.xlu1 %v746_v59, %s7342_s23  ;;  %v950_v59 = vmul.f32 %v7547_v4, %v949_v49  ;;  %v386_v49 = vmul.f32 %v7509_v31, %v384_v40 }
  0x9f   : > { %748 = vrot.lane.b32.xlu0 %v747_v62, %s7342_s23 }
  0xa2   : > { %767 = vrot.lane.b32.xlu1 %v763_v2, %s7341_s18  ;;  %v337_v2 = vmul.f32 %v336_v53, %v7475_v0 }
  0xa3   : > { %765 = vrot.lane.b32.xlu0 %v764_v6, %s7341_s18 }
  0xa6   : > { %787 = vrot.lane.b32.xlu1 %v782_v8, %s7342_s23  ;;  %v296_v8 = vsel %vm293_vm0, %v294_v56, %v295_v55 }
  0xa7   : > { %785 = vrot.lane.b32.xlu0 %v781_v9, %s7342_s23  ;;  %v923_v9 = vmul.f32 %v7547_v4, %v922_v57 }
  0xaa   : > { %801 = vrot.lane.b32.xlu1 %v796_v14, %s7341_s18  ;;  %v955_v14 = vrot.slane %v951_v60, 1 }
  0xab   : > { %799 = vrot.lane.b32.xlu0 %v795_v15, %s7341_s18  ;;  %v954_v15 = vrot.slane %v950_v59, 1 }
  0xae   : > { %831 = vrot.lane.b32.xlu1 %v827_v18, %s7342_s23  ;;  %v342_v18 = vrot.slane %v337_v2, 2 }
  0xaf   : > { %829 = vrot.lane.b32.xlu0 %v828_v23, %s7342_s23  ;;  %v971_v23 = vrot.slane %v967_v10, 1 }
  0xb0   : > { %v344_v32 = vsel %vm341_vm1, %v342_v18, %v343_v19 }
  0xb2   : > { %848 = vrot.lane.b32.xlu1 %v844_v21, %s7341_s18 }
  0xb3   : > { %846 = vrot.lane.b32.xlu0 %v845_v27, %s7341_s18 }
  0xb6   : > { %878 = vrot.lane.b32.xlu1 %v874_v29, %s7342_s23  ;;  %v956_v29 = vsel %vm293_vm0, %v954_v15, %v955_v14 }
  0xb7   : > { %876 = vrot.lane.b32.xlu0 %v875_v37, %s7342_s23  ;;  %v973_v37 = vsel %vm293_vm0, %v971_v23, %v972_v22  ;;  %v466_v23 = vmul.f32 %v7513_v34, %v465_v11 }
  0xb8   : > { %v280_v46 = vpop.permute.xlu1 %279 }
  0xb9   : > { %v266_v48 = vpop.permute.xlu0 %265 }
  0xba   : > { %v271_v50 = vadd.f32 %v266_v48, %v257_v41  ;;  %895 = vrot.lane.b32.xlu1 %v891_v38, %s7341_s18  ;;  %v1002_v38 = vrot.slane %v998_v25, 2 }
  0xbb   : > { %893 = vrot.lane.b32.xlu0 %v892_v47, %s7341_s18  ;;  %v418_v47 = vstv %s7681_s25  ;;  %s7803_s25 = sld [smem:[#allocation6 + $0x1b]] }
  0xbc   : > { %v282_v58 = vpop.permute.xlu1 %281  ;;  %v285_v5 = vadd.f32 %v280_v46, %v271_v50  ;;  %v385_v50 = vmul.f32 %v7513_v34, %v384_v40  ;;  %v1003_v53 = vsel %vm341_vm1, %v1001_v39, %v1002_v38  ;;  %v420_v59 = vmul.f32 %v7509_v31, %v418_v47 }
  0xbd   : > { %v268_v62 = vpop.permute.xlu0 %267  ;;  %v470_v39 = vrot.slane %v466_v23, 2  ;;  %v471_v40 = vrot.slane %v467_v24, 2  ;;  %v1210_v24 = vstv %s7760_s26  ;;  %s7868_s26 = sld [smem:[#allocation6 + $0x4f]] }
  0xbe   : > { %v272_v6 = vadd.f32 %v268_v62, %v258_v51  ;;  %915 = vrot.lane.b32.xlu1 %v910_v52, %s7342_s23  ;;  %v299_v21 = vadd.f32 %v296_v8, %v285_v5  ;;  %v1041_v62 = vstv %s7693_s29  ;;  %v424_v8 = vrot.slane %v420_v59, 1  ;;  %s7808_s29 = sld [smem:[#allocation6 + $0x1e]] }
  0xbf   : > { %913 = vrot.lane.b32.xlu0 %v909_v54, %s7342_s23  ;;  %v1019_v54 = vrot.slane %v1015_v45, 2  ;;  %v1043_v10 = vmul.f32 %v1041_v62, %v7478_v1 }
  0xc0   : > { %v286_v12 = vadd.f32 %v282_v58, %v272_v6  ;;  %v313_v13 = vpop.permute.xlu1 %312  ;;  %v419_v58 = vmul.f32 %v7513_v34, %v418_v47 }
  0xc1   : > { %v311_v17 = vpop.permute.xlu0 %310 }
  0xc2   : > { %v300_v20 = vadd.f32 %v295_v55, %v286_v12  ;;  %929 = vrot.lane.b32.xlu1 %v924_v7, %s7341_s18  ;;  %v316_v27 = vadd.f32 %v311_v17, %v299_v21  ;;  %v1018_v55 = vrot.slane %v1014_v44, 2  ;;  %v423_v7 = vrot.slane %v419_v58, 1 }
  0xc3   : > { %927 = vrot.lane.b32.xlu0 %v923_v9, %s7341_s18  ;;  %v1082_v9 = vstv %s7697_s30  ;;  %s7812_s30 = sld [smem:[#allocation7 + $0x1]] }
  0xc4   : > { %v317_v26 = vadd.f32 %v313_v13, %v300_v20  ;;  %v330_v28 = vpop.permute.xlu1 %329  ;;  %v1020_v5 = vsel %vm341_vm1, %v1018_v55, %v1019_v54  ;;  %v1042_v13 = vmul.f32 %v1041_v62, %v7475_v0  ;;  %v1083_v17 = vmul.f32 %v1082_v9, %v7475_v0 }
  0xc5   : > { %v328_v30 = vpop.permute.xlu0 %327  ;;  %v1084_v18 = vmul.f32 %v1082_v9, %v7478_v1 }
  0xc6   : > { %v334_v35 = vadd.f32 %v330_v28, %v317_v26  ;;  %v333_v36 = vadd.f32 %v328_v30, %v316_v27  ;;  %959 = vrot.lane.b32.xlu1 %v955_v14, %s7342_s23  ;;  %v1055_v14 = vstv %s7706_s5  ;;  %s7096_s5 = sshll.u32 %s10779_s15, 8  ;;  %s7848_s15 = sld [smem:[#allocation6 + $0x4a]] }
  0xc7   : > { %957 = vrot.lane.b32.xlu0 %v956_v29, %s7342_s23  ;;  %v1057_v26 = vmul.f32 %v1055_v14, %v7478_v1  ;;  %v1056_v28 = vmul.f32 %v1055_v14, %v7475_v0 }
  0xc8   : > { %v361_v41 = vpop.permute.xlu1 %360  ;;  %v348_v42 = vadd.f32 %v343_v19, %v334_v35  ;;  %v347_v43 = vadd.f32 %v344_v32, %v333_v36  ;;  %v1099_v19 = vstv %s7709_s6  ;;  %v1088_v35 = vrot.slane %v1084_v18, 1  ;;  %s7832_s6 = sld [smem:[#allocation6 + $0x4c]] }
  0xc9   : > { %v359_v46 = vpop.permute.xlu0 %358  ;;  %v1100_v29 = vmul.f32 %v1099_v19, %v7475_v0  ;;  %v1101_v30 = vmul.f32 %v1099_v19, %v7478_v1  ;;  %v1087_v36 = vrot.slane %v1083_v17, 1  ;;  %v1169_v17 = vstv %s7756_s22  ;;  %s7856_s22 = sld [smem:[#allocation6 + $0x4d]] }
  0xca   : > { %976 = vrot.lane.b32.xlu1 %v972_v22, %s7341_s18  ;;  %v365_v48 = vadd.f32 %v361_v41, %v348_v42  ;;  %v364_v51 = vadd.f32 %v359_v46, %v347_v43  ;;  %v425_v22 = vsel %vm293_vm0, %v423_v7, %v424_v8 }
  0xcb   : > { %974 = vrot.lane.b32.xlu0 %v973_v37, %s7341_s18  ;;  %v1129_v37 = vstv %s7717_s19  ;;  %v1105_v42 = vrot.slane %v1101_v30, 1  ;;  %v1104_v43 = vrot.slane %v1100_v29, 1  ;;  %v1089_v47 = vsel %vm293_vm0, %v1087_v36, %v1088_v35  ;;  %s7836_s19 = sld [smem:[#allocation6 + $0x21]] }
  0xcc   : > { %v378_v52 = vpop.permute.xlu1 %377  ;;  %v1131_v44 = vmul.f32 %v1129_v37, %v7478_v1  ;;  %v1183_v29 = vstv %s7769_s21  ;;  %v1227_v36 = vstv %s7772_s12  ;;  %s7891_s21 = sld [smem:[#allocation6 + $0x24]] }
  0xcd   : > { %v382_v56 = vadd.f32 %v378_v52, %v365_v48  ;;  %v376_v57 = vpop.permute.xlu0 %375  ;;  %v1130_v48 = vmul.f32 %v1129_v37, %v7475_v0  ;;  %v1146_v52 = vstv %s7732_s7  ;;  %v1106_v55 = vsel %vm293_vm0, %v1104_v43, %v1105_v42  ;;  %s7895_s12 = sld [smem:[#allocation6 + $0x27]] }
  0xce   : > { %v381_v60 = vadd.f32 %v376_v57, %v364_v51  ;;  %1006 = vrot.lane.b32.xlu1 %v1002_v38, %s7342_s23  ;;  %v472_v51 = vsel %vm341_vm1, %v470_v39, %v471_v40  ;;  %v512_v57 = vstv %s7740_s8  ;;  %v1148_v62 = vmul.f32 %v1146_v52, %v7478_v1  ;;  %s7986_s7 = sld [smem:[#allocation6 + $0x5c]] }
  0xcf   : > { %1004 = vrot.lane.b32.xlu0 %v1003_v53, %s7342_s23  ;;  %v388_v61 = vadd.f32 %v386_v49, %v382_v56  ;;  %v1135_v56 = vrot.slane %v1131_v44, 2  ;;  %v513_v7 = vmul.f32 %v7547_v4, %v512_v57  ;;  %v1185_v43 = vmul.f32 %v7509_v31, %v1183_v29  ;;  %s7988_s8 = sld [smem:[#allocation6 + $0x5e]] }
  0xd0   : > { %v398_v2 = vpop.permute.xlu1 %397  ;;  %v387_v3 = vadd.f32 %v385_v50, %v381_v60  ;;  %v1134_v60 = vrot.slane %v1130_v48, 2  ;;  %v1152_v9 = vrot.slane %v1148_v62, 2 }
  0xd1   : > { %v396_v6 = vpop.permute.xlu0 %395  ;;  %v402_v12 = vadd.f32 %v398_v2, %v388_v61  ;;  %v1147_v61 = vmul.f32 %v1146_v52, %v7475_v0  ;;  %v1257_v52 = vstv %s7780_s20  ;;  %s7907_s20 = sld [smem:[#allocation6 + $0x52]] }
  0xd2   : > { %1023 = vrot.lane.b32.xlu1 %v1019_v54, %s7341_s18  ;;  %v401_v15 = vadd.f32 %v396_v6, %v387_v3  ;;  %v546_v3 = vstv %s7744_s9  ;;  %v514_v6 = vmul.f32 %v7543_v63, %v512_v57  ;;  %s7853_s9 = scalar_lea.vmem %s10765_s3, %s7096_s5  ;;  %s7958_s5 = sld [smem:[#allocation6 + $0x59]] }
  0xd3   : > { %1021 = vrot.lane.b32.xlu0 %v1020_v5, %s7341_s18  ;;  %v548_v14 = vmul.f32 %v7543_v63, %v546_v3 }
  0xd4   : > { %v412_v16 = vpop.permute.xlu1 %411 }
  0xd5   : > { %v416_v20 = vadd.f32 %v412_v16, %v402_v12  ;;  %v410_v21 = vpop.permute.xlu0 %409  ;;  %v552_v23 = vrot.slane %v548_v14, 1 }
  0xd6   : > { %v415_v25 = vadd.f32 %v410_v21, %v401_v15  ;;  %1048 = vrot.lane.b32.xlu1 %v1043_v10, %s7342_s23  ;;  %v1151_v10 = vrot.slane %v1147_v61, 2 }
  0xd7   : > { %1046 = vrot.lane.b32.xlu0 %v1042_v13, %s7342_s23  ;;  %v429_v27 = vadd.f32 %v424_v8, %v416_v20  ;;  %v1136_v8 = vsel %vm341_vm1, %v1134_v60, %v1135_v56  ;;  %v547_v13 = vmul.f32 %v7547_v4, %v546_v3 }
  0xd8   : > { %v442_v32 = vpop.permute.xlu1 %441  ;;  %v428_v33 = vadd.f32 %v425_v22, %v415_v25  ;;  %v1153_v20 = vsel %vm341_vm1, %v1151_v10, %v1152_v9  ;;  %v1171_v25 = vmul.f32 %v7509_v31, %v1169_v17  ;;  %v646_v10 = vstv %s7803_s25  ;;  %s7919_s25 = sld [smem:[#allocation6 + $0x55]] }
  0xd9   : > { %v440_v38 = vpop.permute.xlu0 %439  ;;  %v446_v41 = vadd.f32 %v442_v32, %v429_v27  ;;  %v551_v22 = vrot.slane %v547_v13, 1 }
  0xda   : > { %1062 = vrot.lane.b32.xlu1 %v1057_v26, %s7341_s18  ;;  %v445_v45 = vadd.f32 %v440_v38, %v428_v33  ;;  %v593_v26 = vstv %s7764_s11  ;;  %v1211_v33 = vmul.f32 %v7513_v34, %v1210_v24  ;;  %s7883_s11 = sld [smem:[#allocation6 + $0x50]] }
  0xdb   : > { %1060 = vrot.lane.b32.xlu0 %v1056_v28, %s7341_s18  ;;  %v1170_v28 = vmul.f32 %v7513_v34, %v1169_v17  ;;  %v553_v39 = vsel %vm293_vm0, %v551_v22, %v552_v23  ;;  %v680_v17 = vstv %s7808_s29  ;;  %s7923_s29 = sld [smem:[#allocation6 + $0x2a]] }
  0xdc   : > { %v459_v46 = vpop.permute.xlu1 %458 }
  0xdd   : > { %v463_v49 = vadd.f32 %v459_v46, %v446_v41  ;;  %v457_v50 = vpop.permute.xlu0 %456  ;;  %v595_v41 = vmul.f32 %v7543_v63, %v593_v26  ;;  %v1228_v46 = vmul.f32 %v7513_v34, %v1227_v36 }
  0xde   : > { %v462_v53 = vadd.f32 %v457_v50, %v445_v45  ;;  %1092 = vrot.lane.b32.xlu1 %v1088_v35, %s7342_s23  ;;  %v1212_v35 = vmul.f32 %v7509_v31, %v1210_v24  ;;  %v1184_v45 = vmul.f32 %v7513_v34, %v1183_v29 }
  0xdf   : > { %1090 = vrot.lane.b32.xlu0 %v1089_v47, %s7342_s23  ;;  %v476_v54 = vadd.f32 %v471_v40, %v463_v49  ;;  %v594_v40 = vmul.f32 %v7547_v4, %v593_v26  ;;  %v1229_v47 = vmul.f32 %v7509_v31, %v1227_v36 }
  0xe0   : > { %v489_v58 = vpop.permute.xlu1 %488  ;;  %v475_v59 = vadd.f32 %v472_v51, %v462_v53  ;;  %v1216_v50 = vrot.slane %v1212_v35, 1  ;;  %v1215_v51 = vrot.slane %v1211_v33, 1  ;;  %v1297_v35 = vstv %s7827_s4  ;;  %s7943_s4 = sld [smem:[#allocation6 + $0x58]] }
  0xe1   : > { %v487_v2 = vpop.permute.xlu0 %486  ;;  %v493_v5 = vadd.f32 %v489_v58, %v476_v54  ;;  %v598_v54 = vrot.slane %v594_v40, 2  ;;  %v1233_v57 = vrot.slane %v1229_v47, 1  ;;  %v1232_v58 = vrot.slane %v1228_v46, 1 }
  0xe2   : > { %1109 = vrot.lane.b32.xlu1 %v1105_v42, %s7341_s18  ;;  %v492_v0 = vadd.f32 %v487_v2, %v475_v59  ;;  %v1259_v59 = vmul.f32 %v7509_v31, %v1257_v52  ;;  %v1217_v62 = vsel %vm293_vm0, %v1215_v51, %v1216_v50  ;;  %v1258_v2 = vmul.f32 %v7513_v34, %v1257_v52 }
  0xe3   : > { %1107 = vrot.lane.b32.xlu0 %v1106_v55, %s7341_s18  ;;  %v599_v55 = vrot.slane %v595_v41, 2  ;;  %v1298_v46 = vmul.f32 %v7547_v4, %v1297_v35  ;;  %v1311_v47 = vstv %s7848_s15  ;;  %v1355_v52 = vstv %s7856_s22  ;;  %s7981_s15 = sld [smem:[#allocation6 + $0x5b]] }
  0xe4   : > { %v506_v1 = vpop.permute.xlu1 %505  ;;  %v1262_v13 = vrot.slane %v1258_v2, 2  ;;  %v1356_v2 = vmul.f32 %v7547_v4, %v1355_v52  ;;  %s7992_s22 = sld [smem:[#allocation6 + $0x33]] }
  0xe5   : > { %v510_v11 = vadd.f32 %v506_v1, %v493_v5  ;;  %v504_v12 = vpop.permute.xlu0 %503 }
  0xe6   : > { %v509_v15 = vadd.f32 %v504_v12, %v492_v0  ;;  %1139 = vrot.lane.b32.xlu1 %v1135_v56, %s7342_s23 }
  0xe7   : > { %1137 = vrot.lane.b32.xlu0 %v1136_v8, %s7342_s23  ;;  %v516_v16 = vadd.f32 %v514_v6, %v510_v11  ;;  %v600_v6 = vsel %vm341_vm1, %v598_v54, %v599_v55  ;;  %v1234_v8 = vsel %vm293_vm0, %v1232_v58, %v1233_v57 }
  0xe8   : > { %v526_v18 = vpop.permute.xlu1 %525  ;;  %v515_v19 = vadd.f32 %v513_v7, %v509_v15  ;;  %v1274_v7 = vstv %s7795_s24  ;;  %s7917_s24 = sld [smem:[#allocation6 + $0x53]] }
  0xe9   : > { %v524_v21 = vpop.permute.xlu0 %523  ;;  %v530_v27 = vadd.f32 %v526_v18, %v516_v16  ;;  %v1275_v14 = vmul.f32 %v7513_v34, %v1274_v7  ;;  %v1276_v15 = vmul.f32 %v7509_v31, %v1274_v7 }
  0xea   : > { %1156 = vrot.lane.b32.xlu1 %v1152_v9, %s7341_s18  ;;  %v529_v30 = vadd.f32 %v524_v21, %v515_v19  ;;  %v1263_v9 = vrot.slane %v1259_v59, 2  ;;  %v644_v19 = vstv %s7812_s30  ;;  %v7845_v21 = vld [vmem:[%s7460_s10] sm:$0xff]  ;;  %v1313_v59 = vmul.f32 %v7543_v63, %v1311_v47  ;;  %s7934_s30 = sld [smem:[#allocation6 + $0x56]] }
  0xeb   : > { %1154 = vrot.lane.b32.xlu0 %v1153_v20, %s7341_s18  ;;  %v7841_v20 = vld [vmem:[%s7460_s10 + $0x8] sm:$0xff]  ;;  %v647_v31 = vmul.f32 %v7845_v21, %v646_v10  ;;  %v1279_v26 = vrot.slane %v1275_v14, 2 }
  0xec   : > { %v540_v32 = vpop.permute.xlu1 %539  ;;  %v648_v34 = vmul.f32 %v7841_v20, %v646_v10  ;;  %v1264_v24 = vsel %vm341_vm1, %v1262_v13, %v1263_v9  ;;  %v682_v29 = vmul.f32 %v7841_v20, %v680_v17 }
  0xed   : > { %v544_v37 = vadd.f32 %v540_v32, %v530_v27  ;;  %v538_v38 = vpop.permute.xlu0 %537 }
  0xee   : > { %v543_v42 = vadd.f32 %v538_v38, %v529_v30  ;;  %1176 = vrot.lane.b32.xlu1 %v1171_v25, %s7342_s23  ;;  %v1280_v25 = vrot.slane %v1276_v15, 2  ;;  %v681_v30 = vmul.f32 %v7845_v21, %v680_v17  ;;  %v650_v33 = vadd.f32 %v648_v34, %v644_v19 }
  0xef   : > { %1174 = vrot.lane.b32.xlu0 %v1170_v28, %s7342_s23  ;;  %v557_v44 = vadd.f32 %v552_v23, %v544_v37  ;;  %v649_v37 = vadd.f32 %v647_v31, %v644_v19  ;;  %v686_v40 = vrot.slane %v682_v29, 1  ;;  %v1402_v31 = vstv %s7883_s11  ;;  %s8006_s11 = sld [smem:[#allocation6 + $0x61]] }
  0xf0   : > { %v570_v48 = vpop.permute.xlu1 %569  ;;  %v556_v49 = vadd.f32 %v553_v39, %v543_v42  ;;  %v1281_v38 = vsel %vm341_vm1, %v1279_v26, %v1280_v25  ;;  %v685_v41 = vrot.slane %v681_v30, 1  ;;  %v1338_v42 = vstv %s7832_s6  ;;  %v7914_v30 = vld [vmem:[%s7460_s10 + $0x20] sm:$0xff]  ;;  %s7967_s6 = sld [smem:[#allocation6 + $0x2d]] }
  0xf1   : > { %v568_v53 = vpop.permute.xlu0 %567  ;;  %v574_v56 = vadd.f32 %v570_v48, %v557_v44  ;;  %v727_v44 = vstv %s7836_s19  ;;  %v1339_v51 = vmul.f32 %v7547_v4, %v1338_v42  ;;  %s7970_s19 = sld [smem:[#allocation6 + $0x30]] }
  0xf2   : > { %1190 = vrot.lane.b32.xlu1 %v1185_v43, %s7341_s18  ;;  %v573_v60 = vadd.f32 %v568_v53, %v556_v49  ;;  %v1299_v43 = vmul.f32 %v7543_v63, %v1297_v35  ;;  %v808_v35 = vstv %s7895_s12  ;;  %s8030_s12 = sld [smem:[#allocation6 + $0x36]] }
  0xf3   : > { %1188 = vrot.lane.b32.xlu0 %v1184_v45, %s7341_s18  ;;  %v1343_v7 = vrot.slane %v1339_v51, 1 }
  0xf4   : > { %v587_v61 = vpop.permute.xlu1 %586 }
  0xf5   : > { %v591_v3 = vadd.f32 %v587_v61, %v574_v56  ;;  %v585_v5 = vpop.permute.xlu0 %584  ;;  %v728_v56 = vmul.f32 %v7845_v21, %v727_v44  ;;  %v1312_v61 = vmul.f32 %v7547_v4, %v1311_v47 }
  0xf6   : > { %v590_v0 = vadd.f32 %v585_v5, %v573_v60  ;;  %1220 = vrot.lane.b32.xlu1 %v1216_v50, %s7342_s23  ;;  %v1340_v50 = vmul.f32 %v7543_v63, %v1338_v42 }
  0xf7   : > { %1218 = vrot.lane.b32.xlu0 %v1217_v62, %s7342_s23  ;;  %v604_v1 = vadd.f32 %v599_v55, %v591_v3  ;;  %v687_v55 = vsel %vm293_vm0, %v685_v41, %v686_v40  ;;  %v1357_v62 = vmul.f32 %v7543_v63, %v1355_v52  ;;  %v1430_v52 = vstv %s7907_s20  ;;  %s8033_s20 = sld [smem:[#allocation6 + $0x39]] }
  0xf8   : > { %v617_v11 = vpop.permute.xlu1 %616  ;;  %v603_v12 = vadd.f32 %v600_v6, %v590_v0  ;;  %v1344_v6 = vrot.slane %v1340_v50, 1  ;;  %v1385_v0 = vstv %s7868_s26  ;;  %s7997_s26 = sld [smem:[#allocation6 + $0x5f]] }
  0xf9   : > { %v615_v16 = vpop.permute.xlu0 %614  ;;  %v621_v18 = vadd.f32 %v617_v11, %v604_v1  ;;  %v1361_v11 = vrot.slane %v1357_v62, 1  ;;  %v1387_v13 = vmul.f32 %v7543_v63, %v1385_v0  ;;  %v1386_v17 = vmul.f32 %v7547_v4, %v1385_v0 }
  0xfa   : > { %1237 = vrot.lane.b32.xlu1 %v1233_v57, %s7341_s18  ;;  %v620_v22 = vadd.f32 %v615_v16, %v603_v12  ;;  %v729_v57 = vmul.f32 %v7841_v20, %v727_v44  ;;  %v1360_v12 = vrot.slane %v1356_v2, 1  ;;  %v1345_v16 = vsel %vm293_vm0, %v1343_v7, %v1344_v6 }
  0xfb   : > { %1235 = vrot.lane.b32.xlu0 %v1234_v8, %s7341_s18  ;;  %v732_v8 = vrot.slane %v728_v56, 2  ;;  %v1431_v2 = vmul.f32 %v7845_v21, %v1430_v52 }
  0xfc   : > { %v634_v23 = vpop.permute.xlu1 %633  ;;  %v1362_v63 = vsel %vm293_vm0, %v1360_v12, %v1361_v11 }
  0xfd   : > { %v638_v27 = vadd.f32 %v634_v23, %v621_v18  ;;  %v632_v28 = vpop.permute.xlu0 %631 }
  0xfe   : > { %v637_v32 = vadd.f32 %v632_v28, %v620_v22  ;;  %1267 = vrot.lane.b32.xlu1 %v1263_v9, %s7342_s23  ;;  %v733_v9 = vrot.slane %v729_v57, 2  ;;  %v7910_v28 = vld [vmem:[%s7460_s10 + $0x28] sm:$0xff] }
  0xff   : > { %642 = vst.msk [vmem:[%s7853_s9 + $0x8] sm:$0x3f] %vm641_vm2, %v638_v27  ;;  %1265 = vrot.lane.b32.xlu0 %v1264_v24, %s7342_s23  ;;  %v1391_v24 = vrot.slane %v1387_v13, 2  ;;  %v1390_v27 = vrot.slane %v1386_v17, 2  ;;  %v1404_v29 = vmul.f32 %v7910_v28, %v1402_v31 }
 0x100   : > { %640 = vst.msk [vmem:[%s7853_s9] sm:$0xff] %vm639_vm3, %v637_v32  ;;  %v660_v36 = vpop.permute.xlu1 %659  ;;  %v734_v34 = vsel %vm341_vm1, %v732_v8, %v733_v9  ;;  %v1403_v32 = vmul.f32 %v7914_v30, %v1402_v31 }
 0x101   : > { %v658_v39 = vpop.permute.xlu0 %657  ;;  %v664_v45 = vadd.f32 %v660_v36, %v650_v33  ;;  %v1408_v44 = vrot.slane %v1404_v29, 2 }
 0x102   : > { %1284 = vrot.lane.b32.xlu1 %v1280_v25, %s7341_s18  ;;  %v663_v48 = vadd.f32 %v658_v39, %v649_v37  ;;  %v774_v25 = vstv %s7891_s21  ;;  %v7927_v37 = vld [vmem:[%s7460_s10 + $0x18] sm:$0xff]  ;;  %v7931_v39 = vld [vmem:[%s7460_s10 + $0x10] sm:$0xff]  ;;  %s8021_s21 = sld [smem:[#allocation6 + $0x62]] }
 0x103   : > { %1282 = vrot.lane.b32.xlu0 %v1281_v38, %s7341_s18  ;;  %v776_v38 = vmul.f32 %v7927_v37, %v774_v25 }
 0x104   : > { %v674_v49 = vpop.permute.xlu1 %673 }
 0x105   : > { %v678_v53 = vadd.f32 %v674_v49, %v664_v45  ;;  %v672_v54 = vpop.permute.xlu0 %671  ;;  %v1407_v45 = vrot.slane %v1403_v32, 2  ;;  %v810_v49 = vmul.f32 %v7927_v37, %v808_v35 }
 0x106   : > { %v677_v58 = vadd.f32 %v672_v54, %v663_v48  ;;  %1304 = vrot.lane.b32.xlu1 %v1299_v43, %s7342_s23  ;;  %v1392_v43 = vsel %vm341_vm1, %v1390_v27, %v1391_v24  ;;  %v809_v48 = vmul.f32 %v7931_v39, %v808_v35 }
 0x107   : > { %1302 = vrot.lane.b32.xlu0 %v1298_v46, %s7342_s23  ;;  %v691_v60 = vadd.f32 %v686_v40, %v678_v53  ;;  %v775_v40 = vmul.f32 %v7931_v39, %v774_v25 }
 0x108   : > { %v704_v3 = vpop.permute.xlu1 %703  ;;  %v690_v5 = vadd.f32 %v687_v55, %v677_v58  ;;  %v1409_v55 = vsel %vm341_vm1, %v1407_v45, %v1408_v44  ;;  %v813_v57 = vrot.slane %v809_v48, 1  ;;  %v814_v58 = vrot.slane %v810_v49, 1 }
 0x109   : > { %v702_v1 = vpop.permute.xlu0 %701  ;;  %v708_v10 = vadd.f32 %v704_v3, %v691_v60  ;;  %v1432_v60 = vmul.f32 %v7841_v20, %v1430_v52  ;;  %v1444_v3 = vstv %s7917_s24  ;;  %s8038_s24 = sld [smem:[#allocation7 + $0x2]] }
 0x10a   : > { %1318 = vrot.lane.b32.xlu1 %v1313_v59, %s7341_s18  ;;  %v707_v14 = vadd.f32 %v702_v1, %v690_v5  ;;  %v1471_v59 = vstv %s7919_s25  ;;  %v1488_v5 = vstv %s7934_s30  ;;  %v1445_v17 = vmul.f32 %v7845_v21, %v1444_v3  ;;  %s8046_s25 = sld [smem:[#allocation6 + $0x64]] }
 0x10b   : > { %1316 = vrot.lane.b32.xlu0 %v1312_v61, %s7341_s18  ;;  %v855_v61 = vstv %s7923_s29  ;;  %v1473_v0 = vmul.f32 %v7841_v20, %v1471_v59  ;;  %v1472_v1 = vmul.f32 %v7845_v21, %v1471_v59  ;;  %s8051_s29 = sld [smem:[#allocation6 + $0x65]] }
 0x10c   : > { %v721_v15 = vpop.permute.xlu1 %720  ;;  %v857_v12 = vmul.f32 %v7927_v37, %v855_v61  ;;  %s8053_s30 = sld [smem:[#allocation6 + $0x67]] }
 0x10d   : > { %v725_v18 = vadd.f32 %v721_v15, %v708_v10  ;;  %v719_v19 = vpop.permute.xlu0 %718  ;;  %v815_v10 = vsel %vm293_vm0, %v813_v57, %v814_v58  ;;  %v1490_v15 = vmul.f32 %v7841_v20, %v1488_v5  ;;  %v1477_v31 = vrot.slane %v1473_v0, 1 }
 0x10e   : > { %v724_v22 = vadd.f32 %v719_v19, %v707_v14  ;;  %1348 = vrot.lane.b32.xlu1 %v1344_v6, %s7342_s23  ;;  %v1446_v14 = vmul.f32 %v7841_v20, %v1444_v3  ;;  %v861_v25 = vrot.slane %v857_v12, 2 }
 0x10f   : > { %1346 = vrot.lane.b32.xlu0 %v1345_v16, %s7342_s23  ;;  %v738_v23 = vadd.f32 %v733_v9, %v725_v18  ;;  %v1489_v18 = vmul.f32 %v7845_v21, %v1488_v5 }
 0x110   : > { %v751_v4 = vpop.permute.xlu1 %750  ;;  %v737_v26 = vadd.f32 %v734_v34, %v724_v22  ;;  %v1476_v22 = vrot.slane %v1472_v1, 1  ;;  %v1558_v1 = vstv %s7981_s15  ;;  %s8100_s15 = sld [smem:[#allocation6 + $0x3f]] }
 0x111   : > { %v749_v33 = vpop.permute.xlu0 %748  ;;  %v755_v36 = vadd.f32 %v751_v4, %v738_v23  ;;  %v1518_v23 = vstv %s7943_s4  ;;  %v1494_v4 = vrot.slane %v1490_v15, 1  ;;  %v1493_v27 = vrot.slane %v1489_v18, 1  ;;  %s8057_s4 = sld [smem:[#allocation6 + $0x3c]] }
 0x112   : > { %1365 = vrot.lane.b32.xlu1 %v1361_v11, %s7341_s18  ;;  %v754_v41 = vadd.f32 %v749_v33, %v737_v26  ;;  %v856_v11 = vmul.f32 %v7931_v39, %v855_v61  ;;  %v1520_v29 = vmul.f32 %v7841_v20, %v1518_v23  ;;  %v1519_v32 = vmul.f32 %v7845_v21, %v1518_v23 }
 0x113   : > { %1363 = vrot.lane.b32.xlu0 %v1362_v63, %s7341_s18  ;;  %v1495_v45 = vsel %vm293_vm0, %v1493_v27, %v1494_v4  ;;  %v1560_v15 = vmul.f32 %v7927_v37, %v1558_v1  ;;  %v1559_v18 = vmul.f32 %v7931_v39, %v1558_v1 }
 0x114   : > { %v768_v42 = vpop.permute.xlu1 %767 }
 0x115   : > { %v772_v46 = vadd.f32 %v768_v42, %v755_v36  ;;  %v766_v47 = vpop.permute.xlu0 %765  ;;  %v1478_v36 = vsel %vm293_vm0, %v1476_v22, %v1477_v31  ;;  %v1535_v42 = vstv %s7958_s5  ;;  %s8063_s5 = sld [smem:[#allocation6 + $0x68]] }
 0x116   : > { %v771_v50 = vadd.f32 %v766_v47, %v754_v41  ;;  %1395 = vrot.lane.b32.xlu1 %v1391_v24, %s7342_s23  ;;  %v860_v24 = vrot.slane %v856_v11, 2  ;;  %v1523_v47 = vrot.slane %v1519_v32, 2  ;;  %v1536_v52 = vmul.f32 %v7845_v21, %v1535_v42 }
 0x117   : > { %1393 = vrot.lane.b32.xlu0 %v1392_v43, %s7342_s23  ;;  %v778_v51 = vadd.f32 %v776_v38, %v772_v46  ;;  %v1524_v46 = vrot.slane %v1520_v29, 2 }
 0x118   : > { %v788_v53 = vpop.permute.xlu1 %787  ;;  %v777_v54 = vadd.f32 %v775_v40, %v771_v50  ;;  %v862_v41 = vsel %vm341_vm1, %v860_v24, %v861_v25  ;;  %v902_v50 = vstv %s7967_s6  ;;  %s8076_s6 = sld [smem:[#allocation6 + $0x6a]] }
 0x119   : > { %v786_v56 = vpop.permute.xlu0 %785  ;;  %v792_v62 = vadd.f32 %v788_v53, %v778_v51  ;;  %v1537_v51 = vmul.f32 %v7841_v20, %v1535_v42  ;;  %v904_v57 = vmul.f32 %v7910_v28, %v902_v50 }
 0x11a   : > { %1412 = vrot.lane.b32.xlu1 %v1408_v44, %s7341_s18  ;;  %v791_v6 = vadd.f32 %v786_v56, %v777_v54  ;;  %v936_v54 = vstv %s7970_s19  ;;  %v1525_v56 = vsel %vm341_vm1, %v1523_v47, %v1524_v46  ;;  %s8091_s19 = sld [smem:[#allocation6 + $0x6b]] }
 0x11b   : > { %1410 = vrot.lane.b32.xlu0 %v1409_v55, %s7341_s18  ;;  %v1541_v61 = vrot.slane %v1537_v51, 2  ;;  %v937_v5 = vmul.f32 %v7914_v30, %v936_v54 }
 0x11c   : > { %v802_v7 = vpop.permute.xlu1 %801 }
 0x11d   : > { %v806_v8 = vadd.f32 %v802_v7, %v792_v62  ;;  %v800_v9 = vpop.permute.xlu0 %799  ;;  %v1540_v62 = vrot.slane %v1536_v52, 2  ;;  %v941_v12 = vrot.slane %v937_v5, 1 }
 0x11e   : > { %v805_v13 = vadd.f32 %v800_v9, %v791_v6  ;;  %1437 = vrot.lane.b32.xlu1 %v1432_v60, %s7342_s23  ;;  %v903_v60 = vmul.f32 %v7914_v30, %v902_v50  ;;  %v938_v6 = vmul.f32 %v7910_v28, %v936_v54 }
 0x11f   : > { %1435 = vrot.lane.b32.xlu0 %v1431_v2, %s7342_s23  ;;  %v819_v16 = vadd.f32 %v814_v58, %v806_v8 }
 0x120   : > { %v832_v19 = vpop.permute.xlu1 %831  ;;  %v818_v34 = vadd.f32 %v815_v10, %v805_v13  ;;  %v1542_v10 = vsel %vm341_vm1, %v1540_v62, %v1541_v61  ;;  %v942_v13 = vrot.slane %v938_v6, 1 }
 0x121   : > { %v830_v63 = vpop.permute.xlu0 %829  ;;  %v836_v26 = vadd.f32 %v832_v19, %v819_v16  ;;  %v983_v16 = vstv %s7992_s22  ;;  %v1572_v19 = vstv %s7986_s7  ;;  %s8103_s7 = sld [smem:[#allocation6 + $0x42]] }
 0x122   : > { %1451 = vrot.lane.b32.xlu1 %v1446_v14, %s7341_s18  ;;  %v835_v33 = vadd.f32 %v830_v63, %v818_v34  ;;  %v1599_v14 = vstv %s7988_s8  ;;  %v1616_v34 = vstv %s7997_s26  ;;  %v985_v27 = vmul.f32 %v7910_v28, %v983_v16  ;;  %s8114_s8 = sld [smem:[#allocation6 + $0x6d]] }
 0x123   : > { %1449 = vrot.lane.b32.xlu0 %v1445_v17, %s7341_s18  ;;  %v1601_v23 = vmul.f32 %v7927_v37, %v1599_v14  ;;  %v1600_v63 = vmul.f32 %v7931_v39, %v1599_v14  ;;  %v1574_v32 = vmul.f32 %v7927_v37, %v1572_v19  ;;  %s8119_s22 = sld [smem:[#allocation6 + $0x6e]] }
 0x124   : > { %v849_v35 = vpop.permute.xlu1 %848  ;;  %v989_v47 = vrot.slane %v985_v27, 2  ;;  %s8121_s26 = sld [smem:[#allocation6 + $0x70]] }
 0x125   : > { %v853_v38 = vadd.f32 %v849_v35, %v836_v26  ;;  %v847_v40 = vpop.permute.xlu0 %846  ;;  %v984_v26 = vmul.f32 %v7914_v30, %v983_v16  ;;  %v1605_v42 = vrot.slane %v1601_v23, 1 }
 0x126   : > { %v852_v43 = vadd.f32 %v847_v40, %v835_v33  ;;  %1481 = vrot.lane.b32.xlu1 %v1477_v31, %s7342_s23  ;;  %v1618_v33 = vmul.f32 %v7927_v37, %v1616_v34 }
 0x127   : > { %1479 = vrot.lane.b32.xlu0 %v1478_v36, %s7342_s23  ;;  %v866_v44 = vadd.f32 %v861_v25, %v853_v38  ;;  %v1573_v36 = vmul.f32 %v7931_v39, %v1572_v19  ;;  %v1617_v38 = vmul.f32 %v7931_v39, %v1616_v34 }
 0x128   : > { %v879_v48 = vpop.permute.xlu1 %878  ;;  %v865_v49 = vadd.f32 %v862_v41, %v852_v43  ;;  %v1604_v43 = vrot.slane %v1600_v63, 1 }
 0x129   : > { %v877_v53 = vpop.permute.xlu0 %876  ;;  %v883_v55 = vadd.f32 %v879_v48, %v866_v44  ;;  %v1646_v44 = vstv %s8006_s11  ;;  %v1622_v48 = vrot.slane %v1618_v33, 1  ;;  %v1621_v50 = vrot.slane %v1617_v38, 1  ;;  %s8125_s11 = sld [smem:[#allocation6 + $0x45]] }
 0x12a   : > { %1498 = vrot.lane.b32.xlu1 %v1494_v4, %s7341_s18  ;;  %v882_v58 = vadd.f32 %v877_v53, %v865_v49  ;;  %v943_v4 = vsel %vm293_vm0, %v941_v12, %v942_v13  ;;  %v1648_v51 = vmul.f32 %v7927_v37, %v1646_v44  ;;  %v1647_v52 = vmul.f32 %v7931_v39, %v1646_v44 }
 0x12b   : > { %1496 = vrot.lane.b32.xlu0 %v1495_v45, %s7341_s18  ;;  %v1623_v62 = vsel %vm293_vm0, %v1621_v50, %v1622_v48  ;;  %v1033_v12 = vstv %s8038_s24  ;;  %v1727_v33 = vstv %s8053_s30  ;;  %s8163_s24 = sld [smem:[#allocation6 + $0x48]] }
 0x12c   : > { %v896_v59 = vpop.permute.xlu1 %895  ;;  %s8182_s30 = sld [smem:[#allocation6 + $0x77]] }
 0x12d   : > { %v900_v2 = vadd.f32 %v896_v59, %v883_v55  ;;  %v894_v3 = vpop.permute.xlu0 %893  ;;  %v1606_v55 = vsel %vm293_vm0, %v1604_v43, %v1605_v42  ;;  %v1663_v59 = vstv %s8021_s21  ;;  %s8130_s21 = sld [smem:[#allocation6 + $0x71]] }
 0x12e   : > { %v899_v7 = vadd.f32 %v894_v3, %v882_v58  ;;  %1528 = vrot.lane.b32.xlu1 %v1524_v46, %s7342_s23  ;;  %v988_v46 = vrot.slane %v984_v26, 2  ;;  %v1651_v3 = vrot.slane %v1647_v52, 2  ;;  %v1664_v1 = vmul.f32 %v7931_v39, %v1663_v59 }
 0x12f   : > { %1526 = vrot.lane.b32.xlu0 %v1525_v56, %s7342_s23  ;;  %v906_v0 = vadd.f32 %v904_v57, %v900_v2  ;;  %v1652_v2 = vrot.slane %v1648_v51, 2 }
 0x130   : > { %v916_v8 = vpop.permute.xlu1 %915  ;;  %v905_v9 = vadd.f32 %v903_v60, %v899_v7  ;;  %v990_v58 = vsel %vm341_vm1, %v988_v46, %v989_v47  ;;  %v1035_v7 = vstv %s8030_s12  ;;  %v1728_v46 = vmul.f32 %v7914_v30, %v1727_v33  ;;  %s8139_s12 = sld [smem:[#allocation6 + $0x73]] }
 0x131   : > { %v914_v11 = vpop.permute.xlu0 %913  ;;  %v920_v17 = vadd.f32 %v916_v8, %v906_v0  ;;  %v1665_v0 = vmul.f32 %v7927_v37, %v1663_v59  ;;  %v1036_v16 = vmul.f32 %v7845_v21, %v1035_v7 }
 0x132   : > { %1545 = vrot.lane.b32.xlu1 %v1541_v61, %s7341_s18  ;;  %v919_v31 = vadd.f32 %v914_v11, %v905_v9  ;;  %v1069_v9 = vstv %s8033_s20  ;;  %v1653_v11 = vsel %vm341_vm1, %v1651_v3, %v1652_v2  ;;  %s8154_s20 = sld [smem:[#allocation6 + $0x74]] }
 0x133   : > { %1543 = vrot.lane.b32.xlu0 %v1542_v10, %s7341_s18 }
 0x134   : > { %v930_v22 = vpop.permute.xlu1 %929 }
 0x135   : > { %v934_v24 = vadd.f32 %v930_v22, %v920_v17  ;;  %v928_v25 = vpop.permute.xlu0 %927  ;;  %v1669_v17 = vrot.slane %v1665_v0, 2  ;;  %v1070_v22 = vmul.f32 %v7845_v21, %v1069_v9 }
 0x136   : > { %v933_v29 = vadd.f32 %v928_v25, %v919_v31  ;;  %1565 = vrot.lane.b32.xlu1 %v1560_v15, %s7342_s23  ;;  %v1071_v31 = vmul.f32 %v7841_v20, %v1069_v9 }
 0x137   : > { %1563 = vrot.lane.b32.xlu0 %v1559_v18, %s7342_s23  ;;  %v947_v35 = vadd.f32 %v942_v13, %v934_v24  ;;  %v1037_v13 = vmul.f32 %v7841_v20, %v1035_v7  ;;  %v1668_v18 = vrot.slane %v1664_v1, 2  ;;  %v1686_v24 = vstv %s8046_s25  ;;  %s8166_s25 = sld [smem:[#allocation6 + $0x4b]] }
 0x138   : > { %v960_v40 = vpop.permute.xlu1 %959  ;;  %v946_v41 = vadd.f32 %v943_v4, %v933_v29  ;;  %v1038_v4 = vadd.f32 %v1036_v16, %v1033_v12  ;;  %v1075_v29 = vrot.slane %v1071_v31, 1 }
 0x139   : > { %v958_v45 = vpop.permute.xlu0 %957  ;;  %v964_v49 = vadd.f32 %v960_v40, %v947_v35  ;;  %v1039_v63 = vadd.f32 %v1037_v13, %v1033_v12  ;;  %v1670_v26 = vsel %vm341_vm1, %v1668_v18, %v1669_v17  ;;  %v1688_v35 = vmul.f32 %v7910_v28, %v1686_v24 }
 0x13a   : > { %1579 = vrot.lane.b32.xlu1 %v1574_v32, %s7341_s18  ;;  %v963_v53 = vadd.f32 %v958_v45, %v946_v41  ;;  %v1074_v32 = vrot.slane %v1070_v22, 1  ;;  %v1687_v40 = vmul.f32 %v7914_v30, %v1686_v24  ;;  %v1700_v41 = vstv %s8051_s29  ;;  %s8177_s29 = sld [smem:[#allocation6 + $0x76]] }
 0x13b   : > { %1577 = vrot.lane.b32.xlu0 %v1573_v36, %s7341_s18  ;;  %v1116_v36 = vstv %s8057_s4  ;;  %v1729_v45 = vmul.f32 %v7910_v28, %v1727_v33  ;;  %s8184_s4 = sld [smem:[#allocation6 + $0x79]] }
 0x13c   : > { %v977_v54 = vpop.permute.xlu1 %976  ;;  %v1117_v50 = vmul.f32 %v7845_v21, %v1116_v36  ;;  %v1118_v51 = vmul.f32 %v7841_v20, %v1116_v36 }
 0x13d   : > { %v981_v56 = vadd.f32 %v977_v54, %v964_v49  ;;  %v975_v57 = vpop.permute.xlu0 %974  ;;  %v1076_v49 = vsel %vm293_vm0, %v1074_v32, %v1075_v29 }
 0x13e   : > { %v980_v60 = vadd.f32 %v975_v57, %v963_v53  ;;  %1609 = vrot.lane.b32.xlu1 %v1605_v42, %s7342_s23  ;;  %v1744_v42 = vstv %s8063_s5  ;;  %v1702_v53 = vmul.f32 %v7910_v28, %v1700_v41  ;;  %v1121_v3 = vrot.slane %v1117_v50, 2  ;;  %s8188_s5 = sld [smem:[#allocation6 + $0x4e]] }
 0x13f   : > { %1607 = vrot.lane.b32.xlu0 %v1606_v55, %s7342_s23  ;;  %v994_v61 = vadd.f32 %v989_v47, %v981_v56  ;;  %v1746_v54 = vmul.f32 %v7910_v28, %v1744_v42  ;;  %v1701_v56 = vmul.f32 %v7914_v30, %v1700_v41  ;;  %v1745_v57 = vmul.f32 %v7914_v30, %v1744_v42 }
 0x140   : > { %v1007_v5 = vpop.permute.xlu1 %1006  ;;  %v993_v6 = vadd.f32 %v990_v58, %v980_v60  ;;  %v1733_v60 = vrot.slane %v1729_v45, 1 }
 0x141   : > { %v1005_v8 = vpop.permute.xlu0 %1004  ;;  %v1011_v10 = vadd.f32 %v1007_v5, %v994_v61  ;;  %v1732_v61 = vrot.slane %v1728_v46, 1  ;;  %v1122_v5 = vrot.slane %v1118_v51, 2  ;;  %v1749_v0 = vrot.slane %v1745_v57, 1 }
 0x142   : > { %1626 = vrot.lane.b32.xlu1 %v1622_v48, %s7341_s18  ;;  %v1010_v14 = vadd.f32 %v1005_v8, %v993_v6  ;;  %v1750_v6 = vrot.slane %v1746_v54, 1  ;;  %v1819_v46 = vstv %s8114_s8  ;;  %s8229_s8 = sld [smem:[#allocation6 + $0x54]] }
 0x143   : > { %1624 = vrot.lane.b32.xlu0 %v1623_v62, %s7341_s18  ;;  %v1774_v62 = vstv %s8076_s6  ;;  %v1821_v54 = vmul.f32 %v7841_v20, %v1819_v46  ;;  %v1820_v57 = vmul.f32 %v7845_v21, %v1819_v46  ;;  %s8193_s6 = sld [smem:[#allocation6 + $0x7a]] }
 0x144   : > { %v1024_v15 = vpop.permute.xlu1 %1023  ;;  %v1776_v1 = vmul.f32 %v7910_v28, %v1774_v62  ;;  %v1775_v8 = vmul.f32 %v7914_v30, %v1774_v62  ;;  %v1751_v18 = vsel %vm293_vm0, %v1749_v0, %v1750_v6 }
 0x145   : > { %v1028_v19 = vadd.f32 %v1024_v15, %v1011_v10  ;;  %v1022_v34 = vpop.permute.xlu0 %1021  ;;  %v1791_v15 = vstv %s8091_s19  ;;  %s8202_s19 = sld [smem:[#allocation6 + $0x7c]] }
 0x146   : > { %v1027_v23 = vadd.f32 %v1022_v34, %v1010_v14  ;;  %1656 = vrot.lane.b32.xlu1 %v1652_v2, %s7342_s23  ;;  %v1123_v14 = vsel %vm341_vm1, %v1121_v3, %v1122_v5  ;;  %v1779_v34 = vrot.slane %v1775_v8, 2  ;;  %v1792_v24 = vmul.f32 %v7914_v30, %v1791_v15 }
 0x147   : > { %6673 = vst.msk [vmem:[%s7853_s9 + $0x18] sm:$0x3f] %vm641_vm2, %v1028_v19  ;;  %1654 = vrot.lane.b32.xlu0 %v1653_v11, %s7342_s23  ;;  %v1734_v11 = vsel %vm293_vm0, %v1732_v61, %v1733_v60  ;;  %v1780_v19 = vrot.slane %v1776_v1, 2 }
 0x148   : > { %6672 = vst.msk [vmem:[%s7853_s9 + $0x10] sm:$0xff] %vm639_vm3, %v1027_v23  ;;  %v1049_v25 = vpop.permute.xlu1 %1048  ;;  %v1163_v23 = vstv %s8100_s15  ;;  %s8217_s15 = sld [smem:[#allocation6 + $0x7d]] }
 0x149   : > { %v1047_v27 = vpop.permute.xlu0 %1046  ;;  %v1053_v38 = vadd.f32 %v1049_v25, %v1039_v63  ;;  %v1793_v63 = vmul.f32 %v7910_v28, %v1791_v15 }
 0x14a   : > { %1673 = vrot.lane.b32.xlu1 %v1669_v17, %s7341_s18  ;;  %v1052_v43 = vadd.f32 %v1047_v27, %v1038_v4  ;;  %v1197_v4 = vstv %s8103_s7  ;;  %v1781_v27 = vsel %vm341_vm1, %v1779_v34, %v1780_v19  ;;  %s8226_s7 = sld [smem:[#allocation6 + $0x51]] }
 0x14b   : > { %1671 = vrot.lane.b32.xlu0 %v1670_v26, %s7341_s18  ;;  %v1797_v36 = vrot.slane %v1793_v63, 2  ;;  %v1198_v42 = vmul.f32 %v7931_v39, %v1197_v4 }
 0x14c   : > { %v1063_v44 = vpop.permute.xlu1 %1062 }
 0x14d   : > { %v1067_v47 = vadd.f32 %v1063_v44, %v1053_v38  ;;  %v1061_v48 = vpop.permute.xlu0 %1060  ;;  %v1796_v38 = vrot.slane %v1792_v24, 2  ;;  %v1202_v51 = vrot.slane %v1198_v42, 1 }
 0x14e   : > { %v1066_v52 = vadd.f32 %v1061_v48, %v1052_v43  ;;  %1693 = vrot.lane.b32.xlu1 %v1688_v35, %s7342_s23  ;;  %v1164_v35 = vmul.f32 %v7931_v39, %v1163_v23  ;;  %v1199_v43 = vmul.f32 %v7927_v37, %v1197_v4 }
 0x14f   : > { %1691 = vrot.lane.b32.xlu0 %v1687_v40, %s7342_s23  ;;  %v1080_v55 = vadd.f32 %v1075_v29, %v1067_v47  ;;  %v1165_v29 = vmul.f32 %v7927_v37, %v1163_v23 }
 0x150   : > { %v1093_v58 = vpop.permute.xlu1 %1092  ;;  %v1079_v59 = vadd.f32 %v1076_v49, %v1066_v52  ;;  %v1798_v49 = vsel %vm341_vm1, %v1796_v38, %v1797_v36  ;;  %v1203_v52 = vrot.slane %v1199_v43, 1 }
 0x151   : > { %v1091_v2 = vpop.permute.xlu0 %1090  ;;  %v1097_v7 = vadd.f32 %v1093_v58, %v1080_v55  ;;  %v1244_v55 = vstv %s8125_s11  ;;  %v1833_v58 = vstv %s8119_s22  ;;  %s8235_s22 = sld [smem:[#allocation7 + $0x3]] }
 0x152   : > { %1707 = vrot.lane.b32.xlu1 %v1702_v53, %s7341_s18  ;;  %v1096_v9 = vadd.f32 %v1091_v2, %v1079_v59  ;;  %v1860_v53 = vstv %s8121_s26  ;;  %v1877_v59 = vstv %s8130_s21  ;;  %v1246_v0 = vmul.f32 %v7927_v37, %v1244_v55  ;;  %s8242_s26 = sld [smem:[#allocation6 + $0x7f]] }
 0x153   : > { %1705 = vrot.lane.b32.xlu0 %v1701_v56, %s7341_s18  ;;  %v1862_v62 = vmul.f32 %v7841_v20, %v1860_v53  ;;  %v1861_v2 = vmul.f32 %v7845_v21, %v1860_v53  ;;  %v1835_v8 = vmul.f32 %v7841_v20, %v1833_v58  ;;  %s8247_s11 = sld [smem:[#allocation6 + $0x80]] }
 0x154   : > { %v1110_v10 = vpop.permute.xlu1 %1109  ;;  %v1250_v34 = vrot.slane %v1246_v0, 2  ;;  %v1988_v0 = vstv %s8184_s4  ;;  %s8249_s21 = sld [smem:[#allocation6 + $0x82]] }
 0x155   : > { %v1114_v12 = vadd.f32 %v1110_v10, %v1097_v7  ;;  %v1108_v13 = vpop.permute.xlu0 %1107  ;;  %v1245_v7 = vmul.f32 %v7931_v39, %v1244_v55  ;;  %v1866_v15 = vrot.slane %v1862_v62, 1  ;;  %s8322_s4 = sld [smem:[#allocation6 + $0x88]] }
 0x156   : > { %v1113_v16 = vadd.f32 %v1108_v13, %v1096_v9  ;;  %1737 = vrot.lane.b32.xlu1 %v1733_v60, %s7342_s23  ;;  %v1879_v9 = vmul.f32 %v7841_v20, %v1877_v59 }
 0x157   : > { %1735 = vrot.lane.b32.xlu0 %v1734_v11, %s7342_s23  ;;  %v1127_v17 = vadd.f32 %v1122_v5, %v1114_v12  ;;  %v1834_v11 = vmul.f32 %v7845_v21, %v1833_v58  ;;  %v1878_v12 = vmul.f32 %v7845_v21, %v1877_v59 }
 0x158   : > { %v1140_v31 = vpop.permute.xlu1 %1139  ;;  %v1126_v22 = vadd.f32 %v1123_v14, %v1113_v16  ;;  %v1865_v16 = vrot.slane %v1861_v2, 1 }
 0x159   : > { %v1138_v25 = vpop.permute.xlu0 %1137  ;;  %v1144_v26 = vadd.f32 %v1140_v31, %v1127_v17  ;;  %v1907_v17 = vstv %s8139_s12  ;;  %v1883_v31 = vrot.slane %v1879_v9, 1  ;;  %v1882_v23 = vrot.slane %v1878_v12, 1  ;;  %s8253_s12 = sld [smem:[#allocation6 + $0x57]] }
 0x15a   : > { %1754 = vrot.lane.b32.xlu1 %v1750_v6, %s7341_s18  ;;  %v1143_v32 = vadd.f32 %v1138_v25, %v1126_v22  ;;  %v1204_v6 = vsel %vm293_vm0, %v1202_v51, %v1203_v52  ;;  %v1909_v63 = vmul.f32 %v7841_v20, %v1907_v17  ;;  %v1908_v24 = vmul.f32 %v7845_v21, %v1907_v17 }
 0x15b   : > { %1752 = vrot.lane.b32.xlu0 %v1751_v18, %s7341_s18  ;;  %v1884_v38 = vsel %vm293_vm0, %v1882_v23, %v1883_v31  ;;  %v2005_v12 = vstv %s8193_s6  ;;  %s8329_s6 = sld [smem:[#allocation6 + $0x8b]] }
 0x15c   : > { %v1157_v33 = vpop.permute.xlu1 %1156 }
 0x15d   : > { %v1161_v40 = vadd.f32 %v1157_v33, %v1144_v26  ;;  %v1155_v41 = vpop.permute.xlu0 %1154  ;;  %v1867_v26 = vsel %vm293_vm0, %v1865_v16, %v1866_v15  ;;  %v1924_v33 = vstv %s8154_s20  ;;  %v1989_v16 = vmul.f32 %v7931_v39, %v1988_v0  ;;  %s8265_s20 = sld [smem:[#allocation6 + $0x83]] }
 0x15e   : > { %v1160_v44 = vadd.f32 %v1155_v41, %v1143_v32  ;;  %1784 = vrot.lane.b32.xlu1 %v1780_v19, %s7342_s23  ;;  %v1249_v19 = vrot.slane %v1245_v7, 2  ;;  %v1912_v41 = vrot.slane %v1908_v24, 2  ;;  %v1925_v46 = vmul.f32 %v7845_v21, %v1924_v33 }
 0x15f   : > { %1782 = vrot.lane.b32.xlu0 %v1781_v27, %s7342_s23  ;;  %v1167_v45 = vadd.f32 %v1165_v29, %v1161_v40  ;;  %v1913_v40 = vrot.slane %v1909_v63, 2  ;;  %v2007_v63 = vmul.f32 %v7927_v37, %v2005_v12 }
 0x160   : > { %v1177_v47 = vpop.permute.xlu1 %1176  ;;  %v1166_v48 = vadd.f32 %v1164_v35, %v1160_v44  ;;  %v1251_v32 = vsel %vm341_vm1, %v1249_v19, %v1250_v34  ;;  %v1291_v44 = vstv %s8163_s24  ;;  %s8278_s24 = sld [smem:[#allocation6 + $0x85]] }
 0x161   : > { %v1175_v50 = vpop.permute.xlu0 %1174  ;;  %v1181_v56 = vadd.f32 %v1177_v47, %v1167_v45  ;;  %v1926_v45 = vmul.f32 %v7841_v20, %v1924_v33  ;;  %v1293_v20 = vmul.f32 %v7910_v28, %v1291_v44 }
 0x162   : > { %1801 = vrot.lane.b32.xlu1 %v1797_v36, %s7341_s18  ;;  %v1180_v60 = vadd.f32 %v1175_v50, %v1166_v48  ;;  %v1325_v48 = vstv %s8166_s25  ;;  %v1914_v50 = vsel %vm341_vm1, %v1912_v41, %v1913_v40  ;;  %s8299_s25 = sld [smem:[#allocation6 + $0x86]] }
 0x163   : > { %1799 = vrot.lane.b32.xlu0 %v1798_v49, %s7341_s18  ;;  %v1930_v53 = vrot.slane %v1926_v45, 2  ;;  %v1327_v58 = vmul.f32 %v7910_v28, %v1325_v48 }
 0x164   : > { %v1191_v61 = vpop.permute.xlu1 %1190 }
 0x165   : > { %v1195_v3 = vadd.f32 %v1191_v61, %v1181_v56  ;;  %v1189_v5 = vpop.permute.xlu0 %1188  ;;  %v1947_v61 = vstv %s8177_s29  ;;  %v1331_v7 = vrot.slane %v1327_v58, 1  ;;  %s8308_s29 = sld [smem:[#allocation6 + $0x5a]] }
 0x166   : > { %v1194_v1 = vadd.f32 %v1189_v5, %v1180_v60  ;;  %1826 = vrot.lane.b32.xlu1 %v1821_v54, %s7342_s23  ;;  %v1929_v54 = vrot.slane %v1925_v46, 2 }
 0x167   : > { %1824 = vrot.lane.b32.xlu0 %v1820_v57, %s7342_s23  ;;  %v1208_v10 = vadd.f32 %v1203_v52, %v1195_v3  ;;  %v1292_v52 = vmul.f32 %v7914_v30, %v1291_v44  ;;  %v1326_v57 = vmul.f32 %v7914_v30, %v1325_v48 }
 0x168   : > { %v1221_v13 = vpop.permute.xlu1 %1220  ;;  %v1207_v14 = vadd.f32 %v1204_v6, %v1194_v1  ;;  %v1931_v3 = vsel %vm341_vm1, %v1929_v54, %v1930_v53  ;;  %v1949_v1 = vmul.f32 %v7927_v37, %v1947_v61 }
 0x169   : > { %v1219_v18 = vpop.permute.xlu0 %1218  ;;  %v1225_v22 = vadd.f32 %v1221_v13, %v1208_v10  ;;  %v1330_v6 = vrot.slane %v1326_v57, 1  ;;  %v1948_v10 = vmul.f32 %v7931_v39, %v1947_v61 }
 0x16a   : > { %1840 = vrot.lane.b32.xlu1 %v1835_v8, %s7341_s18  ;;  %v1224_v25 = vadd.f32 %v1219_v18, %v1207_v14  ;;  %v1372_v8 = vstv %s8188_s5  ;;  %s8327_s5 = sld [smem:[#allocation6 + $0x89]] }
 0x16b   : > { %1838 = vrot.lane.b32.xlu0 %v1834_v11, %s7341_s18  ;;  %v1961_v11 = vstv %s8182_s30  ;;  %v1332_v19 = vsel %vm293_vm0, %v1330_v6, %v1331_v7  ;;  %v1422_v6 = vstv %s8235_s22  ;;  %s8311_s30 = sld [smem:[#allocation6 + $0x5d]] }
 0x16c   : > { %v1238_v4 = vpop.permute.xlu1 %1237  ;;  %v1963_v23 = vmul.f32 %v7927_v37, %v1961_v11  ;;  %s8377_s22 = sld [smem:[#allocation6 + $0x63]] }
 0x16d   : > { %v1242_v27 = vadd.f32 %v1238_v4, %v1225_v22  ;;  %v1236_v29 = vpop.permute.xlu0 %1235  ;;  %v2006_v4 = vmul.f32 %v7931_v39, %v2005_v12 }
 0x16e   : > { %v1241_v35 = vadd.f32 %v1236_v29, %v1224_v25  ;;  %1870 = vrot.lane.b32.xlu1 %v1866_v15, %s7342_s23  ;;  %v1990_v15 = vmul.f32 %v7927_v37, %v1988_v0  ;;  %v1962_v25 = vmul.f32 %v7931_v39, %v1961_v11  ;;  %v2035_v29 = vstv %s8202_s19  ;;  %s8333_s19 = sld [smem:[#allocation6 + $0x60]] }
 0x16f   : > { %1868 = vrot.lane.b32.xlu0 %v1867_v26, %s7342_s23  ;;  %v1255_v36 = vadd.f32 %v1250_v34, %v1242_v27  ;;  %v1373_v34 = vmul.f32 %v7914_v30, %v1372_v8  ;;  %v2037_v41 = vmul.f32 %v7927_v37, %v2035_v29 }
 0x170   : > { %v1268_v42 = vpop.permute.xlu1 %1267  ;;  %v1254_v43 = vadd.f32 %v1251_v32, %v1241_v35  ;;  %v1994_v27 = vrot.slane %v1990_v15, 1 }
 0x171   : > { %v1266_v47 = vpop.permute.xlu0 %1265  ;;  %v1272_v49 = vadd.f32 %v1268_v42, %v1255_v36  ;;  %v1377_v33 = vrot.slane %v1373_v34, 2  ;;  %v2011_v36 = vrot.slane %v2007_v63, 1  ;;  %v2036_v42 = vmul.f32 %v7931_v39, %v2035_v29 }
 0x172   : > { %1887 = vrot.lane.b32.xlu1 %v1883_v31, %s7341_s18  ;;  %v1271_v21 = vadd.f32 %v1266_v47, %v1254_v43  ;;  %v1374_v31 = vmul.f32 %v7910_v28, %v1372_v8  ;;  %v1993_v28 = vrot.slane %v1989_v16, 1  ;;  %v2116_v34 = vstv %s8249_s21  ;;  %s8396_s21 = sld [smem:[#allocation6 + $0x92]] }
 0x173   : > { %1885 = vrot.lane.b32.xlu0 %v1884_v38, %s7341_s18 }
 0x174   : > { %v1285_v51 = vpop.permute.xlu1 %1284  ;;  %v1378_v35 = vrot.slane %v1374_v31, 2  ;;  %v1995_v45 = vsel %vm293_vm0, %v1993_v28, %v1994_v27  ;;  %v8283_v31 = vld [vmem:[%s7460_s10 + $0x28] sm:$0xff] }
 0x175   : > { %v1289_v55 = vadd.f32 %v1285_v51, %v1272_v49  ;;  %v1283_v56 = vpop.permute.xlu0 %1282  ;;  %v2052_v49 = vstv %s8217_s15  ;;  %v2041_v51 = vrot.slane %v2037_v41, 2  ;;  %v2118_v28 = vmul.f32 %v8283_v31, %v2116_v34  ;;  %s8341_s15 = sld [smem:[#allocation6 + $0x8c]] }
 0x176   : > { %v1288_v59 = vadd.f32 %v1283_v56, %v1271_v21  ;;  %1917 = vrot.lane.b32.xlu1 %v1913_v40, %s7342_s23  ;;  %v2010_v40 = vrot.slane %v2006_v4, 1  ;;  %v1379_v48 = vsel %vm341_vm1, %v1377_v33, %v1378_v35  ;;  %v2054_v56 = vmul.f32 %v7927_v37, %v2052_v49 }
 0x177   : > { %1915 = vrot.lane.b32.xlu0 %v1914_v50, %s7342_s23  ;;  %v1295_v60 = vadd.f32 %v1293_v20, %v1289_v55  ;;  %v1424_v55 = vstv %s8226_s7  ;;  %v2053_v57 = vmul.f32 %v7931_v39, %v2052_v49  ;;  %v8262_v39 = vld [vmem:[%s7460_s10] sm:$0xff]  ;;  %v2089_v4 = vstv %s8247_s11  ;;  %s8353_s7 = sld [smem:[#allocation6 + $0x8e]] }
 0x178   : > { %v1305_v62 = vpop.permute.xlu1 %1304  ;;  %v1294_v2 = vadd.f32 %v1292_v52, %v1288_v59  ;;  %v2012_v21 = vsel %vm293_vm0, %v2010_v40, %v2011_v36  ;;  %v2040_v52 = vrot.slane %v2036_v42, 2  ;;  %v1458_v59 = vstv %s8229_s8  ;;  %s8368_s8 = sld [smem:[#allocation6 + $0x8f]] }
 0x179   : > { %v1303_v5 = vpop.permute.xlu0 %1302  ;;  %v1309_v9 = vadd.f32 %v1305_v62, %v1295_v60  ;;  %v8258_v62 = vld [vmem:[%s7460_s10 + $0x8] sm:$0xff]  ;;  %v2057_v0 = vrot.slane %v2053_v57, 2  ;;  %v2091_v41 = vmul.f32 %v8283_v31, %v2089_v4  ;;  %s8391_s11 = sld [smem:[#allocation6 + $0x91]] }
 0x17a   : > { %1934 = vrot.lane.b32.xlu1 %v1930_v53, %s7341_s18  ;;  %v1308_v13 = vadd.f32 %v1303_v5, %v1294_v2  ;;  %v2042_v61 = vsel %vm341_vm1, %v2040_v52, %v2041_v51  ;;  %v1426_v37 = vmul.f32 %v8258_v62, %v1424_v55  ;;  %v1425_v2 = vmul.f32 %v8262_v39, %v1424_v55 }
 0x17b   : > { %1932 = vrot.lane.b32.xlu0 %v1931_v3, %s7341_s18 }
 0x17c   : > { %v1319_v14 = vpop.permute.xlu1 %1318  ;;  %v1428_v12 = vadd.f32 %v1426_v37, %v1422_v6  ;;  %v1427_v15 = vadd.f32 %v1425_v2, %v1422_v6  ;;  %v2180_v2 = vstv %s8299_s25  ;;  %s8416_s25 = sld [smem:[#allocation6 + $0x97]] }
 0x17d   : > { %v1323_v17 = vadd.f32 %v1319_v14, %v1309_v9  ;;  %v1317_v18 = vpop.permute.xlu0 %1316  ;;  %v1460_v9 = vmul.f32 %v8258_v62, %v1458_v59 }
 0x17e   : > { %v1322_v22 = vadd.f32 %v1317_v18, %v1308_v13  ;;  %1954 = vrot.lane.b32.xlu1 %v1949_v1, %s7342_s23  ;;  %v2075_v13 = vstv %s8242_s26  ;;  %s8380_s26 = sld [smem:[#allocation6 + $0x66]] }
 0x17f   : > { %1952 = vrot.lane.b32.xlu0 %v1948_v10, %s7342_s23  ;;  %v1336_v24 = vadd.f32 %v1331_v7, %v1323_v17  ;;  %v2058_v7 = vrot.slane %v2054_v56, 2  ;;  %v1459_v10 = vmul.f32 %v8262_v39, %v1458_v59  ;;  %v1464_v18 = vrot.slane %v1460_v9, 1 }
 0x180   : > { %v1349_v26 = vpop.permute.xlu1 %1348  ;;  %v1335_v30 = vadd.f32 %v1332_v19, %v1322_v22  ;;  %v2077_v22 = vmul.f32 %v8283_v31, %v2075_v13  ;;  %v1552_v9 = vstv %s8308_s29  ;;  %s8431_s29 = sld [smem:[#allocation6 + $0x98]] }
 0x181   : > { %v1347_v32 = vpop.permute.xlu0 %1346  ;;  %v1353_v38 = vadd.f32 %v1349_v26, %v1336_v24  ;;  %v2059_v16 = vsel %vm341_vm1, %v2057_v0, %v2058_v7  ;;  %v1463_v19 = vrot.slane %v1459_v10, 1  ;;  %v8289_v24 = vld [vmem:[%s7460_s10 + $0x20] sm:$0xff]  ;;  %v2133_v26 = vstv %s8265_s20  ;;  %s8402_s20 = sld [smem:[#allocation6 + $0x69]] }
 0x182   : > { %1968 = vrot.lane.b32.xlu1 %v1963_v23, %s7341_s18  ;;  %v1352_v43 = vadd.f32 %v1347_v32, %v1335_v30  ;;  %v1505_v23 = vstv %s8253_s12  ;;  %v2117_v29 = vmul.f32 %v8289_v24, %v2116_v34  ;;  %v2135_v42 = vmul.f32 %v8283_v31, %v2133_v26  ;;  %v8344_v34 = vld [vmem:[%s7460_s10 + $0x10] sm:$0xff]  ;;  %s8398_s12 = sld [smem:[#allocation6 + $0x94]] }
 0x183   : > { %1966 = vrot.lane.b32.xlu0 %v1962_v25, %s7341_s18  ;;  %v2076_v25 = vmul.f32 %v8289_v24, %v2075_v13  ;;  %v2182_v10 = vmul.f32 %v8283_v31, %v2180_v2  ;;  %v1586_v13 = vstv %s8311_s30  ;;  %s8440_s30 = sld [smem:[#allocation6 + $0x6c]] }
 0x184   : > { %v1366_v44 = vpop.permute.xlu1 %1365  ;;  %v2121_v49 = vrot.slane %v2117_v29, 1  ;;  %v2139_v52 = vrot.slane %v2135_v42, 1  ;;  %v2208_v29 = vstv %s8322_s4  ;;  %s8443_s4 = sld [smem:[#allocation6 + $0x6f]] }
 0x185   : > { %v1370_v46 = vadd.f32 %v1366_v44, %v1353_v38  ;;  %v1364_v47 = vpop.permute.xlu0 %1363  ;;  %v1507_v38 = vmul.f32 %v8258_v62, %v1505_v23  ;;  %v2090_v44 = vmul.f32 %v8289_v24, %v2089_v4  ;;  %v2210_v42 = vmul.f32 %v8258_v62, %v2208_v29 }
 0x186   : > { %v1369_v50 = vadd.f32 %v1364_v47, %v1352_v43  ;;  %1998 = vrot.lane.b32.xlu1 %v1994_v27, %s7342_s23 }
 0x187   : > { %1996 = vrot.lane.b32.xlu0 %v1995_v45, %s7342_s23  ;;  %v1383_v20 = vadd.f32 %v1378_v35, %v1370_v46  ;;  %v1465_v35 = vsel %vm293_vm0, %v1463_v19, %v1464_v18  ;;  %v2134_v45 = vmul.f32 %v8289_v24, %v2133_v26  ;;  %v1587_v26 = vmul.f32 %v8344_v34, %v1586_v13 }
 0x188   : > { %v1396_v53 = vpop.permute.xlu1 %1395  ;;  %v1382_v54 = vadd.f32 %v1379_v48, %v1369_v50  ;;  %v2122_v48 = vrot.slane %v2118_v28, 1  ;;  %v2163_v50 = vstv %s8278_s24  ;;  %s8407_s24 = sld [smem:[#allocation6 + $0x95]] }
 0x189   : > { %v1394_v58 = vpop.permute.xlu0 %1393  ;;  %v1400_v60 = vadd.f32 %v1396_v53, %v1383_v20  ;;  %v2165_v55 = vmul.f32 %v8283_v31, %v2163_v50  ;;  %v2164_v56 = vmul.f32 %v8289_v24, %v2163_v50 }
 0x18a   : > { %2015 = vrot.lane.b32.xlu1 %v2011_v36, %s7341_s18  ;;  %v1399_v3 = vadd.f32 %v1394_v58, %v1382_v54  ;;  %v1506_v36 = vmul.f32 %v8262_v39, %v1505_v23  ;;  %v2138_v54 = vrot.slane %v2134_v45, 1  ;;  %v2123_v59 = vsel %vm293_vm0, %v2121_v49, %v2122_v48 }
 0x18b   : > { %2013 = vrot.lane.b32.xlu0 %v2012_v21, %s7341_s18  ;;  %v2168_v0 = vrot.slane %v2164_v56, 2  ;;  %v2186_v23 = vrot.slane %v2182_v10, 2  ;;  %v2209_v45 = vmul.f32 %v8262_v39, %v2208_v29 }
 0x18c   : > { %v1413_v5 = vpop.permute.xlu1 %1412  ;;  %v1510_v21 = vrot.slane %v1506_v36, 2  ;;  %v2140_v6 = vsel %vm293_vm0, %v2138_v54, %v2139_v52 }
 0x18d   : > { %v1417_v1 = vadd.f32 %v1413_v5, %v1400_v60  ;;  %v1411_v8 = vpop.permute.xlu0 %1410 }
 0x18e   : > { %v1416_v11 = vadd.f32 %v1411_v8, %v1399_v3  ;;  %2045 = vrot.lane.b32.xlu1 %v2041_v51, %s7342_s23  ;;  %v1511_v51 = vrot.slane %v1507_v38, 2  ;;  %v1591_v38 = vrot.slane %v1587_v26, 1 }
 0x18f   : > { %6703 = vst.msk [vmem:[%s7853_s9 + $0x28] sm:$0x3f] %vm641_vm2, %v1417_v1  ;;  %2043 = vrot.lane.b32.xlu0 %v2042_v61, %s7342_s23 }
 0x190   : > { %6702 = vst.msk [vmem:[%s7853_s9 + $0x20] sm:$0xff] %vm639_vm3, %v1416_v11  ;;  %v1438_v14 = vpop.permute.xlu1 %1437  ;;  %v1512_v37 = vsel %vm341_vm1, %v1510_v21, %v1511_v51  ;;  %v2181_v11 = vmul.f32 %v8289_v24, %v2180_v2 }
 0x191   : > { %v1436_v17 = vpop.permute.xlu0 %1435  ;;  %v1442_v63 = vadd.f32 %v1438_v14, %v1428_v12 }
 0x192   : > { %2062 = vrot.lane.b32.xlu1 %v2058_v7, %s7341_s18  ;;  %v1441_v30 = vadd.f32 %v1436_v17, %v1427_v15  ;;  %v2169_v7 = vrot.slane %v2165_v55, 2 }
 0x193   : > { %2060 = vrot.lane.b32.xlu0 %v2059_v16, %s7341_s18  ;;  %v8338_v16 = vld [vmem:[%s7460_s10 + $0x18] sm:$0xff] }
 0x194   : > { %v1452_v27 = vpop.permute.xlu1 %1451  ;;  %v2170_v15 = vsel %vm341_vm1, %v2168_v0, %v2169_v7  ;;  %v1554_v17 = vmul.f32 %v8338_v16, %v1552_v9 }
 0x195   : > { %v1456_v32 = vadd.f32 %v1452_v27, %v1442_v63  ;;  %v1450_v33 = vpop.permute.xlu0 %1449  ;;  %v2185_v63 = vrot.slane %v2181_v11, 2 }
 0x196   : > { %v1455_v40 = vadd.f32 %v1450_v33, %v1441_v30  ;;  %2082 = vrot.lane.b32.xlu1 %v2077_v22, %s7342_s23  ;;  %v1553_v22 = vmul.f32 %v8344_v34, %v1552_v9  ;;  %v1588_v30 = vmul.f32 %v8338_v16, %v1586_v13 }
 0x197   : > { %2080 = vrot.lane.b32.xlu0 %v2076_v25, %s7342_s23  ;;  %v1469_v43 = vadd.f32 %v1464_v18, %v1456_v32 }
 0x198   : > { %v1482_v46 = vpop.permute.xlu1 %1481  ;;  %v1468_v47 = vadd.f32 %v1465_v35, %v1455_v40  ;;  %v2187_v35 = vsel %vm341_vm1, %v2185_v63, %v2186_v23  ;;  %v1592_v40 = vrot.slane %v1588_v30, 1 }
 0x199   : > { %v1480_v20 = vpop.permute.xlu0 %1479  ;;  %v1486_v53 = vadd.f32 %v1482_v46, %v1469_v43  ;;  %v1633_v43 = vstv %s8333_s19  ;;  %v2222_v46 = vstv %s8327_s5  ;;  %s8449_s5 = sld [smem:[#allocation7 + $0x4]] }
 0x19a   : > { %2096 = vrot.lane.b32.xlu1 %v2091_v41, %s7341_s18  ;;  %v1485_v57 = vadd.f32 %v1480_v20, %v1468_v47  ;;  %v2249_v41 = vstv %s8329_s6  ;;  %v2266_v47 = vstv %s8341_s15  ;;  %v1635_v54 = vmul.f32 %v8338_v16, %v1633_v43  ;;  %s8456_s6 = sld [smem:[#allocation6 + $0x9a]] }
 0x19b   : > { %2094 = vrot.lane.b32.xlu0 %v2090_v44, %s7341_s18  ;;  %v2251_v50 = vmul.f32 %v8258_v62, %v2249_v41  ;;  %v2250_v20 = vmul.f32 %v8262_v39, %v2249_v41  ;;  %v2224_v56 = vmul.f32 %v8258_v62, %v2222_v46  ;;  %s8461_s19 = sld [smem:[#allocation6 + $0x9b]] }
 0x19c   : > { %v1499_v58 = vpop.permute.xlu1 %1498  ;;  %v1639_v0 = vrot.slane %v1635_v54, 2  ;;  %s8463_s15 = sld [smem:[#allocation6 + $0x9d]] }
 0x19d   : > { %v1503_v60 = vadd.f32 %v1499_v58, %v1486_v53  ;;  %v1497_v61 = vpop.permute.xlu0 %1496  ;;  %v1634_v53 = vmul.f32 %v8344_v34, %v1633_v43  ;;  %v2255_v2 = vrot.slane %v2251_v50, 1 }
 0x19e   : > { %v1502_v3 = vadd.f32 %v1497_v61, %v1485_v57  ;;  %2126 = vrot.lane.b32.xlu1 %v2122_v48, %s7342_s23  ;;  %v2268_v57 = vmul.f32 %v8258_v62, %v2266_v47 }
 0x19f   : > { %2124 = vrot.lane.b32.xlu0 %v2123_v59, %s7342_s23  ;;  %v1516_v5 = vadd.f32 %v1511_v51, %v1503_v60  ;;  %v2223_v59 = vmul.f32 %v8262_v39, %v2222_v46  ;;  %v2267_v60 = vmul.f32 %v8262_v39, %v2266_v47 }
 0x1a0   : > { %v1529_v1 = vpop.permute.xlu1 %1528  ;;  %v1515_v8 = vadd.f32 %v1512_v37, %v1502_v3  ;;  %v2254_v3 = vrot.slane %v2250_v20, 1  ;;  %v2336_v20 = vstv %s8391_s11  ;;  %s8510_s11 = sld [smem:[#allocation6 + $0x75]] }
 0x1a1   : > { %v1527_v12 = vpop.permute.xlu0 %1526  ;;  %v1533_v14 = vadd.f32 %v1529_v1, %v1516_v5  ;;  %v2296_v5 = vstv %s8353_s7  ;;  %v2272_v1 = vrot.slane %v2268_v57, 1  ;;  %v2271_v9 = vrot.slane %v2267_v60, 1  ;;  %s8467_s7 = sld [smem:[#allocation6 + $0x72]] }
 0x1a2   : > { %2143 = vrot.lane.b32.xlu1 %v2139_v52, %s7341_s18  ;;  %v1532_v18 = vadd.f32 %v1527_v12, %v1515_v8  ;;  %v1593_v52 = vsel %vm293_vm0, %v1591_v38, %v1592_v40  ;;  %v2298_v10 = vmul.f32 %v8258_v62, %v2296_v5  ;;  %v2297_v11 = vmul.f32 %v8262_v39, %v2296_v5 }
 0x1a3   : > { %2141 = vrot.lane.b32.xlu0 %v2140_v6, %s7341_s18  ;;  %v2273_v63 = vsel %vm293_vm0, %v2271_v9, %v2272_v1  ;;  %v2338_v57 = vmul.f32 %v8338_v16, %v2336_v20  ;;  %v2337_v60 = vmul.f32 %v8344_v34, %v2336_v20 }
 0x1a4   : > { %v1546_v19 = vpop.permute.xlu1 %1545 }
 0x1a5   : > { %v1550_v25 = vadd.f32 %v1546_v19, %v1533_v14  ;;  %v1544_v4 = vpop.permute.xlu0 %1543  ;;  %v2256_v14 = vsel %vm293_vm0, %v2254_v3, %v2255_v2  ;;  %v2313_v19 = vstv %s8368_s8  ;;  %s8473_s8 = sld [smem:[#allocation6 + $0x9e]] }
 0x1a6   : > { %v1549_v27 = vadd.f32 %v1544_v4, %v1532_v18  ;;  %2173 = vrot.lane.b32.xlu1 %v2169_v7, %s7342_s23  ;;  %v1638_v7 = vrot.slane %v1634_v53, 2  ;;  %v2301_v4 = vrot.slane %v2297_v11, 2  ;;  %v2314_v29 = vmul.f32 %v8262_v39, %v2313_v19 }
 0x1a7   : > { %2171 = vrot.lane.b32.xlu0 %v2170_v15, %s7342_s23  ;;  %v1556_v28 = vadd.f32 %v1554_v17, %v1550_v25  ;;  %v2302_v25 = vrot.slane %v2298_v10, 2 }
 0x1a8   : > { %v1566_v32 = vpop.permute.xlu1 %1565  ;;  %v1555_v33 = vadd.f32 %v1553_v22, %v1549_v27  ;;  %v1640_v18 = vsel %vm341_vm1, %v1638_v7, %v1639_v0  ;;  %v1680_v27 = vstv %s8377_s22  ;;  %s8486_s22 = sld [smem:[#allocation6 + $0xa0]] }
 0x1a9   : > { %v1564_v36 = vpop.permute.xlu0 %1563  ;;  %v1570_v44 = vadd.f32 %v1566_v32, %v1556_v28  ;;  %v2315_v28 = vmul.f32 %v8258_v62, %v2313_v19  ;;  %v1682_v38 = vmul.f32 %v8283_v31, %v1680_v27 }
 0x1aa   : > { %2190 = vrot.lane.b32.xlu1 %v2186_v23, %s7341_s18  ;;  %v1569_v48 = vadd.f32 %v1564_v36, %v1555_v33  ;;  %v1714_v33 = vstv %s8380_s26  ;;  %v2303_v36 = vsel %vm341_vm1, %v2301_v4, %v2302_v25  ;;  %s8501_s26 = sld [smem:[#allocation6 + $0xa1]] }
 0x1ab   : > { %2188 = vrot.lane.b32.xlu0 %v2187_v35, %s7341_s18  ;;  %v2319_v43 = vrot.slane %v2315_v28, 2  ;;  %v1715_v47 = vmul.f32 %v8289_v24, %v1714_v33 }
 0x1ac   : > { %v1580_v49 = vpop.permute.xlu1 %1579 }
 0x1ad   : > { %v1584_v21 = vadd.f32 %v1580_v49, %v1570_v44  ;;  %v1578_v51 = vpop.permute.xlu0 %1577  ;;  %v2318_v44 = vrot.slane %v2314_v29, 2  ;;  %v1719_v54 = vrot.slane %v1715_v47, 1 }
 0x1ae   : > { %v1583_v55 = vadd.f32 %v1578_v51, %v1569_v48  ;;  %2215 = vrot.lane.b32.xlu1 %v2210_v42, %s7342_s23  ;;  %v1681_v42 = vmul.f32 %v8289_v24, %v1680_v27  ;;  %v1716_v48 = vmul.f32 %v8283_v31, %v1714_v33 }
 0x1af   : > { %2213 = vrot.lane.b32.xlu0 %v2209_v45, %s7342_s23  ;;  %v1597_v58 = vadd.f32 %v1592_v40, %v1584_v21 }
 0x1b0   : > { %v1610_v61 = vpop.permute.xlu1 %1609  ;;  %v1596_v37 = vadd.f32 %v1593_v52, %v1583_v55  ;;  %v2320_v52 = vsel %vm341_vm1, %v2318_v44, %v2319_v43  ;;  %v1720_v55 = vrot.slane %v1716_v48, 1 }
 0x1b1   : > { %v1608_v6 = vpop.permute.xlu0 %1607  ;;  %v1614_v8 = vadd.f32 %v1610_v61, %v1597_v58  ;;  %v1761_v58 = vstv %s8402_s20  ;;  %v2350_v61 = vstv %s8396_s21  ;;  %s8513_s21 = sld [smem:[#allocation6 + $0x78]] }
 0x1b2   : > { %2229 = vrot.lane.b32.xlu1 %v2224_v56, %s7341_s18  ;;  %v1613_v12 = vadd.f32 %v1608_v6, %v1596_v37  ;;  %v2377_v56 = vstv %s8398_s12  ;;  %v2394_v37 = vstv %s8407_s24  ;;  %v1763_v9 = vmul.f32 %v8283_v31, %v1761_v58  ;;  %s8524_s12 = sld [smem:[#allocation6 + $0xa3]] }
 0x1b3   : > { %2227 = vrot.lane.b32.xlu0 %v2223_v59, %s7341_s18  ;;  %v2379_v5 = vmul.f32 %v8338_v16, %v2377_v56  ;;  %v2378_v6 = vmul.f32 %v8344_v34, %v2377_v56  ;;  %v2352_v11 = vmul.f32 %v8338_v16, %v2350_v61  ;;  %s8529_s20 = sld [smem:[#allocation6 + $0xa4]] }
 0x1b4   : > { %v1627_v13 = vpop.permute.xlu1 %1626  ;;  %v1767_v4 = vrot.slane %v1763_v9, 2  ;;  %s8531_s24 = sld [smem:[#allocation6 + $0xa6]] }
 0x1b5   : > { %v1631_v15 = vadd.f32 %v1627_v13, %v1614_v8  ;;  %v1625_v17 = vpop.permute.xlu0 %1624  ;;  %v1762_v8 = vmul.f32 %v8289_v24, %v1761_v58  ;;  %v2383_v19 = vrot.slane %v2379_v5, 1  ;;  %v1811_v58 = vstv %s8449_s5  ;;  %s8573_s5 = sld [smem:[#allocation6 + $0x7e]] }
 0x1b6   : > { %v1630_v22 = vadd.f32 %v1625_v17, %v1613_v12  ;;  %2259 = vrot.lane.b32.xlu1 %v2255_v2, %s7342_s23  ;;  %v2396_v12 = vmul.f32 %v8338_v16, %v2394_v37 }
 0x1b7   : > { %2257 = vrot.lane.b32.xlu0 %v2256_v14, %s7342_s23  ;;  %v1644_v23 = vadd.f32 %v1639_v0, %v1631_v15  ;;  %v2351_v14 = vmul.f32 %v8344_v34, %v2350_v61  ;;  %v2395_v15 = vmul.f32 %v8344_v34, %v2394_v37 }
 0x1b8   : > { %v1657_v26 = vpop.permute.xlu1 %1656  ;;  %v1643_v30 = vadd.f32 %v1640_v18, %v1630_v22  ;;  %v2382_v22 = vrot.slane %v2378_v6, 1 }
 0x1b9   : > { %v1655_v32 = vpop.permute.xlu0 %1654  ;;  %v1661_v35 = vadd.f32 %v1657_v26, %v1644_v23  ;;  %v2424_v23 = vstv %s8416_s25  ;;  %v2400_v26 = vrot.slane %v2396_v12, 1  ;;  %v2399_v27 = vrot.slane %v2395_v15, 1  ;;  %s8535_s25 = sld [smem:[#allocation6 + $0x7b]] }
 0x1ba   : > { %2276 = vrot.lane.b32.xlu1 %v2272_v1, %s7341_s18  ;;  %v1660_v40 = vadd.f32 %v1655_v32, %v1643_v30  ;;  %v1721_v1 = vsel %vm293_vm0, %v1719_v54, %v1720_v55  ;;  %v2426_v28 = vmul.f32 %v8338_v16, %v2424_v23  ;;  %v2425_v29 = vmul.f32 %v8344_v34, %v2424_v23 }
 0x1bb   : > { %2274 = vrot.lane.b32.xlu0 %v2273_v63, %s7341_s18  ;;  %v2401_v44 = vsel %vm293_vm0, %v2399_v27, %v2400_v26  ;;  %v2505_v12 = vstv %s8463_s15  ;;  %s8592_s15 = sld [smem:[#allocation6 + $0xad]] }
 0x1bc   : > { %v1674_v41 = vpop.permute.xlu1 %1673 }
 0x1bd   : > { %v1678_v45 = vadd.f32 %v1674_v41, %v1661_v35  ;;  %v1672_v46 = vpop.permute.xlu0 %1671  ;;  %v2384_v35 = vsel %vm293_vm0, %v2382_v22, %v2383_v19  ;;  %v2441_v41 = vstv %s8431_s29  ;;  %s8540_s29 = sld [smem:[#allocation6 + $0xa7]] }
 0x1be   : > { %v1677_v49 = vadd.f32 %v1672_v46, %v1660_v40  ;;  %2306 = vrot.lane.b32.xlu1 %v2302_v25, %s7342_s23  ;;  %v1766_v25 = vrot.slane %v1762_v8, 2  ;;  %v2429_v46 = vrot.slane %v2425_v29, 2  ;;  %v2442_v20 = vmul.f32 %v8344_v34, %v2441_v41 }
 0x1bf   : > { %2304 = vrot.lane.b32.xlu0 %v2303_v36, %s7342_s23  ;;  %v1684_v50 = vadd.f32 %v1682_v38, %v1678_v45  ;;  %v2430_v45 = vrot.slane %v2426_v28, 2 }
 0x1c0   : > { %v1694_v21 = vpop.permute.xlu1 %1693  ;;  %v1683_v51 = vadd.f32 %v1681_v42, %v1677_v49  ;;  %v1768_v40 = vsel %vm341_vm1, %v1766_v25, %v1767_v4  ;;  %v1813_v49 = vstv %s8440_s30  ;;  %v2506_v25 = vmul.f32 %v8289_v24, %v2505_v12  ;;  %s8549_s30 = sld [smem:[#allocation6 + $0xa9]] }
 0x1c1   : > { %v1692_v53 = vpop.permute.xlu0 %1691  ;;  %v1698_v59 = vadd.f32 %v1694_v21, %v1684_v50  ;;  %v2443_v50 = vmul.f32 %v8338_v16, %v2441_v41  ;;  %v1815_v54 = vmul.f32 %v8258_v62, %v1813_v49 }
 0x1c2   : > { %2323 = vrot.lane.b32.xlu1 %v2319_v43, %s7341_s18  ;;  %v1697_v2 = vadd.f32 %v1692_v53, %v1683_v51  ;;  %v1847_v51 = vstv %s8443_s4  ;;  %v2431_v53 = vsel %vm341_vm1, %v2429_v46, %v2430_v45  ;;  %s8564_s4 = sld [smem:[#allocation6 + $0xaa]] }
 0x1c3   : > { %2321 = vrot.lane.b32.xlu0 %v2320_v52, %s7341_s18  ;;  %v1817_v6 = vadd.f32 %v1815_v54, %v1811_v58 }
 0x1c4   : > { %v1708_v3 = vpop.permute.xlu1 %1707 }
 0x1c5   : > { %v1712_v7 = vadd.f32 %v1708_v3, %v1698_v59  ;;  %v1706_v0 = vpop.permute.xlu0 %1705  ;;  %v2447_v59 = vrot.slane %v2443_v50, 2  ;;  %v1848_v3 = vmul.f32 %v8262_v39, %v1847_v51 }
 0x1c6   : > { %v1711_v10 = vadd.f32 %v1706_v0, %v1697_v2  ;;  %2343 = vrot.lane.b32.xlu1 %v2338_v57, %s7342_s23  ;;  %v1849_v2 = vmul.f32 %v8258_v62, %v1847_v51 }
 0x1c7   : > { %2341 = vrot.lane.b32.xlu0 %v2337_v60, %s7342_s23  ;;  %v1725_v13 = vadd.f32 %v1720_v55, %v1712_v7  ;;  %v1814_v55 = vmul.f32 %v8262_v39, %v1813_v49  ;;  %v2446_v60 = vrot.slane %v2442_v20, 2  ;;  %v2464_v7 = vstv %s8456_s6  ;;  %s8576_s6 = sld [smem:[#allocation6 + $0x81]] }
 0x1c8   : > { %v1738_v17 = vpop.permute.xlu1 %1737  ;;  %v1724_v18 = vadd.f32 %v1721_v1, %v1711_v10  ;;  %v1853_v10 = vrot.slane %v1849_v2, 1 }
 0x1c9   : > { %v1736_v63 = vpop.permute.xlu0 %1735  ;;  %v1742_v30 = vadd.f32 %v1738_v17, %v1725_v13  ;;  %v1816_v1 = vadd.f32 %v1814_v55, %v1811_v58  ;;  %v2448_v8 = vsel %vm341_vm1, %v2446_v60, %v2447_v59  ;;  %v2466_v13 = vmul.f32 %v8283_v31, %v2464_v7 }
 0x1ca   : > { %2357 = vrot.lane.b32.xlu1 %v2352_v11, %s7341_s18  ;;  %v1741_v32 = vadd.f32 %v1736_v63, %v1724_v18  ;;  %v1852_v11 = vrot.slane %v1848_v3, 1  ;;  %v2465_v17 = vmul.f32 %v8289_v24, %v2464_v7  ;;  %v2478_v18 = vstv %s8461_s19  ;;  %s8587_s19 = sld [smem:[#allocation6 + $0xac]] }
 0x1cb   : > { %2355 = vrot.lane.b32.xlu0 %v2351_v14, %s7341_s18  ;;  %v1894_v14 = vstv %s8467_s7  ;;  %v2507_v63 = vmul.f32 %v8283_v31, %v2505_v12  ;;  %s8594_s7 = sld [smem:[#allocation6 + $0xaf]] }
 0x1cc   : > { %v1755_v33 = vpop.permute.xlu1 %1754  ;;  %v1895_v27 = vmul.f32 %v8262_v39, %v1894_v14  ;;  %v1896_v28 = vmul.f32 %v8258_v62, %v1894_v14 }
 0x1cd   : > { %v1759_v36 = vadd.f32 %v1755_v33, %v1742_v30  ;;  %v1753_v38 = vpop.permute.xlu0 %1752  ;;  %v1854_v30 = vsel %vm293_vm0, %v1852_v11, %v1853_v10 }
 0x1ce   : > { %v1758_v42 = vadd.f32 %v1753_v38, %v1741_v32  ;;  %2387 = vrot.lane.b32.xlu1 %v2383_v19, %s7342_s23  ;;  %v2522_v19 = vstv %s8473_s8  ;;  %v2480_v32 = vmul.f32 %v8283_v31, %v2478_v18  ;;  %v1899_v46 = vrot.slane %v1895_v27, 2  ;;  %s8598_s8 = sld [smem:[#allocation6 + $0x84]] }
 0x1cf   : > { %2385 = vrot.lane.b32.xlu0 %v2384_v35, %s7342_s23  ;;  %v1772_v43 = vadd.f32 %v1767_v4, %v1759_v36  ;;  %v2524_v33 = vmul.f32 %v8283_v31, %v2522_v19  ;;  %v2479_v36 = vmul.f32 %v8289_v24, %v2478_v18  ;;  %v2523_v38 = vmul.f32 %v8289_v24, %v2522_v19 }
 0x1d0   : > { %v1785_v47 = vpop.permute.xlu1 %1784  ;;  %v1771_v48 = vadd.f32 %v1768_v40, %v1758_v42  ;;  %v2511_v42 = vrot.slane %v2507_v63, 1 }
 0x1d1   : > { %v1783_v21 = vpop.permute.xlu0 %1782  ;;  %v1789_v52 = vadd.f32 %v1785_v47, %v1772_v43  ;;  %v2510_v43 = vrot.slane %v2506_v25, 1  ;;  %v1900_v47 = vrot.slane %v1896_v28, 2  ;;  %v2527_v50 = vrot.slane %v2523_v38, 1 }
 0x1d2   : > { %2404 = vrot.lane.b32.xlu1 %v2400_v26, %s7341_s18  ;;  %v1788_v56 = vadd.f32 %v1783_v21, %v1771_v48  ;;  %v2528_v48 = vrot.slane %v2524_v33, 1  ;;  %v2597_v25 = vstv %s8524_s12  ;;  %s8639_s12 = sld [smem:[#allocation6 + $0x8a]] }
 0x1d3   : > { %2402 = vrot.lane.b32.xlu0 %v2401_v44, %s7341_s18  ;;  %v2552_v44 = vstv %s8486_s22  ;;  %v2599_v33 = vmul.f32 %v8258_v62, %v2597_v25  ;;  %v2598_v38 = vmul.f32 %v8262_v39, %v2597_v25  ;;  %s8603_s22 = sld [smem:[#allocation6 + $0xb0]] }
 0x1d4   : > { %v1802_v57 = vpop.permute.xlu1 %1801  ;;  %v2554_v20 = vmul.f32 %v8283_v31, %v2552_v44  ;;  %v2553_v21 = vmul.f32 %v8289_v24, %v2552_v44  ;;  %v2529_v60 = vsel %vm293_vm0, %v2527_v50, %v2528_v48 }
 0x1d5   : > { %v1806_v61 = vadd.f32 %v1802_v57, %v1789_v52  ;;  %v1800_v37 = vpop.permute.xlu0 %1799  ;;  %v2569_v57 = vstv %s8501_s26  ;;  %s8612_s26 = sld [smem:[#allocation6 + $0xb2]] }
 0x1d6   : > { %v1805_v5 = vadd.f32 %v1800_v37, %v1788_v56  ;;  %2434 = vrot.lane.b32.xlu1 %v2430_v45, %s7342_s23  ;;  %v1901_v56 = vsel %vm341_vm1, %v1899_v46, %v1900_v47  ;;  %v2557_v37 = vrot.slane %v2553_v21, 2  ;;  %v2570_v7 = vmul.f32 %v8289_v24, %v2569_v57 }
 0x1d7   : > { %6733 = vst.msk [vmem:[%s7853_s9 + $0x38] sm:$0x3f] %vm641_vm2, %v1806_v61  ;;  %2432 = vrot.lane.b32.xlu0 %v2431_v53, %s7342_s23  ;;  %v2512_v53 = vsel %vm293_vm0, %v2510_v43, %v2511_v42  ;;  %v2558_v61 = vrot.slane %v2554_v20, 2 }
 0x1d8   : > { %6732 = vst.msk [vmem:[%s7853_s9 + $0x30] sm:$0xff] %vm639_vm3, %v1805_v5  ;;  %v1827_v0 = vpop.permute.xlu1 %1826  ;;  %v1941_v5 = vstv %s8510_s11  ;;  %s8627_s11 = sld [smem:[#allocation6 + $0xb3]] }
 0x1d9   : > { %v1825_v9 = vpop.permute.xlu0 %1824  ;;  %v1831_v15 = vadd.f32 %v1827_v0, %v1817_v6  ;;  %v2571_v6 = vmul.f32 %v8283_v31, %v2569_v57 }
 0x1da   : > { %2451 = vrot.lane.b32.xlu1 %v2447_v59, %s7341_s18  ;;  %v1830_v22 = vadd.f32 %v1825_v9, %v1816_v1  ;;  %v1975_v1 = vstv %s8513_s21  ;;  %v2559_v9 = vsel %vm341_vm1, %v2557_v37, %v2558_v61  ;;  %s8636_s21 = sld [smem:[#allocation6 + $0x87]] }
 0x1db   : > { %2449 = vrot.lane.b32.xlu0 %v2448_v8, %s7341_s18  ;;  %v2575_v14 = vrot.slane %v2571_v6, 2  ;;  %v1976_v19 = vmul.f32 %v8344_v34, %v1975_v1 }
 0x1dc   : > { %v1841_v23 = vpop.permute.xlu1 %1840 }
 0x1dd   : > { %v1845_v4 = vadd.f32 %v1841_v23, %v1831_v15  ;;  %v1839_v26 = vpop.permute.xlu0 %1838  ;;  %v2574_v15 = vrot.slane %v2570_v7, 2  ;;  %v1980_v28 = vrot.slane %v1976_v19, 1 }
 0x1de   : > { %v1844_v29 = vadd.f32 %v1839_v26, %v1830_v22  ;;  %2471 = vrot.lane.b32.xlu1 %v2466_v13, %s7342_s23  ;;  %v1942_v13 = vmul.f32 %v8344_v34, %v1941_v5  ;;  %v1977_v22 = vmul.f32 %v8338_v16, %v1975_v1 }
 0x1df   : > { %2469 = vrot.lane.b32.xlu0 %v2465_v17, %s7342_s23  ;;  %v1858_v35 = vadd.f32 %v1853_v10, %v1845_v4  ;;  %v1943_v10 = vmul.f32 %v8338_v16, %v1941_v5 }
 0x1e0   : > { %v1871_v40 = vpop.permute.xlu1 %1870  ;;  %v1857_v41 = vadd.f32 %v1854_v30, %v1844_v29  ;;  %v2576_v30 = vsel %vm341_vm1, %v2574_v15, %v2575_v14  ;;  %v1981_v29 = vrot.slane %v1977_v22, 1 }
 0x1e1   : > { %v1869_v45 = vpop.permute.xlu0 %1868  ;;  %v1875_v49 = vadd.f32 %v1871_v40, %v1858_v35  ;;  %v2022_v35 = vstv %s8535_s25  ;;  %v2611_v40 = vstv %s8529_s20  ;;  %s8645_s20 = sld [smem:[#allocation7 + $0x5]] }
 0x1e2   : > { %2485 = vrot.lane.b32.xlu1 %v2480_v32, %s7341_s18  ;;  %v1874_v51 = vadd.f32 %v1869_v45, %v1857_v41  ;;  %v2638_v32 = vstv %s8531_s24  ;;  %v2655_v41 = vstv %s8540_s29  ;;  %v2024_v50 = vmul.f32 %v8338_v16, %v2022_v35  ;;  %s8652_s24 = sld [smem:[#allocation6 + $0xb5]] }
 0x1e3   : > { %2483 = vrot.lane.b32.xlu0 %v2479_v36, %s7341_s18  ;;  %v2640_v44 = vmul.f32 %v8258_v62, %v2638_v32  ;;  %v2639_v45 = vmul.f32 %v8262_v39, %v2638_v32  ;;  %v2613_v21 = vmul.f32 %v8258_v62, %v2611_v40  ;;  %s8657_s25 = sld [smem:[#allocation6 + $0xb6]] }
 0x1e4   : > { %v1888_v52 = vpop.permute.xlu1 %1887  ;;  %v2028_v37 = vrot.slane %v2024_v50, 2  ;;  %v2766_v50 = vstv %s8594_s7  ;;  %s8659_s29 = sld [smem:[#allocation6 + $0xb8]] }
 0x1e5   : > { %v1892_v54 = vadd.f32 %v1888_v52, %v1875_v49  ;;  %v1886_v55 = vpop.permute.xlu0 %1885  ;;  %v2023_v49 = vmul.f32 %v8344_v34, %v2022_v35  ;;  %v2644_v57 = vrot.slane %v2640_v44, 1  ;;  %s8732_s7 = sld [smem:[#allocation6 + $0xbe]] }
 0x1e6   : > { %v1891_v58 = vadd.f32 %v1886_v55, %v1874_v51  ;;  %2515 = vrot.lane.b32.xlu1 %v2511_v42, %s7342_s23  ;;  %v2657_v51 = vmul.f32 %v8258_v62, %v2655_v41 }
 0x1e7   : > { %2513 = vrot.lane.b32.xlu0 %v2512_v53, %s7342_s23  ;;  %v1905_v59 = vadd.f32 %v1900_v47, %v1892_v54  ;;  %v2612_v53 = vmul.f32 %v8262_v39, %v2611_v40  ;;  %v2656_v54 = vmul.f32 %v8262_v39, %v2655_v41 }
 0x1e8   : > { %v1918_v2 = vpop.permute.xlu1 %1917  ;;  %v1904_v3 = vadd.f32 %v1901_v56, %v1891_v58  ;;  %v2643_v58 = vrot.slane %v2639_v45, 1 }
 0x1e9   : > { %v1916_v0 = vpop.permute.xlu0 %1915  ;;  %v1922_v8 = vadd.f32 %v1918_v2, %v1905_v59  ;;  %v2685_v59 = vstv %s8549_s30  ;;  %v2661_v2 = vrot.slane %v2657_v51, 1  ;;  %v2660_v5 = vrot.slane %v2656_v54, 1  ;;  %s8663_s30 = sld [smem:[#allocation6 + $0x8d]] }
 0x1ea   : > { %2532 = vrot.lane.b32.xlu1 %v2528_v48, %s7341_s18  ;;  %v1921_v11 = vadd.f32 %v1916_v0, %v1904_v3  ;;  %v1982_v48 = vsel %vm293_vm0, %v1980_v28, %v1981_v29  ;;  %v2687_v6 = vmul.f32 %v8258_v62, %v2685_v59  ;;  %v2686_v7 = vmul.f32 %v8262_v39, %v2685_v59 }
 0x1eb   : > { %2530 = vrot.lane.b32.xlu0 %v2529_v60, %s7341_s18  ;;  %v2662_v15 = vsel %vm293_vm0, %v2660_v5, %v2661_v2  ;;  %v2783_v54 = vstv %s8603_s22  ;;  %s8739_s22 = sld [smem:[#allocation6 + $0xc1]] }
 0x1ec   : > { %v1935_v12 = vpop.permute.xlu1 %1934 }
 0x1ed   : > { %v1939_v17 = vadd.f32 %v1935_v12, %v1922_v8  ;;  %v1933_v18 = vpop.permute.xlu0 %1932  ;;  %v2645_v8 = vsel %vm293_vm0, %v2643_v58, %v2644_v57  ;;  %v2702_v12 = vstv %s8564_s4  ;;  %v2767_v58 = vmul.f32 %v8344_v34, %v2766_v50  ;;  %s8675_s4 = sld [smem:[#allocation6 + $0xb9]] }
 0x1ee   : > { %v1938_v23 = vadd.f32 %v1933_v18, %v1921_v11  ;;  %2562 = vrot.lane.b32.xlu1 %v2558_v61, %s7342_s23  ;;  %v2027_v61 = vrot.slane %v2023_v49, 2  ;;  %v2690_v18 = vrot.slane %v2686_v7, 2  ;;  %v2703_v25 = vmul.f32 %v8262_v39, %v2702_v12 }
 0x1ef   : > { %2560 = vrot.lane.b32.xlu0 %v2559_v9, %s7342_s23  ;;  %v1945_v63 = vadd.f32 %v1943_v10, %v1939_v17  ;;  %v2691_v17 = vrot.slane %v2687_v6, 2  ;;  %v2785_v6 = vmul.f32 %v8338_v16, %v2783_v54 }
 0x1f0   : > { %v1955_v4 = vpop.permute.xlu1 %1954  ;;  %v1944_v26 = vadd.f32 %v1942_v13, %v1938_v23  ;;  %v2029_v11 = vsel %vm341_vm1, %v2027_v61, %v2028_v37  ;;  %v2069_v23 = vstv %s8573_s5  ;;  %s8688_s5 = sld [smem:[#allocation6 + $0xbb]] }
 0x1f1   : > { %v1953_v27 = vpop.permute.xlu0 %1952  ;;  %v1959_v36 = vadd.f32 %v1955_v4, %v1945_v63  ;;  %v2704_v63 = vmul.f32 %v8258_v62, %v2702_v12  ;;  %v2071_v62 = vmul.f32 %v8283_v31, %v2069_v23 }
 0x1f2   : > { %2579 = vrot.lane.b32.xlu1 %v2575_v14, %s7341_s18  ;;  %v1958_v42 = vadd.f32 %v1953_v27, %v1944_v26  ;;  %v2103_v26 = vstv %s8576_s6  ;;  %v2692_v27 = vsel %vm341_vm1, %v2690_v18, %v2691_v17  ;;  %s8709_s6 = sld [smem:[#allocation6 + $0xbc]] }
 0x1f3   : > { %2577 = vrot.lane.b32.xlu0 %v2576_v30, %s7341_s18  ;;  %v2708_v32 = vrot.slane %v2704_v63, 2  ;;  %v2105_v40 = vmul.f32 %v8283_v31, %v2103_v26 }
 0x1f4   : > { %v1969_v43 = vpop.permute.xlu1 %1968 }
 0x1f5   : > { %v1973_v46 = vadd.f32 %v1969_v43, %v1959_v36  ;;  %v1967_v47 = vpop.permute.xlu0 %1966  ;;  %v2725_v43 = vstv %s8587_s19  ;;  %v2109_v49 = vrot.slane %v2105_v40, 1  ;;  %s8718_s19 = sld [smem:[#allocation6 + $0x90]] }
 0x1f6   : > { %v1972_v20 = vadd.f32 %v1967_v47, %v1958_v42  ;;  %2604 = vrot.lane.b32.xlu1 %v2599_v33, %s7342_s23  ;;  %v2707_v33 = vrot.slane %v2703_v25, 2 }
 0x1f7   : > { %2602 = vrot.lane.b32.xlu0 %v2598_v38, %s7342_s23  ;;  %v1986_v52 = vadd.f32 %v1981_v29, %v1973_v46  ;;  %v2070_v29 = vmul.f32 %v8289_v24, %v2069_v23  ;;  %v2104_v38 = vmul.f32 %v8289_v24, %v2103_v26 }
 0x1f8   : > { %v1999_v55 = vpop.permute.xlu1 %1998  ;;  %v1985_v56 = vadd.f32 %v1982_v48, %v1972_v20  ;;  %v2709_v46 = vsel %vm341_vm1, %v2707_v33, %v2708_v32  ;;  %v2727_v20 = vmul.f32 %v8338_v16, %v2725_v43 }
 0x1f9   : > { %v1997_v60 = vpop.permute.xlu0 %1996  ;;  %v2003_v3 = vadd.f32 %v1999_v55, %v1986_v52  ;;  %v2108_v48 = vrot.slane %v2104_v38, 1  ;;  %v2726_v52 = vmul.f32 %v8344_v34, %v2725_v43 }
 0x1fa   : > { %2618 = vrot.lane.b32.xlu1 %v2613_v21, %s7341_s18  ;;  %v2002_v0 = vadd.f32 %v1997_v60, %v1985_v56  ;;  %v2150_v21 = vstv %s8598_s8  ;;  %s8737_s8 = sld [smem:[#allocation6 + $0xbf]] }
 0x1fb   : > { %2616 = vrot.lane.b32.xlu0 %v2612_v53, %s7341_s18  ;;  %v2739_v53 = vstv %s8592_s15  ;;  %v2110_v61 = vsel %vm293_vm0, %v2108_v48, %v2109_v49  ;;  %v2200_v48 = vstv %s8645_s20  ;;  %s8721_s15 = sld [smem:[#allocation6 + $0x93]] }
 0x1fc   : > { %v2016_v1 = vpop.permute.xlu1 %2015  ;;  %v2741_v5 = vmul.f32 %v8338_v16, %v2739_v53  ;;  %s8787_s20 = sld [smem:[#allocation6 + $0x99]] }
 0x1fd   : > { %v2020_v9 = vadd.f32 %v2016_v1, %v2003_v3  ;;  %v2014_v10 = vpop.permute.xlu0 %2013  ;;  %v2784_v1 = vmul.f32 %v8344_v34, %v2783_v54 }
 0x1fe   : > { %v2019_v13 = vadd.f32 %v2014_v10, %v2002_v0  ;;  %2648 = vrot.lane.b32.xlu1 %v2644_v57, %s7342_s23  ;;  %v2768_v57 = vmul.f32 %v8338_v16, %v2766_v50  ;;  %v2740_v0 = vmul.f32 %v8344_v34, %v2739_v53  ;;  %v2813_v10 = vstv %s8612_s26  ;;  %s8743_s26 = sld [smem:[#allocation6 + $0x96]] }
 0x1ff   : > { %2646 = vrot.lane.b32.xlu0 %v2645_v8, %s7342_s23  ;;  %v2033_v14 = vadd.f32 %v2028_v37, %v2020_v9  ;;  %v2151_v37 = vmul.f32 %v8289_v24, %v2150_v21  ;;  %v2815_v18 = vmul.f32 %v8338_v16, %v2813_v10 }
 0x200   : > { %v2046_v19 = vpop.permute.xlu1 %2045  ;;  %v2032_v22 = vadd.f32 %v2029_v11, %v2019_v13  ;;  %v2772_v9 = vrot.slane %v2768_v57, 1 }
 0x201   : > { %v2044_v4 = vpop.permute.xlu0 %2043  ;;  %v2050_v30 = vadd.f32 %v2046_v19, %v2033_v14  ;;  %v2155_v12 = vrot.slane %v2151_v37, 2  ;;  %v2789_v14 = vrot.slane %v2785_v6, 1  ;;  %v2814_v19 = vmul.f32 %v8344_v34, %v2813_v10 }
 0x202   : > { %2665 = vrot.lane.b32.xlu1 %v2661_v2, %s7341_s18  ;;  %v2049_v39 = vadd.f32 %v2044_v4, %v2032_v22  ;;  %v2152_v2 = vmul.f32 %v8283_v31, %v2150_v21  ;;  %v2771_v31 = vrot.slane %v2767_v58, 1  ;;  %v2894_v37 = vstv %s8659_s29  ;;  %s8806_s29 = sld [smem:[#allocation6 + $0xc8]] }
 0x203   : > { %2663 = vrot.lane.b32.xlu0 %v2662_v15, %s7341_s18 }
 0x204   : > { %v2063_v28 = vpop.permute.xlu1 %2062  ;;  %v2156_v13 = vrot.slane %v2152_v2, 2  ;;  %v2773_v63 = vsel %vm293_vm0, %v2771_v31, %v2772_v9  ;;  %v8693_v2 = vld [vmem:[%s7460_s10 + $0x28] sm:$0xff] }
 0x205   : > { %v2067_v35 = vadd.f32 %v2063_v28, %v2050_v30  ;;  %v2061_v36 = vpop.permute.xlu0 %2060  ;;  %v2830_v30 = vstv %s8627_s11  ;;  %v2819_v28 = vrot.slane %v2815_v18, 2  ;;  %v2896_v31 = vmul.f32 %v8693_v2, %v2894_v37  ;;  %s8751_s11 = sld [smem:[#allocation6 + $0xc2]] }
 0x206   : > { %v2066_v41 = vadd.f32 %v2061_v36, %v2049_v39  ;;  %2695 = vrot.lane.b32.xlu1 %v2691_v17, %s7342_s23  ;;  %v2788_v17 = vrot.slane %v2784_v1, 1  ;;  %v2157_v26 = vsel %vm341_vm1, %v2155_v12, %v2156_v13  ;;  %v2832_v36 = vmul.f32 %v8338_v16, %v2830_v30 }
 0x207   : > { %2693 = vrot.lane.b32.xlu0 %v2692_v27, %s7342_s23  ;;  %v2073_v42 = vadd.f32 %v2071_v62, %v2067_v35  ;;  %v2202_v35 = vstv %s8636_s21  ;;  %v2831_v38 = vmul.f32 %v8344_v34, %v2830_v30  ;;  %v8672_v34 = vld [vmem:[%s7460_s10] sm:$0xff]  ;;  %v2867_v1 = vstv %s8657_s25  ;;  %s8763_s21 = sld [smem:[#allocation6 + $0xc4]] }
 0x208   : > { %v2083_v44 = vpop.permute.xlu1 %2082  ;;  %v2072_v45 = vadd.f32 %v2070_v29, %v2066_v41  ;;  %v2790_v39 = vsel %vm293_vm0, %v2788_v17, %v2789_v14  ;;  %v2818_v29 = vrot.slane %v2814_v19, 2  ;;  %v2236_v41 = vstv %s8639_s12  ;;  %s8778_s12 = sld [smem:[#allocation6 + $0xc5]] }
 0x209   : > { %v2081_v47 = vpop.permute.xlu0 %2080  ;;  %v2087_v51 = vadd.f32 %v2083_v44, %v2073_v42  ;;  %v8668_v44 = vld [vmem:[%s7460_s10 + $0x8] sm:$0xff]  ;;  %v2835_v50 = vrot.slane %v2831_v38, 2  ;;  %v2869_v18 = vmul.f32 %v8693_v2, %v2867_v1  ;;  %s8801_s25 = sld [smem:[#allocation6 + $0xc7]] }
 0x20a   : > { %2712 = vrot.lane.b32.xlu1 %v2708_v32, %s7341_s18  ;;  %v2086_v55 = vadd.f32 %v2081_v47, %v2072_v45  ;;  %v2820_v43 = vsel %vm341_vm1, %v2818_v29, %v2819_v28  ;;  %v2204_v16 = vmul.f32 %v8668_v44, %v2202_v35  ;;  %v2203_v45 = vmul.f32 %v8672_v34, %v2202_v35 }
 0x20b   : > { %2710 = vrot.lane.b32.xlu0 %v2709_v46, %s7341_s18 }
 0x20c   : > { %v2097_v56 = vpop.permute.xlu1 %2096  ;;  %v2206_v54 = vadd.f32 %v2204_v16, %v2200_v48  ;;  %v2205_v57 = vadd.f32 %v2203_v45, %v2200_v48  ;;  %v2958_v45 = vstv %s8709_s6  ;;  %s8826_s6 = sld [smem:[#allocation6 + $0xcd]] }
 0x20d   : > { %v2101_v59 = vadd.f32 %v2097_v56, %v2087_v51  ;;  %v2095_v60 = vpop.permute.xlu0 %2094  ;;  %v2238_v51 = vmul.f32 %v8668_v44, %v2236_v41 }
 0x20e   : > { %v2100_v3 = vadd.f32 %v2095_v60, %v2086_v55  ;;  %2732 = vrot.lane.b32.xlu1 %v2727_v20, %s7342_s23  ;;  %v2853_v55 = vstv %s8652_s24  ;;  %s8790_s24 = sld [smem:[#allocation6 + $0x9c]] }
 0x20f   : > { %2730 = vrot.lane.b32.xlu0 %v2726_v52, %s7342_s23  ;;  %v2114_v7 = vadd.f32 %v2109_v49, %v2101_v59  ;;  %v2836_v49 = vrot.slane %v2832_v36, 2  ;;  %v2237_v52 = vmul.f32 %v8672_v34, %v2236_v41  ;;  %v2242_v60 = vrot.slane %v2238_v51, 1 }
 0x210   : > { %v2127_v8 = vpop.permute.xlu1 %2126  ;;  %v2113_v24 = vadd.f32 %v2110_v61, %v2100_v3  ;;  %v2855_v3 = vmul.f32 %v8693_v2, %v2853_v55  ;;  %v2330_v51 = vstv %s8718_s19  ;;  %s8841_s19 = sld [smem:[#allocation6 + $0xce]] }
 0x211   : > { %v2125_v11 = vpop.permute.xlu0 %2124  ;;  %v2131_v15 = vadd.f32 %v2127_v8, %v2114_v7  ;;  %v2837_v58 = vsel %vm341_vm1, %v2835_v50, %v2836_v49  ;;  %v2241_v61 = vrot.slane %v2237_v52, 1  ;;  %v8699_v7 = vld [vmem:[%s7460_s10 + $0x20] sm:$0xff]  ;;  %v2911_v8 = vstv %s8675_s4  ;;  %s8812_s4 = sld [smem:[#allocation6 + $0x9f]] }
 0x212   : > { %2746 = vrot.lane.b32.xlu1 %v2741_v5, %s7341_s18  ;;  %v2130_v22 = vadd.f32 %v2125_v11, %v2113_v24  ;;  %v2283_v5 = vstv %s8663_s30  ;;  %v2895_v10 = vmul.f32 %v8699_v7, %v2894_v37  ;;  %v2913_v19 = vmul.f32 %v8693_v2, %v2911_v8  ;;  %v8754_v37 = vld [vmem:[%s7460_s10 + $0x10] sm:$0xff]  ;;  %s8808_s30 = sld [smem:[#allocation6 + $0xca]] }
 0x213   : > { %2744 = vrot.lane.b32.xlu0 %v2740_v0, %s7341_s18  ;;  %v2854_v0 = vmul.f32 %v8699_v7, %v2853_v55  ;;  %v2960_v52 = vmul.f32 %v8693_v2, %v2958_v45  ;;  %v2364_v55 = vstv %s8721_s15  ;;  %s8850_s15 = sld [smem:[#allocation6 + $0xa2]] }
 0x214   : > { %v2144_v23 = vpop.permute.xlu1 %2143  ;;  %v2899_v30 = vrot.slane %v2895_v10, 1  ;;  %v2917_v29 = vrot.slane %v2913_v19, 1  ;;  %v2986_v10 = vstv %s8732_s7  ;;  %s8853_s7 = sld [smem:[#allocation6 + $0xa5]] }
 0x215   : > { %v2148_v25 = vadd.f32 %v2144_v23, %v2131_v15  ;;  %v2142_v4 = vpop.permute.xlu0 %2141  ;;  %v2285_v15 = vmul.f32 %v8668_v44, %v2283_v5  ;;  %v2868_v23 = vmul.f32 %v8699_v7, %v2867_v1  ;;  %v2988_v19 = vmul.f32 %v8668_v44, %v2986_v10 }
 0x216   : > { %v2147_v27 = vadd.f32 %v2142_v4, %v2130_v22  ;;  %2776 = vrot.lane.b32.xlu1 %v2772_v9, %s7342_s23 }
 0x217   : > { %2774 = vrot.lane.b32.xlu0 %v2773_v63, %s7342_s23  ;;  %v2161_v62 = vadd.f32 %v2156_v13, %v2148_v25  ;;  %v2243_v13 = vsel %vm293_vm0, %v2241_v61, %v2242_v60  ;;  %v2912_v63 = vmul.f32 %v8699_v7, %v2911_v8  ;;  %v2365_v8 = vmul.f32 %v8754_v37, %v2364_v55 }
 0x218   : > { %v2174_v32 = vpop.permute.xlu1 %2173  ;;  %v2160_v33 = vadd.f32 %v2157_v26, %v2147_v27  ;;  %v2900_v26 = vrot.slane %v2896_v31, 1  ;;  %v2941_v27 = vstv %s8688_s5  ;;  %s8817_s5 = sld [smem:[#allocation6 + $0xcb]] }
 0x219   : > { %v2172_v40 = vpop.permute.xlu0 %2171  ;;  %v2178_v42 = vadd.f32 %v2174_v32, %v2161_v62  ;;  %v2943_v35 = vmul.f32 %v8693_v2, %v2941_v27  ;;  %v2942_v36 = vmul.f32 %v8699_v7, %v2941_v27 }
 0x21a   : > { %2793 = vrot.lane.b32.xlu1 %v2789_v14, %s7341_s18  ;;  %v2177_v46 = vadd.f32 %v2172_v40, %v2160_v33  ;;  %v2284_v14 = vmul.f32 %v8672_v34, %v2283_v5  ;;  %v2916_v33 = vrot.slane %v2912_v63, 1  ;;  %v2901_v41 = vsel %vm293_vm0, %v2899_v30, %v2900_v26 }
 0x21b   : > { %2791 = vrot.lane.b32.xlu0 %v2790_v39, %s7341_s18  ;;  %v2946_v50 = vrot.slane %v2942_v36, 2  ;;  %v2964_v5 = vrot.slane %v2960_v52, 2  ;;  %v2987_v63 = vmul.f32 %v8672_v34, %v2986_v10 }
 0x21c   : > { %v2191_v47 = vpop.permute.xlu1 %2190  ;;  %v2288_v39 = vrot.slane %v2284_v14, 2  ;;  %v2918_v48 = vsel %vm293_vm0, %v2916_v33, %v2917_v29 }
 0x21d   : > { %v2195_v20 = vadd.f32 %v2191_v47, %v2178_v42  ;;  %v2189_v21 = vpop.permute.xlu0 %2188 }
 0x21e   : > { %v2194_v53 = vadd.f32 %v2189_v21, %v2177_v46  ;;  %2823 = vrot.lane.b32.xlu1 %v2819_v28, %s7342_s23  ;;  %v2289_v28 = vrot.slane %v2285_v15, 2  ;;  %v2369_v15 = vrot.slane %v2365_v8, 1 }
 0x21f   : > { %6763 = vst.msk [vmem:[%s7853_s9 + $0x48] sm:$0x3f] %vm641_vm2, %v2195_v20  ;;  %2821 = vrot.lane.b32.xlu0 %v2820_v43, %s7342_s23 }
 0x220   : > { %6762 = vst.msk [vmem:[%s7853_s9 + $0x40] sm:$0xff] %vm639_vm3, %v2194_v53  ;;  %v2216_v56 = vpop.permute.xlu1 %2215  ;;  %v2290_v16 = vsel %vm341_vm1, %v2288_v39, %v2289_v28  ;;  %v2959_v53 = vmul.f32 %v8699_v7, %v2958_v45 }
 0x221   : > { %v2214_v59 = vpop.permute.xlu0 %2213  ;;  %v2220_v6 = vadd.f32 %v2216_v56, %v2206_v54 }
 0x222   : > { %2840 = vrot.lane.b32.xlu1 %v2836_v49, %s7341_s18  ;;  %v2219_v24 = vadd.f32 %v2214_v59, %v2205_v57  ;;  %v2947_v49 = vrot.slane %v2943_v35, 2 }
 0x223   : > { %2838 = vrot.lane.b32.xlu0 %v2837_v58, %s7341_s18  ;;  %v8748_v58 = vld [vmem:[%s7460_s10 + $0x18] sm:$0xff] }
 0x224   : > { %v2230_v9 = vpop.permute.xlu1 %2229  ;;  %v2948_v57 = vsel %vm341_vm1, %v2946_v50, %v2947_v49  ;;  %v2332_v59 = vmul.f32 %v8748_v58, %v2330_v51 }
 0x225   : > { %v2234_v11 = vadd.f32 %v2230_v9, %v2220_v6  ;;  %v2228_v12 = vpop.permute.xlu0 %2227  ;;  %v2963_v6 = vrot.slane %v2959_v53, 2 }
 0x226   : > { %v2233_v17 = vadd.f32 %v2228_v12, %v2219_v24  ;;  %2860 = vrot.lane.b32.xlu1 %v2855_v3, %s7342_s23  ;;  %v2331_v3 = vmul.f32 %v8754_v37, %v2330_v51  ;;  %v2366_v24 = vmul.f32 %v8748_v58, %v2364_v55 }
 0x227   : > { %2858 = vrot.lane.b32.xlu0 %v2854_v0, %s7342_s23  ;;  %v2247_v22 = vadd.f32 %v2242_v60, %v2234_v11 }
 0x228   : > { %v2260_v25 = vpop.permute.xlu1 %2259  ;;  %v2246_v4 = vadd.f32 %v2243_v13, %v2233_v17  ;;  %v2965_v13 = vsel %vm341_vm1, %v2963_v6, %v2964_v5  ;;  %v2370_v17 = vrot.slane %v2366_v24, 1 }
 0x229   : > { %v2258_v62 = vpop.permute.xlu0 %2257  ;;  %v2264_v32 = vadd.f32 %v2260_v25, %v2247_v22  ;;  %v2411_v22 = vstv %s8743_s26  ;;  %v3000_v25 = vstv %s8737_s8  ;;  %s8859_s8 = sld [smem:[#allocation7 + $0x6]] }
 0x22a   : > { %2874 = vrot.lane.b32.xlu1 %v2869_v18, %s7341_s18  ;;  %v2263_v38 = vadd.f32 %v2258_v62, %v2246_v4  ;;  %v3027_v18 = vstv %s8739_s22  ;;  %v3044_v4 = vstv %s8751_s11  ;;  %v2413_v33 = vmul.f32 %v8748_v58, %v2411_v22  ;;  %s8866_s22 = sld [smem:[#allocation6 + $0xd0]] }
 0x22b   : > { %2872 = vrot.lane.b32.xlu0 %v2868_v23, %s7341_s18  ;;  %v3029_v27 = vmul.f32 %v8668_v44, %v3027_v18  ;;  %v3028_v62 = vmul.f32 %v8672_v34, %v3027_v18  ;;  %v3002_v36 = vmul.f32 %v8668_v44, %v3000_v25  ;;  %s8871_s26 = sld [smem:[#allocation6 + $0xd1]] }
 0x22c   : > { %v2277_v40 = vpop.permute.xlu1 %2276  ;;  %v2417_v50 = vrot.slane %v2413_v33, 2  ;;  %s8873_s11 = sld [smem:[#allocation6 + $0xd3]] }
 0x22d   : > { %v2281_v42 = vadd.f32 %v2277_v40, %v2264_v32  ;;  %v2275_v43 = vpop.permute.xlu0 %2274  ;;  %v2412_v32 = vmul.f32 %v8754_v37, %v2411_v22  ;;  %v3033_v45 = vrot.slane %v3029_v27, 1 }
 0x22e   : > { %v2280_v46 = vadd.f32 %v2275_v43, %v2263_v38  ;;  %2904 = vrot.lane.b32.xlu1 %v2900_v26, %s7342_s23  ;;  %v3046_v38 = vmul.f32 %v8668_v44, %v3044_v4 }
 0x22f   : > { %2902 = vrot.lane.b32.xlu0 %v2901_v41, %s7342_s23  ;;  %v2294_v47 = vadd.f32 %v2289_v28, %v2281_v42  ;;  %v3001_v41 = vmul.f32 %v8672_v34, %v3000_v25  ;;  %v3045_v42 = vmul.f32 %v8672_v34, %v3044_v4 }
 0x230   : > { %v2307_v20 = vpop.permute.xlu1 %2306  ;;  %v2293_v21 = vadd.f32 %v2290_v16, %v2280_v46  ;;  %v3032_v46 = vrot.slane %v3028_v62, 1  ;;  %v3114_v62 = vstv %s8801_s25  ;;  %s8920_s25 = sld [smem:[#allocation6 + $0xab]] }
 0x231   : > { %v2305_v54 = vpop.permute.xlu0 %2304  ;;  %v2311_v56 = vadd.f32 %v2307_v20, %v2294_v47  ;;  %v3074_v47 = vstv %s8763_s21  ;;  %v3050_v20 = vrot.slane %v3046_v38, 1  ;;  %v3049_v51 = vrot.slane %v3045_v42, 1  ;;  %s8877_s21 = sld [smem:[#allocation6 + $0xa8]] }
 0x232   : > { %2921 = vrot.lane.b32.xlu1 %v2917_v29, %s7341_s18  ;;  %v2310_v60 = vadd.f32 %v2305_v54, %v2293_v21  ;;  %v2371_v29 = vsel %vm293_vm0, %v2369_v15, %v2370_v17  ;;  %v3076_v52 = vmul.f32 %v8668_v44, %v3074_v47  ;;  %v3075_v53 = vmul.f32 %v8672_v34, %v3074_v47 }
 0x233   : > { %2919 = vrot.lane.b32.xlu0 %v2918_v48, %s7341_s18  ;;  %v3051_v6 = vsel %vm293_vm0, %v3049_v51, %v3050_v20  ;;  %v3116_v38 = vmul.f32 %v8748_v58, %v3114_v62  ;;  %v3115_v42 = vmul.f32 %v8754_v37, %v3114_v62 }
 0x234   : > { %v2324_v61 = vpop.permute.xlu1 %2323 }
 0x235   : > { %v2328_v0 = vadd.f32 %v2324_v61, %v2311_v56  ;;  %v2322_v1 = vpop.permute.xlu0 %2321  ;;  %v3034_v56 = vsel %vm293_vm0, %v3032_v46, %v3033_v45  ;;  %v3091_v61 = vstv %s8778_s12  ;;  %s8883_s12 = sld [smem:[#allocation6 + $0xd4]] }
 0x236   : > { %v2327_v9 = vadd.f32 %v2322_v1, %v2310_v60  ;;  %2951 = vrot.lane.b32.xlu1 %v2947_v49, %s7342_s23  ;;  %v2416_v49 = vrot.slane %v2412_v32, 2  ;;  %v3079_v1 = vrot.slane %v3075_v53, 2  ;;  %v3092_v10 = vmul.f32 %v8672_v34, %v3091_v61 }
 0x237   : > { %2949 = vrot.lane.b32.xlu0 %v2948_v57, %s7342_s23  ;;  %v2334_v31 = vadd.f32 %v2332_v59, %v2328_v0  ;;  %v3080_v0 = vrot.slane %v3076_v52, 2 }
 0x238   : > { %v2344_v11 = vpop.permute.xlu1 %2343  ;;  %v2333_v12 = vadd.f32 %v2331_v3, %v2327_v9  ;;  %v2418_v60 = vsel %vm341_vm1, %v2416_v49, %v2417_v50  ;;  %v2458_v9 = vstv %s8787_s20  ;;  %s8896_s20 = sld [smem:[#allocation6 + $0xd6]] }
 0x239   : > { %v2342_v14 = vpop.permute.xlu0 %2341  ;;  %v2348_v23 = vadd.f32 %v2344_v11, %v2334_v31  ;;  %v3093_v31 = vmul.f32 %v8668_v44, %v3091_v61  ;;  %v2460_v15 = vmul.f32 %v8693_v2, %v2458_v9 }
 0x23a   : > { %2968 = vrot.lane.b32.xlu1 %v2964_v5, %s7341_s18  ;;  %v2347_v26 = vadd.f32 %v2342_v14, %v2333_v12  ;;  %v2492_v12 = vstv %s8790_s24  ;;  %v3081_v14 = vsel %vm341_vm1, %v3079_v1, %v3080_v0  ;;  %s8911_s24 = sld [smem:[#allocation6 + $0xd7]] }
 0x23b   : > { %2966 = vrot.lane.b32.xlu0 %v2965_v13, %s7341_s18  ;;  %v3097_v22 = vrot.slane %v3093_v31, 2  ;;  %v2493_v4 = vmul.f32 %v8699_v7, %v2492_v12 }
 0x23c   : > { %v2358_v30 = vpop.permute.xlu1 %2357 }
 0x23d   : > { %v2362_v39 = vadd.f32 %v2358_v30, %v2348_v23  ;;  %v2356_v28 = vpop.permute.xlu0 %2355  ;;  %v3096_v23 = vrot.slane %v3092_v10, 2  ;;  %v2497_v33 = vrot.slane %v2493_v4, 1 }
 0x23e   : > { %v2361_v35 = vadd.f32 %v2356_v28, %v2347_v26  ;;  %2993 = vrot.lane.b32.xlu1 %v2988_v19, %s7342_s23  ;;  %v2459_v19 = vmul.f32 %v8699_v7, %v2458_v9  ;;  %v2494_v26 = vmul.f32 %v8693_v2, %v2492_v12 }
 0x23f   : > { %2991 = vrot.lane.b32.xlu0 %v2987_v63, %s7342_s23  ;;  %v2375_v40 = vadd.f32 %v2370_v17, %v2362_v39 }
 0x240   : > { %v2388_v43 = vpop.permute.xlu1 %2387  ;;  %v2374_v16 = vadd.f32 %v2371_v29, %v2361_v35  ;;  %v3098_v29 = vsel %vm341_vm1, %v3096_v23, %v3097_v22  ;;  %v2498_v35 = vrot.slane %v2494_v26, 1 }
 0x241   : > { %v2386_v48 = vpop.permute.xlu0 %2385  ;;  %v2392_v21 = vadd.f32 %v2388_v43, %v2375_v40  ;;  %v2539_v40 = vstv %s8812_s4  ;;  %v3128_v43 = vstv %s8806_s29  ;;  %s8923_s29 = sld [smem:[#allocation6 + $0xae]] }
 0x242   : > { %3007 = vrot.lane.b32.xlu1 %v3002_v36, %s7341_s18  ;;  %v2391_v54 = vadd.f32 %v2386_v48, %v2374_v16  ;;  %v3155_v36 = vstv %s8808_s30  ;;  %v3172_v16 = vstv %s8817_s5  ;;  %v2541_v51 = vmul.f32 %v8693_v2, %v2539_v40  ;;  %s8934_s30 = sld [smem:[#allocation6 + $0xd9]] }
 0x243   : > { %3005 = vrot.lane.b32.xlu0 %v3001_v41, %s7341_s18  ;;  %v3157_v47 = vmul.f32 %v8748_v58, %v3155_v36  ;;  %v3156_v48 = vmul.f32 %v8754_v37, %v3155_v36  ;;  %v3130_v53 = vmul.f32 %v8748_v58, %v3128_v43  ;;  %s8939_s4 = sld [smem:[#allocation6 + $0xda]] }
 0x244   : > { %v2405_v55 = vpop.permute.xlu1 %2404  ;;  %v2545_v1 = vrot.slane %v2541_v51, 2  ;;  %s8941_s5 = sld [smem:[#allocation6 + $0xdc]] }
 0x245   : > { %v2409_v57 = vadd.f32 %v2405_v55, %v2392_v21  ;;  %v2403_v59 = vpop.permute.xlu0 %2402  ;;  %v2540_v21 = vmul.f32 %v8699_v7, %v2539_v40  ;;  %v3161_v61 = vrot.slane %v3157_v47, 1  ;;  %v2589_v40 = vstv %s8859_s8  ;;  %s8983_s8 = sld [smem:[#allocation6 + $0xb4]] }
 0x246   : > { %v2408_v3 = vadd.f32 %v2403_v59, %v2391_v54  ;;  %3037 = vrot.lane.b32.xlu1 %v3033_v45, %s7342_s23  ;;  %v3174_v54 = vmul.f32 %v8748_v58, %v3172_v16 }
 0x247   : > { %3035 = vrot.lane.b32.xlu0 %v3034_v56, %s7342_s23  ;;  %v2422_v5 = vadd.f32 %v2417_v50, %v2409_v57  ;;  %v3129_v56 = vmul.f32 %v8754_v37, %v3128_v43  ;;  %v3173_v57 = vmul.f32 %v8754_v37, %v3172_v16 }
 0x248   : > { %v2435_v8 = vpop.permute.xlu1 %2434  ;;  %v2421_v24 = vadd.f32 %v2418_v60, %v2408_v3  ;;  %v3160_v3 = vrot.slane %v3156_v48, 1 }
 0x249   : > { %v2433_v11 = vpop.permute.xlu0 %2432  ;;  %v2439_v13 = vadd.f32 %v2435_v8, %v2422_v5  ;;  %v3202_v5 = vstv %s8826_s6  ;;  %v3178_v8 = vrot.slane %v3174_v54, 1  ;;  %v3177_v9 = vrot.slane %v3173_v57, 1  ;;  %s8945_s6 = sld [smem:[#allocation6 + $0xb1]] }
 0x24a   : > { %3054 = vrot.lane.b32.xlu1 %v3050_v20, %s7341_s18  ;;  %v2438_v17 = vadd.f32 %v2433_v11, %v2421_v24  ;;  %v2499_v20 = vsel %vm293_vm0, %v2497_v33, %v2498_v35  ;;  %v3204_v31 = vmul.f32 %v8748_v58, %v3202_v5  ;;  %v3203_v10 = vmul.f32 %v8754_v37, %v3202_v5 }
 0x24b   : > { %3052 = vrot.lane.b32.xlu0 %v3051_v6, %s7341_s18  ;;  %v3179_v23 = vsel %vm293_vm0, %v3177_v9, %v3178_v8  ;;  %v3283_v54 = vstv %s8873_s11  ;;  %s9002_s11 = sld [smem:[#allocation6 + $0xe3]] }
 0x24c   : > { %v2452_v18 = vpop.permute.xlu1 %2451 }
 0x24d   : > { %v2456_v63 = vadd.f32 %v2452_v18, %v2439_v13  ;;  %v2450_v25 = vpop.permute.xlu0 %2449  ;;  %v3162_v13 = vsel %vm293_vm0, %v3160_v3, %v3161_v61  ;;  %v3219_v18 = vstv %s8841_s19  ;;  %s8950_s19 = sld [smem:[#allocation6 + $0xdd]] }
 0x24e   : > { %v2455_v30 = vadd.f32 %v2450_v25, %v2438_v17  ;;  %3084 = vrot.lane.b32.xlu1 %v3080_v0, %s7342_s23  ;;  %v2544_v0 = vrot.slane %v2540_v21, 2  ;;  %v3207_v25 = vrot.slane %v3203_v10, 2  ;;  %v3220_v62 = vmul.f32 %v8754_v37, %v3219_v18 }
 0x24f   : > { %3082 = vrot.lane.b32.xlu0 %v3081_v14, %s7342_s23  ;;  %v2462_v27 = vadd.f32 %v2460_v15, %v2456_v63  ;;  %v3208_v63 = vrot.slane %v3204_v31, 2 }
 0x250   : > { %v2472_v39 = vpop.permute.xlu1 %2471  ;;  %v2461_v28 = vadd.f32 %v2459_v19, %v2455_v30  ;;  %v2546_v17 = vsel %vm341_vm1, %v2544_v0, %v2545_v1  ;;  %v2591_v30 = vstv %s8850_s15  ;;  %v3284_v0 = vmul.f32 %v8699_v7, %v3283_v54  ;;  %s8959_s15 = sld [smem:[#allocation6 + $0xdf]] }
 0x251   : > { %v2470_v32 = vpop.permute.xlu0 %2469  ;;  %v2476_v41 = vadd.f32 %v2472_v39, %v2462_v27  ;;  %v3221_v27 = vmul.f32 %v8748_v58, %v3219_v18  ;;  %v2593_v33 = vmul.f32 %v8668_v44, %v2591_v30 }
 0x252   : > { %3101 = vrot.lane.b32.xlu1 %v3097_v22, %s7341_s18  ;;  %v2475_v45 = vadd.f32 %v2470_v32, %v2461_v28  ;;  %v2625_v28 = vstv %s8853_s7  ;;  %v3209_v32 = vsel %vm341_vm1, %v3207_v25, %v3208_v63  ;;  %s8974_s7 = sld [smem:[#allocation6 + $0xe0]] }
 0x253   : > { %3099 = vrot.lane.b32.xlu0 %v3098_v29, %s7341_s18  ;;  %v2595_v48 = vadd.f32 %v2593_v33, %v2589_v40 }
 0x254   : > { %v2486_v46 = vpop.permute.xlu1 %2485 }
 0x255   : > { %v2490_v49 = vadd.f32 %v2486_v46, %v2476_v41  ;;  %v2484_v50 = vpop.permute.xlu0 %2483  ;;  %v3225_v41 = vrot.slane %v3221_v27, 2  ;;  %v2626_v46 = vmul.f32 %v8672_v34, %v2625_v28 }
 0x256   : > { %v2489_v52 = vadd.f32 %v2484_v50, %v2475_v45  ;;  %3121 = vrot.lane.b32.xlu1 %v3116_v38, %s7342_s23  ;;  %v2627_v45 = vmul.f32 %v8668_v44, %v2625_v28 }
 0x257   : > { %3119 = vrot.lane.b32.xlu0 %v3115_v42, %s7342_s23  ;;  %v2503_v55 = vadd.f32 %v2498_v35, %v2490_v49  ;;  %v2592_v35 = vmul.f32 %v8672_v34, %v2591_v30  ;;  %v3224_v42 = vrot.slane %v3220_v62, 2  ;;  %v3242_v49 = vstv %s8866_s22  ;;  %s8986_s22 = sld [smem:[#allocation6 + $0xb7]] }
 0x258   : > { %v2516_v59 = vpop.permute.xlu1 %2515  ;;  %v2502_v60 = vadd.f32 %v2499_v20, %v2489_v52  ;;  %v2631_v52 = vrot.slane %v2627_v45, 1 }
 0x259   : > { %v2514_v6 = vpop.permute.xlu0 %2513  ;;  %v2520_v24 = vadd.f32 %v2516_v59, %v2503_v55  ;;  %v2594_v20 = vadd.f32 %v2592_v35, %v2589_v40  ;;  %v3226_v21 = vsel %vm341_vm1, %v3224_v42, %v3225_v41  ;;  %v3244_v55 = vmul.f32 %v8693_v2, %v3242_v49 }
 0x25a   : > { %3135 = vrot.lane.b32.xlu1 %v3130_v53, %s7341_s18  ;;  %v2519_v11 = vadd.f32 %v2514_v6, %v2502_v60  ;;  %v2630_v53 = vrot.slane %v2626_v46, 1  ;;  %v3243_v59 = vmul.f32 %v8699_v7, %v3242_v49  ;;  %v3256_v60 = vstv %s8871_s26  ;;  %s8997_s26 = sld [smem:[#allocation6 + $0xe2]] }
 0x25b   : > { %3133 = vrot.lane.b32.xlu0 %v3129_v56, %s7341_s18  ;;  %v2672_v56 = vstv %s8877_s21  ;;  %v3285_v6 = vmul.f32 %v8693_v2, %v3283_v54  ;;  %s9004_s21 = sld [smem:[#allocation6 + $0xe5]] }
 0x25c   : > { %v2533_v12 = vpop.permute.xlu1 %2532  ;;  %v2673_v9 = vmul.f32 %v8672_v34, %v2672_v56  ;;  %v2674_v31 = vmul.f32 %v8668_v44, %v2672_v56 }
 0x25d   : > { %v2537_v14 = vadd.f32 %v2533_v12, %v2520_v24  ;;  %v2531_v15 = vpop.permute.xlu0 %2530  ;;  %v2632_v24 = vsel %vm293_vm0, %v2630_v53, %v2631_v52 }
 0x25e   : > { %v2536_v19 = vadd.f32 %v2531_v15, %v2519_v11  ;;  %3165 = vrot.lane.b32.xlu1 %v3161_v61, %s7342_s23  ;;  %v3300_v61 = vstv %s8883_s12  ;;  %v3258_v11 = vmul.f32 %v8693_v2, %v3256_v60  ;;  %v2677_v25 = vrot.slane %v2673_v9, 2  ;;  %s9008_s12 = sld [smem:[#allocation6 + $0xba]] }
 0x25f   : > { %3163 = vrot.lane.b32.xlu0 %v3162_v13, %s7342_s23  ;;  %v2550_v22 = vadd.f32 %v2545_v1, %v2537_v14  ;;  %v3302_v12 = vmul.f32 %v8693_v2, %v3300_v61  ;;  %v3257_v14 = vmul.f32 %v8699_v7, %v3256_v60  ;;  %v3301_v15 = vmul.f32 %v8699_v7, %v3300_v61 }
 0x260   : > { %v2563_v4 = vpop.permute.xlu1 %2562  ;;  %v2549_v26 = vadd.f32 %v2546_v17, %v2536_v19  ;;  %v3289_v19 = vrot.slane %v3285_v6, 1 }
 0x261   : > { %v2561_v39 = vpop.permute.xlu0 %2560  ;;  %v2567_v29 = vadd.f32 %v2563_v4, %v2550_v22  ;;  %v3288_v22 = vrot.slane %v3284_v0, 1  ;;  %v2678_v4 = vrot.slane %v2674_v31, 2  ;;  %v3305_v27 = vrot.slane %v3301_v15, 1 }
 0x262   : > { %3182 = vrot.lane.b32.xlu1 %v3178_v8, %s7341_s18  ;;  %v2566_v36 = vadd.f32 %v2561_v39, %v2549_v26  ;;  %v3306_v26 = vrot.slane %v3302_v12, 1  ;;  %v3375_v0 = vstv %s8934_s30  ;;  %s9049_s30 = sld [smem:[#allocation6 + $0xc0]] }
 0x263   : > { %3180 = vrot.lane.b32.xlu0 %v3179_v23, %s7341_s18  ;;  %v3330_v23 = vstv %s8896_s20  ;;  %v3377_v12 = vmul.f32 %v8668_v44, %v3375_v0  ;;  %v3376_v15 = vmul.f32 %v8672_v34, %v3375_v0  ;;  %s9013_s20 = sld [smem:[#allocation6 + $0xe6]] }
 0x264   : > { %v2580_v38 = vpop.permute.xlu1 %2579  ;;  %v3332_v62 = vmul.f32 %v8693_v2, %v3330_v23  ;;  %v3331_v39 = vmul.f32 %v8699_v7, %v3330_v23  ;;  %v3307_v42 = vsel %vm293_vm0, %v3305_v27, %v3306_v26 }
 0x265   : > { %v2584_v43 = vadd.f32 %v2580_v38, %v2567_v29  ;;  %v2578_v16 = vpop.permute.xlu0 %2577  ;;  %v3347_v38 = vstv %s8911_s24  ;;  %s9022_s24 = sld [smem:[#allocation6 + $0xe8]] }
 0x266   : > { %v2583_v47 = vadd.f32 %v2578_v16, %v2566_v36  ;;  %3212 = vrot.lane.b32.xlu1 %v3208_v63, %s7342_s23  ;;  %v2679_v36 = vsel %vm341_vm1, %v2677_v25, %v2678_v4  ;;  %v3335_v16 = vrot.slane %v3331_v39, 2  ;;  %v3348_v49 = vmul.f32 %v8699_v7, %v3347_v38 }
 0x267   : > { %6793 = vst.msk [vmem:[%s7853_s9 + $0x58] sm:$0x3f] %vm641_vm2, %v2584_v43  ;;  %3210 = vrot.lane.b32.xlu0 %v3209_v32, %s7342_s23  ;;  %v3290_v32 = vsel %vm293_vm0, %v3288_v22, %v3289_v19  ;;  %v3336_v43 = vrot.slane %v3332_v62, 2 }
 0x268   : > { %6792 = vst.msk [vmem:[%s7853_s9 + $0x50] sm:$0xff] %vm639_vm3, %v2583_v47  ;;  %v2605_v50 = vpop.permute.xlu1 %2604  ;;  %v2719_v47 = vstv %s8920_s25  ;;  %s9037_s25 = sld [smem:[#allocation6 + $0xe9]] }
 0x269   : > { %v2603_v51 = vpop.permute.xlu0 %2602  ;;  %v2609_v57 = vadd.f32 %v2605_v50, %v2595_v48  ;;  %v3349_v48 = vmul.f32 %v8693_v2, %v3347_v38 }
 0x26a   : > { %3229 = vrot.lane.b32.xlu1 %v3225_v41, %s7341_s18  ;;  %v2608_v3 = vadd.f32 %v2603_v51, %v2594_v20  ;;  %v2753_v20 = vstv %s8923_s29  ;;  %v3337_v51 = vsel %vm341_vm1, %v3335_v16, %v3336_v43  ;;  %s9046_s29 = sld [smem:[#allocation6 + $0xbd]] }
 0x26b   : > { %3227 = vrot.lane.b32.xlu0 %v3226_v21, %s7341_s18  ;;  %v3353_v56 = vrot.slane %v3349_v48, 2  ;;  %v2754_v61 = vmul.f32 %v8754_v37, %v2753_v20 }
 0x26c   : > { %v2619_v5 = vpop.permute.xlu1 %2618 }
 0x26d   : > { %v2623_v1 = vadd.f32 %v2619_v5, %v2609_v57  ;;  %v2617_v8 = vpop.permute.xlu0 %2616  ;;  %v3352_v57 = vrot.slane %v3348_v49, 2  ;;  %v2758_v31 = vrot.slane %v2754_v61, 1 }
 0x26e   : > { %v2622_v10 = vadd.f32 %v2617_v8, %v2608_v3  ;;  %3249 = vrot.lane.b32.xlu1 %v3244_v55, %s7342_s23  ;;  %v2720_v55 = vmul.f32 %v8754_v37, %v2719_v47  ;;  %v2755_v3 = vmul.f32 %v8748_v58, %v2753_v20 }
 0x26f   : > { %3247 = vrot.lane.b32.xlu0 %v3243_v59, %s7342_s23  ;;  %v2636_v13 = vadd.f32 %v2631_v52, %v2623_v1  ;;  %v2721_v52 = vmul.f32 %v8748_v58, %v2719_v47 }
 0x270   : > { %v2649_v17 = vpop.permute.xlu1 %2648  ;;  %v2635_v18 = vadd.f32 %v2632_v24, %v2622_v10  ;;  %v3354_v24 = vsel %vm341_vm1, %v3352_v57, %v3353_v56  ;;  %v2759_v10 = vrot.slane %v2755_v3, 1 }
 0x271   : > { %v2647_v63 = vpop.permute.xlu0 %2646  ;;  %v2653_v30 = vadd.f32 %v2649_v17, %v2636_v13  ;;  %v2800_v13 = vstv %s8945_s6  ;;  %v3389_v17 = vstv %s8939_s4  ;;  %s9055_s4 = sld [smem:[#allocation7 + $0x7]] }
 0x272   : > { %3263 = vrot.lane.b32.xlu1 %v3258_v11, %s7341_s18  ;;  %v2652_v28 = vadd.f32 %v2647_v63, %v2635_v18  ;;  %v3416_v11 = vstv %s8941_s5  ;;  %v3433_v18 = vstv %s8950_s19  ;;  %v2802_v27 = vmul.f32 %v8748_v58, %v2800_v13  ;;  %s9062_s5 = sld [smem:[#allocation6 + $0xeb]] }
 0x273   : > { %3261 = vrot.lane.b32.xlu0 %v3257_v14, %s7341_s18  ;;  %v3418_v23 = vmul.f32 %v8668_v44, %v3416_v11  ;;  %v3417_v63 = vmul.f32 %v8672_v34, %v3416_v11  ;;  %v3391_v39 = vmul.f32 %v8668_v44, %v3389_v17  ;;  %s9067_s6 = sld [smem:[#allocation6 + $0xec]] }
 0x274   : > { %v2666_v29 = vpop.permute.xlu1 %2665  ;;  %v2806_v16 = vrot.slane %v2802_v27, 2  ;;  %v3544_v27 = vstv %s9004_s21  ;;  %s9069_s19 = sld [smem:[#allocation6 + $0xee]] }
 0x275   : > { %v2670_v33 = vadd.f32 %v2666_v29, %v2653_v30  ;;  %v2664_v35 = vpop.permute.xlu0 %2663  ;;  %v2801_v30 = vmul.f32 %v8754_v37, %v2800_v13  ;;  %v3422_v38 = vrot.slane %v3418_v23, 1  ;;  %s9142_s21 = sld [smem:[#allocation6 + $0xf4]] }
 0x276   : > { %v2669_v40 = vadd.f32 %v2664_v35, %v2652_v28  ;;  %3293 = vrot.lane.b32.xlu1 %v3289_v19, %s7342_s23  ;;  %v3435_v28 = vmul.f32 %v8668_v44, %v3433_v18 }
 0x277   : > { %3291 = vrot.lane.b32.xlu0 %v3290_v32, %s7342_s23  ;;  %v2683_v41 = vadd.f32 %v2678_v4, %v2670_v33  ;;  %v3390_v32 = vmul.f32 %v8672_v34, %v3389_v17  ;;  %v3434_v33 = vmul.f32 %v8672_v34, %v3433_v18 }
 0x278   : > { %v2696_v45 = vpop.permute.xlu1 %2695  ;;  %v2682_v46 = vadd.f32 %v2679_v36, %v2669_v40  ;;  %v3421_v40 = vrot.slane %v3417_v63, 1 }
 0x279   : > { %v2694_v50 = vpop.permute.xlu0 %2693  ;;  %v2700_v21 = vadd.f32 %v2696_v45, %v2683_v41  ;;  %v3463_v41 = vstv %s8959_s15  ;;  %v3439_v45 = vrot.slane %v3435_v28, 1  ;;  %v3438_v47 = vrot.slane %v3434_v33, 1  ;;  %s9073_s15 = sld [smem:[#allocation6 + $0xc3]] }
 0x27a   : > { %3310 = vrot.lane.b32.xlu1 %v3306_v26, %s7341_s18  ;;  %v2699_v53 = vadd.f32 %v2694_v50, %v2682_v46  ;;  %v2760_v26 = vsel %vm293_vm0, %v2758_v31, %v2759_v10  ;;  %v3465_v48 = vmul.f32 %v8668_v44, %v3463_v41  ;;  %v3464_v49 = vmul.f32 %v8672_v34, %v3463_v41 }
 0x27b   : > { %3308 = vrot.lane.b32.xlu0 %v3307_v42, %s7341_s18  ;;  %v3440_v57 = vsel %vm293_vm0, %v3438_v47, %v3439_v45  ;;  %v3561_v33 = vstv %s9013_s20  ;;  %s9149_s20 = sld [smem:[#allocation6 + $0xf7]] }
 0x27c   : > { %v2713_v54 = vpop.permute.xlu1 %2712 }
 0x27d   : > { %v2717_v59 = vadd.f32 %v2713_v54, %v2700_v21  ;;  %v2711_v60 = vpop.permute.xlu0 %2710  ;;  %v3423_v21 = vsel %vm293_vm0, %v3421_v40, %v3422_v38  ;;  %v3480_v54 = vstv %s8974_s7  ;;  %v3545_v40 = vmul.f32 %v8754_v37, %v3544_v27  ;;  %s9085_s7 = sld [smem:[#allocation6 + $0xef]] }
 0x27e   : > { %v2716_v5 = vadd.f32 %v2711_v60, %v2699_v53  ;;  %3340 = vrot.lane.b32.xlu1 %v3336_v43, %s7342_s23  ;;  %v2805_v43 = vrot.slane %v2801_v30, 2  ;;  %v3468_v60 = vrot.slane %v3464_v49, 2  ;;  %v3481_v0 = vmul.f32 %v8672_v34, %v3480_v54 }
 0x27f   : > { %3338 = vrot.lane.b32.xlu0 %v3337_v51, %s7342_s23  ;;  %v2723_v6 = vadd.f32 %v2721_v52, %v2717_v59  ;;  %v3469_v59 = vrot.slane %v3465_v48, 2  ;;  %v3563_v48 = vmul.f32 %v8748_v58, %v3561_v33 }
 0x280   : > { %v2733_v1 = vpop.permute.xlu1 %2732  ;;  %v2722_v8 = vadd.f32 %v2720_v55, %v2716_v5  ;;  %v2807_v53 = vsel %vm341_vm1, %v2805_v43, %v2806_v16  ;;  %v2847_v5 = vstv %s8983_s8  ;;  %s9098_s8 = sld [smem:[#allocation6 + $0xf1]] }
 0x281   : > { %v2731_v9 = vpop.permute.xlu0 %2730  ;;  %v2737_v14 = vadd.f32 %v2733_v1, %v2723_v6  ;;  %v3482_v6 = vmul.f32 %v8668_v44, %v3480_v54  ;;  %v2849_v44 = vmul.f32 %v8693_v2, %v2847_v5 }
 0x282   : > { %3357 = vrot.lane.b32.xlu1 %v3353_v56, %s7341_s18  ;;  %v2736_v19 = vadd.f32 %v2731_v9, %v2722_v8  ;;  %v2881_v8 = vstv %s8986_s22  ;;  %v3470_v9 = vsel %vm341_vm1, %v3468_v60, %v3469_v59  ;;  %s9119_s22 = sld [smem:[#allocation6 + $0xf2]] }
 0x283   : > { %3355 = vrot.lane.b32.xlu0 %v3354_v24, %s7341_s18  ;;  %v3486_v11 = vrot.slane %v3482_v6, 2  ;;  %v2883_v17 = vmul.f32 %v8693_v2, %v2881_v8 }
 0x284   : > { %v2747_v22 = vpop.permute.xlu1 %2746 }
 0x285   : > { %v2751_v25 = vadd.f32 %v2747_v22, %v2737_v14  ;;  %v2745_v4 = vpop.permute.xlu0 %2744  ;;  %v3503_v22 = vstv %s8997_s26  ;;  %v2887_v30 = vrot.slane %v2883_v17, 1  ;;  %s9128_s26 = sld [smem:[#allocation6 + $0xc6]] }
 0x286   : > { %v2750_v62 = vadd.f32 %v2745_v4, %v2736_v19  ;;  %3382 = vrot.lane.b32.xlu1 %v3377_v12, %s7342_s23  ;;  %v3485_v12 = vrot.slane %v3481_v0, 2 }
 0x287   : > { %3380 = vrot.lane.b32.xlu0 %v3376_v15, %s7342_s23  ;;  %v2764_v29 = vadd.f32 %v2759_v10, %v2751_v25  ;;  %v2848_v10 = vmul.f32 %v8699_v7, %v2847_v5  ;;  %v2882_v15 = vmul.f32 %v8699_v7, %v2881_v8 }
 0x288   : > { %v2777_v35 = vpop.permute.xlu1 %2776  ;;  %v2763_v36 = vadd.f32 %v2760_v26, %v2750_v62  ;;  %v3487_v25 = vsel %vm341_vm1, %v3485_v12, %v3486_v11  ;;  %v3505_v62 = vmul.f32 %v8748_v58, %v3503_v22 }
 0x289   : > { %v2775_v42 = vpop.permute.xlu0 %2774  ;;  %v2781_v46 = vadd.f32 %v2777_v35, %v2764_v29  ;;  %v2886_v26 = vrot.slane %v2882_v15, 1  ;;  %v3504_v29 = vmul.f32 %v8754_v37, %v3503_v22 }
 0x28a   : > { %3396 = vrot.lane.b32.xlu1 %v3391_v39, %s7341_s18  ;;  %v2780_v50 = vadd.f32 %v2775_v42, %v2763_v36  ;;  %v2928_v39 = vstv %s9008_s12  ;;  %s9147_s12 = sld [smem:[#allocation6 + $0xf5]] }
 0x28b   : > { %3394 = vrot.lane.b32.xlu0 %v3390_v32, %s7341_s18  ;;  %v3517_v32 = vstv %s9002_s11  ;;  %v2888_v43 = vsel %vm293_vm0, %v2886_v26, %v2887_v30  ;;  %v2978_v26 = vstv %s9055_s4  ;;  %s9131_s11 = sld [smem:[#allocation6 + $0xc9]] }
 0x28c   : > { %v2794_v20 = vpop.permute.xlu1 %2793  ;;  %v3519_v47 = vmul.f32 %v8748_v58, %v3517_v32  ;;  %s9197_s4 = sld [smem:[#allocation6 + $0xcf]] }
 0x28d   : > { %v2798_v51 = vadd.f32 %v2794_v20, %v2781_v46  ;;  %v2792_v52 = vpop.permute.xlu0 %2791  ;;  %v3562_v20 = vmul.f32 %v8754_v37, %v3561_v33 }
 0x28e   : > { %v2797_v55 = vadd.f32 %v2792_v52, %v2780_v50  ;;  %3426 = vrot.lane.b32.xlu1 %v3422_v38, %s7342_s23  ;;  %v3546_v38 = vmul.f32 %v8748_v58, %v3544_v27  ;;  %v3518_v50 = vmul.f32 %v8754_v37, %v3517_v32  ;;  %v3591_v52 = vstv %s9022_s24  ;;  %s9153_s24 = sld [smem:[#allocation6 + $0xcc]] }
 0x28f   : > { %3424 = vrot.lane.b32.xlu0 %v3423_v21, %s7342_s23  ;;  %v2811_v56 = vadd.f32 %v2806_v16, %v2798_v51  ;;  %v2929_v16 = vmul.f32 %v8699_v7, %v2928_v39  ;;  %v3593_v60 = vmul.f32 %v8748_v58, %v3591_v52 }
 0x290   : > { %v2824_v61 = vpop.permute.xlu1 %2823  ;;  %v2810_v3 = vadd.f32 %v2807_v53, %v2797_v55  ;;  %v3550_v51 = vrot.slane %v3546_v38, 1 }
 0x291   : > { %v2822_v1 = vpop.permute.xlu0 %2821  ;;  %v2828_v24 = vadd.f32 %v2824_v61, %v2811_v56  ;;  %v2933_v54 = vrot.slane %v2929_v16, 2  ;;  %v3567_v56 = vrot.slane %v3563_v48, 1  ;;  %v3592_v61 = vmul.f32 %v8754_v37, %v3591_v52 }
 0x292   : > { %3443 = vrot.lane.b32.xlu1 %v3439_v45, %s7341_s18  ;;  %v2827_v34 = vadd.f32 %v2822_v1, %v2810_v3  ;;  %v2930_v45 = vmul.f32 %v8693_v2, %v2928_v39  ;;  %v3549_v2 = vrot.slane %v3545_v40, 1  ;;  %v3672_v16 = vstv %s9069_s19  ;;  %s9216_s19 = sld [smem:[#allocation6 + $0xfe]] }
 0x293   : > { %3441 = vrot.lane.b32.xlu0 %v3440_v57, %s7341_s18 }
 0x294   : > { %v2841_v31 = vpop.permute.xlu1 %2840  ;;  %v2934_v55 = vrot.slane %v2930_v45, 2  ;;  %v3551_v6 = vsel %vm293_vm0, %v3549_v2, %v3550_v51  ;;  %v9103_v45 = vld [vmem:[%s7460_s10 + $0x28] sm:$0xff] }
 0x295   : > { %v2845_v13 = vadd.f32 %v2841_v31, %v2828_v24  ;;  %v2839_v14 = vpop.permute.xlu0 %2838  ;;  %v3608_v24 = vstv %s9037_s25  ;;  %v3597_v31 = vrot.slane %v3593_v60, 2  ;;  %v3674_v2 = vmul.f32 %v9103_v45, %v3672_v16  ;;  %s9161_s25 = sld [smem:[#allocation6 + $0xf8]] }
 0x296   : > { %v2844_v18 = vadd.f32 %v2839_v14, %v2827_v34  ;;  %3473 = vrot.lane.b32.xlu1 %v3469_v59, %s7342_s23  ;;  %v3566_v59 = vrot.slane %v3562_v20, 1  ;;  %v2935_v8 = vsel %vm341_vm1, %v2933_v54, %v2934_v55  ;;  %v3610_v14 = vmul.f32 %v8748_v58, %v3608_v24 }
 0x297   : > { %3471 = vrot.lane.b32.xlu0 %v3470_v9, %s7342_s23  ;;  %v2851_v19 = vadd.f32 %v2849_v44, %v2845_v13  ;;  %v2980_v13 = vstv %s9046_s29  ;;  %v3609_v15 = vmul.f32 %v8754_v37, %v3608_v24  ;;  %v9082_v37 = vld [vmem:[%s7460_s10] sm:$0xff]  ;;  %v3645_v20 = vstv %s9067_s6  ;;  %s9173_s29 = sld [smem:[#allocation6 + $0xfa]] }
 0x298   : > { %v2861_v23 = vpop.permute.xlu1 %2860  ;;  %v2850_v63 = vadd.f32 %v2848_v10, %v2844_v18  ;;  %v3568_v34 = vsel %vm293_vm0, %v3566_v59, %v3567_v56  ;;  %v3596_v10 = vrot.slane %v3592_v61, 2  ;;  %v3014_v18 = vstv %s9049_s30  ;;  %s9188_s30 = sld [smem:[#allocation6 + $0xfb]] }
 0x299   : > { %v2859_v4 = vpop.permute.xlu0 %2858  ;;  %v2865_v28 = vadd.f32 %v2861_v23, %v2851_v19  ;;  %v9078_v23 = vld [vmem:[%s7460_s10 + $0x8] sm:$0xff]  ;;  %v3613_v27 = vrot.slane %v3609_v15, 2  ;;  %v3647_v60 = vmul.f32 %v9103_v45, %v3645_v20  ;;  %s9211_s6 = sld [smem:[#allocation6 + $0xfd]] }
 0x29a   : > { %3490 = vrot.lane.b32.xlu1 %v3486_v11, %s7341_s18  ;;  %v2864_v35 = vadd.f32 %v2859_v4, %v2850_v63  ;;  %v3598_v22 = vsel %vm341_vm1, %v3596_v10, %v3597_v31  ;;  %v2982_v58 = vmul.f32 %v9078_v23, %v2980_v13  ;;  %v2981_v63 = vmul.f32 %v9082_v37, %v2980_v13 }
 0x29b   : > { %3488 = vrot.lane.b32.xlu0 %v3487_v25, %s7341_s18 }
 0x29c   : > { %v2875_v36 = vpop.permute.xlu1 %2874  ;;  %v2984_v33 = vadd.f32 %v2982_v58, %v2978_v26  ;;  %v2983_v38 = vadd.f32 %v2981_v63, %v2978_v26  ;;  %v3736_v63 = vstv %s9119_s22  ;;  %s9236_s22 = sld [smem:[#allocation6 + $0x103]] }
 0x29d   : > { %v2879_v41 = vadd.f32 %v2875_v36, %v2865_v28  ;;  %v2873_v42 = vpop.permute.xlu0 %2872  ;;  %v3016_v28 = vmul.f32 %v9078_v23, %v3014_v18 }
 0x29e   : > { %v2878_v46 = vadd.f32 %v2873_v42, %v2864_v35  ;;  %3510 = vrot.lane.b32.xlu1 %v3505_v62, %s7342_s23  ;;  %v3631_v35 = vstv %s9062_s5  ;;  %s9200_s5 = sld [smem:[#allocation6 + $0xd2]] }
 0x29f   : > { %3508 = vrot.lane.b32.xlu0 %v3504_v29, %s7342_s23  ;;  %v2892_v49 = vadd.f32 %v2887_v30, %v2879_v41  ;;  %v3614_v30 = vrot.slane %v3610_v14, 2  ;;  %v3015_v29 = vmul.f32 %v9082_v37, %v3014_v18  ;;  %v3020_v42 = vrot.slane %v3016_v28, 1 }
 0x2a0   : > { %v2905_v21 = vpop.permute.xlu1 %2904  ;;  %v2891_v7 = vadd.f32 %v2888_v43, %v2878_v46  ;;  %v3633_v46 = vmul.f32 %v9103_v45, %v3631_v35  ;;  %v3108_v28 = vstv %s9128_s26  ;;  %s9251_s26 = sld [smem:[#allocation6 + $0x104]] }
 0x2a1   : > { %v2903_v53 = vpop.permute.xlu0 %2902  ;;  %v2909_v57 = vadd.f32 %v2905_v21, %v2892_v49  ;;  %v3615_v40 = vsel %vm341_vm1, %v3613_v27, %v3614_v30  ;;  %v3019_v43 = vrot.slane %v3015_v29, 1  ;;  %v9109_v49 = vld [vmem:[%s7460_s10 + $0x20] sm:$0xff]  ;;  %v3689_v21 = vstv %s9085_s7  ;;  %s9222_s7 = sld [smem:[#allocation6 + $0xd5]] }
 0x2a2   : > { %3524 = vrot.lane.b32.xlu1 %v3519_v47, %s7341_s18  ;;  %v2908_v3 = vadd.f32 %v2903_v53, %v2891_v7  ;;  %v3061_v47 = vstv %s9073_s15  ;;  %v3673_v52 = vmul.f32 %v9109_v49, %v3672_v16  ;;  %v3691_v61 = vmul.f32 %v9103_v45, %v3689_v21  ;;  %v9164_v16 = vld [vmem:[%s7460_s10 + $0x10] sm:$0xff]  ;;  %s9218_s15 = sld [smem:[#allocation6 + $0x100]] }
 0x2a3   : > { %3522 = vrot.lane.b32.xlu0 %v3518_v50, %s7341_s18  ;;  %v3632_v50 = vmul.f32 %v9109_v49, %v3631_v35  ;;  %v3738_v29 = vmul.f32 %v9103_v45, %v3736_v63  ;;  %v3142_v35 = vstv %s9131_s11  ;;  %s9260_s11 = sld [smem:[#allocation6 + $0xd8]] }
 0x2a4   : > { %v2922_v5 = vpop.permute.xlu1 %2921  ;;  %v3677_v24 = vrot.slane %v3673_v52, 1  ;;  %v3695_v10 = vrot.slane %v3691_v61, 1  ;;  %v3764_v52 = vstv %s9142_s21  ;;  %s9263_s21 = sld [smem:[#allocation6 + $0xdb]] }
 0x2a5   : > { %v2926_v0 = vadd.f32 %v2922_v5, %v2909_v57  ;;  %v2920_v1 = vpop.permute.xlu0 %2919  ;;  %v3063_v57 = vmul.f32 %v9078_v23, %v3061_v47  ;;  %v3646_v5 = vmul.f32 %v9109_v49, %v3645_v20  ;;  %v3766_v61 = vmul.f32 %v9078_v23, %v3764_v52 }
 0x2a6   : > { %v2925_v9 = vadd.f32 %v2920_v1, %v2908_v3  ;;  %3554 = vrot.lane.b32.xlu1 %v3550_v51, %s7342_s23 }
 0x2a7   : > { %3552 = vrot.lane.b32.xlu0 %v3551_v6, %s7342_s23  ;;  %v2939_v44 = vadd.f32 %v2934_v55, %v2926_v0  ;;  %v3021_v55 = vsel %vm293_vm0, %v3019_v43, %v3020_v42  ;;  %v3690_v6 = vmul.f32 %v9109_v49, %v3689_v21  ;;  %v3143_v21 = vmul.f32 %v9164_v16, %v3142_v35 }
 0x2a8   : > { %v2952_v11 = vpop.permute.xlu1 %2951  ;;  %v2938_v12 = vadd.f32 %v2935_v8, %v2925_v9  ;;  %v3678_v8 = vrot.slane %v3674_v2, 1  ;;  %v3719_v9 = vstv %s9098_s8  ;;  %s9227_s8 = sld [smem:[#allocation6 + $0x101]] }
 0x2a9   : > { %v2950_v17 = vpop.permute.xlu0 %2949  ;;  %v2956_v19 = vadd.f32 %v2952_v11, %v2939_v44  ;;  %v3721_v13 = vmul.f32 %v9103_v45, %v3719_v9  ;;  %v3720_v14 = vmul.f32 %v9109_v49, %v3719_v9 }
 0x2aa   : > { %3571 = vrot.lane.b32.xlu1 %v3567_v56, %s7341_s18  ;;  %v2955_v25 = vadd.f32 %v2950_v17, %v2938_v12  ;;  %v3062_v56 = vmul.f32 %v9082_v37, %v3061_v47  ;;  %v3694_v12 = vrot.slane %v3690_v6, 1  ;;  %v3679_v18 = vsel %vm293_vm0, %v3677_v24, %v3678_v8 }
 0x2ab   : > { %3569 = vrot.lane.b32.xlu0 %v3568_v34, %s7341_s18  ;;  %v3724_v27 = vrot.slane %v3720_v14, 2  ;;  %v3742_v47 = vrot.slane %v3738_v29, 2  ;;  %v3765_v6 = vmul.f32 %v9082_v37, %v3764_v52 }
 0x2ac   : > { %v2969_v4 = vpop.permute.xlu1 %2968  ;;  %v3066_v34 = vrot.slane %v3062_v56, 2  ;;  %v3696_v26 = vsel %vm293_vm0, %v3694_v12, %v3695_v10 }
 0x2ad   : > { %v2973_v62 = vadd.f32 %v2969_v4, %v2956_v19  ;;  %v2967_v39 = vpop.permute.xlu0 %2966 }
 0x2ae   : > { %v2972_v32 = vadd.f32 %v2967_v39, %v2955_v25  ;;  %3601 = vrot.lane.b32.xlu1 %v3597_v31, %s7342_s23  ;;  %v3067_v31 = vrot.slane %v3063_v57, 2  ;;  %v3147_v57 = vrot.slane %v3143_v21, 1 }
 0x2af   : > { %6823 = vst.msk [vmem:[%s7853_s9 + $0x68] sm:$0x3f] %vm641_vm2, %v2973_v62  ;;  %3599 = vrot.lane.b32.xlu0 %v3598_v22, %s7342_s23 }
 0x2b0   : > { %6822 = vst.msk [vmem:[%s7853_s9 + $0x60] sm:$0xff] %vm639_vm3, %v2972_v32  ;;  %v2994_v36 = vpop.permute.xlu1 %2993  ;;  %v3068_v58 = vsel %vm341_vm1, %v3066_v34, %v3067_v31  ;;  %v3737_v32 = vmul.f32 %v9109_v49, %v3736_v63 }
 0x2b1   : > { %v2992_v41 = vpop.permute.xlu0 %2991  ;;  %v2998_v48 = vadd.f32 %v2994_v36, %v2984_v33 }
 0x2b2   : > { %3618 = vrot.lane.b32.xlu1 %v3614_v30, %s7341_s18  ;;  %v2997_v7 = vadd.f32 %v2992_v41, %v2983_v38  ;;  %v3725_v30 = vrot.slane %v3721_v13, 2 }
 0x2b3   : > { %3616 = vrot.lane.b32.xlu0 %v3615_v40, %s7341_s18  ;;  %v9158_v40 = vld [vmem:[%s7460_s10 + $0x18] sm:$0xff] }
 0x2b4   : > { %v3008_v51 = vpop.permute.xlu1 %3007  ;;  %v3726_v38 = vsel %vm341_vm1, %v3724_v27, %v3725_v30  ;;  %v3110_v41 = vmul.f32 %v9158_v40, %v3108_v28 }
 0x2b5   : > { %v3012_v53 = vadd.f32 %v3008_v51, %v2998_v48  ;;  %v3006_v54 = vpop.permute.xlu0 %3005  ;;  %v3741_v48 = vrot.slane %v3737_v32, 2 }
 0x2b6   : > { %v3011_v59 = vadd.f32 %v3006_v54, %v2997_v7  ;;  %3638 = vrot.lane.b32.xlu1 %v3633_v46, %s7342_s23  ;;  %v3109_v46 = vmul.f32 %v9164_v16, %v3108_v28  ;;  %v3144_v7 = vmul.f32 %v9158_v40, %v3142_v35 }
 0x2b7   : > { %3636 = vrot.lane.b32.xlu0 %v3632_v50, %s7342_s23  ;;  %v3025_v3 = vadd.f32 %v3020_v42, %v3012_v53 }
 0x2b8   : > { %v3038_v0 = vpop.permute.xlu1 %3037  ;;  %v3024_v1 = vadd.f32 %v3021_v55, %v3011_v59  ;;  %v3743_v55 = vsel %vm341_vm1, %v3741_v48, %v3742_v47  ;;  %v3148_v59 = vrot.slane %v3144_v7, 1 }
 0x2b9   : > { %v3036_v44 = vpop.permute.xlu0 %3035  ;;  %v3042_v11 = vadd.f32 %v3038_v0, %v3025_v3  ;;  %v3189_v3 = vstv %s9153_s24  ;;  %v3778_v0 = vstv %s9147_s12  ;;  %s9269_s12 = sld [smem:[#allocation7 + $0x8]] }
 0x2ba   : > { %3652 = vrot.lane.b32.xlu1 %v3647_v60, %s7341_s18  ;;  %v3041_v15 = vadd.f32 %v3036_v44, %v3024_v1  ;;  %v3805_v60 = vstv %s9149_s20  ;;  %v3822_v1 = vstv %s9161_s25  ;;  %v3191_v12 = vmul.f32 %v9158_v40, %v3189_v3  ;;  %s9276_s20 = sld [smem:[#allocation6 + $0x106]] }
 0x2bb   : > { %3650 = vrot.lane.b32.xlu0 %v3646_v5, %s7341_s18  ;;  %v3807_v9 = vmul.f32 %v9078_v23, %v3805_v60  ;;  %v3806_v44 = vmul.f32 %v9082_v37, %v3805_v60  ;;  %v3780_v14 = vmul.f32 %v9078_v23, %v3778_v0  ;;  %s9281_s24 = sld [smem:[#allocation6 + $0x107]] }
 0x2bc   : > { %v3055_v17 = vpop.permute.xlu1 %3054  ;;  %v3195_v27 = vrot.slane %v3191_v12, 2  ;;  %s9283_s25 = sld [smem:[#allocation6 + $0x109]] }
 0x2bd   : > { %v3059_v19 = vadd.f32 %v3055_v17, %v3042_v11  ;;  %v3053_v22 = vpop.permute.xlu0 %3052  ;;  %v3190_v11 = vmul.f32 %v9164_v16, %v3189_v3  ;;  %v3811_v63 = vrot.slane %v3807_v9, 1 }
 0x2be   : > { %v3058_v25 = vadd.f32 %v3053_v22, %v3041_v15  ;;  %3682 = vrot.lane.b32.xlu1 %v3678_v8, %s7342_s23  ;;  %v3824_v15 = vmul.f32 %v9078_v23, %v3822_v1 }
 0x2bf   : > { %3680 = vrot.lane.b32.xlu0 %v3679_v18, %s7342_s23  ;;  %v3072_v4 = vadd.f32 %v3067_v31, %v3059_v19  ;;  %v3779_v18 = vmul.f32 %v9082_v37, %v3778_v0  ;;  %v3823_v19 = vmul.f32 %v9082_v37, %v3822_v1 }
 0x2c0   : > { %v3085_v62 = vpop.permute.xlu1 %3084  ;;  %v3071_v39 = vadd.f32 %v3068_v58, %v3058_v25  ;;  %v3810_v25 = vrot.slane %v3806_v44, 1  ;;  %v3892_v44 = vstv %s9211_s6  ;;  %s9330_s6 = sld [smem:[#allocation6 + $0xe1]] }
 0x2c1   : > { %v3083_v33 = vpop.permute.xlu0 %3082  ;;  %v3089_v36 = vadd.f32 %v3085_v62, %v3072_v4  ;;  %v3852_v4 = vstv %s9173_s29  ;;  %v3828_v62 = vrot.slane %v3824_v15, 1  ;;  %v3827_v28 = vrot.slane %v3823_v19, 1  ;;  %s9287_s29 = sld [smem:[#allocation6 + $0xde]] }
 0x2c2   : > { %3699 = vrot.lane.b32.xlu1 %v3695_v10, %s7341_s18  ;;  %v3088_v42 = vadd.f32 %v3083_v33, %v3071_v39  ;;  %v3149_v10 = vsel %vm293_vm0, %v3147_v57, %v3148_v59  ;;  %v3854_v29 = vmul.f32 %v9078_v23, %v3852_v4  ;;  %v3853_v32 = vmul.f32 %v9082_v37, %v3852_v4 }
 0x2c3   : > { %3697 = vrot.lane.b32.xlu0 %v3696_v26, %s7341_s18  ;;  %v3829_v48 = vsel %vm293_vm0, %v3827_v28, %v3828_v62  ;;  %v3894_v15 = vmul.f32 %v9158_v40, %v3892_v44  ;;  %v3893_v19 = vmul.f32 %v9164_v16, %v3892_v44 }
 0x2c4   : > { %v3102_v43 = vpop.permute.xlu1 %3101 }
 0x2c5   : > { %v3106_v50 = vadd.f32 %v3102_v43, %v3089_v36  ;;  %v3100_v20 = vpop.permute.xlu0 %3099  ;;  %v3812_v36 = vsel %vm293_vm0, %v3810_v25, %v3811_v63  ;;  %v3869_v43 = vstv %s9188_s30  ;;  %s9293_s30 = sld [smem:[#allocation6 + $0x10a]] }
 0x2c6   : > { %v3105_v51 = vadd.f32 %v3100_v20, %v3088_v42  ;;  %3729 = vrot.lane.b32.xlu1 %v3725_v30, %s7342_s23  ;;  %v3194_v30 = vrot.slane %v3190_v11, 2  ;;  %v3857_v20 = vrot.slane %v3853_v32, 2  ;;  %v3870_v52 = vmul.f32 %v9082_v37, %v3869_v43 }
 0x2c7   : > { %3727 = vrot.lane.b32.xlu0 %v3726_v38, %s7342_s23  ;;  %v3112_v2 = vadd.f32 %v3110_v41, %v3106_v50  ;;  %v3858_v50 = vrot.slane %v3854_v29, 2 }
 0x2c8   : > { %v3122_v53 = vpop.permute.xlu1 %3121  ;;  %v3111_v54 = vadd.f32 %v3109_v46, %v3105_v51  ;;  %v3196_v42 = vsel %vm341_vm1, %v3194_v30, %v3195_v27  ;;  %v3236_v51 = vstv %s9197_s4  ;;  %s9306_s4 = sld [smem:[#allocation6 + $0x10c]] }
 0x2c9   : > { %v3120_v56 = vpop.permute.xlu0 %3119  ;;  %v3126_v5 = vadd.f32 %v3122_v53, %v3112_v2  ;;  %v3871_v2 = vmul.f32 %v9078_v23, %v3869_v43  ;;  %v3238_v57 = vmul.f32 %v9103_v45, %v3236_v51 }
 0x2ca   : > { %3746 = vrot.lane.b32.xlu1 %v3742_v47, %s7341_s18  ;;  %v3125_v8 = vadd.f32 %v3120_v56, %v3111_v54  ;;  %v3270_v54 = vstv %s9200_s5  ;;  %v3859_v56 = vsel %vm341_vm1, %v3857_v20, %v3858_v50  ;;  %s9321_s5 = sld [smem:[#allocation6 + $0x10d]] }
 0x2cb   : > { %3744 = vrot.lane.b32.xlu0 %v3743_v55, %s7341_s18  ;;  %v3875_v3 = vrot.slane %v3871_v2, 2  ;;  %v3271_v1 = vmul.f32 %v9109_v49, %v3270_v54 }
 0x2cc   : > { %v3136_v24 = vpop.permute.xlu1 %3135 }
 0x2cd   : > { %v3140_v34 = vadd.f32 %v3136_v24, %v3126_v5  ;;  %v3134_v31 = vpop.permute.xlu0 %3133  ;;  %v3874_v5 = vrot.slane %v3870_v52, 2  ;;  %v3275_v12 = vrot.slane %v3271_v1, 1 }
 0x2ce   : > { %v3139_v13 = vadd.f32 %v3134_v31, %v3125_v8  ;;  %3771 = vrot.lane.b32.xlu1 %v3766_v61, %s7342_s23  ;;  %v3237_v61 = vmul.f32 %v9109_v49, %v3236_v51  ;;  %v3272_v8 = vmul.f32 %v9103_v45, %v3270_v54 }
 0x2cf   : > { %3769 = vrot.lane.b32.xlu0 %v3765_v6, %s7342_s23  ;;  %v3153_v17 = vadd.f32 %v3148_v59, %v3140_v34 }
 0x2d0   : > { %v3166_v22 = vpop.permute.xlu1 %3165  ;;  %v3152_v58 = vadd.f32 %v3149_v10, %v3139_v13  ;;  %v3876_v10 = vsel %vm341_vm1, %v3874_v5, %v3875_v3  ;;  %v3276_v13 = vrot.slane %v3272_v8, 1 }
 0x2d1   : > { %v3164_v26 = vpop.permute.xlu0 %3163  ;;  %v3170_v39 = vadd.f32 %v3166_v22, %v3153_v17  ;;  %v3317_v17 = vstv %s9222_s7  ;;  %v3906_v22 = vstv %s9216_s19  ;;  %s9333_s19 = sld [smem:[#allocation6 + $0xe4]] }
 0x2d2   : > { %3785 = vrot.lane.b32.xlu1 %v3780_v14, %s7341_s18  ;;  %v3169_v33 = vadd.f32 %v3164_v26, %v3152_v58  ;;  %v3933_v14 = vstv %s9218_s15  ;;  %v3950_v58 = vstv %s9227_s8  ;;  %v3319_v28 = vmul.f32 %v9103_v45, %v3317_v17  ;;  %s9344_s15 = sld [smem:[#allocation6 + $0x10f]] }
 0x2d3   : > { %3783 = vrot.lane.b32.xlu0 %v3779_v18, %s7341_s18  ;;  %v3935_v4 = vmul.f32 %v9158_v40, %v3933_v14  ;;  %v3934_v26 = vmul.f32 %v9164_v16, %v3933_v14  ;;  %v3908_v32 = vmul.f32 %v9158_v40, %v3906_v22  ;;  %s9349_s7 = sld [smem:[#allocation6 + $0x110]] }
 0x2d4   : > { %v3183_v35 = vpop.permute.xlu1 %3182  ;;  %v3323_v20 = vrot.slane %v3319_v28, 2  ;;  %s9351_s8 = sld [smem:[#allocation6 + $0x112]] }
 0x2d5   : > { %v3187_v38 = vadd.f32 %v3183_v35, %v3170_v39  ;;  %v3181_v41 = vpop.permute.xlu0 %3180  ;;  %v3318_v39 = vmul.f32 %v9109_v49, %v3317_v17  ;;  %v3939_v43 = vrot.slane %v3935_v4, 1  ;;  %v3367_v17 = vstv %s9269_s12  ;;  %s9393_s12 = sld [smem:[#allocation6 + $0xea]] }
 0x2d6   : > { %v3186_v46 = vadd.f32 %v3181_v41, %v3169_v33  ;;  %3815 = vrot.lane.b32.xlu1 %v3811_v63, %s7342_s23  ;;  %v3952_v33 = vmul.f32 %v9158_v40, %v3950_v58 }
 0x2d7   : > { %3813 = vrot.lane.b32.xlu0 %v3812_v36, %s7342_s23  ;;  %v3200_v47 = vadd.f32 %v3195_v27, %v3187_v38  ;;  %v3907_v36 = vmul.f32 %v9164_v16, %v3906_v22  ;;  %v3951_v38 = vmul.f32 %v9164_v16, %v3950_v58 }
 0x2d8   : > { %v3213_v21 = vpop.permute.xlu1 %3212  ;;  %v3199_v7 = vadd.f32 %v3196_v42, %v3186_v46  ;;  %v3938_v46 = vrot.slane %v3934_v26, 1 }
 0x2d9   : > { %v3211_v53 = vpop.permute.xlu0 %3210  ;;  %v3217_v55 = vadd.f32 %v3213_v21, %v3200_v47  ;;  %v3980_v47 = vstv %s9236_s22  ;;  %v3956_v21 = vrot.slane %v3952_v33, 1  ;;  %v3955_v51 = vrot.slane %v3951_v38, 1  ;;  %s9355_s22 = sld [smem:[#allocation6 + $0xe7]] }
 0x2da   : > { %3832 = vrot.lane.b32.xlu1 %v3828_v62, %s7341_s18  ;;  %v3216_v59 = vadd.f32 %v3211_v53, %v3199_v7  ;;  %v3277_v62 = vsel %vm293_vm0, %v3275_v12, %v3276_v13  ;;  %v3982_v2 = vmul.f32 %v9158_v40, %v3980_v47  ;;  %v3981_v52 = vmul.f32 %v9164_v16, %v3980_v47 }
 0x2db   : > { %3830 = vrot.lane.b32.xlu0 %v3829_v48, %s7341_s18  ;;  %v3957_v5 = vsel %vm293_vm0, %v3955_v51, %v3956_v21  ;;  %v4061_v33 = vstv %s9283_s25  ;;  %s9412_s25 = sld [smem:[#allocation6 + $0x119]] }
 0x2dc   : > { %v3230_v60 = vpop.permute.xlu1 %3229 }
 0x2dd   : > { %v3234_v6 = vadd.f32 %v3230_v60, %v3217_v55  ;;  %v3228_v0 = vpop.permute.xlu0 %3227  ;;  %v3940_v55 = vsel %vm293_vm0, %v3938_v46, %v3939_v43  ;;  %v3997_v60 = vstv %s9251_s26  ;;  %s9360_s26 = sld [smem:[#allocation6 + $0x113]] }
 0x2de   : > { %v3233_v24 = vadd.f32 %v3228_v0, %v3216_v59  ;;  %3862 = vrot.lane.b32.xlu1 %v3858_v50, %s7342_s23  ;;  %v3322_v50 = vrot.slane %v3318_v39, 2  ;;  %v3985_v0 = vrot.slane %v3981_v52, 2  ;;  %v3998_v44 = vmul.f32 %v9164_v16, %v3997_v60 }
 0x2df   : > { %3860 = vrot.lane.b32.xlu0 %v3859_v56, %s7342_s23  ;;  %v3240_v9 = vadd.f32 %v3238_v57, %v3234_v6  ;;  %v3986_v6 = vrot.slane %v3982_v2, 2 }
 0x2e0   : > { %v3250_v34 = vpop.permute.xlu1 %3249  ;;  %v3239_v31 = vadd.f32 %v3237_v61, %v3233_v24  ;;  %v3324_v59 = vsel %vm341_vm1, %v3322_v50, %v3323_v20  ;;  %v3369_v24 = vstv %s9260_s11  ;;  %v4062_v50 = vmul.f32 %v9109_v49, %v4061_v33  ;;  %s9369_s11 = sld [smem:[#allocation6 + $0x115]] }
 0x2e1   : > { %v3248_v11 = vpop.permute.xlu0 %3247  ;;  %v3254_v18 = vadd.f32 %v3250_v34, %v3240_v9  ;;  %v3999_v9 = vmul.f32 %v9158_v40, %v3997_v60  ;;  %v3371_v12 = vmul.f32 %v9078_v23, %v3369_v24 }
 0x2e2   : > { %3879 = vrot.lane.b32.xlu1 %v3875_v3, %s7341_s18  ;;  %v3253_v63 = vadd.f32 %v3248_v11, %v3239_v31  ;;  %v3403_v31 = vstv %s9263_s21  ;;  %v3987_v11 = vsel %vm341_vm1, %v3985_v0, %v3986_v6  ;;  %s9384_s21 = sld [smem:[#allocation6 + $0x116]] }
 0x2e3   : > { %3877 = vrot.lane.b32.xlu0 %v3876_v10, %s7341_s18  ;;  %v3373_v26 = vadd.f32 %v3371_v12, %v3367_v17 }
 0x2e4   : > { %v3264_v25 = vpop.permute.xlu1 %3263 }
 0x2e5   : > { %v3268_v30 = vadd.f32 %v3264_v25, %v3254_v18  ;;  %v3262_v27 = vpop.permute.xlu0 %3261  ;;  %v4003_v18 = vrot.slane %v3999_v9, 2  ;;  %v3404_v25 = vmul.f32 %v9082_v37, %v3403_v31 }
 0x2e6   : > { %v3267_v29 = vadd.f32 %v3262_v27, %v3253_v63  ;;  %3899 = vrot.lane.b32.xlu1 %v3894_v15, %s7342_s23  ;;  %v3405_v63 = vmul.f32 %v9078_v23, %v3403_v31 }
 0x2e7   : > { %3897 = vrot.lane.b32.xlu0 %v3893_v19, %s7342_s23  ;;  %v3281_v35 = vadd.f32 %v3276_v13, %v3268_v30  ;;  %v3370_v13 = vmul.f32 %v9082_v37, %v3369_v24  ;;  %v4002_v19 = vrot.slane %v3998_v44, 2  ;;  %v4020_v30 = vstv %s9276_s20  ;;  %s9396_s20 = sld [smem:[#allocation6 + $0xed]] }
 0x2e8   : > { %v3294_v41 = vpop.permute.xlu1 %3293  ;;  %v3280_v42 = vadd.f32 %v3277_v62, %v3267_v29  ;;  %v3409_v29 = vrot.slane %v3405_v63, 1 }
 0x2e9   : > { %v3292_v48 = vpop.permute.xlu0 %3291  ;;  %v3298_v7 = vadd.f32 %v3294_v41, %v3281_v35  ;;  %v3372_v62 = vadd.f32 %v3370_v13, %v3367_v17  ;;  %v4004_v39 = vsel %vm341_vm1, %v4002_v19, %v4003_v18  ;;  %v4022_v35 = vmul.f32 %v9103_v45, %v4020_v30 }
 0x2ea   : > { %3913 = vrot.lane.b32.xlu1 %v3908_v32, %s7341_s18  ;;  %v3297_v53 = vadd.f32 %v3292_v48, %v3280_v42  ;;  %v3408_v32 = vrot.slane %v3404_v25, 1  ;;  %v4021_v41 = vmul.f32 %v9109_v49, %v4020_v30  ;;  %v4034_v42 = vstv %s9281_s24  ;;  %s9407_s24 = sld [smem:[#allocation6 + $0x118]] }
 0x2eb   : > { %3911 = vrot.lane.b32.xlu0 %v3907_v36, %s7341_s18  ;;  %v3450_v36 = vstv %s9287_s29  ;;  %v4063_v48 = vmul.f32 %v9103_v45, %v4061_v33  ;;  %s9414_s29 = sld [smem:[#allocation6 + $0x11b]] }
 0x2ec   : > { %v3311_v54 = vpop.permute.xlu1 %3310  ;;  %v3451_v51 = vmul.f32 %v9082_v37, %v3450_v36  ;;  %v3452_v2 = vmul.f32 %v9078_v23, %v3450_v36 }
 0x2ed   : > { %v3315_v56 = vadd.f32 %v3311_v54, %v3298_v7  ;;  %v3309_v57 = vpop.permute.xlu0 %3308  ;;  %v3410_v7 = vsel %vm293_vm0, %v3408_v32, %v3409_v29 }
 0x2ee   : > { %v3314_v61 = vadd.f32 %v3309_v57, %v3297_v53  ;;  %3943 = vrot.lane.b32.xlu1 %v3939_v43, %s7342_s23  ;;  %v4078_v43 = vstv %s9293_s30  ;;  %v4036_v53 = vmul.f32 %v9103_v45, %v4034_v42  ;;  %v3455_v0 = vrot.slane %v3451_v51, 2  ;;  %s9418_s30 = sld [smem:[#allocation6 + $0xf0]] }
 0x2ef   : > { %3941 = vrot.lane.b32.xlu0 %v3940_v55, %s7342_s23  ;;  %v3328_v3 = vadd.f32 %v3323_v20, %v3315_v56  ;;  %v4080_v54 = vmul.f32 %v9103_v45, %v4078_v43  ;;  %v4035_v56 = vmul.f32 %v9109_v49, %v4034_v42  ;;  %v4079_v57 = vmul.f32 %v9109_v49, %v4078_v43 }
 0x2f0   : > { %v3341_v1 = vpop.permute.xlu1 %3340  ;;  %v3327_v8 = vadd.f32 %v3324_v59, %v3314_v61  ;;  %v4067_v61 = vrot.slane %v4063_v48, 1 }
 0x2f1   : > { %v3339_v34 = vpop.permute.xlu0 %3338  ;;  %v3345_v10 = vadd.f32 %v3341_v1, %v3328_v3  ;;  %v4066_v3 = vrot.slane %v4062_v50, 1  ;;  %v3456_v1 = vrot.slane %v3452_v2, 2  ;;  %v4083_v9 = vrot.slane %v4079_v57, 1 }
 0x2f2   : > { %3960 = vrot.lane.b32.xlu1 %v3956_v21, %s7341_s18  ;;  %v3344_v14 = vadd.f32 %v3339_v34, %v3327_v8  ;;  %v4084_v8 = vrot.slane %v4080_v54, 1  ;;  %v4153_v50 = vstv %s9344_s15  ;;  %s9459_s15 = sld [smem:[#allocation6 + $0xf6]] }
 0x2f3   : > { %3958 = vrot.lane.b32.xlu0 %v3957_v5, %s7341_s18  ;;  %v4108_v5 = vstv %s9306_s4  ;;  %v4155_v54 = vmul.f32 %v9078_v23, %v4153_v50  ;;  %v4154_v57 = vmul.f32 %v9082_v37, %v4153_v50  ;;  %s9423_s4 = sld [smem:[#allocation6 + $0x11c]] }
 0x2f4   : > { %v3358_v15 = vpop.permute.xlu1 %3357  ;;  %v4110_v44 = vmul.f32 %v9103_v45, %v4108_v5  ;;  %v4109_v34 = vmul.f32 %v9109_v49, %v4108_v5  ;;  %v4085_v19 = vsel %vm293_vm0, %v4083_v9, %v4084_v8 }
 0x2f5   : > { %v3362_v22 = vadd.f32 %v3358_v15, %v3345_v10  ;;  %v3356_v58 = vpop.permute.xlu0 %3355  ;;  %v4125_v15 = vstv %s9321_s5  ;;  %s9432_s5 = sld [smem:[#allocation6 + $0x11e]] }
 0x2f6   : > { %v3361_v4 = vadd.f32 %v3356_v58, %v3344_v14  ;;  %3990 = vrot.lane.b32.xlu1 %v3986_v6, %s7342_s23  ;;  %v3457_v14 = vsel %vm341_vm1, %v3455_v0, %v3456_v1  ;;  %v4113_v58 = vrot.slane %v4109_v34, 2  ;;  %v4126_v30 = vmul.f32 %v9109_v49, %v4125_v15 }
 0x2f7   : > { %6853 = vst.msk [vmem:[%s7853_s9 + $0x78] sm:$0x3f] %vm641_vm2, %v3362_v22  ;;  %3988 = vrot.lane.b32.xlu0 %v3987_v11, %s7342_s23  ;;  %v4068_v11 = vsel %vm293_vm0, %v4066_v3, %v4067_v61  ;;  %v4114_v22 = vrot.slane %v4110_v44, 2 }
 0x2f8   : > { %6852 = vst.msk [vmem:[%s7853_s9 + $0x70] sm:$0xff] %vm639_vm3, %v3361_v4  ;;  %v3383_v27 = vpop.permute.xlu1 %3382  ;;  %v3497_v4 = vstv %s9330_s6  ;;  %s9447_s6 = sld [smem:[#allocation6 + $0x11f]] }
 0x2f9   : > { %v3381_v28 = vpop.permute.xlu0 %3380  ;;  %v3387_v38 = vadd.f32 %v3383_v27, %v3373_v26  ;;  %v4127_v26 = vmul.f32 %v9103_v45, %v4125_v15 }
 0x2fa   : > { %4007 = vrot.lane.b32.xlu1 %v4003_v18, %s7341_s18  ;;  %v3386_v46 = vadd.f32 %v3381_v28, %v3372_v62  ;;  %v3531_v62 = vstv %s9333_s19  ;;  %v4115_v28 = vsel %vm341_vm1, %v4113_v58, %v4114_v22  ;;  %s9456_s19 = sld [smem:[#allocation6 + $0xf3]] }
 0x2fb   : > { %4005 = vrot.lane.b32.xlu0 %v4004_v39, %s7341_s18  ;;  %v4131_v36 = vrot.slane %v4127_v26, 2  ;;  %v3532_v43 = vmul.f32 %v9164_v16, %v3531_v62 }
 0x2fc   : > { %v3397_v47 = vpop.permute.xlu1 %3396 }
 0x2fd   : > { %v3401_v20 = vadd.f32 %v3397_v47, %v3387_v38  ;;  %v3395_v21 = vpop.permute.xlu0 %3394  ;;  %v4130_v38 = vrot.slane %v4126_v30, 2  ;;  %v3536_v2 = vrot.slane %v3532_v43, 1 }
 0x2fe   : > { %v3400_v52 = vadd.f32 %v3395_v21, %v3386_v46  ;;  %4027 = vrot.lane.b32.xlu1 %v4022_v35, %s7342_s23  ;;  %v3498_v35 = vmul.f32 %v9164_v16, %v3497_v4  ;;  %v3533_v46 = vmul.f32 %v9158_v40, %v3531_v62 }
 0x2ff   : > { %4025 = vrot.lane.b32.xlu0 %v4021_v41, %s7342_s23  ;;  %v3414_v55 = vadd.f32 %v3409_v29, %v3401_v20  ;;  %v3499_v29 = vmul.f32 %v9158_v40, %v3497_v4 }
 0x300   : > { %v3427_v59 = vpop.permute.xlu1 %3426  ;;  %v3413_v60 = vadd.f32 %v3410_v7, %v3400_v52  ;;  %v4132_v7 = vsel %vm341_vm1, %v4130_v38, %v4131_v36  ;;  %v3537_v52 = vrot.slane %v3533_v46, 1 }
 0x301   : > { %v3425_v6 = vpop.permute.xlu0 %3424  ;;  %v3431_v24 = vadd.f32 %v3427_v59, %v3414_v55  ;;  %v3578_v55 = vstv %s9355_s22  ;;  %v4167_v59 = vstv %s9349_s7  ;;  %s9465_s7 = sld [smem:[#allocation7 + $0x9]] }
 0x302   : > { %4041 = vrot.lane.b32.xlu1 %v4036_v53, %s7341_s18  ;;  %v3430_v31 = vadd.f32 %v3425_v6, %v3413_v60  ;;  %v4194_v53 = vstv %s9351_s8  ;;  %v4211_v60 = vstv %s9360_s26  ;;  %v3580_v9 = vmul.f32 %v9158_v40, %v3578_v55  ;;  %s9472_s8 = sld [smem:[#allocation6 + $0x121]] }
 0x303   : > { %4039 = vrot.lane.b32.xlu0 %v4035_v56, %s7341_s18  ;;  %v4196_v5 = vmul.f32 %v9078_v23, %v4194_v53  ;;  %v4195_v6 = vmul.f32 %v9082_v37, %v4194_v53  ;;  %v4169_v34 = vmul.f32 %v9078_v23, %v4167_v59  ;;  %s9477_s22 = sld [smem:[#allocation6 + $0x122]] }
 0x304   : > { %v3444_v10 = vpop.permute.xlu1 %3443  ;;  %v3584_v58 = vrot.slane %v3580_v9, 2  ;;  %v4322_v9 = vstv %s9414_s29  ;;  %s9479_s26 = sld [smem:[#allocation6 + $0x124]] }
 0x305   : > { %v3448_v12 = vadd.f32 %v3444_v10, %v3431_v24  ;;  %v3442_v13 = vpop.permute.xlu0 %3441  ;;  %v3579_v24 = vmul.f32 %v9164_v16, %v3578_v55  ;;  %v4200_v15 = vrot.slane %v4196_v5, 1  ;;  %s9552_s29 = sld [smem:[#allocation6 + $0x12a]] }
 0x306   : > { %v3447_v17 = vadd.f32 %v3442_v13, %v3430_v31  ;;  %4071 = vrot.lane.b32.xlu1 %v4067_v61, %s7342_s23  ;;  %v4213_v31 = vmul.f32 %v9078_v23, %v4211_v60 }
 0x307   : > { %4069 = vrot.lane.b32.xlu0 %v4068_v11, %s7342_s23  ;;  %v3461_v18 = vadd.f32 %v3456_v1, %v3448_v12  ;;  %v4168_v11 = vmul.f32 %v9082_v37, %v4167_v59  ;;  %v4212_v12 = vmul.f32 %v9082_v37, %v4211_v60 }
 0x308   : > { %v3474_v63 = vpop.permute.xlu1 %3473  ;;  %v3460_v25 = vadd.f32 %v3457_v14, %v3447_v17  ;;  %v4199_v17 = vrot.slane %v4195_v6, 1 }
 0x309   : > { %v3472_v27 = vpop.permute.xlu0 %3471  ;;  %v3478_v39 = vadd.f32 %v3474_v63, %v3461_v18  ;;  %v4241_v18 = vstv %s9369_s11  ;;  %v4217_v63 = vrot.slane %v4213_v31, 1  ;;  %v4216_v4 = vrot.slane %v4212_v12, 1  ;;  %s9483_s11 = sld [smem:[#allocation6 + $0xf9]] }
 0x30a   : > { %4088 = vrot.lane.b32.xlu1 %v4084_v8, %s7341_s18  ;;  %v3477_v32 = vadd.f32 %v3472_v27, %v3460_v25  ;;  %v3538_v8 = vsel %vm293_vm0, %v3536_v2, %v3537_v52  ;;  %v4243_v26 = vmul.f32 %v9078_v23, %v4241_v18  ;;  %v4242_v30 = vmul.f32 %v9082_v37, %v4241_v18 }
 0x30b   : > { %4086 = vrot.lane.b32.xlu0 %v4085_v19, %s7341_s18  ;;  %v4218_v38 = vsel %vm293_vm0, %v4216_v4, %v4217_v63  ;;  %v4339_v12 = vstv %s9423_s4  ;;  %s9559_s4 = sld [smem:[#allocation6 + $0x12d]] }
 0x30c   : > { %v3491_v33 = vpop.permute.xlu1 %3490 }
 0x30d   : > { %v3495_v41 = vadd.f32 %v3491_v33, %v3478_v39  ;;  %v3489_v42 = vpop.permute.xlu0 %3488  ;;  %v4201_v39 = vsel %vm293_vm0, %v4199_v17, %v4200_v15  ;;  %v4258_v33 = vstv %s9384_s21  ;;  %v4323_v17 = vmul.f32 %v9164_v16, %v4322_v9  ;;  %s9495_s21 = sld [smem:[#allocation6 + $0x125]] }
 0x30e   : > { %v3494_v47 = vadd.f32 %v3489_v42, %v3477_v32  ;;  %4118 = vrot.lane.b32.xlu1 %v4114_v22, %s7342_s23  ;;  %v3583_v22 = vrot.slane %v3579_v24, 2  ;;  %v4246_v42 = vrot.slane %v4242_v30, 2  ;;  %v4259_v50 = vmul.f32 %v9082_v37, %v4258_v33 }
 0x30f   : > { %4116 = vrot.lane.b32.xlu0 %v4115_v28, %s7342_s23  ;;  %v3501_v48 = vadd.f32 %v3499_v29, %v3495_v41  ;;  %v4247_v41 = vrot.slane %v4243_v26, 2  ;;  %v4341_v26 = vmul.f32 %v9158_v40, %v4339_v12 }
 0x310   : > { %v3511_v20 = vpop.permute.xlu1 %3510  ;;  %v3500_v21 = vadd.f32 %v3498_v35, %v3494_v47  ;;  %v3585_v32 = vsel %vm341_vm1, %v3583_v22, %v3584_v58  ;;  %v3625_v47 = vstv %s9393_s12  ;;  %s9508_s12 = sld [smem:[#allocation6 + $0x127]] }
 0x311   : > { %v3509_v51 = vpop.permute.xlu0 %3508  ;;  %v3515_v56 = vadd.f32 %v3511_v20, %v3501_v48  ;;  %v4260_v48 = vmul.f32 %v9078_v23, %v4258_v33  ;;  %v3627_v23 = vmul.f32 %v9103_v45, %v3625_v47 }
 0x312   : > { %4135 = vrot.lane.b32.xlu1 %v4131_v36, %s7341_s18  ;;  %v3514_v61 = vadd.f32 %v3509_v51, %v3500_v21  ;;  %v3659_v21 = vstv %s9396_s20  ;;  %v4248_v51 = vsel %vm341_vm1, %v4246_v42, %v4247_v41  ;;  %s9529_s20 = sld [smem:[#allocation6 + $0x128]] }
 0x313   : > { %4133 = vrot.lane.b32.xlu0 %v4132_v7, %s7341_s18  ;;  %v4264_v53 = vrot.slane %v4260_v48, 2  ;;  %v3661_v59 = vmul.f32 %v9103_v45, %v3659_v21 }
 0x314   : > { %v3525_v3 = vpop.permute.xlu1 %3524 }
 0x315   : > { %v3529_v0 = vadd.f32 %v3525_v3, %v3515_v56  ;;  %v3523_v1 = vpop.permute.xlu0 %3522  ;;  %v4281_v3 = vstv %s9407_s24  ;;  %v3665_v24 = vrot.slane %v3661_v59, 1  ;;  %s9538_s24 = sld [smem:[#allocation6 + $0xfc]] }
 0x316   : > { %v3528_v44 = vadd.f32 %v3523_v1, %v3514_v61  ;;  %4160 = vrot.lane.b32.xlu1 %v4155_v54, %s7342_s23  ;;  %v4263_v54 = vrot.slane %v4259_v50, 2 }
 0x317   : > { %4158 = vrot.lane.b32.xlu0 %v4154_v57, %s7342_s23  ;;  %v3542_v10 = vadd.f32 %v3537_v52, %v3529_v0  ;;  %v3626_v52 = vmul.f32 %v9109_v49, %v3625_v47  ;;  %v3660_v57 = vmul.f32 %v9109_v49, %v3659_v21 }
 0x318   : > { %v3555_v13 = vpop.permute.xlu1 %3554  ;;  %v3541_v14 = vadd.f32 %v3538_v8, %v3528_v44  ;;  %v4265_v0 = vsel %vm341_vm1, %v4263_v54, %v4264_v53  ;;  %v4283_v44 = vmul.f32 %v9158_v40, %v4281_v3 }
 0x319   : > { %v3553_v19 = vpop.permute.xlu0 %3552  ;;  %v3559_v25 = vadd.f32 %v3555_v13, %v3542_v10  ;;  %v3664_v8 = vrot.slane %v3660_v57, 1  ;;  %v4282_v10 = vmul.f32 %v9164_v16, %v4281_v3 }
 0x31a   : > { %4174 = vrot.lane.b32.xlu1 %v4169_v34, %s7341_s18  ;;  %v3558_v27 = vadd.f32 %v3553_v19, %v3541_v14  ;;  %v3706_v34 = vstv %s9418_s30  ;;  %s9557_s30 = sld [smem:[#allocation6 + $0x12b]] }
 0x31b   : > { %4172 = vrot.lane.b32.xlu0 %v4168_v11, %s7341_s18  ;;  %v4295_v11 = vstv %s9412_s25  ;;  %v3666_v22 = vsel %vm293_vm0, %v3664_v8, %v3665_v24  ;;  %v3756_v8 = vstv %s9465_s7  ;;  %s9541_s25 = sld [smem:[#allocation6 + $0xff]] }
 0x31c   : > { %v3572_v62 = vpop.permute.xlu1 %3571  ;;  %v4297_v4 = vmul.f32 %v9158_v40, %v4295_v11  ;;  %s9607_s7 = sld [smem:[#allocation6 + $0x105]] }
 0x31d   : > { %v3576_v28 = vadd.f32 %v3572_v62, %v3559_v25  ;;  %v3570_v29 = vpop.permute.xlu0 %3569  ;;  %v4340_v62 = vmul.f32 %v9164_v16, %v4339_v12 }
 0x31e   : > { %v3575_v35 = vadd.f32 %v3570_v29, %v3558_v27  ;;  %4204 = vrot.lane.b32.xlu1 %v4200_v15, %s7342_s23  ;;  %v4324_v15 = vmul.f32 %v9158_v40, %v4322_v9  ;;  %v4296_v27 = vmul.f32 %v9164_v16, %v4295_v11  ;;  %v4369_v29 = vstv %s9432_s5  ;;  %s9563_s5 = sld [smem:[#allocation6 + $0x102]] }
 0x31f   : > { %4202 = vrot.lane.b32.xlu0 %v4201_v39, %s7342_s23  ;;  %v3589_v36 = vadd.f32 %v3584_v58, %v3576_v28  ;;  %v3707_v58 = vmul.f32 %v9109_v49, %v3706_v34  ;;  %v4371_v42 = vmul.f32 %v9158_v40, %v4369_v29 }
 0x320   : > { %v3602_v43 = vpop.permute.xlu1 %3601  ;;  %v3588_v46 = vadd.f32 %v3585_v32, %v3575_v35  ;;  %v4328_v28 = vrot.slane %v4324_v15, 1 }
 0x321   : > { %v3600_v20 = vpop.permute.xlu0 %3599  ;;  %v3606_v7 = vadd.f32 %v3602_v43, %v3589_v36  ;;  %v3711_v33 = vrot.slane %v3707_v58, 2  ;;  %v4345_v36 = vrot.slane %v4341_v26, 1  ;;  %v4370_v43 = vmul.f32 %v9164_v16, %v4369_v29 }
 0x322   : > { %4221 = vrot.lane.b32.xlu1 %v4217_v63, %s7341_s18  ;;  %v3605_v37 = vadd.f32 %v3600_v20, %v3588_v46  ;;  %v3708_v63 = vmul.f32 %v9103_v45, %v3706_v34  ;;  %v4327_v45 = vrot.slane %v4323_v17, 1  ;;  %v4450_v58 = vstv %s9479_s26  ;;  %s9626_s26 = sld [smem:[#allocation6 + $0x134]] }
 0x323   : > { %4219 = vrot.lane.b32.xlu0 %v4218_v38, %s7341_s18 }
 0x324   : > { %v3619_v2 = vpop.permute.xlu1 %3618  ;;  %v3712_v35 = vrot.slane %v3708_v63, 2  ;;  %v4329_v48 = vsel %vm293_vm0, %v4327_v45, %v4328_v28  ;;  %v9513_v63 = vld [vmem:[%s7460_s10 + $0x28] sm:$0xff] }
 0x325   : > { %v3623_v55 = vadd.f32 %v3619_v2, %v3606_v7  ;;  %v3617_v56 = vpop.permute.xlu0 %3616  ;;  %v4386_v7 = vstv %s9447_s6  ;;  %v4375_v2 = vrot.slane %v4371_v42, 2  ;;  %v4452_v45 = vmul.f32 %v9513_v63, %v4450_v58  ;;  %s9571_s6 = sld [smem:[#allocation6 + $0x12e]] }
 0x326   : > { %v3622_v60 = vadd.f32 %v3617_v56, %v3605_v37  ;;  %4251 = vrot.lane.b32.xlu1 %v4247_v41, %s7342_s23  ;;  %v4344_v41 = vrot.slane %v4340_v62, 1  ;;  %v3713_v21 = vsel %vm341_vm1, %v3711_v33, %v3712_v35  ;;  %v4388_v56 = vmul.f32 %v9158_v40, %v4386_v7 }
 0x327   : > { %4249 = vrot.lane.b32.xlu0 %v4248_v51, %s7342_s23  ;;  %v3629_v61 = vadd.f32 %v3627_v23, %v3623_v55  ;;  %v3758_v55 = vstv %s9456_s19  ;;  %v4387_v57 = vmul.f32 %v9164_v16, %v4386_v7  ;;  %v9492_v16 = vld [vmem:[%s7460_s10] sm:$0xff]  ;;  %v4423_v62 = vstv %s9477_s22  ;;  %s9583_s19 = sld [smem:[#allocation6 + $0x130]] }
 0x328   : > { %v3639_v5 = vpop.permute.xlu1 %3638  ;;  %v3628_v6 = vadd.f32 %v3626_v52, %v3622_v60  ;;  %v4346_v37 = vsel %vm293_vm0, %v4344_v41, %v4345_v36  ;;  %v4374_v52 = vrot.slane %v4370_v43, 2  ;;  %v3792_v60 = vstv %s9459_s15  ;;  %s9598_s15 = sld [smem:[#allocation6 + $0x131]] }
 0x329   : > { %v3637_v1 = vpop.permute.xlu0 %3636  ;;  %v3643_v31 = vadd.f32 %v3639_v5, %v3629_v61  ;;  %v9488_v5 = vld [vmem:[%s7460_s10 + $0x8] sm:$0xff]  ;;  %v4391_v9 = vrot.slane %v4387_v57, 2  ;;  %v4425_v42 = vmul.f32 %v9513_v63, %v4423_v62  ;;  %s9621_s22 = sld [smem:[#allocation6 + $0x133]] }
 0x32a   : > { %4268 = vrot.lane.b32.xlu1 %v4264_v53, %s7341_s18  ;;  %v3642_v13 = vadd.f32 %v3637_v1, %v3628_v6  ;;  %v4376_v3 = vsel %vm341_vm1, %v4374_v52, %v4375_v2  ;;  %v3760_v40 = vmul.f32 %v9488_v5, %v3758_v55  ;;  %v3759_v6 = vmul.f32 %v9492_v16, %v3758_v55 }
 0x32b   : > { %4266 = vrot.lane.b32.xlu0 %v4265_v0, %s7341_s18 }
 0x32c   : > { %v3653_v14 = vpop.permute.xlu1 %3652  ;;  %v3762_v12 = vadd.f32 %v3760_v40, %v3756_v8  ;;  %v3761_v15 = vadd.f32 %v3759_v6, %v3756_v8  ;;  %v4514_v6 = vstv %s9529_s20  ;;  %s9646_s20 = sld [smem:[#allocation6 + $0x139]] }
 0x32d   : > { %v3657_v18 = vadd.f32 %v3653_v14, %v3643_v31  ;;  %v3651_v19 = vpop.permute.xlu0 %3650  ;;  %v3794_v31 = vmul.f32 %v9488_v5, %v3792_v60 }
 0x32e   : > { %v3656_v25 = vadd.f32 %v3651_v19, %v3642_v13  ;;  %4288 = vrot.lane.b32.xlu1 %v4283_v44, %s7342_s23  ;;  %v4409_v13 = vstv %s9472_s8  ;;  %s9610_s8 = sld [smem:[#allocation6 + $0x108]] }
 0x32f   : > { %4286 = vrot.lane.b32.xlu0 %v4282_v10, %s7342_s23  ;;  %v3670_v30 = vadd.f32 %v3665_v24, %v3657_v18  ;;  %v4392_v24 = vrot.slane %v4388_v56, 2  ;;  %v3793_v10 = vmul.f32 %v9492_v16, %v3792_v60  ;;  %v3798_v19 = vrot.slane %v3794_v31, 1 }
 0x330   : > { %v3683_v39 = vpop.permute.xlu1 %3682  ;;  %v3669_v49 = vadd.f32 %v3666_v22, %v3656_v25  ;;  %v4411_v25 = vmul.f32 %v9513_v63, %v4409_v13  ;;  %v3886_v31 = vstv %s9538_s24  ;;  %s9661_s24 = sld [smem:[#allocation6 + $0x13a]] }
 0x331   : > { %v3681_v32 = vpop.permute.xlu0 %3680  ;;  %v3687_v38 = vadd.f32 %v3683_v39, %v3670_v30  ;;  %v4393_v17 = vsel %vm341_vm1, %v4391_v9, %v4392_v24  ;;  %v3797_v22 = vrot.slane %v3793_v10, 1  ;;  %v9519_v30 = vld [vmem:[%s7460_s10 + $0x20] sm:$0xff]  ;;  %v4467_v39 = vstv %s9495_s21  ;;  %s9632_s21 = sld [smem:[#allocation6 + $0x10b]] }
 0x332   : > { %4302 = vrot.lane.b32.xlu1 %v4297_v4, %s7341_s18  ;;  %v3686_v46 = vadd.f32 %v3681_v32, %v3669_v49  ;;  %v3839_v4 = vstv %s9483_s11  ;;  %v4451_v29 = vmul.f32 %v9519_v30, %v4450_v58  ;;  %v4469_v43 = vmul.f32 %v9513_v63, %v4467_v39  ;;  %v9574_v58 = vld [vmem:[%s7460_s10 + $0x10] sm:$0xff]  ;;  %s9628_s11 = sld [smem:[#allocation6 + $0x136]] }
 0x333   : > { %4300 = vrot.lane.b32.xlu0 %v4296_v27, %s7341_s18  ;;  %v4410_v27 = vmul.f32 %v9519_v30, %v4409_v13  ;;  %v4516_v10 = vmul.f32 %v9513_v63, %v4514_v6  ;;  %v3920_v13 = vstv %s9541_s25  ;;  %s9670_s25 = sld [smem:[#allocation6 + $0x10e]] }
 0x334   : > { %v3700_v47 = vpop.permute.xlu1 %3699  ;;  %v4455_v7 = vrot.slane %v4451_v29, 1  ;;  %v4473_v52 = vrot.slane %v4469_v43, 1  ;;  %v4542_v29 = vstv %s9552_s29  ;;  %s9673_s29 = sld [smem:[#allocation6 + $0x111]] }
 0x335   : > { %v3704_v50 = vadd.f32 %v3700_v47, %v3687_v38  ;;  %v3698_v20 = vpop.permute.xlu0 %3697  ;;  %v3841_v38 = vmul.f32 %v9488_v5, %v3839_v4  ;;  %v4424_v47 = vmul.f32 %v9519_v30, %v4423_v62  ;;  %v4544_v43 = vmul.f32 %v9488_v5, %v4542_v29 }
 0x336   : > { %v3703_v51 = vadd.f32 %v3698_v20, %v3686_v46  ;;  %4332 = vrot.lane.b32.xlu1 %v4328_v28, %s7342_s23 }
 0x337   : > { %4330 = vrot.lane.b32.xlu0 %v4329_v48, %s7342_s23  ;;  %v3717_v23 = vadd.f32 %v3712_v35, %v3704_v50  ;;  %v3799_v35 = vsel %vm293_vm0, %v3797_v22, %v3798_v19  ;;  %v4468_v48 = vmul.f32 %v9519_v30, %v4467_v39  ;;  %v3921_v39 = vmul.f32 %v9574_v58, %v3920_v13 }
 0x338   : > { %v3730_v53 = vpop.permute.xlu1 %3729  ;;  %v3716_v54 = vadd.f32 %v3713_v21, %v3703_v51  ;;  %v4456_v21 = vrot.slane %v4452_v45, 1  ;;  %v4497_v51 = vstv %s9508_s12  ;;  %s9637_s12 = sld [smem:[#allocation6 + $0x137]] }
 0x339   : > { %v3728_v59 = vpop.permute.xlu0 %3727  ;;  %v3734_v61 = vadd.f32 %v3730_v53, %v3717_v23  ;;  %v4499_v55 = vmul.f32 %v9513_v63, %v4497_v51  ;;  %v4498_v56 = vmul.f32 %v9519_v30, %v4497_v51 }
 0x33a   : > { %4349 = vrot.lane.b32.xlu1 %v4345_v36, %s7341_s18  ;;  %v3733_v0 = vadd.f32 %v3728_v59, %v3716_v54  ;;  %v3840_v36 = vmul.f32 %v9492_v16, %v3839_v4  ;;  %v4472_v54 = vrot.slane %v4468_v48, 1  ;;  %v4457_v60 = vsel %vm293_vm0, %v4455_v7, %v4456_v21 }
 0x33b   : > { %4347 = vrot.lane.b32.xlu0 %v4346_v37, %s7341_s18  ;;  %v4502_v9 = vrot.slane %v4498_v56, 2  ;;  %v4520_v4 = vrot.slane %v4516_v10, 2  ;;  %v4543_v48 = vmul.f32 %v9492_v16, %v4542_v29 }
 0x33c   : > { %v3747_v1 = vpop.permute.xlu1 %3746  ;;  %v3844_v37 = vrot.slane %v3840_v36, 2  ;;  %v4474_v8 = vsel %vm293_vm0, %v4472_v54, %v4473_v52 }
 0x33d   : > { %v3751_v44 = vadd.f32 %v3747_v1, %v3734_v61  ;;  %v3745_v34 = vpop.permute.xlu0 %3744 }
 0x33e   : > { %v3750_v11 = vadd.f32 %v3745_v34, %v3733_v0  ;;  %4379 = vrot.lane.b32.xlu1 %v4375_v2, %s7342_s23  ;;  %v3845_v2 = vrot.slane %v3841_v38, 2  ;;  %v3925_v38 = vrot.slane %v3921_v39, 1 }
 0x33f   : > { %6883 = vst.msk [vmem:[%s7853_s9 + $0x88] sm:$0x3f] %vm641_vm2, %v3751_v44  ;;  %4377 = vrot.lane.b32.xlu0 %v4376_v3, %s7342_s23 }
 0x340   : > { %6882 = vst.msk [vmem:[%s7853_s9 + $0x80] sm:$0xff] %vm639_vm3, %v3750_v11  ;;  %v3772_v14 = vpop.permute.xlu1 %3771  ;;  %v3846_v40 = vsel %vm341_vm1, %v3844_v37, %v3845_v2  ;;  %v4515_v11 = vmul.f32 %v9519_v30, %v4514_v6 }
 0x341   : > { %v3770_v18 = vpop.permute.xlu0 %3769  ;;  %v3776_v26 = vadd.f32 %v3772_v14, %v3762_v12 }
 0x342   : > { %4396 = vrot.lane.b32.xlu1 %v4392_v24, %s7341_s18  ;;  %v3775_v49 = vadd.f32 %v3770_v18, %v3761_v15  ;;  %v4503_v24 = vrot.slane %v4499_v55, 2 }
 0x343   : > { %4394 = vrot.lane.b32.xlu0 %v4393_v17, %s7341_s18  ;;  %v9568_v17 = vld [vmem:[%s7460_s10 + $0x18] sm:$0xff] }
 0x344   : > { %v3786_v28 = vpop.permute.xlu1 %3785  ;;  %v4504_v15 = vsel %vm341_vm1, %v4502_v9, %v4503_v24  ;;  %v3888_v18 = vmul.f32 %v9568_v17, %v3886_v31 }
 0x345   : > { %v3790_v32 = vadd.f32 %v3786_v28, %v3776_v26  ;;  %v3784_v33 = vpop.permute.xlu0 %3783  ;;  %v4519_v26 = vrot.slane %v4515_v11, 2 }
 0x346   : > { %v3789_v41 = vadd.f32 %v3784_v33, %v3775_v49  ;;  %4416 = vrot.lane.b32.xlu1 %v4411_v25, %s7342_s23  ;;  %v3887_v25 = vmul.f32 %v9574_v58, %v3886_v31  ;;  %v3922_v49 = vmul.f32 %v9568_v17, %v3920_v13 }
 0x347   : > { %4414 = vrot.lane.b32.xlu0 %v4410_v27, %s7342_s23  ;;  %v3803_v46 = vadd.f32 %v3798_v19, %v3790_v32 }
 0x348   : > { %v3816_v50 = vpop.permute.xlu1 %3815  ;;  %v3802_v20 = vadd.f32 %v3799_v35, %v3789_v41  ;;  %v4521_v35 = vsel %vm341_vm1, %v4519_v26, %v4520_v4  ;;  %v3926_v41 = vrot.slane %v3922_v49, 1 }
 0x349   : > { %v3814_v23 = vpop.permute.xlu0 %3813  ;;  %v3820_v53 = vadd.f32 %v3816_v50, %v3803_v46  ;;  %v3967_v46 = vstv %s9563_s5  ;;  %v4556_v50 = vstv %s9557_s30  ;;  %s9679_s30 = sld [smem:[#allocation7 + $0xa]] }
 0x34a   : > { %4430 = vrot.lane.b32.xlu1 %v4425_v42, %s7341_s18  ;;  %v3819_v57 = vadd.f32 %v3814_v23, %v3802_v20  ;;  %v4583_v42 = vstv %s9559_s4  ;;  %v4600_v20 = vstv %s9571_s6  ;;  %v3969_v54 = vmul.f32 %v9568_v17, %v3967_v46  ;;  %s9686_s4 = sld [smem:[#allocation6 + $0x13c]] }
 0x34b   : > { %4428 = vrot.lane.b32.xlu0 %v4424_v47, %s7341_s18  ;;  %v4585_v51 = vmul.f32 %v9488_v5, %v4583_v42  ;;  %v4584_v23 = vmul.f32 %v9492_v16, %v4583_v42  ;;  %v4558_v56 = vmul.f32 %v9488_v5, %v4556_v50  ;;  %s9691_s5 = sld [smem:[#allocation6 + $0x13d]] }
 0x34c   : > { %v3833_v59 = vpop.permute.xlu1 %3832  ;;  %v3973_v9 = vrot.slane %v3969_v54, 2  ;;  %s9693_s6 = sld [smem:[#allocation6 + $0x13f]] }
 0x34d   : > { %v3837_v61 = vadd.f32 %v3833_v59, %v3820_v53  ;;  %v3831_v3 = vpop.permute.xlu0 %3830  ;;  %v3968_v53 = vmul.f32 %v9574_v58, %v3967_v46  ;;  %v4589_v6 = vrot.slane %v4585_v51, 1 }
 0x34e   : > { %v3836_v0 = vadd.f32 %v3831_v3, %v3819_v57  ;;  %4460 = vrot.lane.b32.xlu1 %v4456_v21, %s7342_s23  ;;  %v4602_v57 = vmul.f32 %v9488_v5, %v4600_v20 }
 0x34f   : > { %4458 = vrot.lane.b32.xlu0 %v4457_v60, %s7342_s23  ;;  %v3850_v1 = vadd.f32 %v3845_v2, %v3837_v61  ;;  %v4557_v60 = vmul.f32 %v9492_v16, %v4556_v50  ;;  %v4601_v61 = vmul.f32 %v9492_v16, %v4600_v20 }
 0x350   : > { %v3863_v44 = vpop.permute.xlu1 %3862  ;;  %v3849_v34 = vadd.f32 %v3846_v40, %v3836_v0  ;;  %v4588_v0 = vrot.slane %v4584_v23, 1  ;;  %v4670_v23 = vstv %s9621_s22  ;;  %s9740_s22 = sld [smem:[#allocation6 + $0x117]] }
 0x351   : > { %v3861_v12 = vpop.permute.xlu0 %3860  ;;  %v3867_v14 = vadd.f32 %v3863_v44, %v3850_v1  ;;  %v4630_v1 = vstv %s9583_s19  ;;  %v4606_v44 = vrot.slane %v4602_v57, 1  ;;  %v4605_v31 = vrot.slane %v4601_v61, 1  ;;  %s9697_s19 = sld [smem:[#allocation6 + $0x114]] }
 0x352   : > { %4477 = vrot.lane.b32.xlu1 %v4473_v52, %s7341_s18  ;;  %v3866_v19 = vadd.f32 %v3861_v12, %v3849_v34  ;;  %v3927_v52 = vsel %vm293_vm0, %v3925_v38, %v3926_v41  ;;  %v4632_v10 = vmul.f32 %v9488_v5, %v4630_v1  ;;  %v4631_v11 = vmul.f32 %v9492_v16, %v4630_v1 }
 0x353   : > { %4475 = vrot.lane.b32.xlu0 %v4474_v8, %s7341_s18  ;;  %v4607_v26 = vsel %vm293_vm0, %v4605_v31, %v4606_v44  ;;  %v4672_v57 = vmul.f32 %v9568_v17, %v4670_v23  ;;  %v4671_v61 = vmul.f32 %v9574_v58, %v4670_v23 }
 0x354   : > { %v3880_v22 = vpop.permute.xlu1 %3879 }
 0x355   : > { %v3884_v27 = vadd.f32 %v3880_v22, %v3867_v14  ;;  %v3878_v62 = vpop.permute.xlu0 %3877  ;;  %v4590_v14 = vsel %vm293_vm0, %v4588_v0, %v4589_v6  ;;  %v4647_v22 = vstv %s9598_s15  ;;  %s9703_s15 = sld [smem:[#allocation6 + $0x140]] }
 0x356   : > { %v3883_v28 = vadd.f32 %v3878_v62, %v3866_v19  ;;  %4507 = vrot.lane.b32.xlu1 %v4503_v24, %s7342_s23  ;;  %v3972_v24 = vrot.slane %v3968_v53, 2  ;;  %v4635_v62 = vrot.slane %v4631_v11, 2  ;;  %v4648_v29 = vmul.f32 %v9492_v16, %v4647_v22 }
 0x357   : > { %4505 = vrot.lane.b32.xlu0 %v4504_v15, %s7342_s23  ;;  %v3890_v45 = vadd.f32 %v3888_v18, %v3884_v27  ;;  %v4636_v27 = vrot.slane %v4632_v10, 2 }
 0x358   : > { %v3900_v32 = vpop.permute.xlu1 %3899  ;;  %v3889_v33 = vadd.f32 %v3887_v25, %v3883_v28  ;;  %v3974_v19 = vsel %vm341_vm1, %v3972_v24, %v3973_v9  ;;  %v4014_v28 = vstv %s9607_s7  ;;  %s9716_s7 = sld [smem:[#allocation6 + $0x142]] }
 0x359   : > { %v3898_v36 = vpop.permute.xlu0 %3897  ;;  %v3904_v47 = vadd.f32 %v3900_v32, %v3890_v45  ;;  %v4649_v45 = vmul.f32 %v9488_v5, %v4647_v22  ;;  %v4016_v38 = vmul.f32 %v9513_v63, %v4014_v28 }
 0x35a   : > { %4524 = vrot.lane.b32.xlu1 %v4520_v4, %s7341_s18  ;;  %v3903_v21 = vadd.f32 %v3898_v36, %v3889_v33  ;;  %v4048_v33 = vstv %s9610_s8  ;;  %v4637_v36 = vsel %vm341_vm1, %v4635_v62, %v4636_v27  ;;  %s9731_s8 = sld [smem:[#allocation6 + $0x143]] }
 0x35b   : > { %4522 = vrot.lane.b32.xlu0 %v4521_v35, %s7341_s18  ;;  %v4653_v46 = vrot.slane %v4649_v45, 2  ;;  %v4049_v20 = vmul.f32 %v9519_v30, %v4048_v33 }
 0x35c   : > { %v3914_v7 = vpop.permute.xlu1 %3913 }
 0x35d   : > { %v3918_v37 = vadd.f32 %v3914_v7, %v3904_v47  ;;  %v3912_v2 = vpop.permute.xlu0 %3911  ;;  %v4652_v47 = vrot.slane %v4648_v29, 2  ;;  %v4053_v54 = vrot.slane %v4049_v20, 1 }
 0x35e   : > { %v3917_v55 = vadd.f32 %v3912_v2, %v3903_v21  ;;  %4549 = vrot.lane.b32.xlu1 %v4544_v43, %s7342_s23  ;;  %v4015_v43 = vmul.f32 %v9519_v30, %v4014_v28  ;;  %v4050_v21 = vmul.f32 %v9513_v63, %v4048_v33 }
 0x35f   : > { %4547 = vrot.lane.b32.xlu0 %v4543_v48, %s7342_s23  ;;  %v3931_v59 = vadd.f32 %v3926_v41, %v3918_v37 }
 0x360   : > { %v3944_v3 = vpop.permute.xlu1 %3943  ;;  %v3930_v40 = vadd.f32 %v3927_v52, %v3917_v55  ;;  %v4654_v52 = vsel %vm341_vm1, %v4652_v47, %v4653_v46  ;;  %v4054_v55 = vrot.slane %v4050_v21, 1 }
 0x361   : > { %v3942_v8 = vpop.permute.xlu0 %3941  ;;  %v3948_v34 = vadd.f32 %v3944_v3, %v3931_v59  ;;  %v4095_v59 = vstv %s9632_s21  ;;  %v4684_v3 = vstv %s9626_s26  ;;  %s9743_s26 = sld [smem:[#allocation6 + $0x11a]] }
 0x362   : > { %4563 = vrot.lane.b32.xlu1 %v4558_v56, %s7341_s18  ;;  %v3947_v12 = vadd.f32 %v3942_v8, %v3930_v40  ;;  %v4711_v56 = vstv %s9628_s11  ;;  %v4728_v40 = vstv %s9637_s12  ;;  %v4097_v31 = vmul.f32 %v9513_v63, %v4095_v59  ;;  %s9754_s11 = sld [smem:[#allocation6 + $0x145]] }
 0x363   : > { %4561 = vrot.lane.b32.xlu0 %v4557_v60, %s7341_s18  ;;  %v4713_v1 = vmul.f32 %v9568_v17, %v4711_v56  ;;  %v4712_v8 = vmul.f32 %v9574_v58, %v4711_v56  ;;  %v4686_v11 = vmul.f32 %v9568_v17, %v4684_v3  ;;  %s9759_s21 = sld [smem:[#allocation6 + $0x146]] }
 0x364   : > { %v3961_v13 = vpop.permute.xlu1 %3960  ;;  %v4101_v62 = vrot.slane %v4097_v31, 2  ;;  %s9761_s12 = sld [smem:[#allocation6 + $0x148]] }
 0x365   : > { %v3965_v15 = vadd.f32 %v3961_v13, %v3948_v34  ;;  %v3959_v18 = vpop.permute.xlu0 %3958  ;;  %v4096_v34 = vmul.f32 %v9519_v30, %v4095_v59  ;;  %v4717_v22 = vrot.slane %v4713_v1, 1  ;;  %v4145_v59 = vstv %s9679_s30  ;;  %s9803_s30 = sld [smem:[#allocation6 + $0x120]] }
 0x366   : > { %v3964_v25 = vadd.f32 %v3959_v18, %v3947_v12  ;;  %4593 = vrot.lane.b32.xlu1 %v4589_v6, %s7342_s23  ;;  %v4730_v12 = vmul.f32 %v9568_v17, %v4728_v40 }
 0x367   : > { %4591 = vrot.lane.b32.xlu0 %v4590_v14, %s7342_s23  ;;  %v3978_v4 = vadd.f32 %v3973_v9, %v3965_v15  ;;  %v4685_v14 = vmul.f32 %v9574_v58, %v4684_v3  ;;  %v4729_v15 = vmul.f32 %v9574_v58, %v4728_v40 }
 0x368   : > { %v3991_v39 = vpop.permute.xlu1 %3990  ;;  %v3977_v49 = vadd.f32 %v3974_v19, %v3964_v25  ;;  %v4716_v25 = vrot.slane %v4712_v8, 1 }
 0x369   : > { %v3989_v32 = vpop.permute.xlu0 %3988  ;;  %v3995_v35 = vadd.f32 %v3991_v39, %v3978_v4  ;;  %v4758_v4 = vstv %s9646_s20  ;;  %v4734_v39 = vrot.slane %v4730_v12, 1  ;;  %v4733_v28 = vrot.slane %v4729_v15, 1  ;;  %s9765_s20 = sld [smem:[#allocation6 + $0x11d]] }
 0x36a   : > { %4610 = vrot.lane.b32.xlu1 %v4606_v44, %s7341_s18  ;;  %v3994_v41 = vadd.f32 %v3989_v32, %v3977_v49  ;;  %v4055_v44 = vsel %vm293_vm0, %v4053_v54, %v4054_v55  ;;  %v4760_v45 = vmul.f32 %v9568_v17, %v4758_v4  ;;  %v4759_v29 = vmul.f32 %v9574_v58, %v4758_v4 }
 0x36b   : > { %4608 = vrot.lane.b32.xlu0 %v4607_v26, %s7341_s18  ;;  %v4735_v47 = vsel %vm293_vm0, %v4733_v28, %v4734_v39  ;;  %v4839_v12 = vstv %s9693_s6  ;;  %s9822_s6 = sld [smem:[#allocation6 + $0x14f]] }
 0x36c   : > { %v4008_v42 = vpop.permute.xlu1 %4007 }
 0x36d   : > { %v4012_v48 = vadd.f32 %v4008_v42, %v3995_v35  ;;  %v4006_v50 = vpop.permute.xlu0 %4005  ;;  %v4718_v35 = vsel %vm293_vm0, %v4716_v25, %v4717_v22  ;;  %v4775_v42 = vstv %s9661_s24  ;;  %s9770_s24 = sld [smem:[#allocation6 + $0x149]] }
 0x36e   : > { %v4011_v7 = vadd.f32 %v4006_v50, %v3994_v41  ;;  %4640 = vrot.lane.b32.xlu1 %v4636_v27, %s7342_s23  ;;  %v4100_v27 = vrot.slane %v4096_v34, 2  ;;  %v4763_v50 = vrot.slane %v4759_v29, 2  ;;  %v4776_v23 = vmul.f32 %v9574_v58, %v4775_v42 }
 0x36f   : > { %4638 = vrot.lane.b32.xlu0 %v4637_v36, %s7342_s23  ;;  %v4018_v51 = vadd.f32 %v4016_v38, %v4012_v48  ;;  %v4764_v48 = vrot.slane %v4760_v45, 2 }
 0x370   : > { %v4028_v37 = vpop.permute.xlu1 %4027  ;;  %v4017_v2 = vadd.f32 %v4015_v43, %v4011_v7  ;;  %v4102_v41 = vsel %vm341_vm1, %v4100_v27, %v4101_v62  ;;  %v4147_v7 = vstv %s9670_s25  ;;  %v4840_v27 = vmul.f32 %v9519_v30, %v4839_v12  ;;  %s9779_s25 = sld [smem:[#allocation6 + $0x14b]] }
 0x371   : > { %v4026_v53 = vpop.permute.xlu0 %4025  ;;  %v4032_v60 = vadd.f32 %v4028_v37, %v4018_v51  ;;  %v4777_v51 = vmul.f32 %v9568_v17, %v4775_v42  ;;  %v4149_v54 = vmul.f32 %v9488_v5, %v4147_v7 }
 0x372   : > { %4657 = vrot.lane.b32.xlu1 %v4653_v46, %s7341_s18  ;;  %v4031_v6 = vadd.f32 %v4026_v53, %v4017_v2  ;;  %v4181_v2 = vstv %s9673_s29  ;;  %v4765_v53 = vsel %vm341_vm1, %v4763_v50, %v4764_v48  ;;  %s9794_s29 = sld [smem:[#allocation6 + $0x14c]] }
 0x373   : > { %4655 = vrot.lane.b32.xlu0 %v4654_v52, %s7341_s18  ;;  %v4151_v8 = vadd.f32 %v4149_v54, %v4145_v59 }
 0x374   : > { %v4042_v0 = vpop.permute.xlu1 %4041 }
 0x375   : > { %v4046_v24 = vadd.f32 %v4042_v0, %v4032_v60  ;;  %v4040_v9 = vpop.permute.xlu0 %4039  ;;  %v4781_v60 = vrot.slane %v4777_v51, 2  ;;  %v4182_v0 = vmul.f32 %v9492_v16, %v4181_v2 }
 0x376   : > { %v4045_v10 = vadd.f32 %v4040_v9, %v4031_v6  ;;  %4677 = vrot.lane.b32.xlu1 %v4672_v57, %s7342_s23  ;;  %v4183_v6 = vmul.f32 %v9488_v5, %v4181_v2 }
 0x377   : > { %4675 = vrot.lane.b32.xlu0 %v4671_v61, %s7342_s23  ;;  %v4059_v13 = vadd.f32 %v4054_v55, %v4046_v24  ;;  %v4148_v55 = vmul.f32 %v9492_v16, %v4147_v7  ;;  %v4780_v61 = vrot.slane %v4776_v23, 2  ;;  %v4798_v24 = vstv %s9686_s4  ;;  %s9806_s4 = sld [smem:[#allocation6 + $0x123]] }
 0x378   : > { %v4072_v18 = vpop.permute.xlu1 %4071  ;;  %v4058_v19 = vadd.f32 %v4055_v44, %v4045_v10  ;;  %v4187_v10 = vrot.slane %v4183_v6, 1 }
 0x379   : > { %v4070_v26 = vpop.permute.xlu0 %4069  ;;  %v4076_v49 = vadd.f32 %v4072_v18, %v4059_v13  ;;  %v4150_v44 = vadd.f32 %v4148_v55, %v4145_v59  ;;  %v4782_v34 = vsel %vm341_vm1, %v4780_v61, %v4781_v60  ;;  %v4800_v13 = vmul.f32 %v9513_v63, %v4798_v24 }
 0x37a   : > { %4691 = vrot.lane.b32.xlu1 %v4686_v11, %s7341_s18  ;;  %v4075_v32 = vadd.f32 %v4070_v26, %v4058_v19  ;;  %v4186_v11 = vrot.slane %v4182_v0, 1  ;;  %v4799_v18 = vmul.f32 %v9519_v30, %v4798_v24  ;;  %v4812_v19 = vstv %s9691_s5  ;;  %s9817_s5 = sld [smem:[#allocation6 + $0x14e]] }
 0x37b   : > { %4689 = vrot.lane.b32.xlu0 %v4685_v14, %s7341_s18  ;;  %v4228_v14 = vstv %s9697_s19  ;;  %v4841_v26 = vmul.f32 %v9513_v63, %v4839_v12  ;;  %s9824_s19 = sld [smem:[#allocation6 + $0x151]] }
 0x37c   : > { %v4089_v33 = vpop.permute.xlu1 %4088  ;;  %v4229_v28 = vmul.f32 %v9492_v16, %v4228_v14  ;;  %v4230_v45 = vmul.f32 %v9488_v5, %v4228_v14 }
 0x37d   : > { %v4093_v36 = vadd.f32 %v4089_v33, %v4076_v49  ;;  %v4087_v38 = vpop.permute.xlu0 %4086  ;;  %v4188_v49 = vsel %vm293_vm0, %v4186_v11, %v4187_v10 }
 0x37e   : > { %v4092_v43 = vadd.f32 %v4087_v38, %v4075_v32  ;;  %4721 = vrot.lane.b32.xlu1 %v4717_v22, %s7342_s23  ;;  %v4856_v22 = vstv %s9703_s15  ;;  %v4814_v32 = vmul.f32 %v9513_v63, %v4812_v19  ;;  %v4233_v50 = vrot.slane %v4229_v28, 2  ;;  %s9828_s15 = sld [smem:[#allocation6 + $0x126]] }
 0x37f   : > { %4719 = vrot.lane.b32.xlu0 %v4718_v35, %s7342_s23  ;;  %v4106_v46 = vadd.f32 %v4101_v62, %v4093_v36  ;;  %v4858_v33 = vmul.f32 %v9513_v63, %v4856_v22  ;;  %v4813_v36 = vmul.f32 %v9519_v30, %v4812_v19  ;;  %v4857_v38 = vmul.f32 %v9519_v30, %v4856_v22 }
 0x380   : > { %v4119_v20 = vpop.permute.xlu1 %4118  ;;  %v4105_v21 = vadd.f32 %v4102_v41, %v4092_v43  ;;  %v4845_v43 = vrot.slane %v4841_v26, 1 }
 0x381   : > { %v4117_v37 = vpop.permute.xlu0 %4116  ;;  %v4123_v52 = vadd.f32 %v4119_v20, %v4106_v46  ;;  %v4844_v46 = vrot.slane %v4840_v27, 1  ;;  %v4234_v20 = vrot.slane %v4230_v45, 2  ;;  %v4861_v51 = vrot.slane %v4857_v38, 1 }
 0x382   : > { %4738 = vrot.lane.b32.xlu1 %v4734_v39, %s7341_s18  ;;  %v4122_v56 = vadd.f32 %v4117_v37, %v4105_v21  ;;  %v4862_v21 = vrot.slane %v4858_v33, 1  ;;  %v4931_v27 = vstv %s9754_s11  ;;  %s9869_s11 = sld [smem:[#allocation6 + $0x12c]] }
 0x383   : > { %4736 = vrot.lane.b32.xlu0 %v4735_v47, %s7341_s18  ;;  %v4886_v47 = vstv %s9716_s7  ;;  %v4933_v33 = vmul.f32 %v9488_v5, %v4931_v27  ;;  %v4932_v38 = vmul.f32 %v9492_v16, %v4931_v27  ;;  %s9833_s7 = sld [smem:[#allocation6 + $0x152]] }
 0x384   : > { %v4136_v57 = vpop.permute.xlu1 %4135  ;;  %v4888_v23 = vmul.f32 %v9513_v63, %v4886_v47  ;;  %v4887_v37 = vmul.f32 %v9519_v30, %v4886_v47  ;;  %v4863_v61 = vsel %vm293_vm0, %v4861_v51, %v4862_v21 }
 0x385   : > { %v4140_v3 = vadd.f32 %v4136_v57, %v4123_v52  ;;  %v4134_v40 = vpop.permute.xlu0 %4133  ;;  %v4903_v57 = vstv %s9731_s8  ;;  %s9842_s8 = sld [smem:[#allocation6 + $0x154]] }
 0x386   : > { %v4139_v1 = vadd.f32 %v4134_v40, %v4122_v56  ;;  %4768 = vrot.lane.b32.xlu1 %v4764_v48, %s7342_s23  ;;  %v4235_v56 = vsel %vm341_vm1, %v4233_v50, %v4234_v20  ;;  %v4891_v40 = vrot.slane %v4887_v37, 2  ;;  %v4904_v24 = vmul.f32 %v9519_v30, %v4903_v57 }
 0x387   : > { %6913 = vst.msk [vmem:[%s7853_s9 + $0x98] sm:$0x3f] %vm641_vm2, %v4140_v3  ;;  %4766 = vrot.lane.b32.xlu0 %v4765_v53, %s7342_s23  ;;  %v4846_v53 = vsel %vm293_vm0, %v4844_v46, %v4845_v43  ;;  %v4892_v3 = vrot.slane %v4888_v23, 2 }
 0x388   : > { %6912 = vst.msk [vmem:[%s7853_s9 + $0x90] sm:$0xff] %vm639_vm3, %v4139_v1  ;;  %v4161_v9 = vpop.permute.xlu1 %4160  ;;  %v4275_v1 = vstv %s9740_s22  ;;  %s9857_s22 = sld [smem:[#allocation6 + $0x155]] }
 0x389   : > { %v4159_v31 = vpop.permute.xlu0 %4158  ;;  %v4165_v15 = vadd.f32 %v4161_v9, %v4151_v8  ;;  %v4905_v8 = vmul.f32 %v9513_v63, %v4903_v57 }
 0x38a   : > { %4785 = vrot.lane.b32.xlu1 %v4781_v60, %s7341_s18  ;;  %v4164_v25 = vadd.f32 %v4159_v31, %v4150_v44  ;;  %v4309_v44 = vstv %s9743_s26  ;;  %v4893_v31 = vsel %vm341_vm1, %v4891_v40, %v4892_v3  ;;  %s9866_s26 = sld [smem:[#allocation6 + $0x129]] }
 0x38b   : > { %4783 = vrot.lane.b32.xlu0 %v4782_v34, %s7341_s18  ;;  %v4909_v14 = vrot.slane %v4905_v8, 2  ;;  %v4310_v22 = vmul.f32 %v9574_v58, %v4309_v44 }
 0x38c   : > { %v4175_v4 = vpop.permute.xlu1 %4174 }
 0x38d   : > { %v4179_v62 = vadd.f32 %v4175_v4, %v4165_v15  ;;  %v4173_v39 = vpop.permute.xlu0 %4172  ;;  %v4908_v15 = vrot.slane %v4904_v24, 2  ;;  %v4314_v45 = vrot.slane %v4310_v22, 1 }
 0x38e   : > { %v4178_v29 = vadd.f32 %v4173_v39, %v4164_v25  ;;  %4805 = vrot.lane.b32.xlu1 %v4800_v13, %s7342_s23  ;;  %v4276_v13 = vmul.f32 %v9574_v58, %v4275_v1  ;;  %v4311_v25 = vmul.f32 %v9568_v17, %v4309_v44 }
 0x38f   : > { %4803 = vrot.lane.b32.xlu0 %v4799_v18, %s7342_s23  ;;  %v4192_v35 = vadd.f32 %v4187_v10, %v4179_v62  ;;  %v4277_v10 = vmul.f32 %v9568_v17, %v4275_v1 }
 0x390   : > { %v4205_v41 = vpop.permute.xlu1 %4204  ;;  %v4191_v42 = vadd.f32 %v4188_v49, %v4178_v29  ;;  %v4910_v49 = vsel %vm341_vm1, %v4908_v15, %v4909_v14  ;;  %v4315_v29 = vrot.slane %v4311_v25, 1 }
 0x391   : > { %v4203_v48 = vpop.permute.xlu0 %4202  ;;  %v4209_v7 = vadd.f32 %v4205_v41, %v4192_v35  ;;  %v4356_v35 = vstv %s9765_s20  ;;  %v4945_v41 = vstv %s9759_s21  ;;  %s9875_s21 = sld [smem:[#allocation7 + $0xb]] }
 0x392   : > { %4819 = vrot.lane.b32.xlu1 %v4814_v32, %s7341_s18  ;;  %v4208_v2 = vadd.f32 %v4203_v48, %v4191_v42  ;;  %v4972_v32 = vstv %s9761_s12  ;;  %v4989_v42 = vstv %s9770_s24  ;;  %v4358_v51 = vmul.f32 %v9568_v17, %v4356_v35  ;;  %s9882_s12 = sld [smem:[#allocation6 + $0x157]] }
 0x393   : > { %4817 = vrot.lane.b32.xlu0 %v4813_v36, %s7341_s18  ;;  %v4974_v47 = vmul.f32 %v9488_v5, %v4972_v32  ;;  %v4973_v48 = vmul.f32 %v9492_v16, %v4972_v32  ;;  %v4947_v37 = vmul.f32 %v9488_v5, %v4945_v41  ;;  %s9887_s20 = sld [smem:[#allocation6 + $0x158]] }
 0x394   : > { %v4222_v52 = vpop.permute.xlu1 %4221  ;;  %v4362_v40 = vrot.slane %v4358_v51, 2  ;;  %v5100_v51 = vstv %s9824_s19  ;;  %s9889_s24 = sld [smem:[#allocation6 + $0x15a]] }
 0x395   : > { %v4226_v54 = vadd.f32 %v4222_v52, %v4209_v7  ;;  %v4220_v55 = vpop.permute.xlu0 %4219  ;;  %v4357_v7 = vmul.f32 %v9574_v58, %v4356_v35  ;;  %v4978_v57 = vrot.slane %v4974_v47, 1  ;;  %s9962_s19 = sld [smem:[#allocation6 + $0x160]] }
 0x396   : > { %v4225_v59 = vadd.f32 %v4220_v55, %v4208_v2  ;;  %4849 = vrot.lane.b32.xlu1 %v4845_v43, %s7342_s23  ;;  %v4991_v2 = vmul.f32 %v9488_v5, %v4989_v42 }
 0x397   : > { %4847 = vrot.lane.b32.xlu0 %v4846_v53, %s7342_s23  ;;  %v4239_v60 = vadd.f32 %v4234_v20, %v4226_v54  ;;  %v4946_v53 = vmul.f32 %v9492_v16, %v4945_v41  ;;  %v4990_v54 = vmul.f32 %v9492_v16, %v4989_v42 }
 0x398   : > { %v4252_v6 = vpop.permute.xlu1 %4251  ;;  %v4238_v0 = vadd.f32 %v4235_v56, %v4225_v59  ;;  %v4977_v59 = vrot.slane %v4973_v48, 1 }
 0x399   : > { %v4250_v9 = vpop.permute.xlu0 %4249  ;;  %v4256_v34 = vadd.f32 %v4252_v6, %v4239_v60  ;;  %v5019_v60 = vstv %s9779_s25  ;;  %v4995_v6 = vrot.slane %v4991_v2, 1  ;;  %v4994_v1 = vrot.slane %v4990_v54, 1  ;;  %s9893_s25 = sld [smem:[#allocation6 + $0x12f]] }
 0x39a   : > { %4866 = vrot.lane.b32.xlu1 %v4862_v21, %s7341_s18  ;;  %v4255_v11 = vadd.f32 %v4250_v9, %v4238_v0  ;;  %v4316_v21 = vsel %vm293_vm0, %v4314_v45, %v4315_v29  ;;  %v5021_v8 = vmul.f32 %v9488_v5, %v5019_v60  ;;  %v5020_v24 = vmul.f32 %v9492_v16, %v5019_v60 }
 0x39b   : > { %4864 = vrot.lane.b32.xlu0 %v4863_v61, %s7341_s18  ;;  %v4996_v15 = vsel %vm293_vm0, %v4994_v1, %v4995_v6  ;;  %v5117_v54 = vstv %s9833_s7  ;;  %s9969_s7 = sld [smem:[#allocation6 + $0x163]] }
 0x39c   : > { %v4269_v12 = vpop.permute.xlu1 %4268 }
 0x39d   : > { %v4273_v18 = vadd.f32 %v4269_v12, %v4256_v34  ;;  %v4267_v19 = vpop.permute.xlu0 %4266  ;;  %v4979_v34 = vsel %vm293_vm0, %v4977_v59, %v4978_v57  ;;  %v5036_v12 = vstv %s9794_s29  ;;  %v5101_v59 = vmul.f32 %v9574_v58, %v5100_v51  ;;  %s9905_s29 = sld [smem:[#allocation6 + $0x15b]] }
 0x39e   : > { %v4272_v4 = vadd.f32 %v4267_v19, %v4255_v11  ;;  %4896 = vrot.lane.b32.xlu1 %v4892_v3, %s7342_s23  ;;  %v4361_v3 = vrot.slane %v4357_v7, 2  ;;  %v5024_v19 = vrot.slane %v5020_v24, 2  ;;  %v5037_v27 = vmul.f32 %v9492_v16, %v5036_v12 }
 0x39f   : > { %4894 = vrot.lane.b32.xlu0 %v4893_v31, %s7342_s23  ;;  %v4279_v26 = vadd.f32 %v4277_v10, %v4273_v18  ;;  %v5025_v18 = vrot.slane %v5021_v8, 2  ;;  %v5119_v8 = vmul.f32 %v9568_v17, %v5117_v54 }
 0x3a0   : > { %v4289_v62 = vpop.permute.xlu1 %4288  ;;  %v4278_v39 = vadd.f32 %v4276_v13, %v4272_v4  ;;  %v4363_v11 = vsel %vm341_vm1, %v4361_v3, %v4362_v40  ;;  %v4403_v4 = vstv %s9803_s30  ;;  %s9918_s30 = sld [smem:[#allocation6 + $0x15d]] }
 0x3a1   : > { %v4287_v28 = vpop.permute.xlu0 %4286  ;;  %v4293_v36 = vadd.f32 %v4289_v62, %v4279_v26  ;;  %v5038_v26 = vmul.f32 %v9488_v5, %v5036_v12  ;;  %v4405_v5 = vmul.f32 %v9513_v63, %v4403_v4 }
 0x3a2   : > { %4913 = vrot.lane.b32.xlu1 %v4909_v14, %s7341_s18  ;;  %v4292_v43 = vadd.f32 %v4287_v28, %v4278_v39  ;;  %v4437_v39 = vstv %s9806_s4  ;;  %v5026_v28 = vsel %vm341_vm1, %v5024_v19, %v5025_v18  ;;  %s9939_s4 = sld [smem:[#allocation6 + $0x15e]] }
 0x3a3   : > { %4911 = vrot.lane.b32.xlu0 %v4910_v49, %s7341_s18  ;;  %v5042_v32 = vrot.slane %v5038_v26, 2  ;;  %v4439_v41 = vmul.f32 %v9513_v63, %v4437_v39 }
 0x3a4   : > { %v4303_v46 = vpop.permute.xlu1 %4302 }
 0x3a5   : > { %v4307_v50 = vadd.f32 %v4303_v46, %v4293_v36  ;;  %v4301_v20 = vpop.permute.xlu0 %4300  ;;  %v5059_v46 = vstv %s9817_s5  ;;  %v4443_v7 = vrot.slane %v4439_v41, 1  ;;  %s9948_s5 = sld [smem:[#allocation6 + $0x132]] }
 0x3a6   : > { %v4306_v23 = vadd.f32 %v4301_v20, %v4292_v43  ;;  %4938 = vrot.lane.b32.xlu1 %v4933_v33, %s7342_s23  ;;  %v5041_v33 = vrot.slane %v5037_v27, 2 }
 0x3a7   : > { %4936 = vrot.lane.b32.xlu0 %v4932_v38, %s7342_s23  ;;  %v4320_v52 = vadd.f32 %v4315_v29, %v4307_v50  ;;  %v4404_v29 = vmul.f32 %v9519_v30, %v4403_v4  ;;  %v4438_v38 = vmul.f32 %v9519_v30, %v4437_v39 }
 0x3a8   : > { %v4333_v55 = vpop.permute.xlu1 %4332  ;;  %v4319_v56 = vadd.f32 %v4316_v21, %v4306_v23  ;;  %v5043_v50 = vsel %vm341_vm1, %v5041_v33, %v5042_v32  ;;  %v5061_v23 = vmul.f32 %v9568_v17, %v5059_v46 }
 0x3a9   : > { %v4331_v61 = vpop.permute.xlu0 %4330  ;;  %v4337_v0 = vadd.f32 %v4333_v55, %v4320_v52  ;;  %v4442_v21 = vrot.slane %v4438_v38, 1  ;;  %v5060_v52 = vmul.f32 %v9574_v58, %v5059_v46 }
 0x3aa   : > { %4952 = vrot.lane.b32.xlu1 %v4947_v37, %s7341_s18  ;;  %v4336_v9 = vadd.f32 %v4331_v61, %v4319_v56  ;;  %v4484_v37 = vstv %s9828_s15  ;;  %s9967_s15 = sld [smem:[#allocation6 + $0x161]] }
 0x3ab   : > { %4950 = vrot.lane.b32.xlu0 %v4946_v53, %s7341_s18  ;;  %v5073_v53 = vstv %s9822_s6  ;;  %v4444_v3 = vsel %vm293_vm0, %v4442_v21, %v4443_v7  ;;  %v4534_v21 = vstv %s9875_s21  ;;  %s9951_s6 = sld [smem:[#allocation6 + $0x135]] }
 0x3ac   : > { %v4350_v44 = vpop.permute.xlu1 %4349  ;;  %v5075_v1 = vmul.f32 %v9568_v17, %v5073_v53  ;;  %s10017_s21 = sld [smem:[#allocation6 + $0x13b]] }
 0x3ad   : > { %v4354_v31 = vadd.f32 %v4350_v44, %v4337_v0  ;;  %v4348_v10 = vpop.permute.xlu0 %4347  ;;  %v5118_v44 = vmul.f32 %v9574_v58, %v5117_v54 }
 0x3ae   : > { %v4353_v13 = vadd.f32 %v4348_v10, %v4336_v9  ;;  %4982 = vrot.lane.b32.xlu1 %v4978_v57, %s7342_s23  ;;  %v5102_v57 = vmul.f32 %v9568_v17, %v5100_v51  ;;  %v5074_v9 = vmul.f32 %v9574_v58, %v5073_v53  ;;  %v5147_v10 = vstv %s9842_s8  ;;  %s9973_s8 = sld [smem:[#allocation6 + $0x138]] }
 0x3af   : > { %4980 = vrot.lane.b32.xlu0 %v4979_v34, %s7342_s23  ;;  %v4367_v14 = vadd.f32 %v4362_v40, %v4354_v31  ;;  %v4485_v40 = vmul.f32 %v9519_v30, %v4484_v37  ;;  %v5149_v19 = vmul.f32 %v9568_v17, %v5147_v10 }
 0x3b0   : > { %v4380_v22 = vpop.permute.xlu1 %4379  ;;  %v4366_v25 = vadd.f32 %v4363_v11, %v4353_v13  ;;  %v5106_v31 = vrot.slane %v5102_v57, 1 }
 0x3b1   : > { %v4378_v62 = vpop.permute.xlu0 %4377  ;;  %v4384_v49 = vadd.f32 %v4380_v22, %v4367_v14  ;;  %v4489_v12 = vrot.slane %v4485_v40, 2  ;;  %v5123_v14 = vrot.slane %v5119_v8, 1  ;;  %v5148_v22 = vmul.f32 %v9574_v58, %v5147_v10 }
 0x3b2   : > { %4999 = vrot.lane.b32.xlu1 %v4995_v6, %s7341_s18  ;;  %v4383_v16 = vadd.f32 %v4378_v62, %v4366_v25  ;;  %v4486_v6 = vmul.f32 %v9513_v63, %v4484_v37  ;;  %v5105_v63 = vrot.slane %v5101_v59, 1  ;;  %v5228_v40 = vstv %s9889_s24  ;;  %s10036_s24 = sld [smem:[#allocation6 + $0x16a]] }
 0x3b3   : > { %4997 = vrot.lane.b32.xlu0 %v4996_v15, %s7341_s18 }
 0x3b4   : > { %v4397_v45 = vpop.permute.xlu1 %4396  ;;  %v4490_v13 = vrot.slane %v4486_v6, 2  ;;  %v5107_v26 = vsel %vm293_vm0, %v5105_v63, %v5106_v31  ;;  %v9923_v6 = vld [vmem:[%s7460_s10 + $0x28] sm:$0xff] }
 0x3b5   : > { %v4401_v35 = vadd.f32 %v4397_v45, %v4384_v49  ;;  %v4395_v36 = vpop.permute.xlu0 %4394  ;;  %v5164_v49 = vstv %s9857_s22  ;;  %v5153_v45 = vrot.slane %v5149_v19, 2  ;;  %v5230_v63 = vmul.f32 %v9923_v6, %v5228_v40  ;;  %s9981_s22 = sld [smem:[#allocation6 + $0x164]] }
 0x3b6   : > { %v4400_v42 = vadd.f32 %v4395_v36, %v4383_v16  ;;  %5029 = vrot.lane.b32.xlu1 %v5025_v18, %s7342_s23  ;;  %v5122_v18 = vrot.slane %v5118_v44, 1  ;;  %v4491_v39 = vsel %vm341_vm1, %v4489_v12, %v4490_v13  ;;  %v5166_v36 = vmul.f32 %v9568_v17, %v5164_v49 }
 0x3b7   : > { %5027 = vrot.lane.b32.xlu0 %v5026_v28, %s7342_s23  ;;  %v4407_v43 = vadd.f32 %v4405_v5, %v4401_v35  ;;  %v4536_v35 = vstv %s9866_s26  ;;  %v5165_v38 = vmul.f32 %v9574_v58, %v5164_v49  ;;  %v9902_v58 = vld [vmem:[%s7460_s10] sm:$0xff]  ;;  %v5201_v44 = vstv %s9887_s20  ;;  %s9993_s26 = sld [smem:[#allocation6 + $0x166]] }
 0x3b8   : > { %v4417_v47 = vpop.permute.xlu1 %4416  ;;  %v4406_v48 = vadd.f32 %v4404_v29, %v4400_v42  ;;  %v5124_v16 = vsel %vm293_vm0, %v5122_v18, %v5123_v14  ;;  %v5152_v29 = vrot.slane %v5148_v22, 2  ;;  %v4570_v42 = vstv %s9869_s11  ;;  %s10008_s11 = sld [smem:[#allocation6 + $0x167]] }
 0x3b9   : > { %v4415_v20 = vpop.permute.xlu0 %4414  ;;  %v4421_v2 = vadd.f32 %v4417_v47, %v4407_v43  ;;  %v9898_v47 = vld [vmem:[%s7460_s10 + $0x8] sm:$0xff]  ;;  %v5169_v51 = vrot.slane %v5165_v38, 2  ;;  %v5203_v19 = vmul.f32 %v9923_v6, %v5201_v44  ;;  %s10031_s20 = sld [smem:[#allocation6 + $0x169]] }
 0x3ba   : > { %5046 = vrot.lane.b32.xlu1 %v5042_v32, %s7341_s18  ;;  %v4420_v55 = vadd.f32 %v4415_v20, %v4406_v48  ;;  %v5154_v46 = vsel %vm341_vm1, %v5152_v29, %v5153_v45  ;;  %v4538_v17 = vmul.f32 %v9898_v47, %v4536_v35  ;;  %v4537_v48 = vmul.f32 %v9902_v58, %v4536_v35 }
 0x3bb   : > { %5044 = vrot.lane.b32.xlu0 %v5043_v50, %s7341_s18 }
 0x3bc   : > { %v4431_v56 = vpop.permute.xlu1 %4430  ;;  %v4540_v54 = vadd.f32 %v4538_v17, %v4534_v21  ;;  %v4539_v57 = vadd.f32 %v4537_v48, %v4534_v21  ;;  %v5292_v48 = vstv %s9939_s4  ;;  %s10056_s4 = sld [smem:[#allocation6 + $0x16f]] }
 0x3bd   : > { %v4435_v60 = vadd.f32 %v4431_v56, %v4421_v2  ;;  %v4429_v61 = vpop.permute.xlu0 %4428  ;;  %v4572_v2 = vmul.f32 %v9898_v47, %v4570_v42 }
 0x3be   : > { %v4434_v0 = vadd.f32 %v4429_v61, %v4420_v55  ;;  %5066 = vrot.lane.b32.xlu1 %v5061_v23, %s7342_s23  ;;  %v5187_v55 = vstv %s9882_s12  ;;  %s10020_s12 = sld [smem:[#allocation6 + $0x13e]] }
 0x3bf   : > { %5064 = vrot.lane.b32.xlu0 %v5060_v52, %s7342_s23  ;;  %v4448_v24 = vadd.f32 %v4443_v7, %v4435_v60  ;;  %v5170_v7 = vrot.slane %v5166_v36, 2  ;;  %v4571_v52 = vmul.f32 %v9902_v58, %v4570_v42  ;;  %v4576_v61 = vrot.slane %v4572_v2, 1 }
 0x3c0   : > { %v4461_v34 = vpop.permute.xlu1 %4460  ;;  %v4447_v30 = vadd.f32 %v4444_v3, %v4434_v0  ;;  %v5189_v0 = vmul.f32 %v9923_v6, %v5187_v55  ;;  %v4664_v2 = vstv %s9948_s5  ;;  %s10071_s5 = sld [smem:[#allocation6 + $0x170]] }
 0x3c1   : > { %v4459_v11 = vpop.permute.xlu0 %4458  ;;  %v4465_v15 = vadd.f32 %v4461_v34, %v4448_v24  ;;  %v5171_v59 = vsel %vm341_vm1, %v5169_v51, %v5170_v7  ;;  %v4575_v3 = vrot.slane %v4571_v52, 1  ;;  %v9929_v24 = vld [vmem:[%s7460_s10 + $0x20] sm:$0xff]  ;;  %v5245_v34 = vstv %s9905_s29  ;;  %s10042_s29 = sld [smem:[#allocation6 + $0x141]] }
 0x3c2   : > { %5080 = vrot.lane.b32.xlu1 %v5075_v1, %s7341_s18  ;;  %v4464_v25 = vadd.f32 %v4459_v11, %v4447_v30  ;;  %v4617_v1 = vstv %s9893_s25  ;;  %v5229_v10 = vmul.f32 %v9929_v24, %v5228_v40  ;;  %v5247_v22 = vmul.f32 %v9923_v6, %v5245_v34  ;;  %v9984_v40 = vld [vmem:[%s7460_s10 + $0x10] sm:$0xff]  ;;  %s10038_s25 = sld [smem:[#allocation6 + $0x16c]] }
 0x3c3   : > { %5078 = vrot.lane.b32.xlu0 %v5074_v9, %s7341_s18  ;;  %v5188_v9 = vmul.f32 %v9929_v24, %v5187_v55  ;;  %v5294_v52 = vmul.f32 %v9923_v6, %v5292_v48  ;;  %v4698_v55 = vstv %s9951_s6  ;;  %s10080_s6 = sld [smem:[#allocation6 + $0x144]] }
 0x3c4   : > { %v4478_v4 = vpop.permute.xlu1 %4477  ;;  %v5233_v49 = vrot.slane %v5229_v10, 1  ;;  %v5251_v29 = vrot.slane %v5247_v22, 1  ;;  %v5320_v10 = vstv %s9962_s19  ;;  %s10083_s19 = sld [smem:[#allocation6 + $0x147]] }
 0x3c5   : > { %v4482_v27 = vadd.f32 %v4478_v4, %v4465_v15  ;;  %v4476_v62 = vpop.permute.xlu0 %4475  ;;  %v4619_v15 = vmul.f32 %v9898_v47, %v4617_v1  ;;  %v5202_v4 = vmul.f32 %v9929_v24, %v5201_v44  ;;  %v5322_v22 = vmul.f32 %v9898_v47, %v5320_v10 }
 0x3c6   : > { %v4481_v28 = vadd.f32 %v4476_v62, %v4464_v25  ;;  %5110 = vrot.lane.b32.xlu1 %v5106_v31, %s7342_s23 }
 0x3c7   : > { %5108 = vrot.lane.b32.xlu0 %v5107_v26, %s7342_s23  ;;  %v4495_v5 = vadd.f32 %v4490_v13, %v4482_v27  ;;  %v4577_v13 = vsel %vm293_vm0, %v4575_v3, %v4576_v61  ;;  %v5246_v26 = vmul.f32 %v9929_v24, %v5245_v34  ;;  %v4699_v34 = vmul.f32 %v9984_v40, %v4698_v55 }
 0x3c8   : > { %v4508_v32 = vpop.permute.xlu1 %4507  ;;  %v4494_v33 = vadd.f32 %v4491_v39, %v4481_v28  ;;  %v5234_v39 = vrot.slane %v5230_v63, 1  ;;  %v5275_v28 = vstv %s9918_s30  ;;  %s10047_s30 = sld [smem:[#allocation6 + $0x16d]] }
 0x3c9   : > { %v4506_v41 = vpop.permute.xlu0 %4505  ;;  %v4512_v43 = vadd.f32 %v4508_v32, %v4495_v5  ;;  %v5277_v35 = vmul.f32 %v9923_v6, %v5275_v28  ;;  %v5276_v36 = vmul.f32 %v9929_v24, %v5275_v28 }
 0x3ca   : > { %5127 = vrot.lane.b32.xlu1 %v5123_v14, %s7341_s18  ;;  %v4511_v50 = vadd.f32 %v4506_v41, %v4494_v33  ;;  %v4618_v14 = vmul.f32 %v9902_v58, %v4617_v1  ;;  %v5250_v33 = vrot.slane %v5246_v26, 1  ;;  %v5235_v42 = vsel %vm293_vm0, %v5233_v49, %v5234_v39 }
 0x3cb   : > { %5125 = vrot.lane.b32.xlu0 %v5124_v16, %s7341_s18  ;;  %v5280_v51 = vrot.slane %v5276_v36, 2  ;;  %v5298_v1 = vrot.slane %v5294_v52, 2  ;;  %v5321_v26 = vmul.f32 %v9902_v58, %v5320_v10 }
 0x3cc   : > { %v4525_v20 = vpop.permute.xlu1 %4524  ;;  %v4622_v16 = vrot.slane %v4618_v14, 2  ;;  %v5252_v21 = vsel %vm293_vm0, %v5250_v33, %v5251_v29 }
 0x3cd   : > { %v4529_v23 = vadd.f32 %v4525_v20, %v4512_v43  ;;  %v4523_v37 = vpop.permute.xlu0 %4522 }
 0x3ce   : > { %v4528_v53 = vadd.f32 %v4523_v37, %v4511_v50  ;;  %5157 = vrot.lane.b32.xlu1 %v5153_v45, %s7342_s23  ;;  %v4623_v45 = vrot.slane %v4619_v15, 2  ;;  %v4703_v15 = vrot.slane %v4699_v34, 1 }
 0x3cf   : > { %6943 = vst.msk [vmem:[%s7853_s9 + $0xa8] sm:$0x3f] %vm641_vm2, %v4529_v23  ;;  %5155 = vrot.lane.b32.xlu0 %v5154_v46, %s7342_s23 }
 0x3d0   : > { %6942 = vst.msk [vmem:[%s7853_s9 + $0xa0] sm:$0xff] %vm639_vm3, %v4528_v53  ;;  %v4550_v56 = vpop.permute.xlu1 %4549  ;;  %v4624_v17 = vsel %vm341_vm1, %v4622_v16, %v4623_v45  ;;  %v5293_v53 = vmul.f32 %v9929_v24, %v5292_v48 }
 0x3d1   : > { %v4548_v60 = vpop.permute.xlu0 %4547  ;;  %v4554_v8 = vadd.f32 %v4550_v56, %v4540_v54 }
 0x3d2   : > { %5174 = vrot.lane.b32.xlu1 %v5170_v7, %s7341_s18  ;;  %v4553_v30 = vadd.f32 %v4548_v60, %v4539_v57  ;;  %v5281_v7 = vrot.slane %v5277_v35, 2 }
 0x3d3   : > { %5172 = vrot.lane.b32.xlu0 %v5171_v59, %s7341_s18  ;;  %v9978_v59 = vld [vmem:[%s7460_s10 + $0x18] sm:$0xff] }
 0x3d4   : > { %v4564_v31 = vpop.permute.xlu1 %4563  ;;  %v5282_v57 = vsel %vm341_vm1, %v5280_v51, %v5281_v7  ;;  %v4666_v60 = vmul.f32 %v9978_v59, %v4664_v2 }
 0x3d5   : > { %v4568_v11 = vadd.f32 %v4564_v31, %v4554_v8  ;;  %v4562_v12 = vpop.permute.xlu0 %4561  ;;  %v5297_v8 = vrot.slane %v5293_v53, 2 }
 0x3d6   : > { %v4567_v18 = vadd.f32 %v4562_v12, %v4553_v30  ;;  %5194 = vrot.lane.b32.xlu1 %v5189_v0, %s7342_s23  ;;  %v4665_v0 = vmul.f32 %v9984_v40, %v4664_v2  ;;  %v4700_v30 = vmul.f32 %v9978_v59, %v4698_v55 }
 0x3d7   : > { %5192 = vrot.lane.b32.xlu0 %v5188_v9, %s7342_s23  ;;  %v4581_v25 = vadd.f32 %v4576_v61, %v4568_v11 }
 0x3d8   : > { %v4594_v27 = vpop.permute.xlu1 %4593  ;;  %v4580_v62 = vadd.f32 %v4577_v13, %v4567_v18  ;;  %v5299_v13 = vsel %vm341_vm1, %v5297_v8, %v5298_v1  ;;  %v4704_v18 = vrot.slane %v4700_v30, 1 }
 0x3d9   : > { %v4592_v5 = vpop.permute.xlu0 %4591  ;;  %v4598_v32 = vadd.f32 %v4594_v27, %v4581_v25  ;;  %v4745_v25 = vstv %s9973_s8  ;;  %v5334_v27 = vstv %s9967_s15  ;;  %s10089_s15 = sld [smem:[#allocation7 + $0xc]] }
 0x3da   : > { %5208 = vrot.lane.b32.xlu1 %v5203_v19, %s7341_s18  ;;  %v4597_v38 = vadd.f32 %v4592_v5, %v4580_v62  ;;  %v5361_v19 = vstv %s9969_s7  ;;  %v5378_v62 = vstv %s9981_s22  ;;  %v4747_v33 = vmul.f32 %v9978_v59, %v4745_v25  ;;  %s10096_s7 = sld [smem:[#allocation6 + $0x172]] }
 0x3db   : > { %5206 = vrot.lane.b32.xlu0 %v5202_v4, %s7341_s18  ;;  %v5363_v28 = vmul.f32 %v9898_v47, %v5361_v19  ;;  %v5362_v5 = vmul.f32 %v9902_v58, %v5361_v19  ;;  %v5336_v36 = vmul.f32 %v9898_v47, %v5334_v27  ;;  %s10101_s8 = sld [smem:[#allocation6 + $0x173]] }
 0x3dc   : > { %v4611_v41 = vpop.permute.xlu1 %4610  ;;  %v4751_v51 = vrot.slane %v4747_v33, 2  ;;  %s10103_s22 = sld [smem:[#allocation6 + $0x175]] }
 0x3dd   : > { %v4615_v43 = vadd.f32 %v4611_v41, %v4598_v32  ;;  %v4609_v46 = vpop.permute.xlu0 %4608  ;;  %v4746_v32 = vmul.f32 %v9984_v40, %v4745_v25  ;;  %v5367_v48 = vrot.slane %v5363_v28, 1 }
 0x3de   : > { %v4614_v50 = vadd.f32 %v4609_v46, %v4597_v38  ;;  %5238 = vrot.lane.b32.xlu1 %v5234_v39, %s7342_s23  ;;  %v5380_v38 = vmul.f32 %v9898_v47, %v5378_v62 }
 0x3df   : > { %5236 = vrot.lane.b32.xlu0 %v5235_v42, %s7342_s23  ;;  %v4628_v20 = vadd.f32 %v4623_v45, %v4615_v43  ;;  %v5335_v42 = vmul.f32 %v9902_v58, %v5334_v27  ;;  %v5379_v43 = vmul.f32 %v9902_v58, %v5378_v62 }
 0x3e0   : > { %v4641_v23 = vpop.permute.xlu1 %4640  ;;  %v4627_v37 = vadd.f32 %v4624_v17, %v4614_v50  ;;  %v5366_v50 = vrot.slane %v5362_v5, 1  ;;  %v5448_v5 = vstv %s10031_s20  ;;  %s10150_s20 = sld [smem:[#allocation6 + $0x14d]] }
 0x3e1   : > { %v4639_v54 = vpop.permute.xlu0 %4638  ;;  %v4645_v56 = vadd.f32 %v4641_v23, %v4628_v20  ;;  %v5408_v20 = vstv %s9993_s26  ;;  %v5384_v23 = vrot.slane %v5380_v38, 1  ;;  %v5383_v2 = vrot.slane %v5379_v43, 1  ;;  %s10107_s26 = sld [smem:[#allocation6 + $0x14a]] }
 0x3e2   : > { %5255 = vrot.lane.b32.xlu1 %v5251_v29, %s7341_s18  ;;  %v4644_v61 = vadd.f32 %v4639_v54, %v4627_v37  ;;  %v4705_v29 = vsel %vm293_vm0, %v4703_v15, %v4704_v18  ;;  %v5410_v52 = vmul.f32 %v9898_v47, %v5408_v20  ;;  %v5409_v53 = vmul.f32 %v9902_v58, %v5408_v20 }
 0x3e3   : > { %5253 = vrot.lane.b32.xlu0 %v5252_v21, %s7341_s18  ;;  %v5385_v8 = vsel %vm293_vm0, %v5383_v2, %v5384_v23  ;;  %v5450_v38 = vmul.f32 %v9978_v59, %v5448_v5  ;;  %v5449_v43 = vmul.f32 %v9984_v40, %v5448_v5 }
 0x3e4   : > { %v4658_v3 = vpop.permute.xlu1 %4657 }
 0x3e5   : > { %v4662_v9 = vadd.f32 %v4658_v3, %v4645_v56  ;;  %v4656_v44 = vpop.permute.xlu0 %4655  ;;  %v5368_v56 = vsel %vm293_vm0, %v5366_v50, %v5367_v48  ;;  %v5425_v3 = vstv %s10008_s11  ;;  %s10113_s11 = sld [smem:[#allocation6 + $0x176]] }
 0x3e6   : > { %v4661_v31 = vadd.f32 %v4656_v44, %v4644_v61  ;;  %5285 = vrot.lane.b32.xlu1 %v5281_v7, %s7342_s23  ;;  %v4750_v7 = vrot.slane %v4746_v32, 2  ;;  %v5413_v44 = vrot.slane %v5409_v53, 2  ;;  %v5426_v10 = vmul.f32 %v9902_v58, %v5425_v3 }
 0x3e7   : > { %5283 = vrot.lane.b32.xlu0 %v5282_v57, %s7342_s23  ;;  %v4668_v63 = vadd.f32 %v4666_v60, %v4662_v9  ;;  %v5414_v9 = vrot.slane %v5410_v52, 2 }
 0x3e8   : > { %v4678_v11 = vpop.permute.xlu1 %4677  ;;  %v4667_v12 = vadd.f32 %v4665_v0, %v4661_v31  ;;  %v4752_v61 = vsel %vm341_vm1, %v4750_v7, %v4751_v51  ;;  %v4792_v31 = vstv %s10017_s21  ;;  %s10126_s21 = sld [smem:[#allocation6 + $0x178]] }
 0x3e9   : > { %v4676_v14 = vpop.permute.xlu0 %4675  ;;  %v4682_v4 = vadd.f32 %v4678_v11, %v4668_v63  ;;  %v5427_v63 = vmul.f32 %v9898_v47, %v5425_v3  ;;  %v4794_v15 = vmul.f32 %v9923_v6, %v4792_v31 }
 0x3ea   : > { %5302 = vrot.lane.b32.xlu1 %v5298_v1, %s7341_s18  ;;  %v4681_v39 = vadd.f32 %v4676_v14, %v4667_v12  ;;  %v4826_v12 = vstv %s10020_s12  ;;  %v5415_v14 = vsel %vm341_vm1, %v5413_v44, %v5414_v9  ;;  %s10141_s12 = sld [smem:[#allocation6 + $0x179]] }
 0x3eb   : > { %5300 = vrot.lane.b32.xlu0 %v5299_v13, %s7341_s18  ;;  %v5431_v25 = vrot.slane %v5427_v63, 2  ;;  %v4827_v62 = vmul.f32 %v9929_v24, %v4826_v12 }
 0x3ec   : > { %v4692_v49 = vpop.permute.xlu1 %4691 }
 0x3ed   : > { %v4696_v16 = vadd.f32 %v4692_v49, %v4682_v4  ;;  %v4690_v45 = vpop.permute.xlu0 %4689  ;;  %v5430_v4 = vrot.slane %v5426_v10, 2  ;;  %v4831_v33 = vrot.slane %v4827_v62, 1 }
 0x3ee   : > { %v4695_v35 = vadd.f32 %v4690_v45, %v4681_v39  ;;  %5327 = vrot.lane.b32.xlu1 %v5322_v22, %s7342_s23  ;;  %v4793_v22 = vmul.f32 %v9929_v24, %v4792_v31  ;;  %v4828_v39 = vmul.f32 %v9923_v6, %v4826_v12 }
 0x3ef   : > { %5325 = vrot.lane.b32.xlu0 %v5321_v26, %s7342_s23  ;;  %v4709_v41 = vadd.f32 %v4704_v18, %v4696_v16 }
 0x3f0   : > { %v4722_v46 = vpop.permute.xlu1 %4721  ;;  %v4708_v17 = vadd.f32 %v4705_v29, %v4695_v35  ;;  %v5432_v29 = vsel %vm341_vm1, %v5430_v4, %v5431_v25  ;;  %v4832_v35 = vrot.slane %v4828_v39, 1 }
 0x3f1   : > { %v4720_v21 = vpop.permute.xlu0 %4719  ;;  %v4726_v37 = vadd.f32 %v4722_v46, %v4709_v41  ;;  %v4873_v41 = vstv %s10042_s29  ;;  %v5462_v46 = vstv %s10036_s24  ;;  %s10153_s24 = sld [smem:[#allocation6 + $0x150]] }
 0x3f2   : > { %5341 = vrot.lane.b32.xlu1 %v5336_v36, %s7341_s18  ;;  %v4725_v54 = vadd.f32 %v4720_v21, %v4708_v17  ;;  %v5489_v36 = vstv %s10038_s25  ;;  %v5506_v17 = vstv %s10047_s30  ;;  %v4875_v2 = vmul.f32 %v9923_v6, %v4873_v41  ;;  %s10164_s25 = sld [smem:[#allocation6 + $0x17b]] }
 0x3f3   : > { %5339 = vrot.lane.b32.xlu0 %v5335_v42, %s7341_s18  ;;  %v5491_v20 = vmul.f32 %v9978_v59, %v5489_v36  ;;  %v5490_v21 = vmul.f32 %v9984_v40, %v5489_v36  ;;  %v5464_v53 = vmul.f32 %v9978_v59, %v5462_v46  ;;  %s10169_s29 = sld [smem:[#allocation6 + $0x17c]] }
 0x3f4   : > { %v4739_v55 = vpop.permute.xlu1 %4738  ;;  %v4879_v44 = vrot.slane %v4875_v2, 2  ;;  %s10171_s30 = sld [smem:[#allocation6 + $0x17e]] }
 0x3f5   : > { %v4743_v57 = vadd.f32 %v4739_v55, %v4726_v37  ;;  %v4737_v60 = vpop.permute.xlu0 %4736  ;;  %v4874_v37 = vmul.f32 %v9929_v24, %v4873_v41  ;;  %v5495_v3 = vrot.slane %v5491_v20, 1  ;;  %v4923_v41 = vstv %s10089_s15  ;;  %s10213_s15 = sld [smem:[#allocation6 + $0x156]] }
 0x3f6   : > { %v4742_v0 = vadd.f32 %v4737_v60, %v4725_v54  ;;  %5371 = vrot.lane.b32.xlu1 %v5367_v48, %s7342_s23  ;;  %v5508_v54 = vmul.f32 %v9978_v59, %v5506_v17 }
 0x3f7   : > { %5369 = vrot.lane.b32.xlu0 %v5368_v56, %s7342_s23  ;;  %v4756_v1 = vadd.f32 %v4751_v51, %v4743_v57  ;;  %v5463_v56 = vmul.f32 %v9984_v40, %v5462_v46  ;;  %v5507_v57 = vmul.f32 %v9984_v40, %v5506_v17 }
 0x3f8   : > { %v4769_v34 = vpop.permute.xlu1 %4768  ;;  %v4755_v30 = vadd.f32 %v4752_v61, %v4742_v0  ;;  %v5494_v0 = vrot.slane %v5490_v21, 1 }
 0x3f9   : > { %v4767_v11 = vpop.permute.xlu0 %4766  ;;  %v4773_v13 = vadd.f32 %v4769_v34, %v4756_v1  ;;  %v5536_v1 = vstv %s10056_s4  ;;  %v5512_v34 = vrot.slane %v5508_v54, 1  ;;  %v5511_v31 = vrot.slane %v5507_v57, 1  ;;  %s10175_s4 = sld [smem:[#allocation6 + $0x153]] }
 0x3fa   : > { %5388 = vrot.lane.b32.xlu1 %v5384_v23, %s7341_s18  ;;  %v4772_v18 = vadd.f32 %v4767_v11, %v4755_v30  ;;  %v4833_v23 = vsel %vm293_vm0, %v4831_v33, %v4832_v35  ;;  %v5538_v63 = vmul.f32 %v9978_v59, %v5536_v1  ;;  %v5537_v10 = vmul.f32 %v9984_v40, %v5536_v1 }
 0x3fb   : > { %5386 = vrot.lane.b32.xlu0 %v5385_v8, %s7341_s18  ;;  %v5513_v4 = vsel %vm293_vm0, %v5511_v31, %v5512_v34  ;;  %v5617_v54 = vstv %s10103_s22  ;;  %s10232_s22 = sld [smem:[#allocation6 + $0x187]] }
 0x3fc   : > { %v4786_v19 = vpop.permute.xlu1 %4785 }
 0x3fd   : > { %v4790_v26 = vadd.f32 %v4786_v19, %v4773_v13  ;;  %v4784_v27 = vpop.permute.xlu0 %4783  ;;  %v5496_v13 = vsel %vm293_vm0, %v5494_v0, %v5495_v3  ;;  %v5553_v19 = vstv %s10071_s5  ;;  %s10180_s5 = sld [smem:[#allocation6 + $0x17f]] }
 0x3fe   : > { %v4789_v49 = vadd.f32 %v4784_v27, %v4772_v18  ;;  %5418 = vrot.lane.b32.xlu1 %v5414_v9, %s7342_s23  ;;  %v4878_v9 = vrot.slane %v4874_v37, 2  ;;  %v5541_v27 = vrot.slane %v5537_v10, 2  ;;  %v5554_v5 = vmul.f32 %v9984_v40, %v5553_v19 }
 0x3ff   : > { %5416 = vrot.lane.b32.xlu0 %v5415_v14, %s7342_s23  ;;  %v4796_v28 = vadd.f32 %v4794_v15, %v4790_v26  ;;  %v5542_v26 = vrot.slane %v5538_v63, 2 }
 0x400   : > { %v4806_v16 = vpop.permute.xlu1 %4805  ;;  %v4795_v45 = vadd.f32 %v4793_v22, %v4789_v49  ;;  %v4880_v18 = vsel %vm341_vm1, %v4878_v9, %v4879_v44  ;;  %v4925_v49 = vstv %s10080_s6  ;;  %v5618_v9 = vmul.f32 %v9929_v24, %v5617_v54  ;;  %s10189_s6 = sld [smem:[#allocation6 + $0x181]] }
 0x401   : > { %v4804_v32 = vpop.permute.xlu0 %4803  ;;  %v4810_v42 = vadd.f32 %v4806_v16, %v4796_v28  ;;  %v5555_v28 = vmul.f32 %v9978_v59, %v5553_v19  ;;  %v4927_v33 = vmul.f32 %v9898_v47, %v4925_v49 }
 0x402   : > { %5435 = vrot.lane.b32.xlu1 %v5431_v25, %s7341_s18  ;;  %v4809_v48 = vadd.f32 %v4804_v32, %v4795_v45  ;;  %v4959_v45 = vstv %s10083_s19  ;;  %v5543_v32 = vsel %vm341_vm1, %v5541_v27, %v5542_v26  ;;  %s10204_s19 = sld [smem:[#allocation6 + $0x182]] }
 0x403   : > { %5433 = vrot.lane.b32.xlu0 %v5432_v29, %s7341_s18  ;;  %v4929_v21 = vadd.f32 %v4927_v33, %v4923_v41 }
 0x404   : > { %v4820_v50 = vpop.permute.xlu1 %4819 }
 0x405   : > { %v4824_v7 = vadd.f32 %v4820_v50, %v4810_v42  ;;  %v4818_v51 = vpop.permute.xlu0 %4817  ;;  %v5559_v42 = vrot.slane %v5555_v28, 2  ;;  %v4960_v50 = vmul.f32 %v9902_v58, %v4959_v45 }
 0x406   : > { %v4823_v52 = vadd.f32 %v4818_v51, %v4809_v48  ;;  %5455 = vrot.lane.b32.xlu1 %v5450_v38, %s7342_s23  ;;  %v4961_v48 = vmul.f32 %v9898_v47, %v4959_v45 }
 0x407   : > { %5453 = vrot.lane.b32.xlu0 %v5449_v43, %s7342_s23  ;;  %v4837_v55 = vadd.f32 %v4832_v35, %v4824_v7  ;;  %v4926_v35 = vmul.f32 %v9902_v58, %v4925_v49  ;;  %v5558_v43 = vrot.slane %v5554_v5, 2  ;;  %v5576_v7 = vstv %s10096_s7  ;;  %s10216_s7 = sld [smem:[#allocation6 + $0x159]] }
 0x408   : > { %v4850_v60 = vpop.permute.xlu1 %4849  ;;  %v4836_v61 = vadd.f32 %v4833_v23, %v4823_v52  ;;  %v4965_v52 = vrot.slane %v4961_v48, 1 }
 0x409   : > { %v4848_v8 = vpop.permute.xlu0 %4847  ;;  %v4854_v30 = vadd.f32 %v4850_v60, %v4837_v55  ;;  %v4928_v23 = vadd.f32 %v4926_v35, %v4923_v41  ;;  %v5560_v37 = vsel %vm341_vm1, %v5558_v43, %v5559_v42  ;;  %v5578_v55 = vmul.f32 %v9923_v6, %v5576_v7 }
 0x40a   : > { %5469 = vrot.lane.b32.xlu1 %v5464_v53, %s7341_s18  ;;  %v4853_v11 = vadd.f32 %v4848_v8, %v4836_v61  ;;  %v4964_v53 = vrot.slane %v4960_v50, 1  ;;  %v5577_v60 = vmul.f32 %v9929_v24, %v5576_v7  ;;  %v5590_v61 = vstv %s10101_s8  ;;  %s10227_s8 = sld [smem:[#allocation6 + $0x184]] }
 0x40b   : > { %5467 = vrot.lane.b32.xlu0 %v5463_v56, %s7341_s18  ;;  %v5006_v56 = vstv %s10107_s26  ;;  %v5619_v8 = vmul.f32 %v9923_v6, %v5617_v54  ;;  %s10236_s26 = sld [smem:[#allocation6 + $0x15c]] }
 0x40c   : > { %v4867_v12 = vpop.permute.xlu1 %4866  ;;  %v5007_v31 = vmul.f32 %v9902_v58, %v5006_v56  ;;  %v5008_v63 = vmul.f32 %v9898_v47, %v5006_v56 }
 0x40d   : > { %v4871_v14 = vadd.f32 %v4867_v12, %v4854_v30  ;;  %v4865_v15 = vpop.permute.xlu0 %4864  ;;  %v4966_v30 = vsel %vm293_vm0, %v4964_v53, %v4965_v52 }
 0x40e   : > { %v4870_v22 = vadd.f32 %v4865_v15, %v4853_v11  ;;  %5499 = vrot.lane.b32.xlu1 %v5495_v3, %s7342_s23  ;;  %v5634_v3 = vstv %s10113_s11  ;;  %v5592_v11 = vmul.f32 %v9923_v6, %v5590_v61  ;;  %v5011_v27 = vrot.slane %v5007_v31, 2  ;;  %s10241_s11 = sld [smem:[#allocation6 + $0x185]] }
 0x40f   : > { %5497 = vrot.lane.b32.xlu0 %v5496_v13, %s7342_s23  ;;  %v4884_v25 = vadd.f32 %v4879_v44, %v4871_v14  ;;  %v5636_v12 = vmul.f32 %v9923_v6, %v5634_v3  ;;  %v5591_v14 = vmul.f32 %v9929_v24, %v5590_v61  ;;  %v5635_v15 = vmul.f32 %v9929_v24, %v5634_v3 }
 0x410   : > { %v4897_v62 = vpop.permute.xlu1 %4896  ;;  %v4883_v39 = vadd.f32 %v4880_v18, %v4870_v22  ;;  %v5623_v22 = vrot.slane %v5619_v8, 1 }
 0x411   : > { %v4895_v16 = vpop.permute.xlu0 %4894  ;;  %v4901_v29 = vadd.f32 %v4897_v62, %v4884_v25  ;;  %v5622_v25 = vrot.slane %v5618_v9, 1  ;;  %v5012_v62 = vrot.slane %v5008_v63, 2  ;;  %v5639_v28 = vrot.slane %v5635_v15, 1 }
 0x412   : > { %5516 = vrot.lane.b32.xlu1 %v5512_v34, %s7341_s18  ;;  %v4900_v36 = vadd.f32 %v4895_v16, %v4883_v39  ;;  %v5640_v39 = vrot.slane %v5636_v12, 1  ;;  %v5709_v9 = vstv %s10164_s25  ;;  %s10275_s25 = sld [smem:[#allocation6 + $0x15f]] }
 0x413   : > { %5514 = vrot.lane.b32.xlu0 %v5513_v4, %s7341_s18  ;;  %v5664_v4 = vstv %s10126_s21  ;;  %v5711_v12 = vmul.f32 %v9898_v47, %v5709_v9  ;;  %v5710_v15 = vmul.f32 %v9902_v58, %v5709_v9  ;;  %s10247_s21 = sld [smem:[#allocation6 + $0x199]] }
 0x414   : > { %v4914_v38 = vpop.permute.xlu1 %4913  ;;  %v5666_v5 = vmul.f32 %v9923_v6, %v5664_v4  ;;  %v5665_v16 = vmul.f32 %v9929_v24, %v5664_v4  ;;  %v5641_v43 = vsel %vm293_vm0, %v5639_v28, %v5640_v39 }
 0x415   : > { %v4918_v46 = vadd.f32 %v4914_v38, %v4901_v29  ;;  %v4912_v17 = vpop.permute.xlu0 %4911  ;;  %v5681_v38 = vstv %s10141_s12  ;;  %s10251_s12 = sld [smem:[#allocation6 + $0x196]] }
 0x416   : > { %v4917_v20 = vadd.f32 %v4912_v17, %v4900_v36  ;;  %5546 = vrot.lane.b32.xlu1 %v5542_v26, %s7342_s23  ;;  %v5013_v36 = vsel %vm341_vm1, %v5011_v27, %v5012_v62  ;;  %v5669_v17 = vrot.slane %v5665_v16, 2  ;;  %v5682_v7 = vmul.f32 %v9929_v24, %v5681_v38 }
 0x417   : > { %6973 = vst.msk [vmem:[%s7853_s9 + $0xb8] sm:$0x3f] %vm641_vm2, %v4918_v46  ;;  %5544 = vrot.lane.b32.xlu0 %v5543_v32, %s7342_s23  ;;  %v5624_v32 = vsel %vm293_vm0, %v5622_v25, %v5623_v22  ;;  %v5670_v46 = vrot.slane %v5666_v5, 2 }
 0x418   : > { %6972 = vst.msk [vmem:[%s7853_s9 + $0xb0] sm:$0xff] %vm639_vm3, %v4917_v20  ;;  %v4939_v51 = vpop.permute.xlu1 %4938  ;;  %v5053_v20 = vstv %s10150_s20  ;;  %s10261_s20 = sld [smem:[#allocation6 + $0x197]] }
 0x419   : > { %v4937_v2 = vpop.permute.xlu0 %4936  ;;  %v4943_v57 = vadd.f32 %v4939_v51, %v4929_v21  ;;  %v5683_v21 = vmul.f32 %v9923_v6, %v5681_v38 }
 0x41a   : > { %5563 = vrot.lane.b32.xlu1 %v5559_v42, %s7341_s18  ;;  %v4942_v0 = vadd.f32 %v4937_v2, %v4928_v23  ;;  %v5087_v23 = vstv %s10153_s24  ;;  %v5671_v2 = vsel %vm341_vm1, %v5669_v17, %v5670_v46  ;;  %s10267_s24 = sld [smem:[#allocation6 + $0x19a]] }
 0x41b   : > { %5561 = vrot.lane.b32.xlu0 %v5560_v37, %s7341_s18  ;;  %v5687_v56 = vrot.slane %v5683_v21, 2  ;;  %v5088_v3 = vmul.f32 %v9984_v40, %v5087_v23 }
 0x41c   : > { %v4953_v1 = vpop.permute.xlu1 %4952 }
 0x41d   : > { %v4957_v44 = vadd.f32 %v4953_v1, %v4943_v57  ;;  %v4951_v34 = vpop.permute.xlu0 %4950  ;;  %v5686_v57 = vrot.slane %v5682_v7, 2  ;;  %v5092_v63 = vrot.slane %v5088_v3, 1 }
 0x41e   : > { %v4956_v10 = vadd.f32 %v4951_v34, %v4942_v0  ;;  %5583 = vrot.lane.b32.xlu1 %v5578_v55, %s7342_s23  ;;  %v5054_v55 = vmul.f32 %v9984_v40, %v5053_v20  ;;  %v5089_v0 = vmul.f32 %v9978_v59, %v5087_v23 }
 0x41f   : > { %5581 = vrot.lane.b32.xlu0 %v5577_v60, %s7342_s23  ;;  %v4970_v13 = vadd.f32 %v4965_v52, %v4957_v44  ;;  %v5055_v52 = vmul.f32 %v9978_v59, %v5053_v20 }
 0x420   : > { %v4983_v18 = vpop.permute.xlu1 %4982  ;;  %v4969_v19 = vadd.f32 %v4966_v30, %v4956_v10  ;;  %v5688_v30 = vsel %vm341_vm1, %v5686_v57, %v5687_v56  ;;  %v5093_v10 = vrot.slane %v5089_v0, 1 }
 0x421   : > { %v4981_v26 = vpop.permute.xlu0 %4980  ;;  %v4987_v49 = vadd.f32 %v4983_v18, %v4970_v13  ;;  %v5134_v13 = vstv %s10175_s4  ;;  %v5723_v18 = vstv %s10169_s29  ;;  %s10280_s29 = sld [smem:[#allocation6 + $0x19c]] }
 0x422   : > { %5597 = vrot.lane.b32.xlu1 %v5592_v11, %s7341_s18  ;;  %v4986_v45 = vadd.f32 %v4981_v26, %v4969_v19  ;;  %v5750_v11 = vstv %s10171_s30  ;;  %v5767_v19 = vstv %s10180_s5  ;;  %v5136_v28 = vmul.f32 %v9978_v59, %v5134_v13  ;;  %s10293_s30 = sld [smem:[#allocation7 + $0xd]] }
 0x423   : > { %5595 = vrot.lane.b32.xlu0 %v5591_v14, %s7341_s18  ;;  %v5752_v4 = vmul.f32 %v9898_v47, %v5750_v11  ;;  %v5751_v26 = vmul.f32 %v9902_v58, %v5750_v11  ;;  %v5725_v16 = vmul.f32 %v9898_v47, %v5723_v18  ;;  %s10297_s4 = sld [smem:[#allocation6 + $0x162]] }
 0x424   : > { %v5000_v29 = vpop.permute.xlu1 %4999  ;;  %v5140_v17 = vrot.slane %v5136_v28, 2  ;;  %v5878_v28 = vstv %s10232_s22  ;;  %s10305_s5 = sld [smem:[#allocation6 + $0x19d]] }
 0x425   : > { %v5004_v33 = vadd.f32 %v5000_v29, %v4987_v49  ;;  %v4998_v35 = vpop.permute.xlu0 %4997  ;;  %v5135_v49 = vmul.f32 %v9984_v40, %v5134_v13  ;;  %v5756_v38 = vrot.slane %v5752_v4, 1  ;;  %s10360_s22 = sld [smem:[#allocation6 + $0x188]] }
 0x426   : > { %v5003_v41 = vadd.f32 %v4998_v35, %v4986_v45  ;;  %5627 = vrot.lane.b32.xlu1 %v5623_v22, %s7342_s23  ;;  %v5769_v45 = vmul.f32 %v9898_v47, %v5767_v19 }
 0x427   : > { %5625 = vrot.lane.b32.xlu0 %v5624_v32, %s7342_s23  ;;  %v5017_v42 = vadd.f32 %v5012_v62, %v5004_v33  ;;  %v5724_v32 = vmul.f32 %v9902_v58, %v5723_v18  ;;  %v5768_v33 = vmul.f32 %v9902_v58, %v5767_v19 }
 0x428   : > { %v5030_v48 = vpop.permute.xlu1 %5029  ;;  %v5016_v50 = vadd.f32 %v5013_v36, %v5003_v41  ;;  %v5755_v41 = vrot.slane %v5751_v26, 1 }
 0x429   : > { %v5028_v51 = vpop.permute.xlu0 %5027  ;;  %v5034_v37 = vadd.f32 %v5030_v48, %v5017_v42  ;;  %v5797_v42 = vstv %s10189_s6  ;;  %v5773_v48 = vrot.slane %v5769_v45, 1  ;;  %v5772_v20 = vrot.slane %v5768_v33, 1  ;;  %s10324_s6 = sld [smem:[#allocation6 + $0x165]] }
 0x42a   : > { %5644 = vrot.lane.b32.xlu1 %v5640_v39, %s7341_s18  ;;  %v5033_v53 = vadd.f32 %v5028_v51, %v5016_v50  ;;  %v5094_v39 = vsel %vm293_vm0, %v5092_v63, %v5093_v10  ;;  %v5799_v21 = vmul.f32 %v9898_v47, %v5797_v42  ;;  %v5798_v7 = vmul.f32 %v9902_v58, %v5797_v42 }
 0x42b   : > { %5642 = vrot.lane.b32.xlu0 %v5641_v43, %s7341_s18  ;;  %v5774_v57 = vsel %vm293_vm0, %v5772_v20, %v5773_v48  ;;  %v6139_v20 = vstv %s10247_s21  ;;  %s10386_s21 = sld [smem:[#allocation6 + $0x18a]] }
 0x42c   : > { %v5047_v54 = vpop.permute.xlu1 %5046 }
 0x42d   : > { %v5051_v60 = vadd.f32 %v5047_v54, %v5034_v37  ;;  %v5045_v61 = vpop.permute.xlu0 %5044  ;;  %v5757_v37 = vsel %vm293_vm0, %v5755_v41, %v5756_v38  ;;  %v5814_v54 = vstv %s10204_s19  ;;  %s10339_s19 = sld [smem:[#allocation6 + $0x19f]] }
 0x42e   : > { %v5050_v1 = vadd.f32 %v5045_v61, %v5033_v53  ;;  %5674 = vrot.lane.b32.xlu1 %v5670_v46, %s7342_s23  ;;  %v5139_v46 = vrot.slane %v5135_v49, 2  ;;  %v5802_v61 = vrot.slane %v5798_v7, 2  ;;  %v5815_v9 = vmul.f32 %v9902_v58, %v5814_v54 }
 0x42f   : > { %5672 = vrot.lane.b32.xlu0 %v5671_v2, %s7342_s23  ;;  %v5057_v8 = vadd.f32 %v5055_v52, %v5051_v60  ;;  %v5803_v60 = vrot.slane %v5799_v21, 2 }
 0x430   : > { %v5067_v44 = vpop.permute.xlu1 %5066  ;;  %v5056_v34 = vadd.f32 %v5054_v55, %v5050_v1  ;;  %v5141_v53 = vsel %vm341_vm1, %v5139_v46, %v5140_v17  ;;  %v5181_v1 = vstv %s10213_s15  ;;  %s10347_s15 = sld [smem:[#allocation6 + $0x1a0]] }
 0x431   : > { %v5065_v31 = vpop.permute.xlu0 %5064  ;;  %v5071_v14 = vadd.f32 %v5067_v44, %v5057_v8  ;;  %v5816_v8 = vmul.f32 %v9898_v47, %v5814_v54  ;;  %v5183_v63 = vmul.f32 %v9923_v6, %v5181_v1 }
 0x432   : > { %5691 = vrot.lane.b32.xlu1 %v5687_v56, %s7341_s18  ;;  %v5070_v22 = vadd.f32 %v5065_v31, %v5056_v34  ;;  %v5215_v34 = vstv %s10216_s7  ;;  %v5804_v31 = vsel %vm341_vm1, %v5802_v61, %v5803_v60  ;;  %s10349_s7 = sld [smem:[#allocation6 + $0x1a2]] }
 0x433   : > { %5689 = vrot.lane.b32.xlu0 %v5688_v30, %s7341_s18  ;;  %v5820_v11 = vrot.slane %v5816_v8, 2  ;;  %v5217_v18 = vmul.f32 %v9923_v6, %v5215_v34 }
 0x434   : > { %v5081_v25 = vpop.permute.xlu1 %5080 }
 0x435   : > { %v5085_v27 = vadd.f32 %v5081_v25, %v5071_v14  ;;  %v5079_v62 = vpop.permute.xlu0 %5078  ;;  %v5837_v25 = vstv %s10227_s8  ;;  %v5221_v49 = vrot.slane %v5217_v18, 1  ;;  %s10358_s8 = sld [smem:[#allocation6 + $0x168]] }
 0x436   : > { %v5084_v5 = vadd.f32 %v5079_v62, %v5070_v22  ;;  %5716 = vrot.lane.b32.xlu1 %v5711_v12, %s7342_s23  ;;  %v5819_v12 = vrot.slane %v5815_v9, 2 }
 0x437   : > { %5714 = vrot.lane.b32.xlu0 %v5710_v15, %s7342_s23  ;;  %v5098_v29 = vadd.f32 %v5093_v10, %v5085_v27  ;;  %v5182_v10 = vmul.f32 %v9929_v24, %v5181_v1  ;;  %v5216_v15 = vmul.f32 %v9929_v24, %v5215_v34  ;;  %v6156_v1 = vstv %s10267_s24  ;;  %s10410_s24 = sld [smem:[#allocation6 + $0x18b]] }
 0x438   : > { %v5111_v35 = vpop.permute.xlu1 %5110  ;;  %v5097_v36 = vadd.f32 %v5094_v39, %v5084_v5  ;;  %v5821_v27 = vsel %vm341_vm1, %v5819_v12, %v5820_v11  ;;  %v5839_v5 = vmul.f32 %v9978_v59, %v5837_v25 }
 0x439   : > { %v5109_v43 = vpop.permute.xlu0 %5108  ;;  %v5115_v50 = vadd.f32 %v5111_v35, %v5098_v29  ;;  %v5220_v39 = vrot.slane %v5216_v15, 1  ;;  %v5838_v29 = vmul.f32 %v9984_v40, %v5837_v25  ;;  %v5312_v25 = vstv %s10293_s30  ;;  %s10434_s30 = sld [smem:[#allocation6 + $0x174]] }
 0x43a   : > { %5730 = vrot.lane.b32.xlu1 %v5725_v16, %s7341_s18  ;;  %v5114_v51 = vadd.f32 %v5109_v43, %v5097_v36  ;;  %v5262_v16 = vstv %s10236_s26  ;;  %v5879_v36 = vmul.f32 %v9984_v40, %v5878_v28  ;;  %s10367_s26 = sld [smem:[#allocation6 + $0x16b]] }
 0x43b   : > { %5728 = vrot.lane.b32.xlu0 %v5724_v32, %s7341_s18  ;;  %v5851_v32 = vstv %s10241_s11  ;;  %v5222_v43 = vsel %vm293_vm0, %v5220_v39, %v5221_v49  ;;  %v5263_v46 = vmul.f32 %v9929_v24, %v5262_v16  ;;  %s10372_s11 = sld [smem:[#allocation6 + $0x1a3]] }
 0x43c   : > { %v5128_v23 = vpop.permute.xlu1 %5127  ;;  %v5852_v7 = vmul.f32 %v9984_v40, %v5851_v32 }
 0x43d   : > { %v5132_v2 = vadd.f32 %v5128_v23, %v5115_v50  ;;  %v5126_v52 = vpop.permute.xlu0 %5125  ;;  %v5853_v50 = vmul.f32 %v9978_v59, %v5851_v32  ;;  %v5883_v23 = vrot.slane %v5879_v36, 1 }
 0x43e   : > { %v5131_v55 = vadd.f32 %v5126_v52, %v5114_v51  ;;  %5760 = vrot.lane.b32.xlu1 %v5756_v38, %s7342_s23  ;;  %v10265_v38 = vmul.f32 %v9978_v59, %v5878_v28  ;;  %v6098_v51 = vstv %s10251_s12  ;;  %v5267_v59 = vrot.slane %v5263_v46, 2  ;;  %s10392_s12 = sld [smem:[#allocation6 + $0x16e]] }
 0x43f   : > { %5758 = vrot.lane.b32.xlu0 %v5757_v37, %s7342_s23  ;;  %v5145_v56 = vadd.f32 %v5140_v17, %v5132_v2  ;;  %v5264_v17 = vmul.f32 %v9923_v6, %v5262_v16 }
 0x440   : > { %v5158_v3 = vpop.permute.xlu1 %5157  ;;  %v5144_v0 = vadd.f32 %v5141_v53, %v5131_v55  ;;  %v5884_v37 = vrot.slane %v10265_v38, 1  ;;  %v10284_v53 = vld [vmem:[%s7460_s10] sm:$0xff]  ;;  %v10288_v55 = vld [vmem:[%s7460_s10 + $0x8] sm:$0xff] }
 0x441   : > { %v5156_v44 = vpop.permute.xlu0 %5155  ;;  %v5162_v30 = vadd.f32 %v5158_v3, %v5145_v56  ;;  %v5268_v52 = vrot.slane %v5264_v17, 2  ;;  %v6140_v54 = vmul.f32 %v10284_v53, %v6139_v20  ;;  %v10291_v40 = vmul.f32 %v10288_v55, %v6139_v20 }
 0x442   : > { %5777 = vrot.lane.b32.xlu1 %v5773_v48, %s7341_s18  ;;  %v5161_v47 = vadd.f32 %v5156_v44, %v5144_v0  ;;  %v6099_v56 = vmul.f32 %v10284_v53, %v6098_v51  ;;  %v5885_v0 = vsel %vm293_vm0, %v5883_v23, %v5884_v37  ;;  %v6158_v12 = vmul.f32 %v10288_v55, %v6156_v1 }
 0x443   : > { %5775 = vrot.lane.b32.xlu0 %v5774_v57, %s7341_s18  ;;  %v5269_v44 = vsel %vm341_vm1, %v5267_v59, %v5268_v52  ;;  %v6144_v34 = vrot.slane %v6140_v54, 1 }
 0x444   : > { %v5175_v58 = vpop.permute.xlu1 %5174 }
 0x445   : > { %v5179_v13 = vadd.f32 %v5175_v58, %v5162_v30  ;;  %v5173_v14 = vpop.permute.xlu0 %5172  ;;  %v6145_v30 = vrot.slane %v10291_v40, 1  ;;  %v5314_v58 = vstv %s10275_s25  ;;  %s10423_s25 = sld [smem:[#allocation6 + $0x1a6]] }
 0x446   : > { %v5178_v19 = vadd.f32 %v5173_v14, %v5161_v47  ;;  %5807 = vrot.lane.b32.xlu1 %v5803_v60, %s7342_s23  ;;  %v6112_v60 = vstv %s10261_s20  ;;  %v6100_v47 = vmul.f32 %v10288_v55, %v6098_v51  ;;  %s10396_s20 = sld [smem:[#allocation6 + $0x1a5]] }
 0x447   : > { %5805 = vrot.lane.b32.xlu0 %v5804_v31, %s7342_s23  ;;  %v5185_v22 = vadd.f32 %v5183_v63, %v5179_v13  ;;  %v6113_v63 = vmul.f32 %v10284_v53, %v6112_v60  ;;  %v6186_v13 = vstv %s10280_s29  ;;  %s10431_s29 = sld [smem:[#allocation6 + $0x171]] }
 0x448   : > { %v5195_v4 = vpop.permute.xlu1 %5194  ;;  %v5184_v26 = vadd.f32 %v5182_v10, %v5178_v19  ;;  %v6146_v19 = vsel %vm293_vm0, %v6144_v34, %v6145_v30  ;;  %v6188_v28 = vmul.f32 %v10288_v55, %v6186_v13 }
 0x449   : > { %v5193_v62 = vpop.permute.xlu0 %5192  ;;  %v5199_v45 = vadd.f32 %v5195_v4, %v5185_v22  ;;  %v6114_v22 = vmul.f32 %v10288_v55, %v6112_v60  ;;  %v5316_v4 = vmul.f32 %v10288_v55, %v5314_v58 }
 0x44a   : > { %5824 = vrot.lane.b32.xlu1 %v5820_v11, %s7341_s18  ;;  %v5198_v33 = vadd.f32 %v5193_v62, %v5184_v26  ;;  %v6157_v11 = vmul.f32 %v10284_v53, %v6156_v1  ;;  %v6187_v26 = vmul.f32 %v10284_v53, %v6186_v13  ;;  %v6192_v17 = vrot.slane %v6188_v28, 2 }
 0x44b   : > { %5822 = vrot.lane.b32.xlu0 %v5821_v27, %s7341_s18  ;;  %v5348_v27 = vstv %s10297_s4  ;;  %s10445_s4 = sld [smem:[#allocation6 + $0x18d]] }
 0x44c   : > { %v5209_v35 = vpop.permute.xlu1 %5208  ;;  %v6161_v39 = vrot.slane %v6157_v11, 1  ;;  %v5349_v36 = vmul.f32 %v10284_v53, %v5348_v27  ;;  %v6240_v11 = vstv %s10347_s15  ;;  %s10482_s15 = sld [smem:[#allocation6 + $0x1a9]] }
 0x44d   : > { %v5213_v41 = vadd.f32 %v5209_v35, %v5199_v45  ;;  %v5207_v42 = vpop.permute.xlu0 %5206  ;;  %v5315_v45 = vmul.f32 %v10284_v53, %v5314_v58  ;;  %v5350_v35 = vmul.f32 %v10288_v55, %v5348_v27 }
 0x44e   : > { %v5212_v48 = vadd.f32 %v5207_v42, %v5198_v33  ;;  %5844 = vrot.lane.b32.xlu1 %v5839_v5, %s7342_s23  ;;  %v5318_v42 = vadd.f32 %v5316_v4, %v5312_v25  ;;  %v10378_v4 = vld [vmem:[%s7460_s10 + $0x18] sm:$0xff] }
 0x44f   : > { %5842 = vrot.lane.b32.xlu0 %v5838_v29, %s7342_s23  ;;  %v5226_v21 = vadd.f32 %v5221_v49, %v5213_v41  ;;  %v6162_v49 = vrot.slane %v6158_v12, 1  ;;  %v6203_v29 = vstv %s10305_s5  ;;  %v5354_v51 = vrot.slane %v5350_v35, 1  ;;  %s10452_s5 = sld [smem:[#allocation6 + $0x177]] }
 0x450   : > { %v5239_v24 = vpop.permute.xlu1 %5238  ;;  %v5225_v6 = vadd.f32 %v5222_v43, %v5212_v48  ;;  %v6191_v43 = vrot.slane %v6187_v26, 2  ;;  %v6204_v48 = vmul.f32 %v10284_v53, %v6203_v29 }
 0x451   : > { %v5237_v2 = vpop.permute.xlu0 %5236  ;;  %v5243_v57 = vadd.f32 %v5239_v24, %v5226_v21  ;;  %v6163_v46 = vsel %vm293_vm0, %v6161_v39, %v6162_v49  ;;  %v5317_v21 = vadd.f32 %v5315_v45, %v5312_v25  ;;  %v5353_v24 = vrot.slane %v5349_v36, 1 }
 0x452   : > { %5858 = vrot.lane.b32.xlu1 %v5853_v50, %s7341_s18  ;;  %v5242_v61 = vadd.f32 %v5237_v2, %v5225_v6  ;;  %v6205_v50 = vmul.f32 %v10288_v55, %v6203_v29  ;;  %v5395_v6 = vstv %s10324_s6  ;;  %v6193_v2 = vsel %vm341_vm1, %v6191_v43, %v6192_v17  ;;  %s10460_s6 = sld [smem:[#allocation6 + $0x1a8]] }
 0x453   : > { %5856 = vrot.lane.b32.xlu0 %v5852_v7, %s7341_s18  ;;  %v6208_v59 = vrot.slane %v6204_v48, 2  ;;  %v5355_v60 = vsel %vm293_vm0, %v5353_v24, %v5354_v51  ;;  %v5895_v45 = vstv %s10360_s22  ;;  %v6242_v29 = vmul.f32 %v10378_v4, %v6240_v11  ;;  %s10497_s22 = sld [smem:[#allocation6 + $0x191]] }
 0x454   : > { %v5256_v3 = vpop.permute.xlu1 %5255 }
 0x455   : > { %v5260_v8 = vadd.f32 %v5256_v3, %v5243_v57  ;;  %v5254_v9 = vpop.permute.xlu0 %5253  ;;  %v5397_v3 = vmul.f32 %v10288_v55, %v5395_v6 }
 0x456   : > { %v5259_v31 = vadd.f32 %v5254_v9, %v5242_v61  ;;  %6103 = vrot.lane.b32.xlu1 %v6099_v56, %s7342_s23  ;;  %v5396_v61 = vmul.f32 %v10284_v53, %v5395_v6  ;;  %v6226_v9 = vstv %s10339_s19  ;;  %s10469_s19 = sld [smem:[#allocation6 + $0x18e]] }
 0x457   : > { %5886 = vrot.lane.b32.xlu0 %v5885_v0, %s7342_s23  ;;  %v5273_v10 = vadd.f32 %v5268_v52, %v5260_v8  ;;  %v6209_v52 = vrot.slane %v6205_v50, 2  ;;  %v6228_v26 = vmul.f32 %v10378_v4, %v6226_v9  ;;  %v6284_v50 = vstv %s10372_s11  ;;  %s10508_s11 = sld [smem:[#allocation7 + $0xe]] }
 0x458   : > { %v5286_v14 = vpop.permute.xlu1 %5285  ;;  %v5272_v15 = vadd.f32 %v5269_v44, %v5259_v31  ;;  %v5400_v31 = vrot.slane %v5396_v61, 2  ;;  %v5523_v61 = vstv %s10392_s12  ;;  %s10522_s12 = sld [smem:[#allocation6 + $0x193]] }
 0x459   : > { %v5284_v18 = vpop.permute.xlu0 %5283  ;;  %v5290_v62 = vadd.f32 %v5286_v14, %v5273_v10  ;;  %v6210_v8 = vsel %vm341_vm1, %v6208_v59, %v6209_v52  ;;  %v6267_v14 = vstv %s10349_s7  ;;  %s10487_s7 = sld [smem:[#allocation6 + $0x1ab]] }
 0x45a   : > { %6117 = vrot.lane.b32.xlu1 %v6113_v63, %s7341_s18  ;;  %v5289_v5 = vadd.f32 %v5284_v18, %v5272_v15  ;;  %v5401_v63 = vrot.slane %v5397_v3, 2  ;;  %v6269_v39 = vmul.f32 %v10378_v4, %v6267_v14 }
 0x45b   : > { %6105 = vrot.lane.b32.xlu0 %v6100_v47, %s7342_s23  ;;  %v10364_v47 = vld [vmem:[%s7460_s10 + $0x10] sm:$0xff] }
 0x45c   : > { %v5303_v16 = vpop.permute.xlu1 %5302  ;;  %v6227_v58 = vmul.f32 %v10364_v47, %v6226_v9  ;;  %v6241_v25 = vmul.f32 %v10364_v47, %v6240_v11  ;;  %v5896_v48 = vmul.f32 %v10364_v47, %v5895_v45  ;;  %v5524_v11 = vmul.f32 %v10364_v47, %v5523_v61 }
 0x45d   : > { %v5307_v32 = vadd.f32 %v5303_v16, %v5290_v62  ;;  %v5301_v33 = vpop.permute.xlu0 %5300  ;;  %v5442_v62 = vstv %s10358_s8  ;;  %s10495_s8 = sld [smem:[#allocation6 + $0x17a]] }
 0x45e   : > { %v5306_v41 = vadd.f32 %v5301_v33, %v5289_v5  ;;  %6147 = vrot.lane.b32.xlu1 %v6146_v19, %s7342_s23  ;;  %v5402_v19 = vsel %vm341_vm1, %v5400_v31, %v5401_v63  ;;  %v5476_v33 = vstv %s10367_s26  ;;  %v5443_v36 = vmul.f32 %v10364_v47, %v5442_v62  ;;  %s10503_s26 = sld [smem:[#allocation6 + $0x17d]] }
 0x45f   : > { %7003 = vst.msk [vmem:[%s7853_s9 + $0xc8] sm:$0x3f] %vm641_vm2, %v5307_v32  ;;  %6119 = vrot.lane.b32.xlu0 %v6114_v22, %s7341_s18  ;;  %v5444_v32 = vmul.f32 %v10378_v4, %v5442_v62  ;;  %v5942_v62 = vstv %s10410_s24  ;;  %s10536_s24 = sld [smem:[#allocation6 + $0x1ae]] }
 0x460   : > { %7002 = vst.msk [vmem:[%s7853_s9 + $0xc0] sm:$0xff] %vm639_vm3, %v5306_v41  ;;  %v5328_v20 = vpop.permute.xlu1 %5327  ;;  %v6273_v41 = vrot.slane %v6269_v39, 1 }
 0x461   : > { %v5326_v7 = vpop.permute.xlu0 %5325  ;;  %v5332_v23 = vadd.f32 %v5328_v20, %v5318_v42 }
 0x462   : > { %6164 = vrot.lane.b32.xlu1 %v6163_v46, %s7341_s18  ;;  %v5331_v54 = vadd.f32 %v5326_v7, %v5317_v21  ;;  %v5477_v7 = vmul.f32 %v10364_v47, %v5476_v33 }
 0x463   : > { %6149 = vrot.lane.b32.xlu0 %v6145_v30, %s7342_s23 }
 0x464   : > { %v5342_v40 = vpop.permute.xlu1 %5341  ;;  %v5481_v38 = vrot.slane %v5477_v7, 1 }
 0x465   : > { %v5346_v56 = vadd.f32 %v5342_v40, %v5332_v23  ;;  %v5340_v57 = vpop.permute.xlu0 %5339  ;;  %v6286_v23 = vmul.f32 %v10378_v4, %v6284_v50 }
 0x466   : > { %v5345_v0 = vadd.f32 %v5340_v57, %v5331_v54  ;;  %6194 = vrot.lane.b32.xlu1 %v6193_v2, %s7342_s23  ;;  %v6285_v2 = vmul.f32 %v10364_v47, %v6284_v50 }
 0x467   : > { %6166 = vrot.lane.b32.xlu0 %v6162_v49, %s7341_s18  ;;  %v5359_v1 = vadd.f32 %v5354_v51, %v5346_v56  ;;  %v6268_v49 = vmul.f32 %v10364_v47, %v6267_v14  ;;  %v5478_v51 = vmul.f32 %v10378_v4, %v5476_v33  ;;  %v5900_v56 = vrot.slane %v5896_v48, 1 }
 0x468   : > { %v5372_v44 = vpop.permute.xlu1 %5371  ;;  %v5358_v34 = vadd.f32 %v5355_v60, %v5345_v0  ;;  %v5925_v60 = vstv %s10386_s21  ;;  %v6290_v0 = vrot.slane %v6286_v23, 1  ;;  %s10510_s21 = sld [smem:[#allocation6 + $0x1ac]] }
 0x469   : > { %v5370_v30 = vpop.permute.xlu0 %5369  ;;  %v5376_v10 = vadd.f32 %v5372_v44, %v5359_v1  ;;  %v6272_v42 = vrot.slane %v6268_v49, 1  ;;  %v6289_v1 = vrot.slane %v6285_v2, 1  ;;  %v5926_v31 = vmul.f32 %v10364_v47, %v5925_v60 }
 0x46a   : > { %6211 = vrot.lane.b32.xlu1 %v6210_v8, %s7341_s18  ;;  %v5375_v12 = vadd.f32 %v5370_v30, %v5358_v34  ;;  %v6314_v8 = vstv %s10396_s20  ;;  %v5927_v30 = vmul.f32 %v10378_v4, %v5925_v60  ;;  %v5528_v49 = vrot.slane %v5524_v11, 2  ;;  %s10529_s20 = sld [smem:[#allocation6 + $0x180]] }
 0x46b   : > { %6196 = vrot.lane.b32.xlu0 %v6192_v17, %s7342_s23  ;;  %v5897_v17 = vmul.f32 %v10378_v4, %v5895_v45  ;;  %v6274_v54 = vsel %vm293_vm0, %v6272_v42, %v6273_v41  ;;  %v6316_v14 = vmul.f32 %v10378_v4, %v6314_v8 }
 0x46c   : > { %v5389_v13 = vpop.permute.xlu1 %5388 }
 0x46d   : > { %v5393_v15 = vadd.f32 %v5389_v13, %v5376_v10  ;;  %v5387_v18 = vpop.permute.xlu0 %5386  ;;  %v5901_v40 = vrot.slane %v5897_v17, 1 }
 0x46e   : > { %v5392_v22 = vadd.f32 %v5387_v18, %v5375_v12  ;;  %6231 = vrot.lane.b32.xlu1 %v6227_v58, %s7342_s23  ;;  %v5525_v12 = vmul.f32 %v10378_v4, %v5523_v61  ;;  %v6291_v18 = vsel %vm293_vm0, %v6289_v1, %v6290_v0 }
 0x46f   : > { %6213 = vrot.lane.b32.xlu0 %v6209_v52, %s7341_s18  ;;  %v5406_v27 = vadd.f32 %v5401_v63, %v5393_v15  ;;  %v5902_v34 = vsel %vm293_vm0, %v5900_v56, %v5901_v40 }
 0x470   : > { %v5419_v28 = vpop.permute.xlu1 %5418  ;;  %v5405_v5 = vadd.f32 %v5402_v19, %v5392_v22  ;;  %v6315_v19 = vmul.f32 %v10364_v47, %v6314_v8 }
 0x471   : > { %v5417_v16 = vpop.permute.xlu0 %5416  ;;  %v5423_v35 = vadd.f32 %v5419_v28, %v5406_v27  ;;  %v5930_v27 = vrot.slane %v5926_v31, 2  ;;  %v5529_v28 = vrot.slane %v5525_v12, 2 }
 0x472   : > { %6245 = vrot.lane.b32.xlu1 %v6241_v25, %s7341_s18  ;;  %v5422_v43 = vadd.f32 %v5417_v16, %v5405_v5  ;;  %v6320_v5 = vrot.slane %v6316_v14, 2  ;;  %v6319_v45 = vrot.slane %v6315_v19, 2  ;;  %v5651_v14 = vstv %s10452_s5  ;;  %s7068_s5 = sld [smem:[#allocation6 + $0x198]] }
 0x473   : > { %6233 = vrot.lane.b32.xlu0 %v6228_v26, %s7342_s23  ;;  %v5931_v26 = vrot.slane %v5927_v30, 2  ;;  %v5965_v30 = vstv %s10445_s4  ;;  %v6354_v19 = vstv %s10460_s6  ;;  %s10573_s4 = sld [smem:[#allocation6 + $0x186]] }
 0x474   : > { %v5436_v46 = vpop.permute.xlu1 %5435  ;;  %v6321_v50 = vsel %vm341_vm1, %v6319_v45, %v6320_v5  ;;  %s7071_s6 = sld [smem:[#allocation6 + $0x19b]] }
 0x475   : > { %v5440_v20 = vadd.f32 %v5436_v46, %v5423_v35  ;;  %v5434_v21 = vpop.permute.xlu0 %5433  ;;  %v6331_v46 = vstv %s10423_s25  ;;  %s10549_s25 = sld [smem:[#allocation6 + $0x194]] }
 0x476   : > { %v5439_v24 = vadd.f32 %v5434_v21, %v5422_v43  ;;  %5888 = vrot.lane.b32.xlu1 %v5884_v37, %s7342_s23  ;;  %v5482_v37 = vrot.slane %v5478_v51, 1  ;;  %v5530_v43 = vsel %vm341_vm1, %v5528_v49, %v5529_v28  ;;  %v6332_v23 = vmul.f32 %v10364_v47, %v6331_v46 }
 0x477   : > { %6247 = vrot.lane.b32.xlu0 %v6242_v29, %s7341_s18  ;;  %v5446_v6 = vadd.f32 %v5444_v32, %v5440_v20  ;;  %v5944_v29 = vmul.f32 %v10378_v4, %v5942_v62  ;;  %v5943_v32 = vmul.f32 %v10364_v47, %v5942_v62 }
 0x478   : > { %v5456_v59 = vpop.permute.xlu1 %5455  ;;  %v5445_v52 = vadd.f32 %v5443_v36, %v5439_v24  ;;  %v5483_v10 = vsel %vm293_vm0, %v5481_v38, %v5482_v37  ;;  %v5932_v36 = vsel %vm341_vm1, %v5930_v27, %v5931_v26  ;;  %v5570_v24 = vstv %s10431_s29  ;;  %s10562_s29 = sld [smem:[#allocation6 + $0x1af]] }
 0x479   : > { %v5454_v57 = vpop.permute.xlu0 %5453  ;;  %v5460_v3 = vadd.f32 %v5456_v59, %v5446_v6  ;;  %v5948_v20 = vrot.slane %v5944_v29, 2  ;;  %v5947_v21 = vrot.slane %v5943_v32, 2  ;;  %v6333_v6 = vmul.f32 %v10378_v4, %v6331_v46 }
 0x47a   : > { %6277 = vrot.lane.b32.xlu1 %v6273_v41, %s7342_s23  ;;  %v5459_v9 = vadd.f32 %v5454_v57, %v5445_v52  ;;  %v5604_v59 = vstv %s10434_s30  ;;  %v5979_v29 = vstv %s10469_s19  ;;  %s10570_s30 = sld [smem:[#allocation6 + $0x183]] }
 0x47b   : > { %6275 = vrot.lane.b32.xlu0 %v6274_v54, %s7342_s23  ;;  %v5949_v54 = vsel %vm341_vm1, %v5947_v21, %v5948_v20  ;;  %v6337_v61 = vrot.slane %v6333_v6, 2  ;;  %s7074_s19 = sld [smem:[#allocation6 + $0x19e]] }
 0x47c   : > { %v5470_v44 = vpop.permute.xlu1 %5469 }
 0x47d   : > { %v5474_v63 = vadd.f32 %v5470_v44, %v5460_v3  ;;  %v5468_v58 = vpop.permute.xlu0 %5467  ;;  %v6336_v3 = vrot.slane %v6332_v23, 2  ;;  %v6395_v23 = vstv %s10487_s7  ;;  %s7080_s7 = sld [smem:[#allocation6 + $0x1a4]] }
 0x47e   : > { %v5473_v13 = vadd.f32 %v5468_v58, %v5459_v9  ;;  %5905 = vrot.lane.b32.xlu1 %v5901_v40, %s7341_s18  ;;  %v10457_v40 = vld [vmem:[%s7460_s10 + $0x28] sm:$0xff] }
 0x47f   : > { %5903 = vrot.lane.b32.xlu0 %v5902_v34, %s7341_s18  ;;  %v5487_v15 = vadd.f32 %v5482_v37, %v5474_v63  ;;  %v5572_v56 = vmul.f32 %v10457_v40, %v5570_v24  ;;  %v10463_v37 = vld [vmem:[%s7460_s10 + $0x20] sm:$0xff]  ;;  %v5606_v9 = vmul.f32 %v10457_v40, %v5604_v59  ;;  %s10473_s10 = sld [smem:[#allocation6 + $0x190]]  ;;  %v6338_v58 = vsel %vm341_vm1, %v6336_v3, %v6337_v61 }
 0x480   : > { %v5500_v22 = vpop.permute.xlu1 %5499  ;;  %v5486_v25 = vadd.f32 %v5483_v10, %v5473_v13  ;;  %v5571_v60 = vmul.f32 %v10463_v37, %v5570_v24  ;;  %v5605_v8 = vmul.f32 %v10463_v37, %v5604_v59  ;;  %v5967_v13 = vmul.f32 %v10457_v40, %v5965_v30 }
 0x481   : > { %v5498_v39 = vpop.permute.xlu0 %5497  ;;  %v5504_v16 = vadd.f32 %v5500_v22, %v5487_v15  ;;  %v5610_v12 = vrot.slane %v5606_v9, 1  ;;  %v5653_v49 = vmul.f32 %v10457_v40, %v5651_v14  ;;  %v6355_v45 = vmul.f32 %v10463_v37, %v6354_v19 }
 0x482   : > { %6294 = vrot.lane.b32.xlu1 %v6290_v0, %s7341_s18  ;;  %v5503_v33 = vadd.f32 %v5498_v39, %v5486_v25  ;;  %v5609_v11 = vrot.slane %v5605_v8, 1  ;;  %v5652_v39 = vmul.f32 %v10463_v37, %v5651_v14  ;;  %v6397_v3 = vmul.f32 %v10457_v40, %v6395_v23 }
 0x483   : > { %6292 = vrot.lane.b32.xlu0 %v6291_v18, %s7341_s18  ;;  %v5966_v18 = vmul.f32 %v10463_v37, %v5965_v30  ;;  %v5737_v30 = vstv %s10503_s26  ;;  %s10686_s26 = sld [smem:[#allocation6 + $0x1a7]] }
 0x484   : > { %v5517_v35 = vpop.permute.xlu1 %5516  ;;  %v5611_v62 = vsel %vm293_vm0, %v5609_v11, %v5610_v12 }
 0x485   : > { %v5521_v41 = vadd.f32 %v5517_v35, %v5504_v16  ;;  %v5515_v42 = vpop.permute.xlu0 %5514  ;;  %v6006_v32 = vstv %s10473_s10  ;;  %s7077_s10 = sld [smem:[#allocation6 + $0x1a1]] }
 0x486   : > { %v5520_v17 = vadd.f32 %v5515_v42, %v5503_v33  ;;  %5935 = vrot.lane.b32.xlu1 %v5931_v26, %s7342_s23  ;;  %v5657_v42 = vrot.slane %v5653_v49, 2  ;;  %v6008_v46 = vmul.f32 %v10457_v40, %v6006_v32 }
 0x487   : > { %5933 = vrot.lane.b32.xlu0 %v5932_v36, %s7342_s23  ;;  %v5534_v48 = vadd.f32 %v5529_v28, %v5521_v41  ;;  %v5656_v41 = vrot.slane %v5652_v39, 2 }
 0x488   : > { %v5547_v7 = vpop.permute.xlu1 %5546  ;;  %v5533_v51 = vadd.f32 %v5530_v43, %v5520_v17  ;;  %v5981_v43 = vmul.f32 %v10457_v40, %v5979_v29  ;;  %v6007_v17 = vmul.f32 %v10463_v37, %v6006_v32 }
 0x489   : > { %v5545_v2 = vpop.permute.xlu0 %5544  ;;  %v5551_v52 = vadd.f32 %v5547_v7, %v5534_v48  ;;  %v5658_v6 = vsel %vm341_vm1, %v5656_v41, %v5657_v42 }
 0x48a   : > { %6324 = vrot.lane.b32.xlu1 %v6320_v5, %s7342_s23  ;;  %v5550_v57 = vadd.f32 %v5545_v2, %v5533_v51  ;;  %v6356_v5 = vmul.f32 %v10457_v40, %v6354_v19 }
 0x48b   : > { %6322 = vrot.lane.b32.xlu0 %v6321_v50, %s7342_s23  ;;  %v5980_v50 = vmul.f32 %v10463_v37, %v5979_v29 }
 0x48c   : > { %v5564_v38 = vpop.permute.xlu1 %5563 }
 0x48d   : > { %v5568_v0 = vadd.f32 %v5564_v38, %v5551_v52  ;;  %v5562_v1 = vpop.permute.xlu0 %5561  ;;  %v6012_v52 = vrot.slane %v6008_v46, 1  ;;  %v5703_v38 = vstv %s10495_s8  ;;  %s10678_s8 = sld [smem:[#allocation6 + $0x18c]] }
 0x48e   : > { %v5567_v44 = vadd.f32 %v5562_v1, %v5550_v57  ;;  %5952 = vrot.lane.b32.xlu1 %v5948_v20, %s7341_s18  ;;  %v6368_v20 = vstv %s10482_s15  ;;  %v6023_v1 = vstv %s10497_s22  ;;  %s7050_s15 = sld [smem:[#allocation6 + $0x189]] }
 0x48f   : > { %5950 = vrot.lane.b32.xlu0 %v5949_v54, %s7341_s18  ;;  %v5574_v34 = vadd.f32 %v5572_v56, %v5568_v0  ;;  %v6370_v59 = vmul.f32 %v10457_v40, %v6368_v20  ;;  %v6011_v54 = vrot.slane %v6007_v17, 1  ;;  %v6369_v57 = vmul.f32 %v10463_v37, %v6368_v20  ;;  %s10683_s22 = sld [smem:[#allocation6 + $0x18f]] }
 0x490   : > { %v5584_v31 = vpop.permute.xlu1 %5583  ;;  %v5573_v63 = vadd.f32 %v5571_v60, %v5567_v44  ;;  %v6396_v0 = vmul.f32 %v10463_v37, %v6395_v23  ;;  %v5705_v44 = vmul.f32 %v10288_v55, %v5703_v38 }
 0x491   : > { %v5582_v10 = vpop.permute.xlu0 %5581  ;;  %v5588_v15 = vadd.f32 %v5584_v31, %v5574_v34  ;;  %v6013_v9 = vsel %vm293_vm0, %v6011_v54, %v6012_v52  ;;  %v5704_v34 = vmul.f32 %v10284_v53, %v5703_v38 }
 0x492   : > { %6341 = vrot.lane.b32.xlu1 %v6337_v61, %s7341_s18  ;;  %v5587_v22 = vadd.f32 %v5582_v10, %v5573_v63  ;;  %v5701_v63 = vstv %s10508_s11  ;;  %v6024_v10 = vmul.f32 %v10463_v37, %v6023_v1  ;;  %v6400_v14 = vrot.slane %v6396_v0, 1  ;;  %s10690_s11 = sld [smem:[#allocation6 + $0x1aa]] }
 0x493   : > { %6339 = vrot.lane.b32.xlu0 %v6338_v58, %s7341_s18  ;;  %v6025_v58 = vmul.f32 %v10457_v40, %v6023_v1 }
 0x494   : > { %v5598_v25 = vpop.permute.xlu1 %5597  ;;  %v6028_v39 = vrot.slane %v6024_v10, 1 }
 0x495   : > { %v5602_v26 = vadd.f32 %v5598_v25, %v5588_v15  ;;  %v5596_v27 = vpop.permute.xlu0 %5595  ;;  %v6412_v15 = vstv %s10510_s21  ;;  %v5738_v25 = vmul.f32 %v10284_v53, %v5737_v30  ;;  %s10700_s21 = sld [smem:[#allocation6 + $0x192]] }
 0x496   : > { %v5601_v28 = vadd.f32 %v5596_v27, %v5587_v22  ;;  %5972 = vrot.lane.b32.xlu1 %v5967_v13, %s7342_s23  ;;  %v6401_v13 = vrot.slane %v6397_v3, 1  ;;  %v5739_v22 = vmul.f32 %v10288_v55, %v5737_v30  ;;  %v5707_v27 = vadd.f32 %v5705_v44, %v5701_v63 }
 0x497   : > { %5970 = vrot.lane.b32.xlu0 %v5966_v18, %s7342_s23  ;;  %v5615_v16 = vadd.f32 %v5610_v12, %v5602_v26  ;;  %v6414_v49 = vmul.f32 %v10457_v40, %v6412_v15  ;;  %v6070_v3 = vstv %s10549_s25 }
 0x498   : > { %v5628_v33 = vpop.permute.xlu1 %5627  ;;  %v5614_v35 = vadd.f32 %v5611_v62, %v5601_v28  ;;  %v6029_v62 = vrot.slane %v6025_v58, 1  ;;  %v6413_v28 = vmul.f32 %v10463_v37, %v6412_v15  ;;  %v5743_v32 = vrot.slane %v5739_v22, 1 }
 0x499   : > { %v5626_v36 = vpop.permute.xlu0 %5625  ;;  %v5632_v48 = vadd.f32 %v5628_v33, %v5615_v16  ;;  %v5706_v16 = vadd.f32 %v5704_v34, %v5701_v63  ;;  %v5742_v33 = vrot.slane %v5738_v25, 1  ;;  %v6071_v63 = vmul.f32 %v10463_v37, %v6070_v3 }
 0x49a   : > { %6361 = vrot.lane.b32.xlu1 %v6356_v5, %s7342_s23  ;;  %v5631_v21 = vadd.f32 %v5626_v36, %v5614_v35  ;;  %v6053_v35 = vstv %s10522_s12  ;;  %v5784_v36 = vstv %s10529_s20  ;;  %v6417_v46 = vrot.slane %v6413_v28, 1  ;;  %s10714_s12 = sld [smem:[#allocation6 + $0x1ad]] }
 0x49b   : > { %6359 = vrot.lane.b32.xlu0 %v6355_v45, %s7342_s23  ;;  %v6402_v45 = vsel %vm293_vm0, %v6400_v14, %v6401_v13  ;;  %v6054_v20 = vmul.f32 %v10463_v37, %v6053_v35  ;;  %v5786_v23 = vmul.f32 %v10288_v55, %v5784_v36  ;;  %v6459_v14 = vstv %s10562_s29 }
 0x49c   : > { %v5645_v7 = vpop.permute.xlu1 %5644  ;;  %v6075_v25 = vrot.slane %v6071_v63, 2 }
 0x49d   : > { %v5649_v51 = vadd.f32 %v5645_v7, %v5632_v48  ;;  %v5643_v24 = vpop.permute.xlu0 %5642 }
 0x49e   : > { %v5648_v2 = vadd.f32 %v5643_v24, %v5631_v21  ;;  %5986 = vrot.lane.b32.xlu1 %v5981_v43, %s7341_s18  ;;  %v6418_v43 = vrot.slane %v6414_v49, 1  ;;  %v6442_v21 = vstv %s10536_s24  ;;  %v5744_v24 = vsel %vm293_vm0, %v5742_v33, %v5743_v32 }
 0x49f   : > { %5984 = vrot.lane.b32.xlu0 %v5980_v50, %s7341_s18  ;;  %v5662_v56 = vadd.f32 %v5657_v42, %v5649_v51  ;;  %v6030_v42 = vsel %vm293_vm0, %v6028_v39, %v6029_v62  ;;  %v6055_v50 = vmul.f32 %v10457_v40, %v6053_v35  ;;  %v6444_v54 = vmul.f32 %v10457_v40, %v6442_v21 }
 0x4a0   : > { %v5675_v60 = vpop.permute.xlu1 %5674  ;;  %v5661_v61 = vadd.f32 %v5658_v6, %v5648_v2  ;;  %v5785_v6 = vmul.f32 %v10284_v53, %v5784_v36  ;;  %v6461_v39 = vmul.f32 %v10457_v40, %v6459_v14  ;;  %v6460_v49 = vmul.f32 %v10463_v37, %v6459_v14 }
 0x4a1   : > { %v5673_v8 = vpop.permute.xlu0 %5672  ;;  %v5679_v31 = vadd.f32 %v5675_v60, %v5662_v56  ;;  %v6443_v56 = vmul.f32 %v10463_v37, %v6442_v21  ;;  %v6059_v60 = vrot.slane %v6055_v50, 2  ;;  %v6448_v34 = vrot.slane %v6444_v54, 2 }
 0x4a2   : > { %6375 = vrot.lane.b32.xlu1 %v6370_v59, %s7341_s18  ;;  %v5678_v11 = vadd.f32 %v5673_v8, %v5661_v61  ;;  %v6058_v61 = vrot.slane %v6054_v20, 2  ;;  %v5789_v8 = vrot.slane %v5785_v6, 2  ;;  %v6465_v36 = vrot.slane %v6461_v39, 2 }
 0x4a3   : > { %6373 = vrot.lane.b32.xlu0 %v6369_v57, %s7341_s18  ;;  %v6447_v30 = vrot.slane %v6443_v56, 2 }
 0x4a4   : > { %v5692_v12 = vpop.permute.xlu1 %5691  ;;  %v6060_v10 = vsel %vm341_vm1, %v6058_v61, %v6059_v60 }
 0x4a5   : > { %v5696_v18 = vadd.f32 %v5692_v12, %v5679_v31  ;;  %v5690_v19 = vpop.permute.xlu0 %5689  ;;  %v6072_v31 = vmul.f32 %v10457_v40, %v6070_v3 }
 0x4a6   : > { %v5695_v26 = vadd.f32 %v5690_v19, %v5678_v11  ;;  %6016 = vrot.lane.b32.xlu1 %v6012_v52, %s7342_s23  ;;  %v6419_v52 = vsel %vm293_vm0, %v6417_v46, %v6418_v43  ;;  %v6449_v19 = vsel %vm341_vm1, %v6447_v30, %v6448_v34 }
 0x4a7   : > { %7033 = vst.msk [vmem:[%s7853_s9 + $0xd8] sm:$0x3f] %vm641_vm2, %v5696_v18  ;;  %6014 = vrot.lane.b32.xlu0 %v6013_v9, %s7342_s23  ;;  %v5790_v9 = vrot.slane %v5786_v23, 2  ;;  %v6076_v22 = vrot.slane %v6072_v31, 2 }
 0x4a8   : > { %7032 = vst.msk [vmem:[%s7853_s9 + $0xd0] sm:$0xff] %vm639_vm3, %v5695_v26  ;;  %v5717_v5 = vpop.permute.xlu1 %5716 }
 0x4a9   : > { %v5715_v29 = vpop.permute.xlu0 %5714  ;;  %v5721_v41 = vadd.f32 %v5717_v5, %v5707_v27  ;;  %v6077_v33 = vsel %vm341_vm1, %v6075_v25, %v6076_v22 }
 0x4aa   : > { %6405 = vrot.lane.b32.xlu1 %v6401_v13, %s7342_s23  ;;  %v5720_v17 = vadd.f32 %v5715_v29, %v5706_v16  ;;  %v5791_v13 = vsel %vm341_vm1, %v5789_v8, %v5790_v9 }
 0x4ab   : > { %6403 = vrot.lane.b32.xlu0 %v6402_v45, %s7342_s23  ;;  %v5865_v45 = vstv %s10573_s4 }
 0x4ac   : > { %v5731_v48 = vpop.permute.xlu1 %5730  ;;  %v5866_v46 = vmul.f32 %v10364_v47, %v5865_v45 }
 0x4ad   : > { %v5735_v7 = vadd.f32 %v5731_v48, %v5721_v41  ;;  %v5729_v51 = vpop.permute.xlu0 %5728  ;;  %v6464_v41 = vrot.slane %v6460_v49, 2 }
 0x4ae   : > { %v5734_v2 = vadd.f32 %v5729_v51, %v5720_v17  ;;  %6033 = vrot.lane.b32.xlu1 %v6029_v62, %s7341_s18  ;;  %v5831_v62 = vstv %s10570_s30  ;;  %v10595_v17 = vmul.f32 %v10378_v4, %v5865_v45  ;;  %v5870_v6 = vrot.slane %v5866_v46, 1 }
 0x4af   : > { %6031 = vrot.lane.b32.xlu0 %v6030_v42, %s7341_s18  ;;  %v5748_v59 = vadd.f32 %v5743_v32, %v5735_v7  ;;  %v5833_v29 = vmul.f32 %v10378_v4, %v5831_v62  ;;  %v5832_v35 = vmul.f32 %v10364_v47, %v5831_v62  ;;  %v6466_v7 = vsel %vm341_vm1, %v6464_v41, %v6465_v36 }
 0x4b0   : > { %v5761_v57 = vpop.permute.xlu1 %5760  ;;  %v5747_v38 = vadd.f32 %v5744_v24, %v5734_v2  ;;  %v5871_v23 = vrot.slane %v10595_v17, 1 }
 0x4b1   : > { %v5765_v0 = vadd.f32 %v5761_v57, %v5748_v59  ;;  %v5759_v1 = vpop.permute.xlu0 %5758 }
 0x4b2   : > { %v5764_v44 = vadd.f32 %v5759_v1, %v5747_v38  ;;  %6422 = vrot.lane.b32.xlu1 %v6418_v43, %s7341_s18  ;;  %v5872_v56 = vsel %vm293_vm0, %v5870_v6, %v5871_v23 }
 0x4b3   : > { %6420 = vrot.lane.b32.xlu0 %v6419_v52, %s7341_s18 }
 0x4b4   : > { %v5778_v58 = vpop.permute.xlu1 %5777 }
 0x4b5   : > { %v5782_v11 = vadd.f32 %v5778_v58, %v5765_v0  ;;  %v5776_v12 = vpop.permute.xlu0 %5775 }
 0x4b6   : > { %v5781_v15 = vadd.f32 %v5776_v12, %v5764_v44  ;;  %6063 = vrot.lane.b32.xlu1 %v6059_v60, %s7342_s23 }
 0x4b7   : > { %6061 = vrot.lane.b32.xlu0 %v6060_v10, %s7342_s23  ;;  %v5795_v18 = vadd.f32 %v5790_v9, %v5782_v11 }
 0x4b8   : > { %v5808_v26 = vpop.permute.xlu1 %5807  ;;  %v5794_v27 = vadd.f32 %v5791_v13, %v5781_v15 }
 0x4b9   : > { %v5812_v28 = vadd.f32 %v5808_v26, %v5795_v18  ;;  %v5806_v5 = vpop.permute.xlu0 %5805 }
 0x4ba   : > { %v5811_v16 = vadd.f32 %v5806_v5, %v5794_v27  ;;  %6452 = vrot.lane.b32.xlu1 %v6448_v34, %s7342_s23 }
 0x4bb   : > { %6450 = vrot.lane.b32.xlu0 %v6449_v19, %s7342_s23  ;;  %s7064_s23 = sld [smem:[#allocation7 + $0xf]] }
 0x4bc   : > { %v5825_v32 = vpop.permute.xlu1 %5824 }
 0x4bd   : > { %v5829_v42 = vadd.f32 %v5825_v32, %v5812_v28  ;;  %v5823_v43 = vpop.permute.xlu0 %5822 }
 0x4be   : > { %v5828_v48 = vadd.f32 %v5823_v43, %v5811_v16  ;;  %6080 = vrot.lane.b32.xlu1 %v6076_v22, %s7341_s18  ;;  %v6126_v22 = vstv %s7068_s5 }
 0x4bf   : > { %6078 = vrot.lane.b32.xlu0 %v6077_v33, %s7341_s18  ;;  %v5835_v50 = vadd.f32 %v5833_v29, %v5829_v42  ;;  %v6127_v27 = vmul.f32 %v10284_v53, %v6126_v22  ;;  %v6128_v62 = vmul.f32 %v10288_v55, %v6126_v22 }
 0x4c0   : > { %v5845_v20 = vpop.permute.xlu1 %5844  ;;  %v5834_v21 = vadd.f32 %v5832_v35, %v5828_v48 }
 0x4c1   : > { %v5849_v51 = vadd.f32 %v5845_v20, %v5835_v50  ;;  %v5843_v24 = vpop.permute.xlu0 %5842  ;;  %v6090_v18 = vstv %s7064_s23  ;;  %v6131_v16 = vrot.slane %v6127_v27, 1  ;;  %v6132_v45 = vrot.slane %v6128_v62, 1 }
 0x4c2   : > { %v5848_v2 = vadd.f32 %v5843_v24, %v5834_v21  ;;  %6469 = vrot.lane.b32.xlu1 %v6465_v36, %s7341_s18  ;;  %v6173_v36 = vstv %s7071_s6  ;;  %v5912_v27 = vstv %s7050_s15 }
 0x4c3   : > { %6467 = vrot.lane.b32.xlu0 %v6466_v7, %s7341_s18  ;;  %s7065_s18 = sld [smem:[#allocation6 + $0x195]]  ;;  %v6133_v42 = vsel %vm293_vm0, %v6131_v16, %v6132_v45  ;;  %v6174_v48 = vmul.f32 %v10284_v53, %v6173_v36  ;;  %v6175_v50 = vmul.f32 %v10288_v55, %v6173_v36  ;;  %v6301_v36 = vstv %s7080_s7 }
 0x4c4   : > { %v5859_v59 = vpop.permute.xlu1 %5858 }
 0x4c5   : > { %v10603_v52 = vadd.f32 %v5859_v59, %v5849_v51  ;;  %v5857_v54 = vpop.permute.xlu0 %5856  ;;  %v6178_v24 = vrot.slane %v6174_v48, 2  ;;  %v6179_v6 = vrot.slane %v6175_v50, 2 }
 0x4c6   : > { %v5862_v57 = vadd.f32 %v5857_v54, %v5848_v2 }
 0x4c8   : > { %v6104_v38 = vpop.permute.xlu1 %6103  ;;  %v5875_v60 = vadd.f32 %v5872_v56, %v5862_v57 }
 0x4c9   : > { %v5887_v61 = vpop.permute.xlu0 %5886  ;;  %v6092_v12 = vstv %s7065_s18 }
 0x4ca   : > { %v10608_v3 = vadd.f32 %v5887_v61, %v5875_v60  ;;  %v6094_v13 = vmul.f32 %v10288_v55, %v6092_v12  ;;  %v6093_v19 = vmul.f32 %v10284_v53, %v6092_v12  ;;  %v6180_v53 = vsel %vm341_vm1, %v6178_v24, %v6179_v6 }
 0x4cb   : > { %v6254_v12 = vstv %s7077_s10  ;;  %v6302_v24 = vmul.f32 %v10364_v47, %v6301_v36 }
 0x4cc   : > { %v6118_v0 = vpop.permute.xlu1 %6117  ;;  %v6096_v25 = vadd.f32 %v6094_v13, %v6090_v18  ;;  %v6095_v49 = vadd.f32 %v6093_v19, %v6090_v18 }
 0x4cd   : > { %v6106_v1 = vpop.permute.xlu0 %6105 }
 0x4ce   : > { %v6110_v28 = vadd.f32 %v6106_v1, %v6096_v25  ;;  %v6109_v33 = vadd.f32 %v6104_v38, %v6095_v49  ;;  %v6220_v1 = vstv %s7074_s19  ;;  %v6255_v25 = vmul.f32 %v10364_v47, %v6254_v12 }
 0x4cf   : > { %v6221_v18 = vmul.f32 %v10364_v47, %v6220_v1 }
 0x4d0   : > { %v6148_v8 = vpop.permute.xlu1 %6147  ;;  %v6123_v35 = vadd.f32 %v6118_v0, %v6109_v33 }
 0x4d1   : > { %v6120_v9 = vpop.permute.xlu0 %6119 }
 0x4d2   : > { %v6124_v29 = vadd.f32 %v6120_v9, %v6110_v28  ;;  %v6136_v20 = vadd.f32 %v6133_v42, %v6123_v35 }
 0x4d4   : > { %v6165_v44 = vpop.permute.xlu1 %6164  ;;  %v6137_v43 = vadd.f32 %v6132_v45, %v6124_v29  ;;  %v6153_v59 = vadd.f32 %v6148_v8, %v6136_v20  ;;  %v5913_v45 = vmul.f32 %v10364_v47, %v5912_v27  ;;  %v5914_v29 = vmul.f32 %v10378_v4, %v5912_v27 }
 0x4d5   : > { %v6150_v34 = vpop.permute.xlu0 %6149 }
 0x4d6   : > { %v6154_v7 = vadd.f32 %v6150_v34, %v6137_v43  ;;  %v6170_v57 = vadd.f32 %v6165_v44, %v6153_v59  ;;  %v6222_v34 = vmul.f32 %v10378_v4, %v6220_v1  ;;  %v5876_v43 = vadd.f32 %v5871_v23, %v10603_v52 }
 0x4d7   : > { %v5917_v20 = vrot.slane %v5913_v45, 2 }
 0x4d8   : > { %v10610_v30 = vpop.permute.xlu1 %6194  ;;  %v6183_v61 = vadd.f32 %v6180_v53, %v6170_v57 }
 0x4d9   : > { %v6167_v31 = vpop.permute.xlu0 %6166 }
 0x4da   : > { %v6171_v2 = vadd.f32 %v6167_v31, %v6154_v7  ;;  %v6200_v44 = vadd.f32 %v10610_v30, %v6183_v61  ;;  %v5918_v7 = vrot.slane %v5914_v29, 2 }
 0x4dc   : > { %v6212_v63 = vpop.permute.xlu1 %6211  ;;  %v6184_v38 = vadd.f32 %v6179_v6, %v6171_v2  ;;  %v6303_v6 = vmul.f32 %v10378_v4, %v6301_v36  ;;  %v5919_v47 = vsel %vm341_vm1, %v5917_v20, %v5918_v7 }
 0x4dd   : > { %v6197_v58 = vpop.permute.xlu0 %6196  ;;  %v6217_v13 = vadd.f32 %v6212_v63, %v6200_v44  ;;  %v6259_v63 = vrot.slane %v6255_v25, 1  ;;  %v6382_v25 = vstv %s10690_s11 }
 0x4de   : > { %v6201_v0 = vadd.f32 %v6197_v58, %v6184_v38  ;;  %v6307_v59 = vrot.slane %v6303_v6, 2 }
 0x4df   : > { %v6223_v62 = vadd.f32 %v6221_v18, %v6217_v13 }
 0x4e0   : > { %v10612_v10 = vpop.permute.xlu1 %6231 }
 0x4e1   : > { %v6214_v11 = vpop.permute.xlu0 %6213  ;;  %v6237_v35 = vadd.f32 %v10612_v10, %v6223_v62 }
 0x4e2   : > { %v6218_v8 = vadd.f32 %v6214_v11, %v6201_v0  ;;  %v6256_v11 = vmul.f32 %v10378_v4, %v6254_v12  ;;  %v6306_v4 = vrot.slane %v6302_v24, 2 }
 0x4e4   : > { %v10615_v14 = vpop.permute.xlu1 %6245  ;;  %v6224_v22 = vadd.f32 %v6222_v34, %v6218_v8  ;;  %v6260_v16 = vrot.slane %v6256_v11, 1  ;;  %v6308_v1 = vsel %vm341_vm1, %v6306_v4, %v6307_v59 }
 0x4e5   : > { %v10617_v15 = vpop.permute.xlu0 %6233 }
 0x4e6   : > { %v6238_v30 = vadd.f32 %v10617_v15, %v6224_v22  ;;  %v6251_v15 = vadd.f32 %v10615_v14, %v6237_v35  ;;  %v6261_v50 = vsel %vm293_vm0, %v6259_v63, %v6260_v16  ;;  %v6384_v35 = vmul.f32 %v10457_v40, %v6382_v25 }
 0x4e8   : > { %v10620_v26 = vpop.permute.xlu1 %5888  ;;  %v6264_v52 = vadd.f32 %v6261_v50, %v6251_v15  ;;  %v6040_v15 = vstv %s10700_s21  ;;  %v6388_v6 = vrot.slane %v6384_v35, 1 }
 0x4e9   : > { %v6248_v39 = vpop.permute.xlu0 %6247 }
 0x4ea   : > { %v6252_v33 = vadd.f32 %v6248_v39, %v6238_v30  ;;  %v5893_v39 = vadd.f32 %v10620_v26, %v5876_v43 }
 0x4ec   : > { %v10624_v5 = vpop.permute.xlu1 %6277  ;;  %v6265_v10 = vadd.f32 %v6260_v16, %v6252_v33 }
 0x4ed   : > { %v10626_v32 = vpop.permute.xlu0 %6275 }
 0x4ee   : > { %v6282_v26 = vadd.f32 %v10624_v5, %v6265_v10  ;;  %v6281_v57 = vadd.f32 %v10626_v32, %v6264_v52  ;;  %v5993_v32 = vstv %s10683_s22 }
 0x4ef   : > { %v5994_v27 = vmul.f32 %v10463_v37, %v5993_v32 }
 0x4f0   : > { %v10628_v41 = vpop.permute.xlu1 %5905 }
 0x4f1   : > { %v10631_v46 = vpop.permute.xlu0 %5903  ;;  %v5910_v17 = vadd.f32 %v10628_v41, %v5893_v39  ;;  %v5998_v36 = vrot.slane %v5994_v27, 1 }
 0x4f2   : > { %v5909_v14 = vadd.f32 %v10631_v46, %v10608_v3  ;;  %v5959_v46 = vstv %s10678_s8 }
 0x4f3   : > { %v5923_v38 = vadd.f32 %v5918_v7, %v5910_v17  ;;  %v5961_v12 = vmul.f32 %v10457_v40, %v5959_v46  ;;  %v6041_v17 = vmul.f32 %v10463_v37, %v6040_v15 }
 0x4f4   : > { %v10635_v21 = vpop.permute.xlu1 %6294  ;;  %v5922_v3 = vadd.f32 %v5919_v47, %v5909_v14  ;;  %v6042_v14 = vmul.f32 %v10457_v40, %v6040_v15 }
 0x4f5   : > { %v10637_v51 = vpop.permute.xlu0 %6292  ;;  %v6299_v53 = vadd.f32 %v10635_v21, %v6282_v26 }
 0x4f6   : > { %v6298_v0 = vadd.f32 %v10637_v51, %v6281_v57  ;;  %v5960_v51 = vmul.f32 %v10463_v37, %v5959_v46 }
 0x4f7   : > { %v6312_v44 = vadd.f32 %v6307_v59, %v6299_v53 }
 0x4f8   : > { %v10639_v54 = vpop.permute.xlu1 %5935  ;;  %v6311_v18 = vadd.f32 %v6308_v1, %v6298_v0 }
 0x4f9   : > { %v10641_v56 = vpop.permute.xlu0 %5933  ;;  %v5940_v5 = vadd.f32 %v10639_v54, %v5923_v38  ;;  %v6348_v54 = vstv %s10686_s26  ;;  %v6045_v38 = vrot.slane %v6041_v17, 2 }
 0x4fa   : > { %v5939_v8 = vadd.f32 %v10641_v56, %v5922_v3  ;;  %v5995_v56 = vmul.f32 %v10457_v40, %v5993_v32  ;;  %v6350_v16 = vmul.f32 %v10457_v40, %v6348_v54  ;;  %v6349_v33 = vmul.f32 %v10463_v37, %v6348_v54 }
 0x4fb   : > { %v6046_v3 = vrot.slane %v6042_v14, 2 }
 0x4fc   : > { %v10644_v55 = vpop.permute.xlu1 %6324  ;;  %v5999_v43 = vrot.slane %v5995_v56, 1 }
 0x4fd   : > { %v10646_v60 = vpop.permute.xlu0 %6322  ;;  %v6329_v11 = vadd.f32 %v10644_v55, %v6312_v44 }
 0x4fe   : > { %v6328_v62 = vadd.f32 %v10646_v60, %v6311_v18 }
 0x500   : > { %v10648_v9 = vpop.permute.xlu1 %5952 }
 0x501   : > { %v10651_v31 = vpop.permute.xlu0 %5950  ;;  %v5957_v21 = vadd.f32 %v10648_v9, %v5940_v5 }
 0x502   : > { %v5956_v22 = vadd.f32 %v10651_v31, %v5939_v8  ;;  %v6383_v31 = vmul.f32 %v10463_v37, %v6382_v25 }
 0x503   : > { %v5963_v63 = vadd.f32 %v5961_v12, %v5957_v21 }
 0x504   : > { %v10655_v19 = vpop.permute.xlu1 %6341  ;;  %v5962_v29 = vadd.f32 %v5960_v51, %v5956_v22  ;;  %v6387_v39 = vrot.slane %v6383_v31, 1 }
 0x505   : > { %v10657_v58 = vpop.permute.xlu0 %6339  ;;  %v6346_v30 = vadd.f32 %v10655_v19, %v6329_v11 }
 0x506   : > { %v6345_v55 = vadd.f32 %v10657_v58, %v6328_v62 }
 0x507   : > { %v6352_v20 = vadd.f32 %v6350_v16, %v6346_v30 }
 0x508   : > { %v10661_v49 = vpop.permute.xlu1 %5972  ;;  %v6351_v24 = vadd.f32 %v6349_v33, %v6345_v55 }
 0x509   : > { %v10664_v28 = vpop.permute.xlu0 %5970  ;;  %v5977_v60 = vadd.f32 %v10661_v49, %v5963_v63  ;;  %v6000_v49 = vsel %vm293_vm0, %v5998_v36, %v5999_v43 }
 0x50a   : > { %v5976_v19 = vadd.f32 %v10664_v28, %v5962_v29  ;;  %v6429_v28 = vstv %s10714_s12 }
 0x50b   : > { %v6431_v46 = vmul.f32 %v10457_v40, %v6429_v28 }
 0x50c   : > { %v10669_v42 = vpop.permute.xlu1 %6361 }
 0x50d   : > { %v10674_v48 = vpop.permute.xlu0 %6359  ;;  %v6366_v52 = vadd.f32 %v10669_v42, %v6352_v20  ;;  %v6430_v42 = vmul.f32 %v10463_v37, %v6429_v28  ;;  %v6435_v51 = vrot.slane %v6431_v46, 2 }
 0x50e   : > { %v6365_v26 = vadd.f32 %v10674_v48, %v6351_v24 }
 0x50f   : > { %v6434_v12 = vrot.slane %v6430_v42, 2 }
 0x510   : > { %v5987_v2 = vpop.permute.xlu1 %5986 }
 0x511   : > { %v5985_v23 = vpop.permute.xlu0 %5984  ;;  %v5991_v7 = vadd.f32 %v5987_v2, %v5977_v60  ;;  %v6436_v11 = vsel %vm341_vm1, %v6434_v12, %v6435_v51 }
 0x512   : > { %v5990_v58 = vadd.f32 %v5985_v23, %v5976_v19  ;;  %v6389_v23 = vsel %vm293_vm0, %v6387_v39, %v6388_v6 }
 0x513   : > { %v6004_v59 = vadd.f32 %v5999_v43, %v5991_v7 }
 0x514   : > { %v6376_v41 = vpop.permute.xlu1 %6375  ;;  %v6003_v53 = vadd.f32 %v6000_v49, %v5990_v58 }
 0x515   : > { %v6374_v61 = vpop.permute.xlu0 %6373  ;;  %v6380_v4 = vadd.f32 %v6376_v41, %v6366_v52 }
 0x516   : > { %v6379_v57 = vadd.f32 %v6374_v61, %v6365_v26  ;;  %v6047_v61 = vsel %vm341_vm1, %v6045_v38, %v6046_v3 }
 0x517   : > { %v6393_v8 = vadd.f32 %v6388_v6, %v6380_v4 }
 0x518   : > { %v6017_v34 = vpop.permute.xlu1 %6016  ;;  %v6392_v44 = vadd.f32 %v6389_v23, %v6379_v57 }
 0x519   : > { %v6015_v13 = vpop.permute.xlu0 %6014  ;;  %v6021_v0 = vadd.f32 %v6017_v34, %v6004_v59 }
 0x51a   : > { %v6020_v5 = vadd.f32 %v6015_v13, %v6003_v53 }
 0x51c   : > { %v6406_v9 = vpop.permute.xlu1 %6405 }
 0x51d   : > { %v6404_v45 = vpop.permute.xlu0 %6403  ;;  %v6410_v21 = vadd.f32 %v6406_v9, %v6393_v8 }
 0x51e   : > { %v6409_v18 = vadd.f32 %v6404_v45, %v6392_v44 }
 0x520   : > { %v6034_v50 = vpop.permute.xlu1 %6033 }
 0x521   : > { %v6032_v10 = vpop.permute.xlu0 %6031  ;;  %v6038_v48 = vadd.f32 %v6034_v50, %v6021_v0 }
 0x522   : > { %v6037_v41 = vadd.f32 %v6032_v10, %v6020_v5 }
 0x523   : > { %v6051_v54 = vadd.f32 %v6046_v3, %v6038_v48 }
 0x524   : > { %v6423_v47 = vpop.permute.xlu1 %6422  ;;  %v6050_v13 = vadd.f32 %v6047_v61, %v6037_v41 }
 0x525   : > { %v6421_v2 = vpop.permute.xlu0 %6420  ;;  %v6427_v34 = vadd.f32 %v6423_v47, %v6410_v21 }
 0x526   : > { %v6426_v40 = vadd.f32 %v6421_v2, %v6409_v18 }
 0x527   : > { %v6440_v62 = vadd.f32 %v6435_v51, %v6427_v34 }
 0x528   : > { %v6064_v1 = vpop.permute.xlu1 %6063  ;;  %v6439_v63 = vadd.f32 %v6436_v11, %v6426_v40 }
 0x529   : > { %v6062_v32 = vpop.permute.xlu0 %6061  ;;  %v6068_v25 = vadd.f32 %v6064_v1, %v6051_v54 }
 0x52a   : > { %v6067_v27 = vadd.f32 %v6062_v32, %v6050_v13 }
 0x52c   : > { %v6453_v22 = vpop.permute.xlu1 %6452 }
 0x52d   : > { %v6451_v37 = vpop.permute.xlu0 %6450  ;;  %v6457_v31 = vadd.f32 %v6453_v22, %v6440_v62 }
 0x52e   : > { %v6456_v45 = vadd.f32 %v6451_v37, %v6439_v63 }
 0x530   : > { %v6081_v56 = vpop.permute.xlu1 %6080 }
 0x531   : > { %v6085_v9 = vadd.f32 %v6081_v56, %v6068_v25  ;;  %v6079_v30 = vpop.permute.xlu0 %6078 }
 0x532   : > { %v6084_v16 = vadd.f32 %v6079_v30, %v6067_v27 }
 0x533   : > { %7063 = vst.msk [vmem:[%s7853_s9 + $0xe8] sm:$0x3f] %vm641_vm2, %v6085_v9 }
 0x534   : > { %7062 = vst.msk [vmem:[%s7853_s9 + $0xe0] sm:$0xff] %vm639_vm3, %v6084_v16  ;;  %v6470_v55 = vpop.permute.xlu1 %6469 }
 0x535   : > { %v6474_v29 = vadd.f32 %v6470_v55, %v6457_v31  ;;  %v6468_v33 = vpop.permute.xlu0 %6467 }
 0x536   : > { %v6473_v35 = vadd.f32 %v6468_v33, %v6456_v45 }
 0x537   : > { %7093 = vst.msk [vmem:[%s7853_s9 + $0xf8] sm:$0x3f] %vm641_vm2, %v6474_v29 }
 0x538   : > { %7092 = vst.msk [vmem:[%s7853_s9 + $0xf0] sm:$0xff] %vm639_vm3, %v6473_v35 }
 0x539 PF: > { %s18_s17 = sadd.s32 1, %s7334_s17   ;;  %s10771_s12 = smov %s7318_s13 }
 0x53a   : > { %p15_p6 = scmp.ge.s32.totalorder %s18_s17, 4   ;;  %s10772_s13 = smov %s7322_s14 }
 0x53b   : > { %s10773_s14 = smov %s7451_s27  ;;  %s10774_s15 = smov %s7330_s16 }
 0x53c   : > { %s10775_s16 = smov %s10777_s28  ;;  %17 = sbr.rel (!%p15_p6) target bundleno = 6 (0x6), region = 100 }
 0x541   :  { %6508 = vsyncpa [#allocation3], 1 }
 0x542   :  { %6510 = vsyncpa [#allocation3 + $0x1], 1 }
 0x543   :  { %6511 = vsyncpa [#allocation4], 1 }
 0x544   :  { %6513 = vsyncpa [#allocation4 + $0x1], 1 }
 0x545   :  { %6514 = vsyncpa [#allocation5], 1 }
 0x546   :  { %6516 = vsyncpa [#allocation5 + $0x1], 1 }

</bundles_post_ra>
